<compile_context>
chip_gen: v6e
topology: v6e:2x2x1
jax: 0.10.0
libtpu: 0.0.40
codegen_flags: <defaults>
</compile_context>

<pallas_src>
import math
import jax
import jax.numpy as jnp
from jax.experimental import pallas as pl
from jax.experimental.pallas import tpu as pltpu


def make_vss_kernel(depth, H, W, C, num_heads, hidden):
    HW = H * W
    CH = C // num_heads

    def shift_flat(x, off):
        # y[:, p] = x[:, p + off] if 0 <= p + off < HW else 0     (x: (rows, HW))
        rows = x.shape[0]
        if off == 0:
            return x
        z = jnp.zeros((rows, abs(off)), x.dtype)
        if off > 0:
            return jnp.concatenate([x[:, off:], z], axis=-1)
        return jnp.concatenate([z, x[:, :off]], axis=-1)

    def dwconv3x3(x, w, mask_l, mask_r):
        # Depthwise 3x3, stride 1, zero pad 1, on a row-major flattened image.
        # x: (rows, HW); w: (rows, 9), tap index = (di+1)*3 + (dj+1)
        # (matches PyTorch (rows,1,3,3).reshape(rows,9)).
        acc = jnp.zeros_like(x)
        for di in (-1, 0, 1):
            for dj in (-1, 0, 1):
                t = shift_flat(x, di * W + dj)
                if dj == -1:
                    t = t * mask_l          # output column j==0 reads j-1 -> zero
                elif dj == 1:
                    t = t * mask_r          # output column j==W-1 reads j+1 -> zero
                wi = (di + 1) * 3 + (dj + 1)
                acc = acc + t * w[:, wi:wi + 1]
        return acc

    def layernorm(x, w, b, eps=1e-5):
        # Per-pixel LayerNorm over channels (sublane axis). w, b: (C, 1). WithBias variant.
        mu = jnp.mean(x, axis=0, keepdims=True)
        var = jnp.mean((x - mu) ** 2, axis=0, keepdims=True)
        return (x - mu) * jax.lax.rsqrt(var + eps) * w + b

    def l2_normalize_rows(x):
        # PyTorch F.normalize(x, dim=-1): x / max(||x||, 1e-12), per channel row.
        nrm = jnp.sqrt(jnp.sum(x * x, axis=-1, keepdims=True))
        return x / jnp.maximum(nrm, 1e-12)

    def kernel(x_ref,
               n1_w_ref, n1_b_ref,
               qkv_w_ref, qkv_dw_ref, temp_ref, po_w_ref,
               n2_w_ref, n2_b_ref,
               pi_w1_ref, pi_w2_ref, dw1_ref, dw2_ref, fo_w_ref,
               out_ref):
        # Column-boundary masks for the flattened depthwise conv (computed once per step).
        col = jax.lax.broadcasted_iota(jnp.int32, (1, HW), 1) % W
        mask_l = (col >= 1).astype(jnp.float32)
        mask_r = (col <= W - 2).astype(jnp.float32)

        x = x_ref[0].astype(jnp.float32)                     # (C, HW), lane-dense

        for d in range(depth):                               # all blocks fused in one kernel
            # ---------------- Attention branch (MDTA) ----------------
            xn = layernorm(x, n1_w_ref[d], n1_b_ref[d])
            qkv = jnp.dot(qkv_w_ref[d], xn,
                          preferred_element_type=jnp.float32)            # (3C, HW)
            qkv = dwconv3x3(qkv, qkv_dw_ref[d], mask_l, mask_r)

            q = qkv[0:C]
            k = qkv[C:2 * C]
            v = qkv[2 * C:3 * C]
            q = l2_normalize_rows(q) * temp_ref[d]           # fold per-head temperature into q
            k = l2_normalize_rows(k)

            heads = []
            for h in range(num_heads):
                qh = q[h * CH:(h + 1) * CH]                  # (CH, HW)
                kh = k[h * CH:(h + 1) * CH]
                vh = v[h * CH:(h + 1) * CH]
                attn = jax.lax.dot_general(                  # (CH, CH) channel attention
                    qh, kh, (((1,), (1,)), ((), ())),
                    preferred_element_type=jnp.float32)
                attn = attn - jnp.max(attn, axis=-1, keepdims=True)
                attn = jnp.exp(attn)
                attn = attn / jnp.sum(attn, axis=-1, keepdims=True)
                heads.append(jnp.dot(attn, vh,
                                     preferred_element_type=jnp.float32))  # (CH, HW)
            ao = jnp.concatenate(heads, axis=0)              # (C, HW), concat in registers
            x = x + jnp.dot(po_w_ref[d], ao, preferred_element_type=jnp.float32)

            # ---------------- Feed-forward branch (GDFN) ----------------
            yn = layernorm(x, n2_w_ref[d], n2_b_ref[d])
            h1 = jnp.dot(pi_w1_ref[d], yn, preferred_element_type=jnp.float32)  # (hidden, HW)
            h2 = jnp.dot(pi_w2_ref[d], yn, preferred_element_type=jnp.float32)  # (hidden, HW)
            h1 = dwconv3x3(h1, dw1_ref[d], mask_l, mask_r)
            h2 = dwconv3x3(h2, dw2_ref[d], mask_l, mask_r)
            # TODO(synk): PyTorch F.gelu is exact (erf-based); tanh approximation used here.
            g = jax.nn.gelu(h1, approximate=True) * h2
            x = x + jnp.dot(fo_w_ref[d], g, preferred_element_type=jnp.float32)

        out_ref[0] = x.astype(out_ref.dtype)

    return kernel


def vss_layer_forward(x_nchw, params, num_heads):
    """x_nchw: (B, C, H, W) PyTorch layout. params: dict of depth-stacked weights."""
    B, C, H, W = x_nchw.shape
    HW = H * W
    depth = params["qkv_w"].shape[0]
    hidden = params["fo_w"].shape[-1]

    # NCHW -> (B, C, HW): channels on sublanes, pixels on lanes (free reshape).
    x = x_nchw.reshape(B, C, HW)

    kernel = make_vss_kernel(depth, H, W, C, num_heads, hidden)

    names = ["n1_w", "n1_b", "qkv_w", "qkv_dw", "temp_c", "po_w",
             "n2_w", "n2_b", "pi_w1", "pi_w2", "dw1", "dw2", "fo_w"]
    weights = [params[n] for n in names]

    def rep(arr):
        shp = arr.shape
        return pl.BlockSpec(shp, lambda b, n=len(shp): (0,) * n)

    in_specs = [pl.BlockSpec((1, C, HW), lambda b: (b, 0, 0))] + [rep(w) for w in weights]
    out_spec = pl.BlockSpec((1, C, HW), lambda b: (b, 0, 0))

    y = pl.pallas_call(
        kernel,
        out_shape=jax.ShapeDtypeStruct((B, C, HW), x_nchw.dtype),
        grid=(B,),
        in_specs=in_specs,
        out_specs=out_spec,
        compiler_params=pltpu.CompilerParams(dimension_semantics=("parallel",)),
    )(x, *weights)

    # downsample is None in this configuration
    return y.reshape(B, C, H, W)


def init_vss_params(key, dim, depth, num_heads, ffn_expansion_factor):
    """Kernel-ready parameters, stacked along a leading `depth` axis.

    Layouts (per block): 1x1 convs as (Cout, Cin) matrices applied on the left of the
    (C, HW) activation; depthwise 3x3 weights as (channels, 9) with tap = 3*(di+1)+(dj+1)
    (i.e. PyTorch (C,1,3,3).reshape(C,9)); LayerNorm/temperature as (C, 1) columns.
    """
    hidden = int(dim * ffn_expansion_factor)
    ch = dim // num_heads

    def u(k, shape, fan_in):
        bound = 1.0 / math.sqrt(fan_in)
        return jax.random.uniform(k, shape, jnp.float32, -bound, bound)

    blocks = []
    for i in range(depth):
        ks = jax.random.split(jax.random.fold_in(key, i), 6)
        temperature = jnp.ones((num_heads,), jnp.float32)   # nn.Parameter(torch.ones(heads,1,1))
        pi_w = u(ks[3], (2 * hidden, dim), dim)
        ffn_dw = u(ks[4], (2 * hidden, 9), 9)
        blocks.append(dict(
            n1_w=jnp.ones((dim, 1), jnp.float32),
            n1_b=jnp.zeros((dim, 1), jnp.float32),
            qkv_w=u(ks[0], (3 * dim, dim), dim),
            qkv_dw=u(ks[1], (3 * dim, 9), 9),
            temp_c=jnp.repeat(temperature, ch).reshape(dim, 1),  # per-head temp, per-channel bcast
            po_w=u(ks[2], (dim, dim), dim),
            n2_w=jnp.ones((dim, 1), jnp.float32),
            n2_b=jnp.zeros((dim, 1), jnp.float32),
            pi_w1=pi_w[:hidden], pi_w2=pi_w[hidden:],            # split gate halves (aligned)
            dw1=ffn_dw[:hidden], dw2=ffn_dw[hidden:],
            fo_w=u(ks[5], (dim, hidden), hidden),
        ))
    stacked = {k: jnp.stack([b[k] for b in blocks], axis=0) for k in blocks[0]}
    return stacked


if __name__ == "__main__":
    B, C, H, W = 2, 8, 16, 16
    depth = 2
    num_heads = 2
    ffn_expansion_factor = 2.66

    key = jax.random.PRNGKey(0)
    kx, kp = jax.random.split(key)
    x_nchw = jax.random.normal(kx, (B, C, H, W), jnp.float32)
    params = init_vss_params(kp, C, depth, num_heads, ffn_expansion_factor)

    y = vss_layer_forward(x_nchw, params, num_heads=num_heads)
    y = jax.block_until_ready(y)

    assert y.shape == x_nchw.shape, y.shape
    assert bool(jnp.all(jnp.isfinite(y)))
    print("KERNEL_OK")
</pallas_src>

<mosaic_0001>
module attributes {stable_mosaic.version = 11 : i64} {
  func.func @kernel(%arg0: i32, %arg1: memref<1x8x256xf32, #tpu.memory_space<vmem>>, %arg2: memref<2x8x1xf32, #tpu.memory_space<vmem>>, %arg3: memref<2x8x1xf32, #tpu.memory_space<vmem>>, %arg4: memref<2x24x8xf32, #tpu.memory_space<vmem>>, %arg5: memref<2x24x9xf32, #tpu.memory_space<vmem>>, %arg6: memref<2x8x1xf32, #tpu.memory_space<vmem>>, %arg7: memref<2x8x8xf32, #tpu.memory_space<vmem>>, %arg8: memref<2x8x1xf32, #tpu.memory_space<vmem>>, %arg9: memref<2x8x1xf32, #tpu.memory_space<vmem>>, %arg10: memref<2x21x8xf32, #tpu.memory_space<vmem>>, %arg11: memref<2x21x8xf32, #tpu.memory_space<vmem>>, %arg12: memref<2x21x9xf32, #tpu.memory_space<vmem>>, %arg13: memref<2x21x9xf32, #tpu.memory_space<vmem>>, %arg14: memref<2x8x21xf32, #tpu.memory_space<vmem>>, %arg15: memref<1x8x256xf32, #tpu.memory_space<vmem>>) attributes {dimension_semantics = [#tpu.dimension_semantics<parallel>], iteration_bounds = array<i64: 2>, scalar_prefetch = 0 : i64, scratch_operands = 0 : i64, tpu.core_type = #tpu.core_type<tc>, window_params = [{transform_indices = @transform_0, window_bounds = array<i64: 1, 8, 256>}, {pipeline_mode = #tpu.pipeline_mode<synchronous>, transform_indices = @transform_1, window_bounds = array<i64: 2, 8, 1>}, {pipeline_mode = #tpu.pipeline_mode<synchronous>, transform_indices = @transform_2, window_bounds = array<i64: 2, 8, 1>}, {pipeline_mode = #tpu.pipeline_mode<synchronous>, transform_indices = @transform_3, window_bounds = array<i64: 2, 24, 8>}, {pipeline_mode = #tpu.pipeline_mode<synchronous>, transform_indices = @transform_4, window_bounds = array<i64: 2, 24, 9>}, {pipeline_mode = #tpu.pipeline_mode<synchronous>, transform_indices = @transform_5, window_bounds = array<i64: 2, 8, 1>}, {pipeline_mode = #tpu.pipeline_mode<synchronous>, transform_indices = @transform_6, window_bounds = array<i64: 2, 8, 8>}, {pipeline_mode = #tpu.pipeline_mode<synchronous>, transform_indices = @transform_7, window_bounds = array<i64: 2, 8, 1>}, {pipeline_mode = #tpu.pipeline_mode<synchronous>, transform_indices = @transform_8, window_bounds = array<i64: 2, 8, 1>}, {pipeline_mode = #tpu.pipeline_mode<synchronous>, transform_indices = @transform_9, window_bounds = array<i64: 2, 21, 8>}, {pipeline_mode = #tpu.pipeline_mode<synchronous>, transform_indices = @transform_10, window_bounds = array<i64: 2, 21, 8>}, {pipeline_mode = #tpu.pipeline_mode<synchronous>, transform_indices = @transform_11, window_bounds = array<i64: 2, 21, 9>}, {pipeline_mode = #tpu.pipeline_mode<synchronous>, transform_indices = @transform_12, window_bounds = array<i64: 2, 21, 9>}, {pipeline_mode = #tpu.pipeline_mode<synchronous>, transform_indices = @transform_13, window_bounds = array<i64: 2, 8, 21>}, {transform_indices = @transform_14, window_bounds = array<i64: 1, 8, 256>}]} {
    %0 = tpu.iota {dimensions = array<i32: 1>} : vector<1x256xi32>
    %c16_i32 = arith.constant 16 : i32
    %c0_i32 = arith.constant 0 : i32
    %1 = arith.cmpi eq, %c16_i32, %c0_i32 : i32
    %c1_i32 = arith.constant 1 : i32
    %2 = arith.select %1, %c1_i32, %c16_i32 : i32
    %3 = vector.broadcast %2 : i32 to vector<1x256xi32>
    %4 = arith.remsi %0, %3 : vector<1x256xi32>
    %c0_i32_0 = arith.constant 0 : i32
    %5 = vector.broadcast %c0_i32_0 : i32 to vector<1x256xi32>
    %6 = arith.cmpi ne, %4, %5 : vector<1x256xi32>
    %c0_i32_1 = arith.constant 0 : i32
    %7 = vector.broadcast %c0_i32_1 : i32 to vector<1x256xi32>
    %8 = arith.cmpi slt, %4, %7 : vector<1x256xi32>
    %c0_i32_2 = arith.constant 0 : i32
    %9 = arith.cmpi slt, %2, %c0_i32_2 : i32
    %10 = vector.broadcast %9 : i1 to vector<1x256xi1>
    %11 = vector.broadcast %10 : vector<1x256xi1> to vector<1x256xi1>
    %12 = arith.xori %8, %11 : vector<1x256xi1>
    %13 = arith.andi %12, %6 : vector<1x256xi1>
    %14 = vector.broadcast %2 : i32 to vector<1x256xi32>
    %15 = arith.addi %4, %14 : vector<1x256xi32>
    %16 = arith.select %13, %15, %4 : vector<1x256xi1>, vector<1x256xi32>
    %c1_i32_3 = arith.constant 1 : i32
    %17 = vector.broadcast %c1_i32_3 : i32 to vector<1x256xi32>
    %18 = arith.cmpi sge, %16, %17 : vector<1x256xi32>
    %19 = arith.extui %18 : vector<1x256xi1> to vector<1x256xi32>
    %20 = arith.sitofp %19 : vector<1x256xi32> to vector<1x256xf32>
    %c14_i32 = arith.constant 14 : i32
    %21 = vector.broadcast %c14_i32 : i32 to vector<1x256xi32>
    %22 = arith.cmpi sle, %16, %21 : vector<1x256xi32>
    %23 = arith.extui %22 : vector<1x256xi1> to vector<1x256xi32>
    %24 = arith.sitofp %23 : vector<1x256xi32> to vector<1x256xf32>
    %c0 = arith.constant 0 : index
    %c0_4 = arith.constant 0 : index
    %c0_5 = arith.constant 0 : index
    %25 = vector.load %arg1[%c0, %c0_4, %c0_5] : memref<1x8x256xf32, #tpu.memory_space<vmem>>, vector<1x8x256xf32>
    %26 = vector.shape_cast %25 : vector<1x8x256xf32> to vector<8x256xf32>
    %c0_6 = arith.constant 0 : index
    %c0_7 = arith.constant 0 : index
    %c0_8 = arith.constant 0 : index
    %27 = vector.load %arg2[%c0_6, %c0_7, %c0_8] : memref<2x8x1xf32, #tpu.memory_space<vmem>>, vector<1x8x1xf32>
    %28 = vector.shape_cast %27 : vector<1x8x1xf32> to vector<8x1xf32>
    %c0_9 = arith.constant 0 : index
    %c0_10 = arith.constant 0 : index
    %c0_11 = arith.constant 0 : index
    %29 = vector.load %arg3[%c0_9, %c0_10, %c0_11] : memref<2x8x1xf32, #tpu.memory_space<vmem>>, vector<1x8x1xf32>
    %30 = vector.shape_cast %29 : vector<1x8x1xf32> to vector<8x1xf32>
    %cst = arith.constant dense<0.000000e+00> : vector<256xf32>
    %31 = vector.multi_reduction <add>, %26, %cst [0] : vector<8x256xf32> to vector<256xf32>
    %32 = vector.shape_cast %31 : vector<256xf32> to vector<1x256xf32>
    %cst_12 = arith.constant 8.000000e+00 : f32
    %33 = vector.broadcast %cst_12 : f32 to vector<1x256xf32>
    %34 = arith.divf %32, %33 : vector<1x256xf32>
    %35 = vector.broadcast %34 : vector<1x256xf32> to vector<8x256xf32>
    %36 = arith.subf %26, %35 : vector<8x256xf32>
    %37 = arith.mulf %36, %36 : vector<8x256xf32>
    %cst_13 = arith.constant dense<0.000000e+00> : vector<256xf32>
    %38 = vector.multi_reduction <add>, %37, %cst_13 [0] : vector<8x256xf32> to vector<256xf32>
    %39 = vector.shape_cast %38 : vector<256xf32> to vector<1x256xf32>
    %cst_14 = arith.constant 8.000000e+00 : f32
    %40 = vector.broadcast %cst_14 : f32 to vector<1x256xf32>
    %41 = arith.divf %39, %40 : vector<1x256xf32>
    %42 = vector.broadcast %34 : vector<1x256xf32> to vector<8x256xf32>
    %43 = arith.subf %26, %42 : vector<8x256xf32>
    %cst_15 = arith.constant 9.99999974E-6 : f32
    %44 = vector.broadcast %cst_15 : f32 to vector<1x256xf32>
    %45 = arith.addf %41, %44 : vector<1x256xf32>
    %46 = math.rsqrt %45 : vector<1x256xf32>
    %47 = vector.broadcast %46 : vector<1x256xf32> to vector<8x256xf32>
    %48 = arith.mulf %43, %47 : vector<8x256xf32>
    %49 = vector.broadcast %28 : vector<8x1xf32> to vector<8x256xf32>
    %50 = arith.mulf %48, %49 : vector<8x256xf32>
    %51 = vector.broadcast %30 : vector<8x1xf32> to vector<8x256xf32>
    %52 = arith.addf %50, %51 : vector<8x256xf32>
    %c0_16 = arith.constant 0 : index
    %c0_17 = arith.constant 0 : index
    %c0_18 = arith.constant 0 : index
    %53 = vector.load %arg4[%c0_16, %c0_17, %c0_18] : memref<2x24x8xf32, #tpu.memory_space<vmem>>, vector<1x24x8xf32>
    %54 = vector.shape_cast %53 : vector<1x24x8xf32> to vector<24x8xf32>
    %cst_19 = arith.constant dense<0.000000e+00> : vector<24x256xf32>
    %55 = tpu.matmul %54, %52, %cst_19 {dimension_numbers = #tpu.dot_dimension_numbers<[1], [0], [0], [1], [0, 0, 1, 1], [], []>} : vector<24x8xf32>, vector<8x256xf32>, vector<24x256xf32> -> vector<24x256xf32>
    %c0_20 = arith.constant 0 : index
    %c0_21 = arith.constant 0 : index
    %c0_22 = arith.constant 0 : index
    %56 = vector.load %arg5[%c0_20, %c0_21, %c0_22] : memref<2x24x9xf32, #tpu.memory_space<vmem>>, vector<1x24x9xf32>
    %57 = vector.shape_cast %56 : vector<1x24x9xf32> to vector<24x9xf32>
    %cst_23 = arith.constant 0.000000e+00 : f32
    %58 = vector.broadcast %cst_23 : f32 to vector<24x256xf32>
    %cst_24 = arith.constant 0.000000e+00 : f32
    %59 = vector.broadcast %cst_24 : f32 to vector<24x17xf32>
    %60 = vector.extract_strided_slice %55 {offsets = [0, 0], sizes = [24, 239], strides = [1, 1]} : vector<24x256xf32> to vector<24x239xf32>
    %61 = tpu.concatenate %59, %60 in 1 : vector<24x17xf32>, vector<24x239xf32> -> vector<24x256xf32>
    %62 = vector.broadcast %20 : vector<1x256xf32> to vector<24x256xf32>
    %63 = arith.mulf %61, %62 : vector<24x256xf32>
    %64 = vector.extract_strided_slice %57 {offsets = [0, 0], sizes = [24, 1], strides = [1, 1]} : vector<24x9xf32> to vector<24x1xf32>
    %65 = vector.broadcast %64 : vector<24x1xf32> to vector<24x256xf32>
    %66 = arith.mulf %63, %65 : vector<24x256xf32>
    %67 = arith.addf %58, %66 : vector<24x256xf32>
    %cst_25 = arith.constant 0.000000e+00 : f32
    %68 = vector.broadcast %cst_25 : f32 to vector<24x16xf32>
    %69 = vector.extract_strided_slice %55 {offsets = [0, 0], sizes = [24, 240], strides = [1, 1]} : vector<24x256xf32> to vector<24x240xf32>
    %70 = tpu.concatenate %68, %69 in 1 : vector<24x16xf32>, vector<24x240xf32> -> vector<24x256xf32>
    %71 = vector.extract_strided_slice %57 {offsets = [0, 1], sizes = [24, 1], strides = [1, 1]} : vector<24x9xf32> to vector<24x1xf32>
    %72 = vector.broadcast %71 : vector<24x1xf32> to vector<24x256xf32>
    %73 = arith.mulf %70, %72 : vector<24x256xf32>
    %74 = arith.addf %67, %73 : vector<24x256xf32>
    %cst_26 = arith.constant 0.000000e+00 : f32
    %75 = vector.broadcast %cst_26 : f32 to vector<24x15xf32>
    %76 = vector.extract_strided_slice %55 {offsets = [0, 0], sizes = [24, 241], strides = [1, 1]} : vector<24x256xf32> to vector<24x241xf32>
    %77 = tpu.concatenate %75, %76 in 1 : vector<24x15xf32>, vector<24x241xf32> -> vector<24x256xf32>
    %78 = vector.broadcast %24 : vector<1x256xf32> to vector<24x256xf32>
    %79 = arith.mulf %77, %78 : vector<24x256xf32>
    %80 = vector.extract_strided_slice %57 {offsets = [0, 2], sizes = [24, 1], strides = [1, 1]} : vector<24x9xf32> to vector<24x1xf32>
    %81 = vector.broadcast %80 : vector<24x1xf32> to vector<24x256xf32>
    %82 = arith.mulf %79, %81 : vector<24x256xf32>
    %83 = arith.addf %74, %82 : vector<24x256xf32>
    %cst_27 = arith.constant 0.000000e+00 : f32
    %84 = vector.broadcast %cst_27 : f32 to vector<24x1xf32>
    %85 = vector.extract_strided_slice %55 {offsets = [0, 0], sizes = [24, 255], strides = [1, 1]} : vector<24x256xf32> to vector<24x255xf32>
    %86 = tpu.concatenate %84, %85 in 1 : vector<24x1xf32>, vector<24x255xf32> -> vector<24x256xf32>
    %87 = vector.broadcast %20 : vector<1x256xf32> to vector<24x256xf32>
    %88 = arith.mulf %86, %87 : vector<24x256xf32>
    %89 = vector.extract_strided_slice %57 {offsets = [0, 3], sizes = [24, 1], strides = [1, 1]} : vector<24x9xf32> to vector<24x1xf32>
    %90 = vector.broadcast %89 : vector<24x1xf32> to vector<24x256xf32>
    %91 = arith.mulf %88, %90 : vector<24x256xf32>
    %92 = arith.addf %83, %91 : vector<24x256xf32>
    %93 = vector.extract_strided_slice %57 {offsets = [0, 4], sizes = [24, 1], strides = [1, 1]} : vector<24x9xf32> to vector<24x1xf32>
    %94 = vector.broadcast %93 : vector<24x1xf32> to vector<24x256xf32>
    %95 = arith.mulf %55, %94 : vector<24x256xf32>
    %96 = arith.addf %92, %95 : vector<24x256xf32>
    %cst_28 = arith.constant 0.000000e+00 : f32
    %97 = vector.broadcast %cst_28 : f32 to vector<24x1xf32>
    %98 = vector.extract_strided_slice %55 {offsets = [0, 1], sizes = [24, 255], strides = [1, 1]} : vector<24x256xf32> to vector<24x255xf32>
    %99 = tpu.concatenate %98, %97 in 1 : vector<24x255xf32>, vector<24x1xf32> -> vector<24x256xf32>
    %100 = vector.broadcast %24 : vector<1x256xf32> to vector<24x256xf32>
    %101 = arith.mulf %99, %100 : vector<24x256xf32>
    %102 = vector.extract_strided_slice %57 {offsets = [0, 5], sizes = [24, 1], strides = [1, 1]} : vector<24x9xf32> to vector<24x1xf32>
    %103 = vector.broadcast %102 : vector<24x1xf32> to vector<24x256xf32>
    %104 = arith.mulf %101, %103 : vector<24x256xf32>
    %105 = arith.addf %96, %104 : vector<24x256xf32>
    %cst_29 = arith.constant 0.000000e+00 : f32
    %106 = vector.broadcast %cst_29 : f32 to vector<24x15xf32>
    %107 = vector.extract_strided_slice %55 {offsets = [0, 15], sizes = [24, 241], strides = [1, 1]} : vector<24x256xf32> to vector<24x241xf32>
    %108 = tpu.concatenate %107, %106 in 1 : vector<24x241xf32>, vector<24x15xf32> -> vector<24x256xf32>
    %109 = vector.broadcast %20 : vector<1x256xf32> to vector<24x256xf32>
    %110 = arith.mulf %108, %109 : vector<24x256xf32>
    %111 = vector.extract_strided_slice %57 {offsets = [0, 6], sizes = [24, 1], strides = [1, 1]} : vector<24x9xf32> to vector<24x1xf32>
    %112 = vector.broadcast %111 : vector<24x1xf32> to vector<24x256xf32>
    %113 = arith.mulf %110, %112 : vector<24x256xf32>
    %114 = arith.addf %105, %113 : vector<24x256xf32>
    %cst_30 = arith.constant 0.000000e+00 : f32
    %115 = vector.broadcast %cst_30 : f32 to vector<24x16xf32>
    %116 = vector.extract_strided_slice %55 {offsets = [0, 16], sizes = [24, 240], strides = [1, 1]} : vector<24x256xf32> to vector<24x240xf32>
    %117 = tpu.concatenate %116, %115 in 1 : vector<24x240xf32>, vector<24x16xf32> -> vector<24x256xf32>
    %118 = vector.extract_strided_slice %57 {offsets = [0, 7], sizes = [24, 1], strides = [1, 1]} : vector<24x9xf32> to vector<24x1xf32>
    %119 = vector.broadcast %118 : vector<24x1xf32> to vector<24x256xf32>
    %120 = arith.mulf %117, %119 : vector<24x256xf32>
    %121 = arith.addf %114, %120 : vector<24x256xf32>
    %cst_31 = arith.constant 0.000000e+00 : f32
    %122 = vector.broadcast %cst_31 : f32 to vector<24x17xf32>
    %123 = vector.extract_strided_slice %55 {offsets = [0, 17], sizes = [24, 239], strides = [1, 1]} : vector<24x256xf32> to vector<24x239xf32>
    %124 = tpu.concatenate %123, %122 in 1 : vector<24x239xf32>, vector<24x17xf32> -> vector<24x256xf32>
    %125 = vector.broadcast %24 : vector<1x256xf32> to vector<24x256xf32>
    %126 = arith.mulf %124, %125 : vector<24x256xf32>
    %127 = vector.extract_strided_slice %57 {offsets = [0, 8], sizes = [24, 1], strides = [1, 1]} : vector<24x9xf32> to vector<24x1xf32>
    %128 = vector.broadcast %127 : vector<24x1xf32> to vector<24x256xf32>
    %129 = arith.mulf %126, %128 : vector<24x256xf32>
    %130 = arith.addf %121, %129 : vector<24x256xf32>
    %131 = vector.extract_strided_slice %130 {offsets = [0, 0], sizes = [8, 256], strides = [1, 1]} : vector<24x256xf32> to vector<8x256xf32>
    %132 = vector.extract_strided_slice %130 {offsets = [8, 0], sizes = [8, 256], strides = [1, 1]} : vector<24x256xf32> to vector<8x256xf32>
    %133 = vector.extract_strided_slice %130 {offsets = [16, 0], sizes = [8, 256], strides = [1, 1]} : vector<24x256xf32> to vector<8x256xf32>
    %134 = arith.mulf %131, %131 : vector<8x256xf32>
    %cst_32 = arith.constant dense<0.000000e+00> : vector<8xf32>
    %135 = vector.multi_reduction <add>, %134, %cst_32 [1] : vector<8x256xf32> to vector<8xf32>
    %136 = vector.shape_cast %135 : vector<8xf32> to vector<8x1xf32>
    %137 = math.sqrt %136 : vector<8x1xf32>
    %cst_33 = arith.constant 9.99999996E-13 : f32
    %138 = vector.broadcast %cst_33 : f32 to vector<8x1xf32>
    %139 = arith.maximumf %137, %138 : vector<8x1xf32>
    %140 = vector.broadcast %139 : vector<8x1xf32> to vector<8x256xf32>
    %141 = arith.divf %131, %140 : vector<8x256xf32>
    %c0_34 = arith.constant 0 : index
    %c0_35 = arith.constant 0 : index
    %c0_36 = arith.constant 0 : index
    %142 = vector.load %arg6[%c0_34, %c0_35, %c0_36] : memref<2x8x1xf32, #tpu.memory_space<vmem>>, vector<1x8x1xf32>
    %143 = vector.shape_cast %142 : vector<1x8x1xf32> to vector<8x1xf32>
    %144 = vector.broadcast %143 : vector<8x1xf32> to vector<8x256xf32>
    %145 = arith.mulf %141, %144 : vector<8x256xf32>
    %146 = arith.mulf %132, %132 : vector<8x256xf32>
    %cst_37 = arith.constant dense<0.000000e+00> : vector<8xf32>
    %147 = vector.multi_reduction <add>, %146, %cst_37 [1] : vector<8x256xf32> to vector<8xf32>
    %148 = vector.shape_cast %147 : vector<8xf32> to vector<8x1xf32>
    %149 = math.sqrt %148 : vector<8x1xf32>
    %cst_38 = arith.constant 9.99999996E-13 : f32
    %150 = vector.broadcast %cst_38 : f32 to vector<8x1xf32>
    %151 = arith.maximumf %149, %150 : vector<8x1xf32>
    %152 = vector.broadcast %151 : vector<8x1xf32> to vector<8x256xf32>
    %153 = arith.divf %132, %152 : vector<8x256xf32>
    %154 = vector.extract_strided_slice %145 {offsets = [0, 0], sizes = [4, 256], strides = [1, 1]} : vector<8x256xf32> to vector<4x256xf32>
    %155 = vector.extract_strided_slice %153 {offsets = [0, 0], sizes = [4, 256], strides = [1, 1]} : vector<8x256xf32> to vector<4x256xf32>
    %156 = vector.extract_strided_slice %133 {offsets = [0, 0], sizes = [4, 256], strides = [1, 1]} : vector<8x256xf32> to vector<4x256xf32>
    %cst_39 = arith.constant dense<0.000000e+00> : vector<4x4xf32>
    %157 = tpu.matmul %154, %155, %cst_39 {dimension_numbers = #tpu.dot_dimension_numbers<[1], [1], [0], [0], [0, 0, 1, 0], [], []>} : vector<4x256xf32>, vector<4x256xf32>, vector<4x4xf32> -> vector<4x4xf32>
    %cst_40 = arith.constant dense<0xFF800000> : vector<4xf32>
    %158 = vector.multi_reduction <maximumf>, %157, %cst_40 [1] : vector<4x4xf32> to vector<4xf32>
    %159 = vector.shape_cast %158 : vector<4xf32> to vector<4x1xf32>
    %160 = vector.broadcast %159 : vector<4x1xf32> to vector<4x4xf32>
    %161 = arith.subf %157, %160 : vector<4x4xf32>
    %162 = math.exp %161 : vector<4x4xf32>
    %cst_41 = arith.constant dense<0.000000e+00> : vector<4xf32>
    %163 = vector.multi_reduction <add>, %162, %cst_41 [1] : vector<4x4xf32> to vector<4xf32>
    %164 = vector.shape_cast %163 : vector<4xf32> to vector<4x1xf32>
    %165 = vector.broadcast %164 : vector<4x1xf32> to vector<4x4xf32>
    %166 = arith.divf %162, %165 : vector<4x4xf32>
    %cst_42 = arith.constant dense<0.000000e+00> : vector<4x256xf32>
    %167 = tpu.matmul %166, %156, %cst_42 {dimension_numbers = #tpu.dot_dimension_numbers<[1], [0], [0], [1], [0, 0, 1, 1], [], []>} : vector<4x4xf32>, vector<4x256xf32>, vector<4x256xf32> -> vector<4x256xf32>
    %168 = vector.extract_strided_slice %145 {offsets = [4, 0], sizes = [4, 256], strides = [1, 1]} : vector<8x256xf32> to vector<4x256xf32>
    %169 = vector.extract_strided_slice %153 {offsets = [4, 0], sizes = [4, 256], strides = [1, 1]} : vector<8x256xf32> to vector<4x256xf32>
    %170 = vector.extract_strided_slice %133 {offsets = [4, 0], sizes = [4, 256], strides = [1, 1]} : vector<8x256xf32> to vector<4x256xf32>
    %cst_43 = arith.constant dense<0.000000e+00> : vector<4x4xf32>
    %171 = tpu.matmul %168, %169, %cst_43 {dimension_numbers = #tpu.dot_dimension_numbers<[1], [1], [0], [0], [0, 0, 1, 0], [], []>} : vector<4x256xf32>, vector<4x256xf32>, vector<4x4xf32> -> vector<4x4xf32>
    %cst_44 = arith.constant dense<0xFF800000> : vector<4xf32>
    %172 = vector.multi_reduction <maximumf>, %171, %cst_44 [1] : vector<4x4xf32> to vector<4xf32>
    %173 = vector.shape_cast %172 : vector<4xf32> to vector<4x1xf32>
    %174 = vector.broadcast %173 : vector<4x1xf32> to vector<4x4xf32>
    %175 = arith.subf %171, %174 : vector<4x4xf32>
    %176 = math.exp %175 : vector<4x4xf32>
    %cst_45 = arith.constant dense<0.000000e+00> : vector<4xf32>
    %177 = vector.multi_reduction <add>, %176, %cst_45 [1] : vector<4x4xf32> to vector<4xf32>
    %178 = vector.shape_cast %177 : vector<4xf32> to vector<4x1xf32>
    %179 = vector.broadcast %178 : vector<4x1xf32> to vector<4x4xf32>
    %180 = arith.divf %176, %179 : vector<4x4xf32>
    %cst_46 = arith.constant dense<0.000000e+00> : vector<4x256xf32>
    %181 = tpu.matmul %180, %170, %cst_46 {dimension_numbers = #tpu.dot_dimension_numbers<[1], [0], [0], [1], [0, 0, 1, 1], [], []>} : vector<4x4xf32>, vector<4x256xf32>, vector<4x256xf32> -> vector<4x256xf32>
    %182 = tpu.concatenate %167, %181 in 0 : vector<4x256xf32>, vector<4x256xf32> -> vector<8x256xf32>
    %c0_47 = arith.constant 0 : index
    %c0_48 = arith.constant 0 : index
    %c0_49 = arith.constant 0 : index
    %183 = vector.load %arg7[%c0_47, %c0_48, %c0_49] : memref<2x8x8xf32, #tpu.memory_space<vmem>>, vector<1x8x8xf32>
    %184 = vector.shape_cast %183 : vector<1x8x8xf32> to vector<8x8xf32>
    %cst_50 = arith.constant dense<0.000000e+00> : vector<8x256xf32>
    %185 = tpu.matmul %184, %182, %cst_50 {dimension_numbers = #tpu.dot_dimension_numbers<[1], [0], [0], [1], [0, 0, 1, 1], [], []>} : vector<8x8xf32>, vector<8x256xf32>, vector<8x256xf32> -> vector<8x256xf32>
    %186 = arith.addf %26, %185 : vector<8x256xf32>
    %c0_51 = arith.constant 0 : index
    %c0_52 = arith.constant 0 : index
    %c0_53 = arith.constant 0 : index
    %187 = vector.load %arg8[%c0_51, %c0_52, %c0_53] : memref<2x8x1xf32, #tpu.memory_space<vmem>>, vector<1x8x1xf32>
    %188 = vector.shape_cast %187 : vector<1x8x1xf32> to vector<8x1xf32>
    %c0_54 = arith.constant 0 : index
    %c0_55 = arith.constant 0 : index
    %c0_56 = arith.constant 0 : index
    %189 = vector.load %arg9[%c0_54, %c0_55, %c0_56] : memref<2x8x1xf32, #tpu.memory_space<vmem>>, vector<1x8x1xf32>
    %190 = vector.shape_cast %189 : vector<1x8x1xf32> to vector<8x1xf32>
    %cst_57 = arith.constant dense<0.000000e+00> : vector<256xf32>
    %191 = vector.multi_reduction <add>, %186, %cst_57 [0] : vector<8x256xf32> to vector<256xf32>
    %192 = vector.shape_cast %191 : vector<256xf32> to vector<1x256xf32>
    %cst_58 = arith.constant 8.000000e+00 : f32
    %193 = vector.broadcast %cst_58 : f32 to vector<1x256xf32>
    %194 = arith.divf %192, %193 : vector<1x256xf32>
    %195 = vector.broadcast %194 : vector<1x256xf32> to vector<8x256xf32>
    %196 = arith.subf %186, %195 : vector<8x256xf32>
    %197 = arith.mulf %196, %196 : vector<8x256xf32>
    %cst_59 = arith.constant dense<0.000000e+00> : vector<256xf32>
    %198 = vector.multi_reduction <add>, %197, %cst_59 [0] : vector<8x256xf32> to vector<256xf32>
    %199 = vector.shape_cast %198 : vector<256xf32> to vector<1x256xf32>
    %cst_60 = arith.constant 8.000000e+00 : f32
    %200 = vector.broadcast %cst_60 : f32 to vector<1x256xf32>
    %201 = arith.divf %199, %200 : vector<1x256xf32>
    %202 = vector.broadcast %194 : vector<1x256xf32> to vector<8x256xf32>
    %203 = arith.subf %186, %202 : vector<8x256xf32>
    %cst_61 = arith.constant 9.99999974E-6 : f32
    %204 = vector.broadcast %cst_61 : f32 to vector<1x256xf32>
    %205 = arith.addf %201, %204 : vector<1x256xf32>
    %206 = math.rsqrt %205 : vector<1x256xf32>
    %207 = vector.broadcast %206 : vector<1x256xf32> to vector<8x256xf32>
    %208 = arith.mulf %203, %207 : vector<8x256xf32>
    %209 = vector.broadcast %188 : vector<8x1xf32> to vector<8x256xf32>
    %210 = arith.mulf %208, %209 : vector<8x256xf32>
    %211 = vector.broadcast %190 : vector<8x1xf32> to vector<8x256xf32>
    %212 = arith.addf %210, %211 : vector<8x256xf32>
    %c0_62 = arith.constant 0 : index
    %c0_63 = arith.constant 0 : index
    %c0_64 = arith.constant 0 : index
    %213 = vector.load %arg10[%c0_62, %c0_63, %c0_64] : memref<2x21x8xf32, #tpu.memory_space<vmem>>, vector<1x21x8xf32>
    %214 = vector.shape_cast %213 : vector<1x21x8xf32> to vector<21x8xf32>
    %cst_65 = arith.constant dense<0.000000e+00> : vector<21x256xf32>
    %215 = tpu.matmul %214, %212, %cst_65 {dimension_numbers = #tpu.dot_dimension_numbers<[1], [0], [0], [1], [0, 0, 1, 1], [], []>} : vector<21x8xf32>, vector<8x256xf32>, vector<21x256xf32> -> vector<21x256xf32>
    %c0_66 = arith.constant 0 : index
    %c0_67 = arith.constant 0 : index
    %c0_68 = arith.constant 0 : index
    %216 = vector.load %arg11[%c0_66, %c0_67, %c0_68] : memref<2x21x8xf32, #tpu.memory_space<vmem>>, vector<1x21x8xf32>
    %217 = vector.shape_cast %216 : vector<1x21x8xf32> to vector<21x8xf32>
    %cst_69 = arith.constant dense<0.000000e+00> : vector<21x256xf32>
    %218 = tpu.matmul %217, %212, %cst_69 {dimension_numbers = #tpu.dot_dimension_numbers<[1], [0], [0], [1], [0, 0, 1, 1], [], []>} : vector<21x8xf32>, vector<8x256xf32>, vector<21x256xf32> -> vector<21x256xf32>
    %c0_70 = arith.constant 0 : index
    %c0_71 = arith.constant 0 : index
    %c0_72 = arith.constant 0 : index
    %219 = vector.load %arg12[%c0_70, %c0_71, %c0_72] : memref<2x21x9xf32, #tpu.memory_space<vmem>>, vector<1x21x9xf32>
    %220 = vector.shape_cast %219 : vector<1x21x9xf32> to vector<21x9xf32>
    %cst_73 = arith.constant 0.000000e+00 : f32
    %221 = vector.broadcast %cst_73 : f32 to vector<21x256xf32>
    %cst_74 = arith.constant 0.000000e+00 : f32
    %222 = vector.broadcast %cst_74 : f32 to vector<21x17xf32>
    %223 = vector.extract_strided_slice %215 {offsets = [0, 0], sizes = [21, 239], strides = [1, 1]} : vector<21x256xf32> to vector<21x239xf32>
    %224 = tpu.concatenate %222, %223 in 1 : vector<21x17xf32>, vector<21x239xf32> -> vector<21x256xf32>
    %225 = vector.broadcast %20 : vector<1x256xf32> to vector<21x256xf32>
    %226 = arith.mulf %224, %225 : vector<21x256xf32>
    %227 = vector.extract_strided_slice %220 {offsets = [0, 0], sizes = [21, 1], strides = [1, 1]} : vector<21x9xf32> to vector<21x1xf32>
    %228 = vector.broadcast %227 : vector<21x1xf32> to vector<21x256xf32>
    %229 = arith.mulf %226, %228 : vector<21x256xf32>
    %230 = arith.addf %221, %229 : vector<21x256xf32>
    %cst_75 = arith.constant 0.000000e+00 : f32
    %231 = vector.broadcast %cst_75 : f32 to vector<21x16xf32>
    %232 = vector.extract_strided_slice %215 {offsets = [0, 0], sizes = [21, 240], strides = [1, 1]} : vector<21x256xf32> to vector<21x240xf32>
    %233 = tpu.concatenate %231, %232 in 1 : vector<21x16xf32>, vector<21x240xf32> -> vector<21x256xf32>
    %234 = vector.extract_strided_slice %220 {offsets = [0, 1], sizes = [21, 1], strides = [1, 1]} : vector<21x9xf32> to vector<21x1xf32>
    %235 = vector.broadcast %234 : vector<21x1xf32> to vector<21x256xf32>
    %236 = arith.mulf %233, %235 : vector<21x256xf32>
    %237 = arith.addf %230, %236 : vector<21x256xf32>
    %cst_76 = arith.constant 0.000000e+00 : f32
    %238 = vector.broadcast %cst_76 : f32 to vector<21x15xf32>
    %239 = vector.extract_strided_slice %215 {offsets = [0, 0], sizes = [21, 241], strides = [1, 1]} : vector<21x256xf32> to vector<21x241xf32>
    %240 = tpu.concatenate %238, %239 in 1 : vector<21x15xf32>, vector<21x241xf32> -> vector<21x256xf32>
    %241 = vector.broadcast %24 : vector<1x256xf32> to vector<21x256xf32>
    %242 = arith.mulf %240, %241 : vector<21x256xf32>
    %243 = vector.extract_strided_slice %220 {offsets = [0, 2], sizes = [21, 1], strides = [1, 1]} : vector<21x9xf32> to vector<21x1xf32>
    %244 = vector.broadcast %243 : vector<21x1xf32> to vector<21x256xf32>
    %245 = arith.mulf %242, %244 : vector<21x256xf32>
    %246 = arith.addf %237, %245 : vector<21x256xf32>
    %cst_77 = arith.constant 0.000000e+00 : f32
    %247 = vector.broadcast %cst_77 : f32 to vector<21x1xf32>
    %248 = vector.extract_strided_slice %215 {offsets = [0, 0], sizes = [21, 255], strides = [1, 1]} : vector<21x256xf32> to vector<21x255xf32>
    %249 = tpu.concatenate %247, %248 in 1 : vector<21x1xf32>, vector<21x255xf32> -> vector<21x256xf32>
    %250 = vector.broadcast %20 : vector<1x256xf32> to vector<21x256xf32>
    %251 = arith.mulf %249, %250 : vector<21x256xf32>
    %252 = vector.extract_strided_slice %220 {offsets = [0, 3], sizes = [21, 1], strides = [1, 1]} : vector<21x9xf32> to vector<21x1xf32>
    %253 = vector.broadcast %252 : vector<21x1xf32> to vector<21x256xf32>
    %254 = arith.mulf %251, %253 : vector<21x256xf32>
    %255 = arith.addf %246, %254 : vector<21x256xf32>
    %256 = vector.extract_strided_slice %220 {offsets = [0, 4], sizes = [21, 1], strides = [1, 1]} : vector<21x9xf32> to vector<21x1xf32>
    %257 = vector.broadcast %256 : vector<21x1xf32> to vector<21x256xf32>
    %258 = arith.mulf %215, %257 : vector<21x256xf32>
    %259 = arith.addf %255, %258 : vector<21x256xf32>
    %cst_78 = arith.constant 0.000000e+00 : f32
    %260 = vector.broadcast %cst_78 : f32 to vector<21x1xf32>
    %261 = vector.extract_strided_slice %215 {offsets = [0, 1], sizes = [21, 255], strides = [1, 1]} : vector<21x256xf32> to vector<21x255xf32>
    %262 = tpu.concatenate %261, %260 in 1 : vector<21x255xf32>, vector<21x1xf32> -> vector<21x256xf32>
    %263 = vector.broadcast %24 : vector<1x256xf32> to vector<21x256xf32>
    %264 = arith.mulf %262, %263 : vector<21x256xf32>
    %265 = vector.extract_strided_slice %220 {offsets = [0, 5], sizes = [21, 1], strides = [1, 1]} : vector<21x9xf32> to vector<21x1xf32>
    %266 = vector.broadcast %265 : vector<21x1xf32> to vector<21x256xf32>
    %267 = arith.mulf %264, %266 : vector<21x256xf32>
    %268 = arith.addf %259, %267 : vector<21x256xf32>
    %cst_79 = arith.constant 0.000000e+00 : f32
    %269 = vector.broadcast %cst_79 : f32 to vector<21x15xf32>
    %270 = vector.extract_strided_slice %215 {offsets = [0, 15], sizes = [21, 241], strides = [1, 1]} : vector<21x256xf32> to vector<21x241xf32>
    %271 = tpu.concatenate %270, %269 in 1 : vector<21x241xf32>, vector<21x15xf32> -> vector<21x256xf32>
    %272 = vector.broadcast %20 : vector<1x256xf32> to vector<21x256xf32>
    %273 = arith.mulf %271, %272 : vector<21x256xf32>
    %274 = vector.extract_strided_slice %220 {offsets = [0, 6], sizes = [21, 1], strides = [1, 1]} : vector<21x9xf32> to vector<21x1xf32>
    %275 = vector.broadcast %274 : vector<21x1xf32> to vector<21x256xf32>
    %276 = arith.mulf %273, %275 : vector<21x256xf32>
    %277 = arith.addf %268, %276 : vector<21x256xf32>
    %cst_80 = arith.constant 0.000000e+00 : f32
    %278 = vector.broadcast %cst_80 : f32 to vector<21x16xf32>
    %279 = vector.extract_strided_slice %215 {offsets = [0, 16], sizes = [21, 240], strides = [1, 1]} : vector<21x256xf32> to vector<21x240xf32>
    %280 = tpu.concatenate %279, %278 in 1 : vector<21x240xf32>, vector<21x16xf32> -> vector<21x256xf32>
    %281 = vector.extract_strided_slice %220 {offsets = [0, 7], sizes = [21, 1], strides = [1, 1]} : vector<21x9xf32> to vector<21x1xf32>
    %282 = vector.broadcast %281 : vector<21x1xf32> to vector<21x256xf32>
    %283 = arith.mulf %280, %282 : vector<21x256xf32>
    %284 = arith.addf %277, %283 : vector<21x256xf32>
    %cst_81 = arith.constant 0.000000e+00 : f32
    %285 = vector.broadcast %cst_81 : f32 to vector<21x17xf32>
    %286 = vector.extract_strided_slice %215 {offsets = [0, 17], sizes = [21, 239], strides = [1, 1]} : vector<21x256xf32> to vector<21x239xf32>
    %287 = tpu.concatenate %286, %285 in 1 : vector<21x239xf32>, vector<21x17xf32> -> vector<21x256xf32>
    %288 = vector.broadcast %24 : vector<1x256xf32> to vector<21x256xf32>
    %289 = arith.mulf %287, %288 : vector<21x256xf32>
    %290 = vector.extract_strided_slice %220 {offsets = [0, 8], sizes = [21, 1], strides = [1, 1]} : vector<21x9xf32> to vector<21x1xf32>
    %291 = vector.broadcast %290 : vector<21x1xf32> to vector<21x256xf32>
    %292 = arith.mulf %289, %291 : vector<21x256xf32>
    %293 = arith.addf %284, %292 : vector<21x256xf32>
    %c0_82 = arith.constant 0 : index
    %c0_83 = arith.constant 0 : index
    %c0_84 = arith.constant 0 : index
    %294 = vector.load %arg13[%c0_82, %c0_83, %c0_84] : memref<2x21x9xf32, #tpu.memory_space<vmem>>, vector<1x21x9xf32>
    %295 = vector.shape_cast %294 : vector<1x21x9xf32> to vector<21x9xf32>
    %cst_85 = arith.constant 0.000000e+00 : f32
    %296 = vector.broadcast %cst_85 : f32 to vector<21x256xf32>
    %cst_86 = arith.constant 0.000000e+00 : f32
    %297 = vector.broadcast %cst_86 : f32 to vector<21x17xf32>
    %298 = vector.extract_strided_slice %218 {offsets = [0, 0], sizes = [21, 239], strides = [1, 1]} : vector<21x256xf32> to vector<21x239xf32>
    %299 = tpu.concatenate %297, %298 in 1 : vector<21x17xf32>, vector<21x239xf32> -> vector<21x256xf32>
    %300 = vector.broadcast %20 : vector<1x256xf32> to vector<21x256xf32>
    %301 = arith.mulf %299, %300 : vector<21x256xf32>
    %302 = vector.extract_strided_slice %295 {offsets = [0, 0], sizes = [21, 1], strides = [1, 1]} : vector<21x9xf32> to vector<21x1xf32>
    %303 = vector.broadcast %302 : vector<21x1xf32> to vector<21x256xf32>
    %304 = arith.mulf %301, %303 : vector<21x256xf32>
    %305 = arith.addf %296, %304 : vector<21x256xf32>
    %cst_87 = arith.constant 0.000000e+00 : f32
    %306 = vector.broadcast %cst_87 : f32 to vector<21x16xf32>
    %307 = vector.extract_strided_slice %218 {offsets = [0, 0], sizes = [21, 240], strides = [1, 1]} : vector<21x256xf32> to vector<21x240xf32>
    %308 = tpu.concatenate %306, %307 in 1 : vector<21x16xf32>, vector<21x240xf32> -> vector<21x256xf32>
    %309 = vector.extract_strided_slice %295 {offsets = [0, 1], sizes = [21, 1], strides = [1, 1]} : vector<21x9xf32> to vector<21x1xf32>
    %310 = vector.broadcast %309 : vector<21x1xf32> to vector<21x256xf32>
    %311 = arith.mulf %308, %310 : vector<21x256xf32>
    %312 = arith.addf %305, %311 : vector<21x256xf32>
    %cst_88 = arith.constant 0.000000e+00 : f32
    %313 = vector.broadcast %cst_88 : f32 to vector<21x15xf32>
    %314 = vector.extract_strided_slice %218 {offsets = [0, 0], sizes = [21, 241], strides = [1, 1]} : vector<21x256xf32> to vector<21x241xf32>
    %315 = tpu.concatenate %313, %314 in 1 : vector<21x15xf32>, vector<21x241xf32> -> vector<21x256xf32>
    %316 = vector.broadcast %24 : vector<1x256xf32> to vector<21x256xf32>
    %317 = arith.mulf %315, %316 : vector<21x256xf32>
    %318 = vector.extract_strided_slice %295 {offsets = [0, 2], sizes = [21, 1], strides = [1, 1]} : vector<21x9xf32> to vector<21x1xf32>
    %319 = vector.broadcast %318 : vector<21x1xf32> to vector<21x256xf32>
    %320 = arith.mulf %317, %319 : vector<21x256xf32>
    %321 = arith.addf %312, %320 : vector<21x256xf32>
    %cst_89 = arith.constant 0.000000e+00 : f32
    %322 = vector.broadcast %cst_89 : f32 to vector<21x1xf32>
    %323 = vector.extract_strided_slice %218 {offsets = [0, 0], sizes = [21, 255], strides = [1, 1]} : vector<21x256xf32> to vector<21x255xf32>
    %324 = tpu.concatenate %322, %323 in 1 : vector<21x1xf32>, vector<21x255xf32> -> vector<21x256xf32>
    %325 = vector.broadcast %20 : vector<1x256xf32> to vector<21x256xf32>
    %326 = arith.mulf %324, %325 : vector<21x256xf32>
    %327 = vector.extract_strided_slice %295 {offsets = [0, 3], sizes = [21, 1], strides = [1, 1]} : vector<21x9xf32> to vector<21x1xf32>
    %328 = vector.broadcast %327 : vector<21x1xf32> to vector<21x256xf32>
    %329 = arith.mulf %326, %328 : vector<21x256xf32>
    %330 = arith.addf %321, %329 : vector<21x256xf32>
    %331 = vector.extract_strided_slice %295 {offsets = [0, 4], sizes = [21, 1], strides = [1, 1]} : vector<21x9xf32> to vector<21x1xf32>
    %332 = vector.broadcast %331 : vector<21x1xf32> to vector<21x256xf32>
    %333 = arith.mulf %218, %332 : vector<21x256xf32>
    %334 = arith.addf %330, %333 : vector<21x256xf32>
    %cst_90 = arith.constant 0.000000e+00 : f32
    %335 = vector.broadcast %cst_90 : f32 to vector<21x1xf32>
    %336 = vector.extract_strided_slice %218 {offsets = [0, 1], sizes = [21, 255], strides = [1, 1]} : vector<21x256xf32> to vector<21x255xf32>
    %337 = tpu.concatenate %336, %335 in 1 : vector<21x255xf32>, vector<21x1xf32> -> vector<21x256xf32>
    %338 = vector.broadcast %24 : vector<1x256xf32> to vector<21x256xf32>
    %339 = arith.mulf %337, %338 : vector<21x256xf32>
    %340 = vector.extract_strided_slice %295 {offsets = [0, 5], sizes = [21, 1], strides = [1, 1]} : vector<21x9xf32> to vector<21x1xf32>
    %341 = vector.broadcast %340 : vector<21x1xf32> to vector<21x256xf32>
    %342 = arith.mulf %339, %341 : vector<21x256xf32>
    %343 = arith.addf %334, %342 : vector<21x256xf32>
    %cst_91 = arith.constant 0.000000e+00 : f32
    %344 = vector.broadcast %cst_91 : f32 to vector<21x15xf32>
    %345 = vector.extract_strided_slice %218 {offsets = [0, 15], sizes = [21, 241], strides = [1, 1]} : vector<21x256xf32> to vector<21x241xf32>
    %346 = tpu.concatenate %345, %344 in 1 : vector<21x241xf32>, vector<21x15xf32> -> vector<21x256xf32>
    %347 = vector.broadcast %20 : vector<1x256xf32> to vector<21x256xf32>
    %348 = arith.mulf %346, %347 : vector<21x256xf32>
    %349 = vector.extract_strided_slice %295 {offsets = [0, 6], sizes = [21, 1], strides = [1, 1]} : vector<21x9xf32> to vector<21x1xf32>
    %350 = vector.broadcast %349 : vector<21x1xf32> to vector<21x256xf32>
    %351 = arith.mulf %348, %350 : vector<21x256xf32>
    %352 = arith.addf %343, %351 : vector<21x256xf32>
    %cst_92 = arith.constant 0.000000e+00 : f32
    %353 = vector.broadcast %cst_92 : f32 to vector<21x16xf32>
    %354 = vector.extract_strided_slice %218 {offsets = [0, 16], sizes = [21, 240], strides = [1, 1]} : vector<21x256xf32> to vector<21x240xf32>
    %355 = tpu.concatenate %354, %353 in 1 : vector<21x240xf32>, vector<21x16xf32> -> vector<21x256xf32>
    %356 = vector.extract_strided_slice %295 {offsets = [0, 7], sizes = [21, 1], strides = [1, 1]} : vector<21x9xf32> to vector<21x1xf32>
    %357 = vector.broadcast %356 : vector<21x1xf32> to vector<21x256xf32>
    %358 = arith.mulf %355, %357 : vector<21x256xf32>
    %359 = arith.addf %352, %358 : vector<21x256xf32>
    %cst_93 = arith.constant 0.000000e+00 : f32
    %360 = vector.broadcast %cst_93 : f32 to vector<21x17xf32>
    %361 = vector.extract_strided_slice %218 {offsets = [0, 17], sizes = [21, 239], strides = [1, 1]} : vector<21x256xf32> to vector<21x239xf32>
    %362 = tpu.concatenate %361, %360 in 1 : vector<21x239xf32>, vector<21x17xf32> -> vector<21x256xf32>
    %363 = vector.broadcast %24 : vector<1x256xf32> to vector<21x256xf32>
    %364 = arith.mulf %362, %363 : vector<21x256xf32>
    %365 = vector.extract_strided_slice %295 {offsets = [0, 8], sizes = [21, 1], strides = [1, 1]} : vector<21x9xf32> to vector<21x1xf32>
    %366 = vector.broadcast %365 : vector<21x1xf32> to vector<21x256xf32>
    %367 = arith.mulf %364, %366 : vector<21x256xf32>
    %368 = arith.addf %359, %367 : vector<21x256xf32>
    %369 = arith.mulf %293, %293 : vector<21x256xf32>
    %370 = arith.mulf %293, %369 : vector<21x256xf32>
    %cst_94 = arith.constant 4.471500e-02 : f32
    %371 = vector.broadcast %cst_94 : f32 to vector<21x256xf32>
    %372 = arith.mulf %371, %370 : vector<21x256xf32>
    %373 = arith.addf %293, %372 : vector<21x256xf32>
    %cst_95 = arith.constant 0.797884583 : f32
    %374 = vector.broadcast %cst_95 : f32 to vector<21x256xf32>
    %375 = arith.mulf %374, %373 : vector<21x256xf32>
    %376 = math.tanh %375 : vector<21x256xf32>
    %cst_96 = arith.constant 1.000000e+00 : f32
    %377 = vector.broadcast %cst_96 : f32 to vector<21x256xf32>
    %378 = arith.addf %377, %376 : vector<21x256xf32>
    %cst_97 = arith.constant 5.000000e-01 : f32
    %379 = vector.broadcast %cst_97 : f32 to vector<21x256xf32>
    %380 = arith.mulf %379, %378 : vector<21x256xf32>
    %381 = arith.mulf %293, %380 : vector<21x256xf32>
    %382 = arith.mulf %381, %368 : vector<21x256xf32>
    %c0_98 = arith.constant 0 : index
    %c0_99 = arith.constant 0 : index
    %c0_100 = arith.constant 0 : index
    %383 = vector.load %arg14[%c0_98, %c0_99, %c0_100] : memref<2x8x21xf32, #tpu.memory_space<vmem>>, vector<1x8x21xf32>
    %384 = vector.shape_cast %383 : vector<1x8x21xf32> to vector<8x21xf32>
    %cst_101 = arith.constant dense<0.000000e+00> : vector<8x256xf32>
    %385 = tpu.matmul %384, %382, %cst_101 {dimension_numbers = #tpu.dot_dimension_numbers<[1], [0], [0], [1], [0, 0, 1, 1], [], []>} : vector<8x21xf32>, vector<21x256xf32>, vector<8x256xf32> -> vector<8x256xf32>
    %386 = arith.addf %186, %385 : vector<8x256xf32>
    %c1 = arith.constant 1 : index
    %c0_102 = arith.constant 0 : index
    %c0_103 = arith.constant 0 : index
    %387 = vector.load %arg2[%c1, %c0_102, %c0_103] : memref<2x8x1xf32, #tpu.memory_space<vmem>>, vector<1x8x1xf32>
    %388 = vector.shape_cast %387 : vector<1x8x1xf32> to vector<8x1xf32>
    %c1_104 = arith.constant 1 : index
    %c0_105 = arith.constant 0 : index
    %c0_106 = arith.constant 0 : index
    %389 = vector.load %arg3[%c1_104, %c0_105, %c0_106] : memref<2x8x1xf32, #tpu.memory_space<vmem>>, vector<1x8x1xf32>
    %390 = vector.shape_cast %389 : vector<1x8x1xf32> to vector<8x1xf32>
    %cst_107 = arith.constant dense<0.000000e+00> : vector<256xf32>
    %391 = vector.multi_reduction <add>, %386, %cst_107 [0] : vector<8x256xf32> to vector<256xf32>
    %392 = vector.shape_cast %391 : vector<256xf32> to vector<1x256xf32>
    %cst_108 = arith.constant 8.000000e+00 : f32
    %393 = vector.broadcast %cst_108 : f32 to vector<1x256xf32>
    %394 = arith.divf %392, %393 : vector<1x256xf32>
    %395 = vector.broadcast %394 : vector<1x256xf32> to vector<8x256xf32>
    %396 = arith.subf %386, %395 : vector<8x256xf32>
    %397 = arith.mulf %396, %396 : vector<8x256xf32>
    %cst_109 = arith.constant dense<0.000000e+00> : vector<256xf32>
    %398 = vector.multi_reduction <add>, %397, %cst_109 [0] : vector<8x256xf32> to vector<256xf32>
    %399 = vector.shape_cast %398 : vector<256xf32> to vector<1x256xf32>
    %cst_110 = arith.constant 8.000000e+00 : f32
    %400 = vector.broadcast %cst_110 : f32 to vector<1x256xf32>
    %401 = arith.divf %399, %400 : vector<1x256xf32>
    %402 = vector.broadcast %394 : vector<1x256xf32> to vector<8x256xf32>
    %403 = arith.subf %386, %402 : vector<8x256xf32>
    %cst_111 = arith.constant 9.99999974E-6 : f32
    %404 = vector.broadcast %cst_111 : f32 to vector<1x256xf32>
    %405 = arith.addf %401, %404 : vector<1x256xf32>
    %406 = math.rsqrt %405 : vector<1x256xf32>
    %407 = vector.broadcast %406 : vector<1x256xf32> to vector<8x256xf32>
    %408 = arith.mulf %403, %407 : vector<8x256xf32>
    %409 = vector.broadcast %388 : vector<8x1xf32> to vector<8x256xf32>
    %410 = arith.mulf %408, %409 : vector<8x256xf32>
    %411 = vector.broadcast %390 : vector<8x1xf32> to vector<8x256xf32>
    %412 = arith.addf %410, %411 : vector<8x256xf32>
    %c1_112 = arith.constant 1 : index
    %c0_113 = arith.constant 0 : index
    %c0_114 = arith.constant 0 : index
    %413 = vector.load %arg4[%c1_112, %c0_113, %c0_114] : memref<2x24x8xf32, #tpu.memory_space<vmem>>, vector<1x24x8xf32>
    %414 = vector.shape_cast %413 : vector<1x24x8xf32> to vector<24x8xf32>
    %cst_115 = arith.constant dense<0.000000e+00> : vector<24x256xf32>
    %415 = tpu.matmul %414, %412, %cst_115 {dimension_numbers = #tpu.dot_dimension_numbers<[1], [0], [0], [1], [0, 0, 1, 1], [], []>} : vector<24x8xf32>, vector<8x256xf32>, vector<24x256xf32> -> vector<24x256xf32>
    %c1_116 = arith.constant 1 : index
    %c0_117 = arith.constant 0 : index
    %c0_118 = arith.constant 0 : index
    %416 = vector.load %arg5[%c1_116, %c0_117, %c0_118] : memref<2x24x9xf32, #tpu.memory_space<vmem>>, vector<1x24x9xf32>
    %417 = vector.shape_cast %416 : vector<1x24x9xf32> to vector<24x9xf32>
    %cst_119 = arith.constant 0.000000e+00 : f32
    %418 = vector.broadcast %cst_119 : f32 to vector<24x256xf32>
    %cst_120 = arith.constant 0.000000e+00 : f32
    %419 = vector.broadcast %cst_120 : f32 to vector<24x17xf32>
    %420 = vector.extract_strided_slice %415 {offsets = [0, 0], sizes = [24, 239], strides = [1, 1]} : vector<24x256xf32> to vector<24x239xf32>
    %421 = tpu.concatenate %419, %420 in 1 : vector<24x17xf32>, vector<24x239xf32> -> vector<24x256xf32>
    %422 = vector.broadcast %20 : vector<1x256xf32> to vector<24x256xf32>
    %423 = arith.mulf %421, %422 : vector<24x256xf32>
    %424 = vector.extract_strided_slice %417 {offsets = [0, 0], sizes = [24, 1], strides = [1, 1]} : vector<24x9xf32> to vector<24x1xf32>
    %425 = vector.broadcast %424 : vector<24x1xf32> to vector<24x256xf32>
    %426 = arith.mulf %423, %425 : vector<24x256xf32>
    %427 = arith.addf %418, %426 : vector<24x256xf32>
    %cst_121 = arith.constant 0.000000e+00 : f32
    %428 = vector.broadcast %cst_121 : f32 to vector<24x16xf32>
    %429 = vector.extract_strided_slice %415 {offsets = [0, 0], sizes = [24, 240], strides = [1, 1]} : vector<24x256xf32> to vector<24x240xf32>
    %430 = tpu.concatenate %428, %429 in 1 : vector<24x16xf32>, vector<24x240xf32> -> vector<24x256xf32>
    %431 = vector.extract_strided_slice %417 {offsets = [0, 1], sizes = [24, 1], strides = [1, 1]} : vector<24x9xf32> to vector<24x1xf32>
    %432 = vector.broadcast %431 : vector<24x1xf32> to vector<24x256xf32>
    %433 = arith.mulf %430, %432 : vector<24x256xf32>
    %434 = arith.addf %427, %433 : vector<24x256xf32>
    %cst_122 = arith.constant 0.000000e+00 : f32
    %435 = vector.broadcast %cst_122 : f32 to vector<24x15xf32>
    %436 = vector.extract_strided_slice %415 {offsets = [0, 0], sizes = [24, 241], strides = [1, 1]} : vector<24x256xf32> to vector<24x241xf32>
    %437 = tpu.concatenate %435, %436 in 1 : vector<24x15xf32>, vector<24x241xf32> -> vector<24x256xf32>
    %438 = vector.broadcast %24 : vector<1x256xf32> to vector<24x256xf32>
    %439 = arith.mulf %437, %438 : vector<24x256xf32>
    %440 = vector.extract_strided_slice %417 {offsets = [0, 2], sizes = [24, 1], strides = [1, 1]} : vector<24x9xf32> to vector<24x1xf32>
    %441 = vector.broadcast %440 : vector<24x1xf32> to vector<24x256xf32>
    %442 = arith.mulf %439, %441 : vector<24x256xf32>
    %443 = arith.addf %434, %442 : vector<24x256xf32>
    %cst_123 = arith.constant 0.000000e+00 : f32
    %444 = vector.broadcast %cst_123 : f32 to vector<24x1xf32>
    %445 = vector.extract_strided_slice %415 {offsets = [0, 0], sizes = [24, 255], strides = [1, 1]} : vector<24x256xf32> to vector<24x255xf32>
    %446 = tpu.concatenate %444, %445 in 1 : vector<24x1xf32>, vector<24x255xf32> -> vector<24x256xf32>
    %447 = vector.broadcast %20 : vector<1x256xf32> to vector<24x256xf32>
    %448 = arith.mulf %446, %447 : vector<24x256xf32>
    %449 = vector.extract_strided_slice %417 {offsets = [0, 3], sizes = [24, 1], strides = [1, 1]} : vector<24x9xf32> to vector<24x1xf32>
    %450 = vector.broadcast %449 : vector<24x1xf32> to vector<24x256xf32>
    %451 = arith.mulf %448, %450 : vector<24x256xf32>
    %452 = arith.addf %443, %451 : vector<24x256xf32>
    %453 = vector.extract_strided_slice %417 {offsets = [0, 4], sizes = [24, 1], strides = [1, 1]} : vector<24x9xf32> to vector<24x1xf32>
    %454 = vector.broadcast %453 : vector<24x1xf32> to vector<24x256xf32>
    %455 = arith.mulf %415, %454 : vector<24x256xf32>
    %456 = arith.addf %452, %455 : vector<24x256xf32>
    %cst_124 = arith.constant 0.000000e+00 : f32
    %457 = vector.broadcast %cst_124 : f32 to vector<24x1xf32>
    %458 = vector.extract_strided_slice %415 {offsets = [0, 1], sizes = [24, 255], strides = [1, 1]} : vector<24x256xf32> to vector<24x255xf32>
    %459 = tpu.concatenate %458, %457 in 1 : vector<24x255xf32>, vector<24x1xf32> -> vector<24x256xf32>
    %460 = vector.broadcast %24 : vector<1x256xf32> to vector<24x256xf32>
    %461 = arith.mulf %459, %460 : vector<24x256xf32>
    %462 = vector.extract_strided_slice %417 {offsets = [0, 5], sizes = [24, 1], strides = [1, 1]} : vector<24x9xf32> to vector<24x1xf32>
    %463 = vector.broadcast %462 : vector<24x1xf32> to vector<24x256xf32>
    %464 = arith.mulf %461, %463 : vector<24x256xf32>
    %465 = arith.addf %456, %464 : vector<24x256xf32>
    %cst_125 = arith.constant 0.000000e+00 : f32
    %466 = vector.broadcast %cst_125 : f32 to vector<24x15xf32>
    %467 = vector.extract_strided_slice %415 {offsets = [0, 15], sizes = [24, 241], strides = [1, 1]} : vector<24x256xf32> to vector<24x241xf32>
    %468 = tpu.concatenate %467, %466 in 1 : vector<24x241xf32>, vector<24x15xf32> -> vector<24x256xf32>
    %469 = vector.broadcast %20 : vector<1x256xf32> to vector<24x256xf32>
    %470 = arith.mulf %468, %469 : vector<24x256xf32>
    %471 = vector.extract_strided_slice %417 {offsets = [0, 6], sizes = [24, 1], strides = [1, 1]} : vector<24x9xf32> to vector<24x1xf32>
    %472 = vector.broadcast %471 : vector<24x1xf32> to vector<24x256xf32>
    %473 = arith.mulf %470, %472 : vector<24x256xf32>
    %474 = arith.addf %465, %473 : vector<24x256xf32>
    %cst_126 = arith.constant 0.000000e+00 : f32
    %475 = vector.broadcast %cst_126 : f32 to vector<24x16xf32>
    %476 = vector.extract_strided_slice %415 {offsets = [0, 16], sizes = [24, 240], strides = [1, 1]} : vector<24x256xf32> to vector<24x240xf32>
    %477 = tpu.concatenate %476, %475 in 1 : vector<24x240xf32>, vector<24x16xf32> -> vector<24x256xf32>
    %478 = vector.extract_strided_slice %417 {offsets = [0, 7], sizes = [24, 1], strides = [1, 1]} : vector<24x9xf32> to vector<24x1xf32>
    %479 = vector.broadcast %478 : vector<24x1xf32> to vector<24x256xf32>
    %480 = arith.mulf %477, %479 : vector<24x256xf32>
    %481 = arith.addf %474, %480 : vector<24x256xf32>
    %cst_127 = arith.constant 0.000000e+00 : f32
    %482 = vector.broadcast %cst_127 : f32 to vector<24x17xf32>
    %483 = vector.extract_strided_slice %415 {offsets = [0, 17], sizes = [24, 239], strides = [1, 1]} : vector<24x256xf32> to vector<24x239xf32>
    %484 = tpu.concatenate %483, %482 in 1 : vector<24x239xf32>, vector<24x17xf32> -> vector<24x256xf32>
    %485 = vector.broadcast %24 : vector<1x256xf32> to vector<24x256xf32>
    %486 = arith.mulf %484, %485 : vector<24x256xf32>
    %487 = vector.extract_strided_slice %417 {offsets = [0, 8], sizes = [24, 1], strides = [1, 1]} : vector<24x9xf32> to vector<24x1xf32>
    %488 = vector.broadcast %487 : vector<24x1xf32> to vector<24x256xf32>
    %489 = arith.mulf %486, %488 : vector<24x256xf32>
    %490 = arith.addf %481, %489 : vector<24x256xf32>
    %491 = vector.extract_strided_slice %490 {offsets = [0, 0], sizes = [8, 256], strides = [1, 1]} : vector<24x256xf32> to vector<8x256xf32>
    %492 = vector.extract_strided_slice %490 {offsets = [8, 0], sizes = [8, 256], strides = [1, 1]} : vector<24x256xf32> to vector<8x256xf32>
    %493 = vector.extract_strided_slice %490 {offsets = [16, 0], sizes = [8, 256], strides = [1, 1]} : vector<24x256xf32> to vector<8x256xf32>
    %494 = arith.mulf %491, %491 : vector<8x256xf32>
    %cst_128 = arith.constant dense<0.000000e+00> : vector<8xf32>
    %495 = vector.multi_reduction <add>, %494, %cst_128 [1] : vector<8x256xf32> to vector<8xf32>
    %496 = vector.shape_cast %495 : vector<8xf32> to vector<8x1xf32>
    %497 = math.sqrt %496 : vector<8x1xf32>
    %cst_129 = arith.constant 9.99999996E-13 : f32
    %498 = vector.broadcast %cst_129 : f32 to vector<8x1xf32>
    %499 = arith.maximumf %497, %498 : vector<8x1xf32>
    %500 = vector.broadcast %499 : vector<8x1xf32> to vector<8x256xf32>
    %501 = arith.divf %491, %500 : vector<8x256xf32>
    %c1_130 = arith.constant 1 : index
    %c0_131 = arith.constant 0 : index
    %c0_132 = arith.constant 0 : index
    %502 = vector.load %arg6[%c1_130, %c0_131, %c0_132] : memref<2x8x1xf32, #tpu.memory_space<vmem>>, vector<1x8x1xf32>
    %503 = vector.shape_cast %502 : vector<1x8x1xf32> to vector<8x1xf32>
    %504 = vector.broadcast %503 : vector<8x1xf32> to vector<8x256xf32>
    %505 = arith.mulf %501, %504 : vector<8x256xf32>
    %506 = arith.mulf %492, %492 : vector<8x256xf32>
    %cst_133 = arith.constant dense<0.000000e+00> : vector<8xf32>
    %507 = vector.multi_reduction <add>, %506, %cst_133 [1] : vector<8x256xf32> to vector<8xf32>
    %508 = vector.shape_cast %507 : vector<8xf32> to vector<8x1xf32>
    %509 = math.sqrt %508 : vector<8x1xf32>
    %cst_134 = arith.constant 9.99999996E-13 : f32
    %510 = vector.broadcast %cst_134 : f32 to vector<8x1xf32>
    %511 = arith.maximumf %509, %510 : vector<8x1xf32>
    %512 = vector.broadcast %511 : vector<8x1xf32> to vector<8x256xf32>
    %513 = arith.divf %492, %512 : vector<8x256xf32>
    %514 = vector.extract_strided_slice %505 {offsets = [0, 0], sizes = [4, 256], strides = [1, 1]} : vector<8x256xf32> to vector<4x256xf32>
    %515 = vector.extract_strided_slice %513 {offsets = [0, 0], sizes = [4, 256], strides = [1, 1]} : vector<8x256xf32> to vector<4x256xf32>
    %516 = vector.extract_strided_slice %493 {offsets = [0, 0], sizes = [4, 256], strides = [1, 1]} : vector<8x256xf32> to vector<4x256xf32>
    %cst_135 = arith.constant dense<0.000000e+00> : vector<4x4xf32>
    %517 = tpu.matmul %514, %515, %cst_135 {dimension_numbers = #tpu.dot_dimension_numbers<[1], [1], [0], [0], [0, 0, 1, 0], [], []>} : vector<4x256xf32>, vector<4x256xf32>, vector<4x4xf32> -> vector<4x4xf32>
    %cst_136 = arith.constant dense<0xFF800000> : vector<4xf32>
    %518 = vector.multi_reduction <maximumf>, %517, %cst_136 [1] : vector<4x4xf32> to vector<4xf32>
    %519 = vector.shape_cast %518 : vector<4xf32> to vector<4x1xf32>
    %520 = vector.broadcast %519 : vector<4x1xf32> to vector<4x4xf32>
    %521 = arith.subf %517, %520 : vector<4x4xf32>
    %522 = math.exp %521 : vector<4x4xf32>
    %cst_137 = arith.constant dense<0.000000e+00> : vector<4xf32>
    %523 = vector.multi_reduction <add>, %522, %cst_137 [1] : vector<4x4xf32> to vector<4xf32>
    %524 = vector.shape_cast %523 : vector<4xf32> to vector<4x1xf32>
    %525 = vector.broadcast %524 : vector<4x1xf32> to vector<4x4xf32>
    %526 = arith.divf %522, %525 : vector<4x4xf32>
    %cst_138 = arith.constant dense<0.000000e+00> : vector<4x256xf32>
    %527 = tpu.matmul %526, %516, %cst_138 {dimension_numbers = #tpu.dot_dimension_numbers<[1], [0], [0], [1], [0, 0, 1, 1], [], []>} : vector<4x4xf32>, vector<4x256xf32>, vector<4x256xf32> -> vector<4x256xf32>
    %528 = vector.extract_strided_slice %505 {offsets = [4, 0], sizes = [4, 256], strides = [1, 1]} : vector<8x256xf32> to vector<4x256xf32>
    %529 = vector.extract_strided_slice %513 {offsets = [4, 0], sizes = [4, 256], strides = [1, 1]} : vector<8x256xf32> to vector<4x256xf32>
    %530 = vector.extract_strided_slice %493 {offsets = [4, 0], sizes = [4, 256], strides = [1, 1]} : vector<8x256xf32> to vector<4x256xf32>
    %cst_139 = arith.constant dense<0.000000e+00> : vector<4x4xf32>
    %531 = tpu.matmul %528, %529, %cst_139 {dimension_numbers = #tpu.dot_dimension_numbers<[1], [1], [0], [0], [0, 0, 1, 0], [], []>} : vector<4x256xf32>, vector<4x256xf32>, vector<4x4xf32> -> vector<4x4xf32>
    %cst_140 = arith.constant dense<0xFF800000> : vector<4xf32>
    %532 = vector.multi_reduction <maximumf>, %531, %cst_140 [1] : vector<4x4xf32> to vector<4xf32>
    %533 = vector.shape_cast %532 : vector<4xf32> to vector<4x1xf32>
    %534 = vector.broadcast %533 : vector<4x1xf32> to vector<4x4xf32>
    %535 = arith.subf %531, %534 : vector<4x4xf32>
    %536 = math.exp %535 : vector<4x4xf32>
    %cst_141 = arith.constant dense<0.000000e+00> : vector<4xf32>
    %537 = vector.multi_reduction <add>, %536, %cst_141 [1] : vector<4x4xf32> to vector<4xf32>
    %538 = vector.shape_cast %537 : vector<4xf32> to vector<4x1xf32>
    %539 = vector.broadcast %538 : vector<4x1xf32> to vector<4x4xf32>
    %540 = arith.divf %536, %539 : vector<4x4xf32>
    %cst_142 = arith.constant dense<0.000000e+00> : vector<4x256xf32>
    %541 = tpu.matmul %540, %530, %cst_142 {dimension_numbers = #tpu.dot_dimension_numbers<[1], [0], [0], [1], [0, 0, 1, 1], [], []>} : vector<4x4xf32>, vector<4x256xf32>, vector<4x256xf32> -> vector<4x256xf32>
    %542 = tpu.concatenate %527, %541 in 0 : vector<4x256xf32>, vector<4x256xf32> -> vector<8x256xf32>
    %c1_143 = arith.constant 1 : index
    %c0_144 = arith.constant 0 : index
    %c0_145 = arith.constant 0 : index
    %543 = vector.load %arg7[%c1_143, %c0_144, %c0_145] : memref<2x8x8xf32, #tpu.memory_space<vmem>>, vector<1x8x8xf32>
    %544 = vector.shape_cast %543 : vector<1x8x8xf32> to vector<8x8xf32>
    %cst_146 = arith.constant dense<0.000000e+00> : vector<8x256xf32>
    %545 = tpu.matmul %544, %542, %cst_146 {dimension_numbers = #tpu.dot_dimension_numbers<[1], [0], [0], [1], [0, 0, 1, 1], [], []>} : vector<8x8xf32>, vector<8x256xf32>, vector<8x256xf32> -> vector<8x256xf32>
    %546 = arith.addf %386, %545 : vector<8x256xf32>
    %c1_147 = arith.constant 1 : index
    %c0_148 = arith.constant 0 : index
    %c0_149 = arith.constant 0 : index
    %547 = vector.load %arg8[%c1_147, %c0_148, %c0_149] : memref<2x8x1xf32, #tpu.memory_space<vmem>>, vector<1x8x1xf32>
    %548 = vector.shape_cast %547 : vector<1x8x1xf32> to vector<8x1xf32>
    %c1_150 = arith.constant 1 : index
    %c0_151 = arith.constant 0 : index
    %c0_152 = arith.constant 0 : index
    %549 = vector.load %arg9[%c1_150, %c0_151, %c0_152] : memref<2x8x1xf32, #tpu.memory_space<vmem>>, vector<1x8x1xf32>
    %550 = vector.shape_cast %549 : vector<1x8x1xf32> to vector<8x1xf32>
    %cst_153 = arith.constant dense<0.000000e+00> : vector<256xf32>
    %551 = vector.multi_reduction <add>, %546, %cst_153 [0] : vector<8x256xf32> to vector<256xf32>
    %552 = vector.shape_cast %551 : vector<256xf32> to vector<1x256xf32>
    %cst_154 = arith.constant 8.000000e+00 : f32
    %553 = vector.broadcast %cst_154 : f32 to vector<1x256xf32>
    %554 = arith.divf %552, %553 : vector<1x256xf32>
    %555 = vector.broadcast %554 : vector<1x256xf32> to vector<8x256xf32>
    %556 = arith.subf %546, %555 : vector<8x256xf32>
    %557 = arith.mulf %556, %556 : vector<8x256xf32>
    %cst_155 = arith.constant dense<0.000000e+00> : vector<256xf32>
    %558 = vector.multi_reduction <add>, %557, %cst_155 [0] : vector<8x256xf32> to vector<256xf32>
    %559 = vector.shape_cast %558 : vector<256xf32> to vector<1x256xf32>
    %cst_156 = arith.constant 8.000000e+00 : f32
    %560 = vector.broadcast %cst_156 : f32 to vector<1x256xf32>
    %561 = arith.divf %559, %560 : vector<1x256xf32>
    %562 = vector.broadcast %554 : vector<1x256xf32> to vector<8x256xf32>
    %563 = arith.subf %546, %562 : vector<8x256xf32>
    %cst_157 = arith.constant 9.99999974E-6 : f32
    %564 = vector.broadcast %cst_157 : f32 to vector<1x256xf32>
    %565 = arith.addf %561, %564 : vector<1x256xf32>
    %566 = math.rsqrt %565 : vector<1x256xf32>
    %567 = vector.broadcast %566 : vector<1x256xf32> to vector<8x256xf32>
    %568 = arith.mulf %563, %567 : vector<8x256xf32>
    %569 = vector.broadcast %548 : vector<8x1xf32> to vector<8x256xf32>
    %570 = arith.mulf %568, %569 : vector<8x256xf32>
    %571 = vector.broadcast %550 : vector<8x1xf32> to vector<8x256xf32>
    %572 = arith.addf %570, %571 : vector<8x256xf32>
    %c1_158 = arith.constant 1 : index
    %c0_159 = arith.constant 0 : index
    %c0_160 = arith.constant 0 : index
    %573 = vector.load %arg10[%c1_158, %c0_159, %c0_160] : memref<2x21x8xf32, #tpu.memory_space<vmem>>, vector<1x21x8xf32>
    %574 = vector.shape_cast %573 : vector<1x21x8xf32> to vector<21x8xf32>
    %cst_161 = arith.constant dense<0.000000e+00> : vector<21x256xf32>
    %575 = tpu.matmul %574, %572, %cst_161 {dimension_numbers = #tpu.dot_dimension_numbers<[1], [0], [0], [1], [0, 0, 1, 1], [], []>} : vector<21x8xf32>, vector<8x256xf32>, vector<21x256xf32> -> vector<21x256xf32>
    %c1_162 = arith.constant 1 : index
    %c0_163 = arith.constant 0 : index
    %c0_164 = arith.constant 0 : index
    %576 = vector.load %arg11[%c1_162, %c0_163, %c0_164] : memref<2x21x8xf32, #tpu.memory_space<vmem>>, vector<1x21x8xf32>
    %577 = vector.shape_cast %576 : vector<1x21x8xf32> to vector<21x8xf32>
    %cst_165 = arith.constant dense<0.000000e+00> : vector<21x256xf32>
    %578 = tpu.matmul %577, %572, %cst_165 {dimension_numbers = #tpu.dot_dimension_numbers<[1], [0], [0], [1], [0, 0, 1, 1], [], []>} : vector<21x8xf32>, vector<8x256xf32>, vector<21x256xf32> -> vector<21x256xf32>
    %c1_166 = arith.constant 1 : index
    %c0_167 = arith.constant 0 : index
    %c0_168 = arith.constant 0 : index
    %579 = vector.load %arg12[%c1_166, %c0_167, %c0_168] : memref<2x21x9xf32, #tpu.memory_space<vmem>>, vector<1x21x9xf32>
    %580 = vector.shape_cast %579 : vector<1x21x9xf32> to vector<21x9xf32>
    %cst_169 = arith.constant 0.000000e+00 : f32
    %581 = vector.broadcast %cst_169 : f32 to vector<21x256xf32>
    %cst_170 = arith.constant 0.000000e+00 : f32
    %582 = vector.broadcast %cst_170 : f32 to vector<21x17xf32>
    %583 = vector.extract_strided_slice %575 {offsets = [0, 0], sizes = [21, 239], strides = [1, 1]} : vector<21x256xf32> to vector<21x239xf32>
    %584 = tpu.concatenate %582, %583 in 1 : vector<21x17xf32>, vector<21x239xf32> -> vector<21x256xf32>
    %585 = vector.broadcast %20 : vector<1x256xf32> to vector<21x256xf32>
    %586 = arith.mulf %584, %585 : vector<21x256xf32>
    %587 = vector.extract_strided_slice %580 {offsets = [0, 0], sizes = [21, 1], strides = [1, 1]} : vector<21x9xf32> to vector<21x1xf32>
    %588 = vector.broadcast %587 : vector<21x1xf32> to vector<21x256xf32>
    %589 = arith.mulf %586, %588 : vector<21x256xf32>
    %590 = arith.addf %581, %589 : vector<21x256xf32>
    %cst_171 = arith.constant 0.000000e+00 : f32
    %591 = vector.broadcast %cst_171 : f32 to vector<21x16xf32>
    %592 = vector.extract_strided_slice %575 {offsets = [0, 0], sizes = [21, 240], strides = [1, 1]} : vector<21x256xf32> to vector<21x240xf32>
    %593 = tpu.concatenate %591, %592 in 1 : vector<21x16xf32>, vector<21x240xf32> -> vector<21x256xf32>
    %594 = vector.extract_strided_slice %580 {offsets = [0, 1], sizes = [21, 1], strides = [1, 1]} : vector<21x9xf32> to vector<21x1xf32>
    %595 = vector.broadcast %594 : vector<21x1xf32> to vector<21x256xf32>
    %596 = arith.mulf %593, %595 : vector<21x256xf32>
    %597 = arith.addf %590, %596 : vector<21x256xf32>
    %cst_172 = arith.constant 0.000000e+00 : f32
    %598 = vector.broadcast %cst_172 : f32 to vector<21x15xf32>
    %599 = vector.extract_strided_slice %575 {offsets = [0, 0], sizes = [21, 241], strides = [1, 1]} : vector<21x256xf32> to vector<21x241xf32>
    %600 = tpu.concatenate %598, %599 in 1 : vector<21x15xf32>, vector<21x241xf32> -> vector<21x256xf32>
    %601 = vector.broadcast %24 : vector<1x256xf32> to vector<21x256xf32>
    %602 = arith.mulf %600, %601 : vector<21x256xf32>
    %603 = vector.extract_strided_slice %580 {offsets = [0, 2], sizes = [21, 1], strides = [1, 1]} : vector<21x9xf32> to vector<21x1xf32>
    %604 = vector.broadcast %603 : vector<21x1xf32> to vector<21x256xf32>
    %605 = arith.mulf %602, %604 : vector<21x256xf32>
    %606 = arith.addf %597, %605 : vector<21x256xf32>
    %cst_173 = arith.constant 0.000000e+00 : f32
    %607 = vector.broadcast %cst_173 : f32 to vector<21x1xf32>
    %608 = vector.extract_strided_slice %575 {offsets = [0, 0], sizes = [21, 255], strides = [1, 1]} : vector<21x256xf32> to vector<21x255xf32>
    %609 = tpu.concatenate %607, %608 in 1 : vector<21x1xf32>, vector<21x255xf32> -> vector<21x256xf32>
    %610 = vector.broadcast %20 : vector<1x256xf32> to vector<21x256xf32>
    %611 = arith.mulf %609, %610 : vector<21x256xf32>
    %612 = vector.extract_strided_slice %580 {offsets = [0, 3], sizes = [21, 1], strides = [1, 1]} : vector<21x9xf32> to vector<21x1xf32>
    %613 = vector.broadcast %612 : vector<21x1xf32> to vector<21x256xf32>
    %614 = arith.mulf %611, %613 : vector<21x256xf32>
    %615 = arith.addf %606, %614 : vector<21x256xf32>
    %616 = vector.extract_strided_slice %580 {offsets = [0, 4], sizes = [21, 1], strides = [1, 1]} : vector<21x9xf32> to vector<21x1xf32>
    %617 = vector.broadcast %616 : vector<21x1xf32> to vector<21x256xf32>
    %618 = arith.mulf %575, %617 : vector<21x256xf32>
    %619 = arith.addf %615, %618 : vector<21x256xf32>
    %cst_174 = arith.constant 0.000000e+00 : f32
    %620 = vector.broadcast %cst_174 : f32 to vector<21x1xf32>
    %621 = vector.extract_strided_slice %575 {offsets = [0, 1], sizes = [21, 255], strides = [1, 1]} : vector<21x256xf32> to vector<21x255xf32>
    %622 = tpu.concatenate %621, %620 in 1 : vector<21x255xf32>, vector<21x1xf32> -> vector<21x256xf32>
    %623 = vector.broadcast %24 : vector<1x256xf32> to vector<21x256xf32>
    %624 = arith.mulf %622, %623 : vector<21x256xf32>
    %625 = vector.extract_strided_slice %580 {offsets = [0, 5], sizes = [21, 1], strides = [1, 1]} : vector<21x9xf32> to vector<21x1xf32>
    %626 = vector.broadcast %625 : vector<21x1xf32> to vector<21x256xf32>
    %627 = arith.mulf %624, %626 : vector<21x256xf32>
    %628 = arith.addf %619, %627 : vector<21x256xf32>
    %cst_175 = arith.constant 0.000000e+00 : f32
    %629 = vector.broadcast %cst_175 : f32 to vector<21x15xf32>
    %630 = vector.extract_strided_slice %575 {offsets = [0, 15], sizes = [21, 241], strides = [1, 1]} : vector<21x256xf32> to vector<21x241xf32>
    %631 = tpu.concatenate %630, %629 in 1 : vector<21x241xf32>, vector<21x15xf32> -> vector<21x256xf32>
    %632 = vector.broadcast %20 : vector<1x256xf32> to vector<21x256xf32>
    %633 = arith.mulf %631, %632 : vector<21x256xf32>
    %634 = vector.extract_strided_slice %580 {offsets = [0, 6], sizes = [21, 1], strides = [1, 1]} : vector<21x9xf32> to vector<21x1xf32>
    %635 = vector.broadcast %634 : vector<21x1xf32> to vector<21x256xf32>
    %636 = arith.mulf %633, %635 : vector<21x256xf32>
    %637 = arith.addf %628, %636 : vector<21x256xf32>
    %cst_176 = arith.constant 0.000000e+00 : f32
    %638 = vector.broadcast %cst_176 : f32 to vector<21x16xf32>
    %639 = vector.extract_strided_slice %575 {offsets = [0, 16], sizes = [21, 240], strides = [1, 1]} : vector<21x256xf32> to vector<21x240xf32>
    %640 = tpu.concatenate %639, %638 in 1 : vector<21x240xf32>, vector<21x16xf32> -> vector<21x256xf32>
    %641 = vector.extract_strided_slice %580 {offsets = [0, 7], sizes = [21, 1], strides = [1, 1]} : vector<21x9xf32> to vector<21x1xf32>
    %642 = vector.broadcast %641 : vector<21x1xf32> to vector<21x256xf32>
    %643 = arith.mulf %640, %642 : vector<21x256xf32>
    %644 = arith.addf %637, %643 : vector<21x256xf32>
    %cst_177 = arith.constant 0.000000e+00 : f32
    %645 = vector.broadcast %cst_177 : f32 to vector<21x17xf32>
    %646 = vector.extract_strided_slice %575 {offsets = [0, 17], sizes = [21, 239], strides = [1, 1]} : vector<21x256xf32> to vector<21x239xf32>
    %647 = tpu.concatenate %646, %645 in 1 : vector<21x239xf32>, vector<21x17xf32> -> vector<21x256xf32>
    %648 = vector.broadcast %24 : vector<1x256xf32> to vector<21x256xf32>
    %649 = arith.mulf %647, %648 : vector<21x256xf32>
    %650 = vector.extract_strided_slice %580 {offsets = [0, 8], sizes = [21, 1], strides = [1, 1]} : vector<21x9xf32> to vector<21x1xf32>
    %651 = vector.broadcast %650 : vector<21x1xf32> to vector<21x256xf32>
    %652 = arith.mulf %649, %651 : vector<21x256xf32>
    %653 = arith.addf %644, %652 : vector<21x256xf32>
    %c1_178 = arith.constant 1 : index
    %c0_179 = arith.constant 0 : index
    %c0_180 = arith.constant 0 : index
    %654 = vector.load %arg13[%c1_178, %c0_179, %c0_180] : memref<2x21x9xf32, #tpu.memory_space<vmem>>, vector<1x21x9xf32>
    %655 = vector.shape_cast %654 : vector<1x21x9xf32> to vector<21x9xf32>
    %cst_181 = arith.constant 0.000000e+00 : f32
    %656 = vector.broadcast %cst_181 : f32 to vector<21x256xf32>
    %cst_182 = arith.constant 0.000000e+00 : f32
    %657 = vector.broadcast %cst_182 : f32 to vector<21x17xf32>
    %658 = vector.extract_strided_slice %578 {offsets = [0, 0], sizes = [21, 239], strides = [1, 1]} : vector<21x256xf32> to vector<21x239xf32>
    %659 = tpu.concatenate %657, %658 in 1 : vector<21x17xf32>, vector<21x239xf32> -> vector<21x256xf32>
    %660 = vector.broadcast %20 : vector<1x256xf32> to vector<21x256xf32>
    %661 = arith.mulf %659, %660 : vector<21x256xf32>
    %662 = vector.extract_strided_slice %655 {offsets = [0, 0], sizes = [21, 1], strides = [1, 1]} : vector<21x9xf32> to vector<21x1xf32>
    %663 = vector.broadcast %662 : vector<21x1xf32> to vector<21x256xf32>
    %664 = arith.mulf %661, %663 : vector<21x256xf32>
    %665 = arith.addf %656, %664 : vector<21x256xf32>
    %cst_183 = arith.constant 0.000000e+00 : f32
    %666 = vector.broadcast %cst_183 : f32 to vector<21x16xf32>
    %667 = vector.extract_strided_slice %578 {offsets = [0, 0], sizes = [21, 240], strides = [1, 1]} : vector<21x256xf32> to vector<21x240xf32>
    %668 = tpu.concatenate %666, %667 in 1 : vector<21x16xf32>, vector<21x240xf32> -> vector<21x256xf32>
    %669 = vector.extract_strided_slice %655 {offsets = [0, 1], sizes = [21, 1], strides = [1, 1]} : vector<21x9xf32> to vector<21x1xf32>
    %670 = vector.broadcast %669 : vector<21x1xf32> to vector<21x256xf32>
    %671 = arith.mulf %668, %670 : vector<21x256xf32>
    %672 = arith.addf %665, %671 : vector<21x256xf32>
    %cst_184 = arith.constant 0.000000e+00 : f32
    %673 = vector.broadcast %cst_184 : f32 to vector<21x15xf32>
    %674 = vector.extract_strided_slice %578 {offsets = [0, 0], sizes = [21, 241], strides = [1, 1]} : vector<21x256xf32> to vector<21x241xf32>
    %675 = tpu.concatenate %673, %674 in 1 : vector<21x15xf32>, vector<21x241xf32> -> vector<21x256xf32>
    %676 = vector.broadcast %24 : vector<1x256xf32> to vector<21x256xf32>
    %677 = arith.mulf %675, %676 : vector<21x256xf32>
    %678 = vector.extract_strided_slice %655 {offsets = [0, 2], sizes = [21, 1], strides = [1, 1]} : vector<21x9xf32> to vector<21x1xf32>
    %679 = vector.broadcast %678 : vector<21x1xf32> to vector<21x256xf32>
    %680 = arith.mulf %677, %679 : vector<21x256xf32>
    %681 = arith.addf %672, %680 : vector<21x256xf32>
    %cst_185 = arith.constant 0.000000e+00 : f32
    %682 = vector.broadcast %cst_185 : f32 to vector<21x1xf32>
    %683 = vector.extract_strided_slice %578 {offsets = [0, 0], sizes = [21, 255], strides = [1, 1]} : vector<21x256xf32> to vector<21x255xf32>
    %684 = tpu.concatenate %682, %683 in 1 : vector<21x1xf32>, vector<21x255xf32> -> vector<21x256xf32>
    %685 = vector.broadcast %20 : vector<1x256xf32> to vector<21x256xf32>
    %686 = arith.mulf %684, %685 : vector<21x256xf32>
    %687 = vector.extract_strided_slice %655 {offsets = [0, 3], sizes = [21, 1], strides = [1, 1]} : vector<21x9xf32> to vector<21x1xf32>
    %688 = vector.broadcast %687 : vector<21x1xf32> to vector<21x256xf32>
    %689 = arith.mulf %686, %688 : vector<21x256xf32>
    %690 = arith.addf %681, %689 : vector<21x256xf32>
    %691 = vector.extract_strided_slice %655 {offsets = [0, 4], sizes = [21, 1], strides = [1, 1]} : vector<21x9xf32> to vector<21x1xf32>
    %692 = vector.broadcast %691 : vector<21x1xf32> to vector<21x256xf32>
    %693 = arith.mulf %578, %692 : vector<21x256xf32>
    %694 = arith.addf %690, %693 : vector<21x256xf32>
    %cst_186 = arith.constant 0.000000e+00 : f32
    %695 = vector.broadcast %cst_186 : f32 to vector<21x1xf32>
    %696 = vector.extract_strided_slice %578 {offsets = [0, 1], sizes = [21, 255], strides = [1, 1]} : vector<21x256xf32> to vector<21x255xf32>
    %697 = tpu.concatenate %696, %695 in 1 : vector<21x255xf32>, vector<21x1xf32> -> vector<21x256xf32>
    %698 = vector.broadcast %24 : vector<1x256xf32> to vector<21x256xf32>
    %699 = arith.mulf %697, %698 : vector<21x256xf32>
    %700 = vector.extract_strided_slice %655 {offsets = [0, 5], sizes = [21, 1], strides = [1, 1]} : vector<21x9xf32> to vector<21x1xf32>
    %701 = vector.broadcast %700 : vector<21x1xf32> to vector<21x256xf32>
    %702 = arith.mulf %699, %701 : vector<21x256xf32>
    %703 = arith.addf %694, %702 : vector<21x256xf32>
    %cst_187 = arith.constant 0.000000e+00 : f32
    %704 = vector.broadcast %cst_187 : f32 to vector<21x15xf32>
    %705 = vector.extract_strided_slice %578 {offsets = [0, 15], sizes = [21, 241], strides = [1, 1]} : vector<21x256xf32> to vector<21x241xf32>
    %706 = tpu.concatenate %705, %704 in 1 : vector<21x241xf32>, vector<21x15xf32> -> vector<21x256xf32>
    %707 = vector.broadcast %20 : vector<1x256xf32> to vector<21x256xf32>
    %708 = arith.mulf %706, %707 : vector<21x256xf32>
    %709 = vector.extract_strided_slice %655 {offsets = [0, 6], sizes = [21, 1], strides = [1, 1]} : vector<21x9xf32> to vector<21x1xf32>
    %710 = vector.broadcast %709 : vector<21x1xf32> to vector<21x256xf32>
    %711 = arith.mulf %708, %710 : vector<21x256xf32>
    %712 = arith.addf %703, %711 : vector<21x256xf32>
    %cst_188 = arith.constant 0.000000e+00 : f32
    %713 = vector.broadcast %cst_188 : f32 to vector<21x16xf32>
    %714 = vector.extract_strided_slice %578 {offsets = [0, 16], sizes = [21, 240], strides = [1, 1]} : vector<21x256xf32> to vector<21x240xf32>
    %715 = tpu.concatenate %714, %713 in 1 : vector<21x240xf32>, vector<21x16xf32> -> vector<21x256xf32>
    %716 = vector.extract_strided_slice %655 {offsets = [0, 7], sizes = [21, 1], strides = [1, 1]} : vector<21x9xf32> to vector<21x1xf32>
    %717 = vector.broadcast %716 : vector<21x1xf32> to vector<21x256xf32>
    %718 = arith.mulf %715, %717 : vector<21x256xf32>
    %719 = arith.addf %712, %718 : vector<21x256xf32>
    %cst_189 = arith.constant 0.000000e+00 : f32
    %720 = vector.broadcast %cst_189 : f32 to vector<21x17xf32>
    %721 = vector.extract_strided_slice %578 {offsets = [0, 17], sizes = [21, 239], strides = [1, 1]} : vector<21x256xf32> to vector<21x239xf32>
    %722 = tpu.concatenate %721, %720 in 1 : vector<21x239xf32>, vector<21x17xf32> -> vector<21x256xf32>
    %723 = vector.broadcast %24 : vector<1x256xf32> to vector<21x256xf32>
    %724 = arith.mulf %722, %723 : vector<21x256xf32>
    %725 = vector.extract_strided_slice %655 {offsets = [0, 8], sizes = [21, 1], strides = [1, 1]} : vector<21x9xf32> to vector<21x1xf32>
    %726 = vector.broadcast %725 : vector<21x1xf32> to vector<21x256xf32>
    %727 = arith.mulf %724, %726 : vector<21x256xf32>
    %728 = arith.addf %719, %727 : vector<21x256xf32>
    %729 = arith.mulf %653, %653 : vector<21x256xf32>
    %730 = arith.mulf %653, %729 : vector<21x256xf32>
    %cst_190 = arith.constant 4.471500e-02 : f32
    %731 = vector.broadcast %cst_190 : f32 to vector<21x256xf32>
    %732 = arith.mulf %731, %730 : vector<21x256xf32>
    %733 = arith.addf %653, %732 : vector<21x256xf32>
    %cst_191 = arith.constant 0.797884583 : f32
    %734 = vector.broadcast %cst_191 : f32 to vector<21x256xf32>
    %735 = arith.mulf %734, %733 : vector<21x256xf32>
    %736 = math.tanh %735 : vector<21x256xf32>
    %cst_192 = arith.constant 1.000000e+00 : f32
    %737 = vector.broadcast %cst_192 : f32 to vector<21x256xf32>
    %738 = arith.addf %737, %736 : vector<21x256xf32>
    %cst_193 = arith.constant 5.000000e-01 : f32
    %739 = vector.broadcast %cst_193 : f32 to vector<21x256xf32>
    %740 = arith.mulf %739, %738 : vector<21x256xf32>
    %741 = arith.mulf %653, %740 : vector<21x256xf32>
    %742 = arith.mulf %741, %728 : vector<21x256xf32>
    %c1_194 = arith.constant 1 : index
    %c0_195 = arith.constant 0 : index
    %c0_196 = arith.constant 0 : index
    %743 = vector.load %arg14[%c1_194, %c0_195, %c0_196] : memref<2x8x21xf32, #tpu.memory_space<vmem>>, vector<1x8x21xf32>
    %744 = vector.shape_cast %743 : vector<1x8x21xf32> to vector<8x21xf32>
    %cst_197 = arith.constant dense<0.000000e+00> : vector<8x256xf32>
    %745 = tpu.matmul %744, %742, %cst_197 {dimension_numbers = #tpu.dot_dimension_numbers<[1], [0], [0], [1], [0, 0, 1, 1], [], []>} : vector<8x21xf32>, vector<21x256xf32>, vector<8x256xf32> -> vector<8x256xf32>
    %746 = arith.addf %546, %745 : vector<8x256xf32>
    %c0_198 = arith.constant 0 : index
    %c0_199 = arith.constant 0 : index
    %c0_200 = arith.constant 0 : index
    %747 = vector.load %arg15[%c0_198, %c0_199, %c0_200] : memref<1x8x256xf32, #tpu.memory_space<vmem>>, vector<1x8x256xf32>
    %748 = vector.shape_cast %747 : vector<1x8x256xf32> to vector<8x256xf32>
    %749 = vector.shape_cast %746 : vector<8x256xf32> to vector<1x8x256xf32>
    tpu.vector_store %arg15[%c0_198, %c0_199, %c0_200], %749 {strides = array<i32>} : memref<1x8x256xf32, #tpu.memory_space<vmem>>, vector<1x8x256xf32>,
    return
  }
  func.func @transform_0(%arg0: i32) -> (i32, i32, i32) {
    %c0_i32 = arith.constant 0 : i32
    %c0_i32_0 = arith.constant 0 : i32
    %c0_i32_1 = arith.constant 0 : i32
    return %arg0, %c0_i32, %c0_i32_0 : i32, i32, i32
  }
  func.func @transform_1(%arg0: i32) -> (i32, i32, i32) {
    %c0_i32 = arith.constant 0 : i32
    %c0_i32_0 = arith.constant 0 : i32
    %c0_i32_1 = arith.constant 0 : i32
    %c0_i32_2 = arith.constant 0 : i32
    return %c0_i32, %c0_i32_0, %c0_i32_1 : i32, i32, i32
  }
  func.func @transform_2(%arg0: i32) -> (i32, i32, i32) {
    %c0_i32 = arith.constant 0 : i32
    %c0_i32_0 = arith.constant 0 : i32
    %c0_i32_1 = arith.constant 0 : i32
    %c0_i32_2 = arith.constant 0 : i32
    return %c0_i32, %c0_i32_0, %c0_i32_1 : i32, i32, i32
  }
  func.func @transform_3(%arg0: i32) -> (i32, i32, i32) {
    %c0_i32 = arith.constant 0 : i32
    %c0_i32_0 = arith.constant 0 : i32
    %c0_i32_1 = arith.constant 0 : i32
    %c0_i32_2 = arith.constant 0 : i32
    return %c0_i32, %c0_i32_0, %c0_i32_1 : i32, i32, i32
  }
  func.func @transform_4(%arg0: i32) -> (i32, i32, i32) {
    %c0_i32 = arith.constant 0 : i32
    %c0_i32_0 = arith.constant 0 : i32
    %c0_i32_1 = arith.constant 0 : i32
    %c0_i32_2 = arith.constant 0 : i32
    return %c0_i32, %c0_i32_0, %c0_i32_1 : i32, i32, i32
  }
  func.func @transform_5(%arg0: i32) -> (i32, i32, i32) {
    %c0_i32 = arith.constant 0 : i32
    %c0_i32_0 = arith.constant 0 : i32
    %c0_i32_1 = arith.constant 0 : i32
    %c0_i32_2 = arith.constant 0 : i32
    return %c0_i32, %c0_i32_0, %c0_i32_1 : i32, i32, i32
  }
  func.func @transform_6(%arg0: i32) -> (i32, i32, i32) {
    %c0_i32 = arith.constant 0 : i32
    %c0_i32_0 = arith.constant 0 : i32
    %c0_i32_1 = arith.constant 0 : i32
    %c0_i32_2 = arith.constant 0 : i32
    return %c0_i32, %c0_i32_0, %c0_i32_1 : i32, i32, i32
  }
  func.func @transform_7(%arg0: i32) -> (i32, i32, i32) {
    %c0_i32 = arith.constant 0 : i32
    %c0_i32_0 = arith.constant 0 : i32
    %c0_i32_1 = arith.constant 0 : i32
    %c0_i32_2 = arith.constant 0 : i32
    return %c0_i32, %c0_i32_0, %c0_i32_1 : i32, i32, i32
  }
  func.func @transform_8(%arg0: i32) -> (i32, i32, i32) {
    %c0_i32 = arith.constant 0 : i32
    %c0_i32_0 = arith.constant 0 : i32
    %c0_i32_1 = arith.constant 0 : i32
    %c0_i32_2 = arith.constant 0 : i32
    return %c0_i32, %c0_i32_0, %c0_i32_1 : i32, i32, i32
  }
  func.func @transform_9(%arg0: i32) -> (i32, i32, i32) {
    %c0_i32 = arith.constant 0 : i32
    %c0_i32_0 = arith.constant 0 : i32
    %c0_i32_1 = arith.constant 0 : i32
    %c0_i32_2 = arith.constant 0 : i32
    return %c0_i32, %c0_i32_0, %c0_i32_1 : i32, i32, i32
  }
  func.func @transform_10(%arg0: i32) -> (i32, i32, i32) {
    %c0_i32 = arith.constant 0 : i32
    %c0_i32_0 = arith.constant 0 : i32
    %c0_i32_1 = arith.constant 0 : i32
    %c0_i32_2 = arith.constant 0 : i32
    return %c0_i32, %c0_i32_0, %c0_i32_1 : i32, i32, i32
  }
  func.func @transform_11(%arg0: i32) -> (i32, i32, i32) {
    %c0_i32 = arith.constant 0 : i32
    %c0_i32_0 = arith.constant 0 : i32
    %c0_i32_1 = arith.constant 0 : i32
    %c0_i32_2 = arith.constant 0 : i32
    return %c0_i32, %c0_i32_0, %c0_i32_1 : i32, i32, i32
  }
  func.func @transform_12(%arg0: i32) -> (i32, i32, i32) {
    %c0_i32 = arith.constant 0 : i32
    %c0_i32_0 = arith.constant 0 : i32
    %c0_i32_1 = arith.constant 0 : i32
    %c0_i32_2 = arith.constant 0 : i32
    return %c0_i32, %c0_i32_0, %c0_i32_1 : i32, i32, i32
  }
  func.func @transform_13(%arg0: i32) -> (i32, i32, i32) {
    %c0_i32 = arith.constant 0 : i32
    %c0_i32_0 = arith.constant 0 : i32
    %c0_i32_1 = arith.constant 0 : i32
    %c0_i32_2 = arith.constant 0 : i32
    return %c0_i32, %c0_i32_0, %c0_i32_1 : i32, i32, i32
  }
  func.func @transform_14(%arg0: i32) -> (i32, i32, i32) {
    %c0_i32 = arith.constant 0 : i32
    %c0_i32_0 = arith.constant 0 : i32
    %c0_i32_1 = arith.constant 0 : i32
    return %arg0, %c0_i32, %c0_i32_0 : i32, i32, i32
  }
}

</mosaic_0001>

<bundles_post_ra>
// kernel: tpu_custom_call.1
= control target key start
LH: loop header
LB: loop body
LE: loop exit
PB: predicated region body
PF: predicated region fallthrough
CT: control target
= control target key end

     0   :  { %s9009_s0 = inlined_call_operand.vmem [shape: f32[2,8,256], index: 0, kind: input, shape index: {}]   ;;  %s9010_s1 = inlined_call_operand.vmem [shape: f32[2,8,1], index: 1, kind: input, shape index: {}]   ;;  %s9011_s2 = inlined_call_operand.vmem [shape: f32[2,8,1], index: 2, kind: input, shape index: {}]   ;;  %s9012_s3 = inlined_call_operand.vmem [shape: f32[2,24,8], index: 3, kind: input, shape index: {}]   ;;  %s9013_s4 = inlined_call_operand.vmem [shape: f32[2,24,9], index: 4, kind: input, shape index: {}]   ;;  %s9014_s5 = inlined_call_operand.vmem [shape: f32[2,8,1], index: 5, kind: input, shape index: {}]   ;;  %s9015_s6 = inlined_call_operand.vmem [shape: f32[2,8,8], index: 6, kind: input, shape index: {}]   ;;  %s9016_s7 = inlined_call_operand.vmem [shape: f32[2,8,1], index: 7, kind: input, shape index: {}]   ;;  %s9017_s8 = inlined_call_operand.vmem [shape: f32[2,8,1], index: 8, kind: input, shape index: {}]   ;;  %s9018_s9 = inlined_call_operand.vmem [shape: f32[2,21,8], index: 9, kind: input, shape index: {}]   ;;  %s9019_s10 = inlined_call_operand.vmem [shape: f32[2,21,8], index: 10, kind: input, shape index: {}]   ;;  %s9020_s11 = inlined_call_operand.vmem [shape: f32[2,21,9], index: 11, kind: input, shape index: {}]   ;;  %s9021_s12 = inlined_call_operand.vmem [shape: f32[2,21,9], index: 12, kind: input, shape index: {}]   ;;  %s9022_s13 = inlined_call_operand.vmem [shape: f32[2,8,21], index: 13, kind: input, shape index: {}]   ;;  %s9023_s14 = inlined_call_operand.hbm [shape: f32[2,8,256], index: 14, kind: output, shape index: {}]  }
   0x1   :  { %9185 = sst [smem:[#allocation91_spill]] %s9009_s0 }
   0x2   :  { %9186 = sst [smem:[#allocation92_spill]] %s9010_s1 }
   0x3   :  { %9187 = sst [smem:[#allocation93_spill]] %s9023_s14 }
   0x4   :  { %19 = vsyncpa [#allocation3], 0 }
   0x5   :  { %21 = vsyncpa [#allocation3 + $0x1], 0  ;;  %s5820_s29 = smov 0   ;;  %s5822_s30 = smov 0  }
   0x6   :  { %s5824_s15 = smov 0   ;;  %s5826_s16 = smov 0  }
   0x7 LB: > { %9188 = sst [smem:[#allocation5_spill]] %s5712_s29  ;;  %s5841_s17 = sadd.s32 4294967295, %s5724_s16   ;;  %s5724_s16 = sphi %s5826_s16, %s9500_s16   ;;  %s5720_s15 = sphi %s5824_s15, %s9502_s15   ;;  %s5716_s30 = sphi %s5822_s30, %s9504_s30   ;;  %s5712_s29 = sphi %s5820_s29, %s9503_s29  }
   0x8   : > { %9189 = sst [smem:[#allocation6_spill]] %s5720_s15  ;;  %s5337_s18 = sadd.s32 4294967294, %s5724_s16  }
   0x9   : > { %9190 = sst [smem:[#allocation7_spill]] %s5724_s16  ;;  %s5845_s19 = sadd.s32 1, %s5724_s16  }
   0xa   : > { %9191 = sst [smem:[#allocation8_spill]] %s5845_s19  ;;  %s333_s20 = sadd.s32 1, %s5720_s15 }
   0xb   : > { %s330_s21 = ssub.s32 %s5724_s16, %s5845_s19  ;;  %p343_p0 = scmp.ne.s32.totalorder %s5720_s15, %s5716_s30 }
   0xc   : > { %p331_p1 = scmp.eq.s32.totalorder %s330_s21, 0  ;;  %p344_p2 = scmp.eq.s32.totalorder %s5841_s17, 1 }
   0xd   : > { %p349_p3 = scmp.ne.s32.totalorder %s5716_s30, %s5712_s29  ;;  %p350_p4 = scmp.eq.s32.totalorder %s5337_s18, 1 }
   0xe   : > { %s5856_s22 = scalar_select %p331_p1, %s5720_s15, %s333_s20  }
   0xf   : > { %p5858_p5 = por %p344_p2, %p343_p0  ;;  %p5862_p6 = por %p350_p4, %p349_p3 }
  0x10   : > { %9192 = sst [smem:[#allocation9_spill]] %s5856_s22  ;;  %p5340_p7 = scmp.ge.s32.totalorder %s5724_s16, 1 }
  0x11   : > { %s9194_s24 = scalar_select %p5862_p6, 1, 0 }
  0x12   : > { %p415_p8 = scmp.lt.s32.totalorder %s5724_s16, 3 }
  0x13   : > { %9195 = sst [smem:[#allocation10_spill]] %s9194_s24 }
  0x14   : > { %p416_p9 = pnand %p5340_p7, %p415_p8 }
  0x16   : > { %419 = sbr.rel (%p416_p9) target bundleno = 5837 (0x16cd), region = 76 }
  0x1b   : > { %s9196_s1 = sld [smem:[#allocation92_spill]]  ;;  %v9040_v1 = vmov 0   ;;  %v508_v2 = vld [vmem:[%s9011_s2] sm:$0xff]  ;;  %v9046_v3 = vmov 0.0   ;;  %v659_v4 = vld [vmem:[%s9013_s4 + $0x8] sm:$0xff]  ;;  %v9052_v5 = vmov 2  }
  0x1c   : > { %5475 = vset.pattern.permute.xlu0 %v9040_v1  ;;  %5476 = vset.pattern.permute.xlu1 %v9040_v1  ;;  %v658_v6 = vld [vmem:[%s9013_s4] sm:$0xff]  ;;  %v9065_v7 = vmov 1   ;;  %v9063_v8 = vmov 3   ;;  %p461_p10 = scmp.lt.s32.totalorder %s5841_s17, 1  ;;  %v9050_v9 = vmov 4   ;;  %v9048_v10 = vmov 5  }
  0x1d   : > { %639 = vmatprep.mubr.f32.mxu0 %v9046_v3  ;;  %705 = vperm.xlu1 %5476, %v659_v4   ;;  %s9197_s0 = sld [smem:[#allocation91_spill]]  ;;  %v9042_v11 = vmov 7   ;;  %v9044_v15 = vmov 6   ;;  %v9038_v16 = vmov 8   ;;  %v562_v60 = vld [vmem:[%s9012_s3] sm:$0xff]  ;;  %vm565_vm0 = vcmask 64512  }
  0x1e   : > { %s462_s26 = scalar_select %p461_p10, %s5841_s17, 1  ;;  %v563_v61 = vld [vmem:[%s9012_s3 + $0x8] sm:$0xff]  ;;  %vm679_vm2 = vcmask 138240   ;;  %vm737_vm3 = vcmask 130048   ;;  %vm786_vm5 = vcmask 121856   ;;  %vm841_vm8 = vcmask 7168  }
  0x1f   : > { %s9036_s28 = smov 16   ;;  %s9028_s18 = smov 17   ;;  %vm920_vm9 = vcmask 1039360   ;;  %vm975_vm10 = vcmask 924672   ;;  %vm1030_vm11 = vcmask 916480   ;;  %vm1079_vm12 = vcmask 908288  }
  0x20   : > { %s5416_s27 = sshll.u32 %s462_s26, 4  ;;  %s9032_s21 = smov 15  }
  0x21   : > { %v507_v0 = vld [vmem:[%s9196_s1] sm:$0xff]  ;;  %5477 = vset.pattern.permute.xlu1 %v9065_v7  ;;  %s9024_s25 = smov 1   ;;  %s9026_s26 = smov 113  }
  0x22   : > { %550 = vperm.xlu0 %5475, %v507_v0   ;;  %755 = vperm.xlu1 %5477, %v659_v4   ;;  %s9203_s22 = smov 17   ;;  %s9213_s15 = smov 111  }
  0x23   : > { %s5894_s20 = scalar_lea.vmem %s9197_s0, %s5416_s27  ;;  %s9034_s27 = smov 127  }
  0x24   : > { %v506_v12 = vld [vmem:[%s5894_s20 + $0x8] sm:$0xff]  ;;  %v505_v13 = vld [vmem:[%s5894_s20] sm:$0xff]  ;;  %s9200_s0 = smov 112   ;;  %s9495_s16 = sld [smem:[#allocation93_spill]] }
  0x25   : > { %v515_v14 = vrot.slane %v506_v12, 4  ;;  %v509_v17 = vrot.slane %v505_v13, 4 }
  0x26   : > { %557 = vperm.xlu0 %5475, %v508_v2   ;;  %751 = vperm.xlu1 %5477, %v658_v6  }
  0x27   : > { %v516_v18 = vadd.f32 %v515_v14, %v506_v12  ;;  %v510_v19 = vadd.f32 %v509_v17, %v505_v13 }
  0x29   : > { %v517_v20 = vrot.slane %v516_v18, 2  ;;  %v511_v21 = vrot.slane %v510_v19, 2 }
  0x2a   : > { %5478 = vset.pattern.permute.xlu0 %v9052_v5  ;;  %5479 = vset.pattern.permute.xlu1 %v9063_v8  ;;  %s9496_s24 = smov %s9495_s16 }
  0x2b   : > { %810 = vperm.xlu0 %5478, %v659_v4   ;;  %865 = vperm.xlu1 %5479, %v659_v4   ;;  %v518_v22 = vadd.f32 %v517_v20, %v516_v18  ;;  %v512_v23 = vadd.f32 %v511_v21, %v510_v19 }
  0x2d   : > { %v519_v24 = vrot.slane %v518_v22, 1  ;;  %v513_v25 = vrot.slane %v512_v23, 1 }
  0x2f   : > { %806 = vperm.xlu0 %5478, %v658_v6   ;;  %5482 = vset.pattern.permute.xlu1 %v9048_v10  ;;  %v520_v26 = vadd.f32 %v519_v24, %v518_v22  ;;  %v514_v27 = vadd.f32 %v513_v25, %v512_v23 }
  0x30   : > { %944 = vperm.xlu1 %5482, %v659_v4  }
  0x31   : > { %v523_v28 = vmul.f32 0.125, %v520_v26  ;;  %v522_v29 = vmul.f32 0.125, %v514_v27 }
  0x33   : > { %5480 = vset.pattern.permute.xlu0 %v9063_v8  ;;  %v525_v30 = vsub.f32 %v506_v12, %v523_v28  ;;  %v524_v31 = vsub.f32 %v505_v13, %v522_v29 }
  0x34   : > { %861 = vperm.xlu0 %5480, %v658_v6   ;;  %5485 = vset.pattern.permute.xlu1 %v9042_v11 }
  0x35   : > { %1048 = vperm.xlu1 %5485, %v659_v4   ;;  %v527_v32 = vmul.f32 %v525_v30, %v525_v30  ;;  %v526_v33 = vmul.f32 %v524_v31, %v524_v31 }
  0x37   : > { %v534_v34 = vrot.slane %v527_v32, 4  ;;  %v528_v35 = vrot.slane %v526_v33, 4 }
  0x38   : > { %5481 = vset.pattern.permute.xlu0 %v9050_v9 }
  0x39   : > { %889 = vperm.xlu0 %5481, %v659_v4   ;;  %5488 = vset.pattern.permute.xlu1 %v9038_v16  ;;  %v535_v36 = vadd.f32 %v534_v34, %v527_v32  ;;  %v529_v37 = vadd.f32 %v528_v35, %v526_v33 }
  0x3a   : > { %1103 = vperm.xlu1 %5488, %v659_v4  }
  0x3b   : > { %v536_v38 = vrot.slane %v535_v36, 2  ;;  %v530_v39 = vrot.slane %v529_v37, 2 }
  0x3d   : > { %885 = vperm.xlu0 %5481, %v658_v6   ;;  %v537_v40 = vadd.f32 %v536_v38, %v535_v36  ;;  %v531_v41 = vadd.f32 %v530_v39, %v529_v37 }
  0x3e   : > { %1099 = vperm.xlu1 %5488, %v658_v6  }
  0x3f   : > { %v538_v42 = vrot.slane %v537_v40, 1  ;;  %v532_v43 = vrot.slane %v531_v41, 1 }
  0x41   : > { %5483 = vset.pattern.permute.xlu0 %v9048_v10  ;;  %v539_v44 = vadd.f32 %v538_v42, %v537_v40  ;;  %v533_v45 = vadd.f32 %v532_v43, %v531_v41  ;;  %v466_v42 = vlaneseq }
  0x42   : > { %940 = vperm.xlu0 %5483, %v658_v6   ;;  %5489 = vset.pattern.permute.xlu1 %v9040_v1 }
  0x43   : > { %v541_v46 = vmul.f32 0.125, %v539_v44  ;;  %v540_v47 = vmul.f32 0.125, %v533_v45  ;;  %v467_v45 = vand.u32 127, %v466_v42 }
  0x45   : > { %v543_v48 = vadd.f32 1e-05, %v541_v46  ;;  %v542_v49 = vadd.f32 1e-05, %v540_v47  ;;  %v473_v47 = vand.u32 15, %v467_v45 }
  0x46   : > { %5484 = vset.pattern.permute.xlu0 %v9044_v15 }
  0x47   : > { %999 = vperm.xlu0 %5484, %v659_v4   ;;  %5590 = vrsqrt.f32 %v543_v48  ;;  %v564_v4 = vld [vmem:[%s9012_s3 + $0x10] sm:$0xff]  ;;  %vm493_vm1 = vcmp.ge.s32.totalorder %v473_v47, 1  ;;  %vm499_vm4 = vcmp.le.s32.totalorder %v473_v47, 14 }
  0x48   : > { %5592 = vrsqrt.f32 %v542_v49 }
  0x4b   : > { %995 = vperm.xlu0 %5484, %v658_v6  }
  0x4f   : > { %5486 = vset.pattern.permute.xlu0 %v9042_v11 }
  0x50   : > { %1044 = vperm.xlu0 %5486, %v658_v6  }
  0x54   : > { %5487 = vset.pattern.permute.xlu0 %v9040_v1  ;;  %v5591_v50 = vpop.eup %5590 }
  0x55   : > { %700 = vperm.xlu0 %5487, %v658_v6   ;;  %v5593_v51 = vpop.eup %5592  ;;  %v547_v52 = vmul.f32 %v5591_v50, %v525_v30  ;;  %v468_v50 = vadd.s32 128, %v467_v45 }
  0x56   : > { %v546_v53 = vmul.f32 %v5593_v51, %v524_v31 }
  0x98   : > { %v5986_v6 = vpop.permute.xlu1 %705 }
  0x9d   : > { %v551_v54 = vpop.permute.xlu0 %550  ;;  %v5994_v13 = vpop.permute.xlu1 %755 }
  0x9e   : > { %v554_v55 = vmul.f32 %v551_v54, %v547_v52  ;;  %v553_v56 = vmul.f32 %v551_v54, %v546_v53  ;;  %v480_v52 = vand.u32 15, %v468_v50  ;;  %v6041_v53 = vsel %vm493_vm1, 1.0, %v9046_v3 }
  0xa0   : > { %vm494_vm6 = vcmp.ge.s32.totalorder %v480_v52, 1  ;;  %vm500_vm7 = vcmp.le.s32.totalorder %v480_v52, 14 }
  0xa1   : > { %v558_v57 = vpop.permute.xlu0 %557  ;;  %v6000_v17 = vpop.permute.xlu1 %751  ;;  %v6059_v47 = vsel %vm500_vm7, 1.0, %v9046_v3  ;;  %vm1244_vm7 = vcmask 31744  }
  0xa2   : > { %v561_v58 = vadd.f32 %v558_v57, %v554_v55  ;;  %v560_v59 = vadd.f32 %v558_v57, %v553_v56 }
  0xa4   : > { %605 = vmatprep.subr.mxu0 %v561_v58 }
  0xa5   : > { %606 = vmatpush1.msra.mxu0 %v560_v59  ;;  %v6049_v59 = vsel %vm499_vm4, 1.0, %v9046_v3  ;;  %vm1232_vm4 = vcmask 27648  }
  0xa6   : > { %5348 = vmatmul.mubr.msk.f32.vlgmr.msra.gmra.mxu0 %vm565_vm0, %v562_v60  ;;  %v5990_v12 = vpop.permute.xlu0 %810  ;;  %v6004_v19 = vpop.permute.xlu1 %865 }
  0xa7   : > { %645 = vmatprep.mubr.f32.mxu0 %v9046_v3 }
  0xaa   : > { %5349 = vmatmul.mubr.msk.f32.gmra.mxu0 %vm565_vm0, %v563_v61  ;;  %v5996_v14 = vpop.permute.xlu0 %806 }
  0xab   : > { %651 = vmatprep.mubr.f32.mxu0 %v9046_v3  ;;  %v6008_v21 = vpop.permute.xlu1 %944 }
  0xae   : > { %5350 = vmatmul.mubr.msk.f32.gmra.mxu0 %vm565_vm0, %v564_v4  ;;  %v6055_v4 = vsel %vm494_vm6, 1.0, %v9046_v3  ;;  %vm1248_vm6 = vcmask 1043456  }
  0xaf   : > { %1492 = vmatprep.mubr.f32.mxu0 %v9046_v3  ;;  %v6002_v18 = vpop.permute.xlu0 %861 }
  0xb0   : > { %v6012_v23 = vpop.permute.xlu1 %1048 }
  0xb4   : > { %v6006_v20 = vpop.permute.xlu0 %889 }
  0xb5   : > { %v6016_v25 = vpop.permute.xlu1 %1103 }
  0xb8   : > { %v6010_v22 = vpop.permute.xlu0 %885 }
  0xb9   : > { %v6020_v27 = vpop.permute.xlu1 %1099 }
  0xbd   : > { %v6014_v24 = vpop.permute.xlu0 %940 }
  0xc2   : > { %v6018_v26 = vpop.permute.xlu0 %999 }
  0xc6   : > { %v6022_v28 = vpop.permute.xlu0 %995 }
  0xcb   : > { %v6026_v31 = vpop.permute.xlu0 %1044 }
  0xd0   : > { %v6030_v33 = vpop.permute.xlu0 %700 }
 0x166   : > { %v5915_v62 = vpop.f32.mrf.mxu0 }
 0x167   : > { %725 = vrot.lane.b32.xlu0 %v5915_v62, %s9036_s28  ;;  %667 = vrot.lane.b32.xlu1 %v5915_v62, %s9028_s18 }
 0x168   : > { %v5925_v63 = vpop.f32.mrf.mxu0 }
 0x16a   : > { %v5931_v0 = vpop.f32.mrf.mxu0 }
 0x16b   : > { %774 = vrot.lane.b32.xlu0 %v5915_v62, %s9032_s21  ;;  %829 = vrot.lane.b32.xlu1 %v5915_v62, %s9024_s25  ;;  %s9030_s25 = smov 112  }
 0x16c   : > { %v5941_v2 = vpop.f32.mrf.mxu0 }
 0x16f   : > { %963 = vrot.lane.b32.xlu0 %v5915_v62, %s9026_s26  ;;  %908 = vrot.lane.b32.xlu1 %v5915_v62, %s9034_s27  ;;  %s9198_s26 = smov 1  }
 0x173   : > { %669 = vrot.lane.b32.xlu1 %v5925_v63, %s9028_s18  ;;  %671 = vrot.lane.b32.xlu0 %v5931_v0, %s9028_s18  ;;  %s9054_s18 = smov 111  }
 0x177   : > { %727 = vrot.lane.b32.xlu1 %v5925_v63, %s9036_s28  ;;  %1022 = vrot.lane.b32.xlu0 %v5931_v0, %s9030_s25  ;;  %s9199_s25 = smov 113  }
 0x17b   : > { %776 = vrot.lane.b32.xlu1 %v5925_v63, %s9032_s21  ;;  %731 = vrot.lane.b32.xlu0 %v5941_v2, %s9036_s28 }
 0x17f   : > { %831 = vrot.lane.b32.xlu1 %v5925_v63, %s9198_s26  ;;  %780 = vrot.lane.b32.xlu0 %v5941_v2, %s9032_s21 }
 0x183   : > { %910 = vrot.lane.b32.xlu1 %v5925_v63, %s9034_s27  ;;  %1071 = vrot.lane.b32.xlu0 %v5931_v0, %s9054_s18  ;;  %s9201_s27 = smov 15  }
 0x187   : > { %965 = vrot.lane.b32.xlu1 %v5925_v63, %s9199_s25  ;;  %969 = vrot.lane.b32.xlu0 %v5941_v2, %s9199_s25 }
 0x18b   : > { %729 = vrot.lane.b32.xlu1 %v5931_v0, %s9036_s28  ;;  %1018 = vrot.lane.b32.xlu0 %v5915_v62, %s9200_s0  ;;  %s9202_s28 = smov 127  }
 0x18f   : > { %778 = vrot.lane.b32.xlu1 %v5931_v0, %s9201_s27  ;;  %1067 = vrot.lane.b32.xlu0 %v5915_v62, %s9054_s18 }
 0x193   : > { %833 = vrot.lane.b32.xlu1 %v5931_v0, %s9198_s26 }
 0x197   : > { %912 = vrot.lane.b32.xlu1 %v5931_v0, %s9202_s28 }
 0x19b   : > { %967 = vrot.lane.b32.xlu1 %v5931_v0, %s9199_s25 }
 0x19f   : > { %673 = vrot.lane.b32.xlu1 %v5941_v2, %s9203_s22 }
 0x1a3   : > { %835 = vrot.lane.b32.xlu1 %v5941_v2, %s9198_s26 }
 0x1a7   : > { %914 = vrot.lane.b32.xlu1 %v5941_v2, %s9202_s28 }
 0x1ab   : > { %1020 = vrot.lane.b32.xlu1 %v5925_v63, %s9200_s0 }
 0x1af   : > { %1024 = vrot.lane.b32.xlu1 %v5941_v2, %s9200_s0 }
 0x1b3   : > { %1073 = vrot.lane.b32.xlu1 %v5941_v2, %s9054_s18 }
 0x1b7   : > { %1069 = vrot.lane.b32.xlu1 %v5925_v63, %s9054_s18  ;;  %s9205_s18 = smov 16  }
 0x1d9   : > { %v668_v29 = vpop.permute.xlu1 %667  ;;  %v726_v36 = vpop.permute.xlu0 %725 }
 0x1da   : > { %v689_v54 = vsel %vm679_vm2, 0.0, %v668_v29  ;;  %v747_v58 = vsel %vm737_vm3, 0.0, %v726_v36 }
 0x1db   : > { %v692_v57 = vmul.f32 %v6041_v53, %v689_v54  ;;  %v762_v50 = vmul.f32 %v6000_v17, %v747_v58  ;;  %v6065_v54 = vmul.f32 %v6010_v22, %v5915_v62 }
 0x1dd   : > { %v6024_v30 = vpop.permute.xlu1 %829  ;;  %v775_v38 = vpop.permute.xlu0 %774  ;;  %v713_v52 = vmul.f32 %v6030_v33, %v692_v57 }
 0x1de   : > { %v796_v60 = vsel %vm786_vm5, 0.0, %v775_v38  ;;  %v851_v1 = vsel %vm841_vm8, 0.0, %v6024_v30 }
 0x1df   : > { %v799_v16 = vmul.f32 %v6049_v59, %v796_v60 }
 0x1e1   : > { %v6028_v32 = vpop.permute.xlu1 %908  ;;  %v6034_v41 = vpop.permute.xlu0 %963 }
 0x1e5   : > { %v670_v34 = vpop.permute.xlu1 %669  ;;  %v672_v44 = vpop.permute.xlu0 %671 }
 0x1e6   : > { %v690_v42 = vsel %vm679_vm2, 0.0, %v672_v44  ;;  %v680_v3 = vsel %vm679_vm2, %v668_v29, %v670_v34 }
 0x1e7   : > { %v694_v10 = vmul.f32 %v6041_v53, %v690_v42 }
 0x1e9   : > { %v728_v35 = vpop.permute.xlu1 %727  ;;  %v6038_v49 = vpop.permute.xlu0 %1022 }
 0x1ea   : > { %v738_v58 = vsel %vm737_vm3, %v726_v36, %v728_v35 }
 0x1ed   : > { %v777_v37 = vpop.permute.xlu1 %776  ;;  %v732_v55 = vpop.permute.xlu0 %731 }
 0x1ee   : > { %v787_v57 = vsel %vm786_vm5, %v775_v38, %v777_v37  ;;  %v768_v37 = vadd.f32 %v762_v50, %v713_v52  ;;  %v817_v38 = vmul.f32 %v5996_v14, %v799_v16  ;;  %v763_v50 = vmul.f32 %v6000_v17, %v738_v58 }
 0x1f1   : > { %v832_v39 = vpop.permute.xlu1 %831  ;;  %v781_v45 = vpop.permute.xlu0 %780 }
 0x1f2   : > { %v842_v29 = vsel %vm841_vm8, %v6024_v30, %v832_v39  ;;  %v715_v39 = vmul.f32 %v5986_v6, %v694_v10 }
 0x1f3   : > { %v855_v16 = vmul.f32 %v6055_v4, %v842_v29 }
 0x1f5   : > { %v6032_v40 = vpop.permute.xlu1 %910 }
 0x1f9   : > { %v6036_v43 = vpop.permute.xlu1 %965 }
 0x1fd   : > { %v730_v46 = vpop.permute.xlu1 %729 }
 0x1fe   : > { %v739_v60 = vsel %vm737_vm3, %v730_v46, %v732_v55  ;;  %v748_v9 = vsel %vm737_vm3, 0.0, %v730_v46  ;;  %v800_v46 = vmul.f32 %v6059_v47, %v787_v57  ;;  %v6088_v55 = vpop.permute.xlu0 %1071 }
 0x1ff   : > { %v765_v42 = vmul.f32 %v5994_v13, %v739_v60 }
 0x200   : > { %v818_v10 = vmul.f32 %v5996_v14, %v800_v46  ;;  %v899_v46 = vmul.f32 %v6006_v20, %v5941_v2  ;;  %v985_v2 = vsel %vm975_vm10, %v6036_v43, 0.0 }
 0x201   : > { %v779_v48 = vpop.permute.xlu1 %778 }
 0x202   : > { %v788_v11 = vsel %vm786_vm5, %v779_v48, %v781_v45  ;;  %v797_v15 = vsel %vm786_vm5, 0.0, %v779_v48  ;;  %v693_v48 = vmul.f32 %v6055_v4, %v680_v3 }
 0x203   : > { %v801_v34 = vmul.f32 %v6049_v59, %v797_v15  ;;  %v802_v35 = vmul.f32 %v6059_v47, %v788_v11 }
 0x204   : > { %v714_v60 = vmul.f32 %v6030_v33, %v693_v48 }
 0x205   : > { %v834_v51 = vpop.permute.xlu1 %833  ;;  %v819_v52 = vmul.f32 %v5990_v12, %v801_v34  ;;  %v820_v57 = vmul.f32 %v5990_v12, %v802_v35  ;;  %v873_v12 = vmul.f32 %v6002_v18, %v855_v16  ;;  %v970_v34 = vpop.permute.xlu0 %969 }
 0x206   : > { %v852_v5 = vsel %vm841_vm8, 0.0, %v834_v51  ;;  %v769_v29 = vadd.f32 %v763_v50, %v714_v60 }
 0x207   : > { %v856_v30 = vmul.f32 %v6041_v53, %v852_v5  ;;  %v854_v5 = vmul.f32 %v6041_v53, %v851_v1 }
 0x208   : > { %v824_v48 = vadd.f32 %v818_v10, %v769_v29 }
 0x209   : > { %v6044_v56 = vpop.permute.xlu1 %912  ;;  %v874_v17 = vmul.f32 %v6004_v19, %v856_v30  ;;  %v1019_v60 = vpop.permute.xlu0 %1018 }
 0x20d   : > { %v6052_v61 = vpop.permute.xlu1 %967 }
 0x20e   : > { %v977_v30 = vsel %vm975_vm10, %v6052_v61, %v970_v34 }
 0x211   : > { %v674_v62 = vpop.permute.xlu1 %673 }
 0x212   : > { %v681_v45 = vsel %vm679_vm2, %v672_v44, %v674_v62  ;;  %v764_v44 = vmul.f32 %v5994_v13, %v748_v9  ;;  %v823_v62 = vadd.f32 %v817_v38, %v768_v37  ;;  %v872_v38 = vmul.f32 %v6002_v18, %v854_v5 }
 0x213   : > { %v695_v36 = vmul.f32 %v6055_v4, %v681_v45  ;;  %v879_v18 = vadd.f32 %v873_v12, %v824_v48  ;;  %v1068_v48 = vpop.permute.xlu0 %1067 }
 0x215   : > { %v716_v15 = vmul.f32 %v5986_v6, %v695_v36  ;;  %v836_v11 = vpop.permute.xlu1 %835  ;;  %v770_v6 = vadd.f32 %v764_v44, %v715_v39  ;;  %v986_v44 = vsel %vm975_vm10, %v970_v34, 0.0  ;;  %v976_v39 = vsel %vm975_vm10, %v6034_v41, %v6036_v43 }
 0x216   : > { %v843_v3 = vsel %vm841_vm8, %v834_v51, %v836_v11  ;;  %v878_v11 = vadd.f32 %v872_v38, %v823_v62  ;;  %v897_v41 = vmul.f32 %v6010_v22, %v5925_v63  ;;  %v988_v43 = vmul.f32 %v6041_v53, %v976_v39 }
 0x217   : > { %v771_v9 = vadd.f32 %v765_v42, %v716_v15  ;;  %v857_v13 = vmul.f32 %v6055_v4, %v843_v3  ;;  %v825_v36 = vadd.f32 %v819_v52, %v770_v6  ;;  %v991_v52 = vmul.f32 %v6055_v4, %v986_v44 }
 0x218   : > { %v903_v62 = vadd.f32 %v897_v41, %v879_v18  ;;  %v902_v5 = vadd.f32 %v6065_v54, %v878_v11  ;;  %v1006_v12 = vmul.f32 %v6022_v28, %v988_v43  ;;  %v6197_v43 = vpop.f32.mrf.mxu0 }
 0x219   : > { %v826_v58 = vadd.f32 %v820_v57, %v771_v9  ;;  %v875_v51 = vmul.f32 %v6004_v19, %v857_v13  ;;  %v915_v45 = vpop.permute.xlu1 %914  ;;  %v921_v19 = vsel %vm920_vm9, %v6028_v32, %v6032_v40  ;;  %v880_v42 = vadd.f32 %v874_v17, %v825_v36 }
 0x21a   : > { %v922_v35 = vsel %vm920_vm9, %v6044_v56, %v915_v45  ;;  %v931_v1 = vsel %vm920_vm9, %v915_v45, 0.0  ;;  %v930_v56 = vsel %vm920_vm9, %v6032_v40, 0.0  ;;  %v898_v32 = vmul.f32 %v6006_v20, %v5931_v0 }
 0x21b   : > { %v881_v33 = vadd.f32 %v875_v51, %v826_v58  ;;  %v935_v14 = vmul.f32 %v6049_v59, %v922_v35  ;;  %v936_v37 = vmul.f32 %v6059_v47, %v931_v1  ;;  %v933_v61 = vmul.f32 %v6049_v59, %v921_v19 }
 0x21c   : > { %v934_v3 = vmul.f32 %v6059_v47, %v930_v56  ;;  %v990_v57 = vmul.f32 %v6041_v53, %v977_v30  ;;  %v904_v0 = vadd.f32 %v898_v32, %v880_v42  ;;  %v989_v9 = vmul.f32 %v6055_v4, %v985_v2 }
 0x21d   : > { %v1021_v15 = vpop.permute.xlu1 %1020  ;;  %v905_v40 = vadd.f32 %v899_v46, %v881_v33  ;;  %v953_v50 = vmul.f32 %v6008_v21, %v935_v14  ;;  %v954_v16 = vmul.f32 %v6008_v21, %v936_v37  ;;  %v951_v63 = vmul.f32 %v6014_v24, %v933_v61 }
 0x21e   : > { %v952_v22 = vmul.f32 %v6014_v24, %v934_v3  ;;  %v1009_v17 = vmul.f32 %v6018_v26, %v991_v52  ;;  %v1008_v58 = vmul.f32 %v6018_v26, %v990_v57  ;;  %v1031_v51 = vsel %vm1030_vm11, %v1019_v60, %v1021_v15 }
 0x21f   : > { %v959_v10 = vadd.f32 %v953_v50, %v904_v0  ;;  %v960_v6 = vadd.f32 %v954_v16, %v905_v40  ;;  %v1007_v34 = vmul.f32 %v6022_v28, %v989_v9  ;;  %v957_v14 = vadd.f32 %v951_v63, %v902_v5 }
 0x220   : > { %v958_v37 = vadd.f32 %v952_v22, %v903_v62  ;;  %v9204_v9 = vmov 2   ;;  %v9207_v62 = vmov 5   ;;  %v9208_v5 = vmov 6  }
 0x221   : > { %v1025_v20 = vpop.permute.xlu1 %1024  ;;  %v1014_v1 = vadd.f32 %v1008_v58, %v959_v10  ;;  %v1015_v26 = vadd.f32 %v1009_v17, %v960_v6  ;;  %v1012_v44 = vadd.f32 %v1006_v12, %v957_v14  ;;  %v9209_v60 = vmov 7  }
 0x222   : > { %v1032_v21 = vsel %vm1030_vm11, %v6038_v49, %v1025_v20  ;;  %v1041_v13 = vsel %vm1030_vm11, %v1025_v20, 0.0  ;;  %v1040_v49 = vsel %vm1030_vm11, %v1021_v15, 0.0  ;;  %v1013_v42 = vadd.f32 %v1007_v34, %v958_v37  ;;  %v6191_v20 = vld [vmem:[%s9013_s4 + $0x10] sm:$0xff] }
 0x223   : > { %v1057_v45 = vmul.f32 %v6012_v23, %v1032_v21  ;;  %v1058_v29 = vmul.f32 %v6012_v23, %v1041_v13  ;;  %v1055_v23 = vmul.f32 %v6026_v31, %v1031_v51  ;;  %v1056_v38 = vmul.f32 %v6026_v31, %v1040_v49  ;;  %v6204_v21 = vpop.f32.mrf.mxu0 }
 0x224   : > { %v9206_v13 = vmov 4   ;;  %v9210_v10 = vmov 0   ;;  %v9211_v6 = vmov 8  }
 0x225   : > { %v1074_v54 = vpop.permute.xlu1 %1073  ;;  %v1063_v19 = vadd.f32 %v1057_v45, %v1014_v1  ;;  %v1064_v28 = vadd.f32 %v1058_v29, %v1015_v26  ;;  %v1061_v32 = vadd.f32 %v1055_v23, %v1012_v44  ;;  %v1062_v2 = vadd.f32 %v1056_v38, %v1013_v42 }
 0x226   : > { %v1081_v24 = vsel %vm1079_vm12, %v6088_v55, %v1074_v54  ;;  %v1090_v35 = vsel %vm1079_vm12, %v1074_v54, 0.0 }
 0x227   : > { %v1094_v36 = vmul.f32 %v6049_v59, %v1081_v24  ;;  %v1095_v33 = vmul.f32 %v6059_v47, %v1090_v35 }
 0x229   : > { %v1112_v46 = vmul.f32 %v6016_v25, %v1094_v36  ;;  %v1113_v55 = vmul.f32 %v6016_v25, %v1095_v33  ;;  %v1070_v56 = vpop.permute.xlu1 %1069 }
 0x22a   : > { %v1080_v30 = vsel %vm1079_vm12, %v1068_v48, %v1070_v56  ;;  %v1089_v15 = vsel %vm1079_vm12, %v1070_v56, 0.0 }
 0x22b   : > { %v1092_v11 = vmul.f32 %v6049_v59, %v1080_v30  ;;  %v1093_v18 = vmul.f32 %v6059_v47, %v1089_v15  ;;  %v6167_v39 = vadd.f32 %v1112_v46, %v1063_v19  ;;  %v6169_v31 = vadd.f32 %v1113_v55, %v1064_v28 }
 0x22c   : > { %v9212_v28 = vmov 0.0  }
 0x22d   : > { %v1110_v40 = vmul.f32 %v6020_v27, %v1092_v11  ;;  %v1111_v25 = vmul.f32 %v6020_v27, %v1093_v18  ;;  %v1146_v50 = vmul.f32 %v6167_v39, %v6167_v39  ;;  %v1147_v16 = vmul.f32 %v6169_v31, %v6169_v31  ;;  %v1138_v27 = vld [vmem:[%s9014_s5] sm:$0xff] }
 0x22f   : > { %v1148_v61 = vadd.f32 %v1147_v16, %v1146_v50  ;;  %v6177_v3 = vadd.f32 %v1110_v40, %v1061_v32  ;;  %v6179_v52 = vadd.f32 %v1111_v25, %v1062_v2 }
 0x231   : > { %1149 = vadd.xlane.f32.xlu0 %v1148_v61  ;;  %v1122_v57 = vmul.f32 %v6177_v3, %v6177_v3  ;;  %v1123_v41 = vmul.f32 %v6179_v52, %v6179_v52 }
 0x233   : > { %v1124_v0 = vadd.f32 %v1123_v41, %v1122_v57 }
 0x235   : > { %1125 = vadd.xlane.f32.xlu1 %v1124_v0 }
 0x246   : > { %710 = vperm.xlu1 %5489, %v6191_v20  }
 0x247   : > { %1141 = vperm.xlu0 %5487, %v1138_v27  }
 0x24a   : > { %5490 = vset.pattern.permute.xlu1 %v9065_v7 }
 0x24b   : > { %5492 = vset.pattern.permute.xlu0 %v9063_v8  ;;  %759 = vperm.xlu1 %5490, %v6191_v20  }
 0x24c   : > { %733 = vrot.lane.b32.xlu0 %v6197_v43, %s9205_s18 }
 0x24f   : > { %5491 = vset.pattern.permute.xlu1 %v9204_v9 }
 0x250   : > { %675 = vrot.lane.b32.xlu1 %v6197_v43, %s9203_s22  ;;  %782 = vrot.lane.b32.xlu0 %v6197_v43, %s9201_s27 }
 0x254   : > { %677 = vrot.lane.b32.xlu1 %v6204_v21, %s9203_s22  ;;  %869 = vperm.xlu0 %5492, %v6191_v20  }
 0x258   : > { %814 = vperm.xlu1 %5491, %v6191_v20   ;;  %5493 = vset.pattern.permute.xlu0 %v9206_v13 }
 0x259   : > { %893 = vperm.xlu0 %5493, %v6191_v20  }
 0x25c   : > { %735 = vrot.lane.b32.xlu1 %v6204_v21, %s9205_s18 }
 0x25d   : > { %5494 = vset.pattern.permute.xlu1 %v9207_v62  ;;  %5495 = vset.pattern.permute.xlu0 %v9208_v5 }
 0x25e   : > { %1003 = vperm.xlu0 %5495, %v6191_v20  }
 0x260   : > { %784 = vrot.lane.b32.xlu1 %v6204_v21, %s9201_s27 }
 0x262   : > { %5496 = vset.pattern.permute.xlu0 %v9209_v60 }
 0x263   : > { %1052 = vperm.xlu0 %5496, %v6191_v20  }
 0x264   : > { %837 = vrot.lane.b32.xlu1 %v6197_v43, %s9198_s26 }
 0x267   : > { %1028 = vrot.lane.b32.xlu0 %v6204_v21, %s9200_s0 }
 0x268   : > { %839 = vrot.lane.b32.xlu1 %v6204_v21, %s9198_s26  ;;  %5498 = vset.pattern.permute.xlu0 %v9210_v10 }
 0x26b   : > { %1026 = vrot.lane.b32.xlu0 %v6197_v43, %s9200_s0 }
 0x26c   : > { %948 = vperm.xlu1 %5494, %v6191_v20  }
 0x270   : > { %5497 = vset.pattern.permute.xlu1 %v9211_v6 }
 0x2ba   : > { %v1150_v63 = vpop.xlane.xlu0 %1149 }
 0x2bb   : > { %5594 = vrsqrt.f32 %v1150_v63  ;;  %vm1153_vm13 = vcmp.eq.f32.partialorder %v1150_v63, inf  ;;  %v1156_v51 = vand.u32 2147483648, %v1150_v63  ;;  %vm1155_vm14 = vcmp.eq.f32.partialorder %v1150_v63, 0.0 }
 0x2be   : > { %v1126_v22 = vpop.xlane.xlu1 %1125 }
 0x2bf   : > { %5596 = vrsqrt.f32 %v1126_v22  ;;  %vm1129_vm15 = vcmp.eq.f32.partialorder %v1126_v22, inf  ;;  %v1132_v34 = vand.u32 2147483648, %v1126_v22  ;;  %vm1131_vm1 = vcmp.eq.f32.partialorder %v1126_v22, 0.0 }
 0x2c2   : > { %v1142_v38 = vpop.permute.xlu0 %1141  ;;  %v6264_v44 = vpop.permute.xlu1 %710 }
 0x2c6   : > { %v6266_v42 = vpop.permute.xlu1 %759  ;;  %v734_v32 = vpop.permute.xlu0 %733 }
 0x2c8   : > { %v5595_v17 = vpop.eup %5594 }
 0x2c9   : > { %v1152_v58 = vmul.f32 %v5595_v17, %v1150_v63 }
 0x2ca   : > { %v6268_v30 = vpop.permute.xlu1 %675  ;;  %v783_v40 = vpop.permute.xlu0 %782 }
 0x2cb   : > { %v1154_v49 = vsel %vm1153_vm13, %v1150_v63, %v1152_v58  ;;  %vm9146_vm13 = vcmask 1044480  }
 0x2cc   : > { %v5597_v45 = vpop.eup %5596  ;;  %v1157_v29 = vsel %vm1155_vm14, %v1156_v51, %v1154_v49  ;;  %vm9145_vm14 = vcmask 171008  }
 0x2cd   : > { %v1128_v54 = vmul.f32 %v5597_v45, %v1126_v22  ;;  %v1158_v12 = vmax.f32 %v1157_v29, 1e-12 }
 0x2ce   : > { %v678_v15 = vpop.permute.xlu1 %677 }
 0x2cf   : > { %v1130_v24 = vsel %vm1129_vm15, %v1126_v22, %v1128_v54  ;;  %5598 = vrcp.f32 %v1158_v12  ;;  %v682_v50 = vsel %vm679_vm2, %v6268_v30, %v678_v15  ;;  %v6279_v61 = vpop.permute.xlu0 %869 }
 0x2d0   : > { %v1133_v35 = vsel %vm1131_vm1, %v1132_v34, %v1130_v24  ;;  %v697_v16 = vmul.f32 %v6055_v4, %v682_v50 }
 0x2d1   : > { %v1134_v1 = vmax.f32 %v1133_v35, 1e-12 }
 0x2d2   : > { %v718_v27 = vmul.f32 %v6264_v44, %v697_v16 }
 0x2d3   : > { %5600 = vrcp.f32 %v1134_v1  ;;  %v6270_v11 = vpop.permute.xlu1 %814 }
 0x2d4   : > { %v894_v58 = vpop.permute.xlu0 %893 }
 0x2d7   : > { %v736_v18 = vpop.permute.xlu1 %735 }
 0x2d9   : > { %v1004_v54 = vpop.permute.xlu0 %1003 }
 0x2dc   : > { %v5599_v26 = vpop.eup %5598 }
 0x2dd   : > { %v6235_v36 = vmul.f32 %v5599_v26, %v6169_v31  ;;  %v6238_v33 = vmul.f32 %v5599_v26, %v6167_v39  ;;  %v785_v39 = vpop.permute.xlu1 %784 }
 0x2de   : > { %v789_v57 = vsel %vm786_vm5, %v783_v40, %v785_v39 }
 0x2df   : > { %1192 = vmatprep.subr.mxu1 %v6235_v36  ;;  %v804_v63 = vmul.f32 %v6059_v47, %v789_v57 }
 0x2e0   : > { %v5601_v14 = vpop.eup %5600  ;;  %1193 = vmatpush1.xpose.msra.mxu1 %v6238_v33 }
 0x2e1   : > { %v1136_v37 = vmul.f32 %v5601_v14, %v6177_v3  ;;  %v1137_v23 = vmul.f32 %v5601_v14, %v6179_v52  ;;  %v6272_v31 = vpop.permute.xlu1 %837  ;;  %v740_v52 = vsel %vm737_vm3, %v734_v32, %v736_v18  ;;  %v822_v49 = vmul.f32 %v6270_v11, %v804_v63 }
 0x2e3   : > { %v6244_v48 = vmul.f32 %v1142_v38, %v1136_v37  ;;  %v6246_v19 = vmul.f32 %v1142_v38, %v1137_v23  ;;  %v901_v37 = vmul.f32 %v894_v58, %v6204_v21  ;;  %v1053_v23 = vpop.permute.xlu0 %1052 }
 0x2e5   : > { %1226 = vmatprep.mubr.f32.mxu1 %v6246_v19  ;;  %v840_v2 = vpop.permute.xlu1 %839 }
 0x2e6   : > { %1227 = vmatmul.mubr.f32.vlgmr.msra.gmra.mxu1 %v6244_v48  ;;  %v844_v17 = vsel %vm841_vm8, %v6272_v31, %v840_v2 }
 0x2e7   : > { %1319 = vmatprep.mubr.f32.mxu1 %v9212_v28  ;;  %v859_v45 = vmul.f32 %v6055_v4, %v844_v17  ;;  %v1029_v50 = vpop.permute.xlu0 %1028 }
 0x2e9   : > { %v6274_v25 = vpop.permute.xlu1 %948  ;;  %v877_v24 = vmul.f32 %v6279_v61, %v859_v45  ;;  %v749_v45 = vsel %vm737_vm3, 0.0, %v734_v32 }
 0x3a6   : > { %v1228_v46 = vpop.f32.mrf.mxu1 }
 0x3a7   : > { %v1233_v55 = vsel %vm1232_vm4, %v1228_v46, -inf }
 0x3a8   : > { %v1230_v56 = vpop.f32.mrf.mxu1  ;;  %1234 = vmax.xlane.f32.xlu1 %v1233_v55 }
 0x3b9   : > { %918 = vrot.lane.b32.xlu1 %v6204_v21, %s9202_s28 }
 0x3bd   : > { %916 = vrot.lane.b32.xlu1 %v6197_v43, %s9202_s28 }
 0x3c1   : > { %973 = vrot.lane.b32.xlu1 %v6204_v21, %s9199_s25 }
 0x3c5   : > { %971 = vrot.lane.b32.xlu1 %v6197_v43, %s9199_s25 }
 0x3c9   : > { %1107 = vperm.xlu1 %5497, %v6191_v20   ;;  %v767_v20 = vmul.f32 %v6266_v42, %v740_v52 }
 0x3cb   : > { %v773_v51 = vadd.f32 %v767_v20, %v718_v27 }
 0x3cd   : > { %1077 = vrot.lane.b32.xlu1 %v6204_v21, %s9213_s15  ;;  %v828_v34 = vadd.f32 %v822_v49, %v773_v51  ;;  %v691_v51 = vsel %vm679_vm2, 0.0, %v6268_v30 }
 0x3ce   : > { %5499 = vset.pattern.permute.xlu1 %v9210_v10  ;;  %v696_v49 = vmul.f32 %v6041_v53, %v691_v51 }
 0x3cf   : > { %v883_v14 = vadd.f32 %v877_v24, %v828_v34  ;;  %v766_v24 = vmul.f32 %v6266_v42, %v749_v45 }
 0x3d0   : > { %v717_v34 = vmul.f32 %v6264_v44, %v696_v49 }
 0x3d1   : > { %v907_v18 = vadd.f32 %v901_v37, %v883_v14 }
 0x3d2   : > { %v772_v14 = vadd.f32 %v766_v24, %v717_v34  ;;  %v1584_v34 = vld [vmem:[%s9016_s7] sm:$0xff] }
 0x3d3   : > { %v1585_v24 = vld [vmem:[%s9017_s8] sm:$0xff] }
 0x431   : > { %v1235_v3 = vpop.xlane.xlu1 %1234 }
 0x432   : > { %v1236_v41 = vsub.f32 %v1228_v46, %v1235_v3  ;;  %v1042_v3 = vsel %vm1030_vm11, %v1029_v50, 0.0 }
 0x434   : > { %v1237_v0 = vmul.f32 1.442695, %v1236_v41  ;;  %v1060_v41 = vmul.f32 %v1053_v23, %v1042_v3 }
 0x435   : > { %v919_v22 = vpop.permute.xlu1 %918 }
 0x436   : > { %5602 = vpow2.f32 %v1237_v0  ;;  %v932_v12 = vsel %vm920_vm9, %v919_v22, 0.0 }
 0x437   : > { %v938_v26 = vmul.f32 %v6059_v47, %v932_v12  ;;  %v798_v12 = vsel %vm786_vm5, 0.0, %v783_v40 }
 0x439   : > { %v917_v29 = vpop.permute.xlu1 %916  ;;  %v956_v56 = vmul.f32 %v6274_v25, %v938_v26  ;;  %v853_v26 = vsel %vm841_vm8, 0.0, %v6272_v31 }
 0x43a   : > { %v858_v37 = vmul.f32 %v6041_v53, %v853_v26 }
 0x43b   : > { %v962_v16 = vadd.f32 %v956_v56, %v907_v18 }
 0x43c   : > { %v876_v32 = vmul.f32 %v6279_v61, %v858_v37 }
 0x43d   : > { %v974_v35 = vpop.permute.xlu1 %973 }
 0x43e   : > { %v987_v1 = vsel %vm975_vm10, %v974_v35, 0.0 }
 0x43f   : > { %v993_v38 = vmul.f32 %v6055_v4, %v987_v1  ;;  %v803_v1 = vmul.f32 %v6049_v59, %v798_v12 }
 0x441   : > { %v972_v46 = vpop.permute.xlu1 %971  ;;  %v1011_v39 = vmul.f32 %v1004_v54, %v993_v38  ;;  %v821_v30 = vmul.f32 %v6270_v11, %v803_v1  ;;  %v923_v38 = vsel %vm920_vm9, %v917_v29, %v919_v22  ;;  %v6352_v1 = vld [vmem:[%s9020_s11 + $0x10] sm:$0x1f] }
 0x442   : > { %v978_v40 = vsel %vm975_vm10, %v972_v46, %v974_v35  ;;  %v937_v44 = vmul.f32 %v6049_v59, %v923_v38 }
 0x443   : > { %v6296_v55 = vpop.eup %5602  ;;  %v1017_v21 = vadd.f32 %v1011_v39, %v962_v16  ;;  %v827_v56 = vadd.f32 %v821_v30, %v772_v14  ;;  %v992_v18 = vmul.f32 %v6041_v53, %v978_v40  ;;  %v1027_v16 = vpop.permute.xlu0 %1026  ;;  %v1829_v40 = vld [vmem:[%s9020_s11 + $0x8] sm:$0xff] }
 0x444   : > { %v1239_v15 = vsel %vm1232_vm4, %v6296_v55, 0.0  ;;  %v955_v31 = vmul.f32 %v6274_v25, %v937_v44  ;;  %v1033_v29 = vsel %vm1030_vm11, %v1027_v16, %v1029_v50  ;;  %v1335_v25 = vrot.slane %v6235_v36, 4  ;;  %v6372_v44 = vld [vmem:[%s9020_s11] sm:$0xff] }
 0x445   : > { %1240 = vadd.xlane.f32.xlu1 %v1239_v15  ;;  %v1108_v2 = vpop.permute.xlu1 %1107  ;;  %v1066_v20 = vadd.f32 %v1060_v41, %v1017_v21  ;;  %v882_v42 = vadd.f32 %v876_v32, %v827_v56  ;;  %v900_v15 = vmul.f32 %v894_v58, %v6197_v43  ;;  %v1010_v3 = vmul.f32 %v1004_v54, %v992_v18  ;;  %v1507_v56 = vld [vmem:[%s9015_s6] sm:$0xff]  ;;  %v6409_v18 = vld [vmem:[%s9021_s12 + $0x10] sm:$0x1f] }
 0x446   : > { %v1059_v46 = vmul.f32 %v1053_v23, %v1033_v29  ;;  %v1329_v23 = vrot.slane %v6246_v19, 4  ;;  %v1328_v36 = vrot.slane %v6244_v48, 4 }
 0x447   : > { %v906_v39 = vadd.f32 %v900_v15, %v882_v42  ;;  %v6396_v42 = vld [vmem:[%s9021_s12 + $0x8] sm:$0xff]  ;;  %v6402_v15 = vld [vmem:[%s9021_s12] sm:$0xff] }
 0x449   : > { %v1078_v52 = vpop.permute.xlu1 %1077  ;;  %v961_v22 = vadd.f32 %v955_v31, %v906_v39  ;;  %v5662_v39 = vld [vmem:[%s5894_s20] sm:$0xff] }
 0x44a   : > { %v1091_v57 = vsel %vm1079_vm12, %v1078_v52, 0.0 }
 0x44b   : > { %v1097_v0 = vmul.f32 %v6059_v47, %v1091_v57  ;;  %v1016_v61 = vadd.f32 %v1010_v3, %v961_v22  ;;  %v5663_v22 = vld [vmem:[%s5894_s20 + $0x8] sm:$0xff] }
 0x44d   : > { %v1115_v27 = vmul.f32 %v1108_v2, %v1097_v0 }
 0x44f   : > { %v1121_v63 = vadd.f32 %v1115_v27, %v1066_v20 }
 0x451   : > { %5351 = vmatprep.subr.msk.mxu1 %vm1248_vm6, %v1121_v63  ;;  %v1420_v17 = vrot.slane %v1121_v63, 4 }
 0x453   : > { %5354 = vmatprep.subr.msk.mxu0 %vm1248_vm6, %v1420_v17 }
 0x456   : > { %1075 = vrot.lane.b32.xlu1 %v6197_v43, %s9213_s15  ;;  %v1065_v43 = vadd.f32 %v1059_v46, %v1016_v61 }
 0x4ce   : > { %v1241_v11 = vpop.xlane.xlu1 %1240 }
 0x4cf   : > { %5604 = vrcp.f32 %v1241_v11 }
 0x4d2   : > { %v1076_v21 = vpop.permute.xlu1 %1075 }
 0x4d3   : > { %v1082_v35 = vsel %vm1079_vm12, %v1076_v21, %v1078_v52  ;;  %v1334_v52 = vrot.slane %v6238_v33, 4 }
 0x4d4   : > { %v1096_v57 = vmul.f32 %v6049_v59, %v1082_v35 }
 0x4d6   : > { %v1114_v58 = vmul.f32 %v1108_v2, %v1096_v57 }
 0x4d8   : > { %v1120_v41 = vadd.f32 %v1114_v58, %v1065_v43 }
 0x4da   : > { %v1419_v0 = vrot.slane %v1120_v41, 4  ;;  %5352 = vmatpush1.msk.msra.mxu1 %vm1248_vm6, %v1120_v41 }
 0x4db   : > { %1368 = vmatprep.subr.mxu1 %v1335_v25 }
 0x4dc   : > { %v5605_v54 = vpop.eup %5604  ;;  %5355 = vmatpush1.msk.msra.mxu0 %vm1248_vm6, %v1419_v0 }
 0x4dd   : > { %v1243_v50 = vmul.f32 %v5605_v54, %v6296_v55 }
 0x4df   : > { %5353 = vmatmul.mubr.msk.f32.vlgmr.msra.gmra.mxu1 %vm1244_vm7, %v1243_v50 }
 0x4e0   : > { %1369 = vmatpush1.xpose.msra.mxu1 %v1334_v52  ;;  %1402 = vmatprep.mubr.f32.mxu1 %v1329_v23 }
 0x4e3   : > { %1403 = vmatmul.mubr.f32.vlgmr.msra.gmra.mxu1 %v1328_v36 }
 0x4e4   : > { %1575 = vmatprep.mubr.f32.mxu1 %v9212_v28 }
 0x59f   : > { %v1321_v2 = vpop.f32.mrf.mxu1 }
 0x5a1   : > { %v1323_v27 = vpop.f32.mrf.mxu1 }
 0x5a3   : > { %v1404_v20 = vpop.f32.mrf.mxu1 }
 0x5a4   : > { %v1408_v63 = vsel %vm1232_vm4, %v1404_v20, -inf }
 0x5a5   : > { %1409 = vmax.xlane.f32.xlu0 %v1408_v63  ;;  %v1406_v55 = vpop.f32.mrf.mxu1 }
 0x5bb   : > { %1626 = vperm.xlu0 %5498, %v1584_v34  }
 0x5bf   : > { %5502 = vset.pattern.permute.xlu0 %v9065_v7 }
 0x5c0   : > { %1923 = vperm.xlu0 %5502, %v1829_v40  }
 0x5c4   : > { %1919 = vperm.xlu0 %5502, %v6372_v44  }
 0x5c8   : > { %2379 = vperm.xlu0 %5502, %v6396_v42  }
 0x5cc   : > { %2375 = vperm.xlu0 %5502, %v6402_v15  }
 0x5d0   : > { %5518 = vset.pattern.permute.xlu0 %v9204_v9 }
 0x5d1   : > { %1973 = vperm.xlu0 %5518, %v6372_v44  }
 0x5d5   : > { %2429 = vperm.xlu0 %5518, %v6402_v15  }
 0x5d9   : > { %5520 = vset.pattern.permute.xlu0 %v9063_v8 }
 0x5da   : > { %2035 = vperm.xlu0 %5520, %v6352_v1  }
 0x5de   : > { %2031 = vperm.xlu0 %5520, %v1829_v40  }
 0x5e2   : > { %2491 = vperm.xlu0 %5520, %v6409_v18  }
 0x5e6   : > { %2487 = vperm.xlu0 %5520, %v6396_v42  }
 0x5ea   : > { %5521 = vset.pattern.permute.xlu0 %v9206_v13 }
 0x5eb   : > { %2055 = vperm.xlu0 %5521, %v1829_v40  }
 0x5ef   : > { %2511 = vperm.xlu0 %5521, %v6396_v42  }
 0x5f3   : > { %5524 = vset.pattern.permute.xlu0 %v9207_v62 }
 0x5f4   : > { %2105 = vperm.xlu0 %5524, %v6372_v44  }
 0x5f8   : > { %2561 = vperm.xlu0 %5524, %v6402_v15  }
 0x5fc   : > { %5528 = vset.pattern.permute.xlu0 %v9208_v5 }
 0x5fd   : > { %2167 = vperm.xlu0 %5528, %v6352_v1  }
 0x601   : > { %2159 = vperm.xlu0 %5528, %v6372_v44  }
 0x605   : > { %2623 = vperm.xlu0 %5528, %v6409_v18  }
 0x609   : > { %2615 = vperm.xlu0 %5528, %v6402_v15  }
 0x60d   : > { %5530 = vset.pattern.permute.xlu0 %v9209_v60 }
 0x60e   : > { %2215 = vperm.xlu0 %5530, %v6352_v1  }
 0x612   : > { %2207 = vperm.xlu0 %5530, %v6372_v44  }
 0x616   : > { %2671 = vperm.xlu0 %5530, %v6409_v18  }
 0x62e   : > { %v1410_v17 = vpop.xlane.xlu0 %1409 }
 0x62f   : > { %v1411_v33 = vsub.f32 %v1404_v20, %v1410_v17 }
 0x631   : > { %v1412_v51 = vmul.f32 1.442695, %v1411_v33 }
 0x633   : > { %5606 = vpow2.f32 %v1412_v51 }
 0x640   : > { %v5607_v19 = vpop.eup %5606 }
 0x641   : > { %v1414_v49 = vsel %vm1232_vm4, %v5607_v19, 0.0 }
 0x642   : > { %1415 = vadd.xlane.f32.xlu1 %v1414_v49 }
 0x653   : > { %1633 = vperm.xlu1 %5499, %v1585_v24  }
 0x657   : > { %1879 = vperm.xlu1 %5499, %v6352_v1  }
 0x65b   : > { %5500 = vset.pattern.permute.xlu1 %v9065_v7 }
 0x65c   : > { %1927 = vperm.xlu1 %5500, %v6352_v1  }
 0x660   : > { %5501 = vset.pattern.permute.xlu1 %v9210_v10 }
 0x661   : > { %1874 = vperm.xlu1 %5501, %v1829_v40  }
 0x665   : > { %5503 = vset.pattern.permute.xlu1 %v9204_v9 }
 0x666   : > { %1981 = vperm.xlu1 %5503, %v6352_v1  }
 0x66a   : > { %5504 = vset.pattern.permute.xlu1 %v9210_v10 }
 0x66b   : > { %1869 = vperm.xlu1 %5504, %v6372_v44  }
 0x66f   : > { %5505 = vset.pattern.permute.xlu1 %v9204_v9 }
 0x670   : > { %1977 = vperm.xlu1 %5505, %v1829_v40  }
 0x674   : > { %5506 = vset.pattern.permute.xlu1 %v9206_v13 }
 0x675   : > { %2059 = vperm.xlu1 %5506, %v6352_v1  }
 0x679   : > { %5507 = vset.pattern.permute.xlu1 %v9063_v8 }
 0x67a   : > { %2027 = vperm.xlu1 %5507, %v6372_v44  }
 0x67e   : > { %5508 = vset.pattern.permute.xlu1 %v9207_v62 }
 0x67f   : > { %2113 = vperm.xlu1 %5508, %v6352_v1  }
 0x683   : > { %5509 = vset.pattern.permute.xlu1 %v9206_v13 }
 0x684   : > { %2051 = vperm.xlu1 %5509, %v6372_v44  }
 0x688   : > { %5510 = vset.pattern.permute.xlu1 %v9207_v62 }
 0x689   : > { %2109 = vperm.xlu1 %5510, %v1829_v40  }
 0x68d   : > { %5511 = vset.pattern.permute.xlu1 %v9208_v5 }
 0x68e   : > { %2163 = vperm.xlu1 %5511, %v1829_v40  }
 0x692   : > { %5512 = vset.pattern.permute.xlu1 %v9209_v60 }
 0x693   : > { %2211 = vperm.xlu1 %5512, %v1829_v40  }
 0x697   : > { %5513 = vset.pattern.permute.xlu1 %v9211_v6 }
 0x698   : > { %2269 = vperm.xlu1 %5513, %v6352_v1  }
 0x69c   : > { %2265 = vperm.xlu1 %5513, %v1829_v40  }
 0x6a0   : > { %2261 = vperm.xlu1 %5513, %v6372_v44  }
 0x6a4   : > { %5514 = vset.pattern.permute.xlu1 %v9065_v7 }
 0x6a5   : > { %2383 = vperm.xlu1 %5514, %v6409_v18  }
 0x6a9   : > { %5515 = vset.pattern.permute.xlu1 %v9210_v10 }
 0x6aa   : > { %2330 = vperm.xlu1 %5515, %v6396_v42  }
 0x6ae   : > { %5516 = vset.pattern.permute.xlu1 %v9204_v9 }
 0x6af   : > { %2437 = vperm.xlu1 %5516, %v6409_v18  }
 0x6b3   : > { %5517 = vset.pattern.permute.xlu1 %v9210_v10 }
 0x6b4   : > { %2325 = vperm.xlu1 %5517, %v6402_v15  }
 0x6b8   : > { %5519 = vset.pattern.permute.xlu1 %v9204_v9 }
 0x6b9   : > { %2433 = vperm.xlu1 %5519, %v6396_v42  }
 0x6bd   : > { %5522 = vset.pattern.permute.xlu1 %v9206_v13 }
 0x6be   : > { %2515 = vperm.xlu1 %5522, %v6409_v18  }
 0x6c2   : > { %5523 = vset.pattern.permute.xlu1 %v9063_v8 }
 0x6c3   : > { %2483 = vperm.xlu1 %5523, %v6402_v15  }
 0x6c7   : > { %5525 = vset.pattern.permute.xlu1 %v9207_v62 }
 0x6c8   : > { %2569 = vperm.xlu1 %5525, %v6409_v18  }
 0x6cb   : > { %v1416_v45 = vpop.xlane.xlu1 %1415 }
 0x6cc   : > { %5608 = vrcp.f32 %v1416_v45  ;;  %5526 = vset.pattern.permute.xlu1 %v9206_v13 }
 0x6cd   : > { %2507 = vperm.xlu1 %5526, %v6402_v15  }
 0x6d1   : > { %5527 = vset.pattern.permute.xlu1 %v9207_v62 }
 0x6d2   : > { %2565 = vperm.xlu1 %5527, %v6396_v42  }
 0x6d6   : > { %5529 = vset.pattern.permute.xlu1 %v9208_v5 }
 0x6d7   : > { %2619 = vperm.xlu1 %5529, %v6396_v42  }
 0x6d9   : > { %v5609_v48 = vpop.eup %5608 }
 0x6da   : > { %v1418_v12 = vmul.f32 %v5609_v48, %v5607_v19 }
 0x6db   : > { %5531 = vset.pattern.permute.xlu1 %v9209_v60 }
 0x6dc   : > { %5356 = vmatmul.mubr.msk.f32.vlgmr.msra.gmra.mxu0 %vm1244_vm7, %v1418_v12  ;;  %2667 = vperm.xlu1 %5531, %v6396_v42  }
 0x6dd   : > { %1714 = vmatprep.mubr.f32.mxu0 %v9212_v28 }
 0x6e0   : > { %5532 = vset.pattern.permute.xlu1 %v9211_v6 }
 0x6e1   : > { %2725 = vperm.xlu1 %5532, %v6409_v18  }
 0x79c   : > { %v1494_v26 = vpop.f32.mrf.mxu0 }
 0x79d   : > { %v1501_v14 = vrot.slane %v1494_v26, 4 }
 0x79e   : > { %v1496_v37 = vpop.f32.mrf.mxu0 }
 0x79f   : > { %v1502_v30 = vrot.slane %v1496_v37, 4  ;;  %v1505_v32 = vsel %vm1248_vm6, %v1321_v2, %v1501_v14 }
 0x7a1   : > { %v1506_v38 = vsel %vm1248_vm6, %v1323_v27, %v1502_v30  ;;  %v1627_v30 = vpop.permute.xlu0 %1626 }
 0x7a2   : > { %1541 = vmatprep.subr.mxu1 %v1506_v38 }
 0x7a3   : > { %1542 = vmatpush1.msra.mxu1 %v1505_v32 }
 0x7a4   : > { %5357 = vmatmul.mubr.msk.f32.vlgmr.msra.gmra.mxu1 %vm565_vm0, %v1507_v56 }
 0x7a5   : > { %1809 = vmatprep.mubr.f32.mxu1 %v9212_v28 }
 0x864   : > { %v1577_v31 = vpop.f32.mrf.mxu1 }
 0x865   : > { %v6447_v16 = vadd.f32 %v5662_v39, %v1577_v31  ;;  %v1634_v31 = vpop.permute.xlu1 %1633 }
 0x866   : > { %v1579_v3 = vpop.f32.mrf.mxu1 }
 0x867   : > { %9214 = vst [vmem:[#allocation11_spill] sm:$0xff] %v6447_v16  ;;  %v1586_v11 = vrot.slane %v6447_v16, 4  ;;  %v6453_v29 = vadd.f32 %v5663_v22, %v1579_v3  ;;  %v1733_v22 = vld [vmem:[%s9019_s10] sm:$0xff] }
 0x869   : > { %9215 = vst [vmem:[#allocation12_spill] sm:$0xff] %v6453_v29  ;;  %v1587_v61 = vadd.f32 %v1586_v11, %v6447_v16  ;;  %v1592_v21 = vrot.slane %v6453_v29, 4  ;;  %v1638_v11 = vld [vmem:[%s9018_s9] sm:$0xff] }
 0x86b   : > { %v1588_v35 = vrot.slane %v1587_v61, 2  ;;  %v1593_v46 = vadd.f32 %v1592_v21, %v6453_v29  ;;  %v1734_v21 = vld [vmem:[%s9019_s10 + $0x8] sm:$0xff] }
 0x86d   : > { %v1589_v57 = vadd.f32 %v1588_v35, %v1587_v61  ;;  %v1594_v43 = vrot.slane %v1593_v46, 2  ;;  %v1639_v61 = vld [vmem:[%s9018_s9 + $0x8] sm:$0xff]  ;;  %v1640_v35 = vld [vmem:[%s9018_s9 + $0x10] sm:$0x1f] }
 0x86f   : > { %v1595_v58 = vadd.f32 %v1594_v43, %v1593_v46  ;;  %v1590_v41 = vrot.slane %v1589_v57, 1  ;;  %v1735_v46 = vld [vmem:[%s9019_s10 + $0x10] sm:$0x1f] }
 0x871   : > { %v1591_v25 = vadd.f32 %v1590_v41, %v1589_v57  ;;  %v1596_v0 = vrot.slane %v1595_v58, 1  ;;  %v6500_v57 = vpop.permute.xlu1 %1879 }
 0x872   : > { %9216 = vst [vmem:[#allocation13_spill] sm:$0xff] %v6500_v57 }
 0x873   : > { %v1597_v54 = vadd.f32 %v1596_v0, %v1595_v58  ;;  %v1598_v50 = vmul.f32 0.125, %v1591_v25 }
 0x875   : > { %v1599_v52 = vmul.f32 0.125, %v1597_v54  ;;  %v1600_v23 = vsub.f32 %v6447_v16, %v1598_v50  ;;  %v6502_v43 = vpop.permute.xlu1 %1927 }
 0x876   : > { %9217 = vst [vmem:[#allocation14_spill] sm:$0xff] %v6502_v43 }
 0x877   : > { %v1601_v36 = vsub.f32 %v6453_v29, %v1599_v52  ;;  %v1602_v2 = vmul.f32 %v1600_v23, %v1600_v23 }
 0x879   : > { %v1603_v27 = vmul.f32 %v1601_v36, %v1601_v36  ;;  %v1604_v20 = vrot.slane %v1602_v2, 4  ;;  %v6504_v58 = vpop.permute.xlu1 %1874 }
 0x87a   : > { %9218 = vst [vmem:[#allocation15_spill] sm:$0xff] %v6504_v58 }
 0x87b   : > { %v1605_v63 = vadd.f32 %v1604_v20, %v1602_v2  ;;  %v1610_v55 = vrot.slane %v1603_v27, 4 }
 0x87d   : > { %v1606_v17 = vrot.slane %v1605_v63, 2  ;;  %v1611_v33 = vadd.f32 %v1610_v55, %v1603_v27  ;;  %v6506_v41 = vpop.permute.xlu1 %1981 }
 0x87e   : > { %9219 = vst [vmem:[#allocation16_spill] sm:$0xff] %v6506_v41 }
 0x87f   : > { %v1607_v51 = vadd.f32 %v1606_v17, %v1605_v63  ;;  %v1612_v19 = vrot.slane %v1611_v33, 2 }
 0x881   : > { %v1608_v49 = vrot.slane %v1607_v51, 1  ;;  %v1613_v45 = vadd.f32 %v1612_v19, %v1611_v33  ;;  %v6508_v25 = vpop.permute.xlu1 %1869 }
 0x883   : > { %v1609_v48 = vadd.f32 %v1608_v49, %v1607_v51  ;;  %v1614_v12 = vrot.slane %v1613_v45, 1 }
 0x885   : > { %v1615_v34 = vadd.f32 %v1614_v12, %v1613_v45  ;;  %v1616_v24 = vmul.f32 0.125, %v1609_v48  ;;  %v6510_v0 = vpop.permute.xlu1 %1977 }
 0x886   : > { %9220 = vst [vmem:[#allocation17_spill] sm:$0xff] %v6510_v0 }
 0x887   : > { %v1617_v1 = vmul.f32 0.125, %v1615_v34  ;;  %v1618_v26 = vadd.f32 1e-05, %v1616_v24 }
 0x889   : > { %v1619_v14 = vadd.f32 1e-05, %v1617_v1  ;;  %5610 = vrsqrt.f32 %v1618_v26  ;;  %v6512_v54 = vpop.permute.xlu1 %2059 }
 0x88a   : > { %9221 = vst [vmem:[#allocation18_spill] sm:$0xff] %v6512_v54 }
 0x88b   : > { %5612 = vrsqrt.f32 %v1619_v14 }
 0x88d   : > { %v6514_v50 = vpop.permute.xlu1 %2027 }
 0x891   : > { %v6516_v52 = vpop.permute.xlu1 %2113 }
 0x892   : > { %9222 = vst [vmem:[#allocation19_spill] sm:$0xff] %v6516_v52 }
 0x896   : > { %v5611_v37 = vpop.eup %5610 }
 0x897   : > { %v1622_v38 = vmul.f32 %v5611_v37, %v1600_v23  ;;  %v6518_v23 = vpop.permute.xlu0 %1923 }
 0x898   : > { %v5613_v56 = vpop.eup %5612 }
 0x899   : > { %v1623_v32 = vmul.f32 %v5613_v56, %v1601_v36  ;;  %v1629_v40 = vmul.f32 %v1627_v30, %v1622_v38  ;;  %v6520_v36 = vpop.permute.xlu1 %2051 }
 0x89b   : > { %v1630_v44 = vmul.f32 %v1627_v30, %v1623_v32  ;;  %v1636_v3 = vadd.f32 %v1634_v31, %v1629_v40  ;;  %v6522_v2 = vpop.permute.xlu0 %1919 }
 0x89d   : > { %v1637_v39 = vadd.f32 %v1634_v31, %v1630_v44  ;;  %v6530_v20 = vpop.permute.xlu1 %2109 }
 0x89e   : > { %9223 = vst [vmem:[#allocation20_spill] sm:$0xff] %v6530_v20 }
 0x89f   : > { %1680 = vmatprep.subr.mxu0 %v1637_v39  ;;  %1775 = vmatprep.subr.mxu1 %v1637_v39  ;;  %v6536_v63 = vpop.permute.xlu0 %2379 }
 0x8a0   : > { %1681 = vmatpush1.msra.mxu0 %v1636_v3  ;;  %1776 = vmatpush1.msra.mxu1 %v1636_v3  ;;  %9224 = vst [vmem:[#allocation21_spill] sm:$0xff] %v6536_v63 }
 0x8a1   : > { %5358 = vmatmul.mubr.msk.f32.vlgmr.msra.gmra.mxu0 %vm565_vm0, %v1638_v11  ;;  %5361 = vmatmul.mubr.msk.f32.vlgmr.msra.gmra.mxu1 %vm565_vm0, %v1733_v22  ;;  %v6538_v55 = vpop.permute.xlu1 %2163 }
 0x8a2   : > { %1720 = vmatprep.mubr.f32.mxu0 %v9212_v28  ;;  %1815 = vmatprep.mubr.f32.mxu1 %v9212_v28  ;;  %9225 = vst [vmem:[#allocation22_spill] sm:$0xff] %v6538_v55 }
 0x8a3   : > { %v6546_v33 = vpop.permute.xlu0 %2375 }
 0x8a4   : > { %9226 = vst [vmem:[#allocation23_spill] sm:$0xff] %v6546_v33  ;;  %v5367_v33 = vld [vmem:[%s9196_s1 + $0x8] sm:$0xff] }
 0x8a5   : > { %5359 = vmatmul.mubr.msk.f32.gmra.mxu0 %vm565_vm0, %v1639_v61  ;;  %5362 = vmatmul.mubr.msk.f32.gmra.mxu1 %vm565_vm0, %v1734_v21  ;;  %v6552_v51 = vpop.permute.xlu1 %2211 }
 0x8a6   : > { %1726 = vmatprep.mubr.f32.mxu0 %v9212_v28  ;;  %1821 = vmatprep.mubr.f32.mxu1 %v9212_v28  ;;  %9227 = vst [vmem:[#allocation24_spill] sm:$0xff] %v6552_v51 }
 0x8a7   : > { %v6560_v49 = vpop.permute.xlu0 %1973 }
 0x8a9   : > { %5360 = vmatmul.mubr.msk.f32.gmra.mxu0 %vm565_vm0, %v1640_v35  ;;  %5363 = vmatmul.mubr.msk.f32.gmra.mxu1 %vm565_vm0, %v1735_v46  ;;  %v6562_v45 = vpop.permute.xlu1 %2269 }
 0x8aa   : > { %2876 = vmatprep.mubr.f32.mxu0 %v9212_v28  ;;  %3018 = vmatprep.mubr.f32.mxu1 %v9212_v28  ;;  %9228 = vst [vmem:[#allocation25_spill] sm:$0xff] %v6562_v45 }
 0x8ab   : > { %v6568_v48 = vpop.permute.xlu0 %2429 }
 0x8ac   : > { %9229 = vst [vmem:[#allocation26_spill] sm:$0xff] %v6568_v48 }
 0x8ad   : > { %v6574_v12 = vpop.permute.xlu1 %2265 }
 0x8ae   : > { %9230 = vst [vmem:[#allocation27_spill] sm:$0xff] %v6574_v12 }
 0x8af   : > { %v6580_v34 = vpop.permute.xlu0 %2035 }
 0x8b0   : > { %9231 = vst [vmem:[#allocation28_spill] sm:$0xff] %v6580_v34 }
 0x8b1   : > { %v6582_v24 = vpop.permute.xlu1 %2261 }
 0x8b2   : > { %9232 = vst [vmem:[#allocation29_spill] sm:$0xff] %v6582_v24 }
 0x8b3   : > { %v6588_v1 = vpop.permute.xlu0 %2031 }
 0x8b4   : > { %9233 = vst [vmem:[#allocation30_spill] sm:$0xff] %v6588_v1  ;;  %v9266_v1 = vmov 1  }
 0x8b5   : > { %v6594_v26 = vpop.permute.xlu1 %2383 }
 0x8b6   : > { %9234 = vst [vmem:[#allocation31_spill] sm:$0xff] %v6594_v26 }
 0x8b7   : > { %v6598_v37 = vpop.permute.xlu0 %2491 }
 0x8b8   : > { %9235 = vst [vmem:[#allocation32_spill] sm:$0xff] %v6598_v37 }
 0x8b9   : > { %v6604_v30 = vpop.permute.xlu1 %2330 }
 0x8ba   : > { %9236 = vst [vmem:[#allocation33_spill] sm:$0xff] %v6604_v30 }
 0x8bb   : > { %v6610_v38 = vpop.permute.xlu0 %2487 }
 0x8bc   : > { %9237 = vst [vmem:[#allocation34_spill] sm:$0xff] %v6610_v38 }
 0x8bd   : > { %v6618_v32 = vpop.permute.xlu1 %2437 }
 0x8be   : > { %9238 = vst [vmem:[#allocation35_spill] sm:$0xff] %v6618_v32 }
 0x8bf   : > { %v6620_v40 = vpop.permute.xlu0 %2055 }
 0x8c1   : > { %v6626_v44 = vpop.permute.xlu1 %2325 }
 0x8c3   : > { %v6632_v31 = vpop.permute.xlu0 %2511 }
 0x8c5   : > { %v6640_v3 = vpop.permute.xlu1 %2433 }
 0x8c6   : > { %9239 = vst [vmem:[#allocation36_spill] sm:$0xff] %v6640_v3 }
 0x8c7   : > { %v6638_v39 = vpop.permute.xlu0 %2105 }
 0x8c9   : > { %v6650_v61 = vpop.permute.xlu1 %2515 }
 0x8ca   : > { %9241 = vst [vmem:[#allocation38_spill] sm:$0xff] %v6650_v61 }
 0x8cb   : > { %v6646_v11 = vpop.permute.xlu0 %2561 }
 0x8cc   : > { %9240 = vst [vmem:[#allocation37_spill] sm:$0xff] %v6646_v11 }
 0x8cd   : > { %v6662_v35 = vpop.permute.xlu1 %2483 }
 0x8ce   : > { %9243 = vst [vmem:[#allocation40_spill] sm:$0xff] %v6662_v35 }
 0x8cf   : > { %v6660_v21 = vpop.permute.xlu0 %2167 }
 0x8d0   : > { %9242 = vst [vmem:[#allocation39_spill] sm:$0xff] %v6660_v21 }
 0x8d1   : > { %v6672_v7 = vpop.permute.xlu1 %2569 }
 0x8d2   : > { %9244 = vst [vmem:[#allocation41_spill] sm:$0xff] %v6672_v7 }
 0x8d3   : > { %v6668_v46 = vpop.permute.xlu0 %2159 }
 0x8d5   : > { %v6684_v29 = vpop.permute.xlu1 %2507 }
 0x8d7   : > { %v6682_v28 = vpop.permute.xlu0 %2623 }
 0x8d8   : > { %9245 = vst [vmem:[#allocation42_spill] sm:$0xff] %v6682_v28 }
 0x8d9   : > { %v6690_v16 = vpop.permute.xlu1 %2565 }
 0x8da   : > { %9246 = vst [vmem:[#allocation43_spill] sm:$0xff] %v6690_v16 }
 0x8db   : > { %v6692_v7 = vpop.permute.xlu0 %2615 }
 0x8dc   : > { %9247 = vst [vmem:[#allocation44_spill] sm:$0xff] %v6692_v7 }
 0x8dd   : > { %v6704_v28 = vpop.permute.xlu1 %2619 }
 0x8de   : > { %9248 = vst [vmem:[#allocation45_spill] sm:$0xff] %v6704_v28 }
 0x8df   : > { %v6706_v32 = vpop.permute.xlu0 %2215 }
 0x8e0   : > { %9249 = vst [vmem:[#allocation46_spill] sm:$0xff] %v6706_v32 }
 0x8e1   : > { %v6714_v16 = vpop.permute.xlu1 %2667 }
 0x8e2   : > { %9251 = vst [vmem:[#allocation48_spill] sm:$0xff] %v6714_v16 }
 0x8e3   : > { %v6716_v7 = vpop.permute.xlu0 %2207 }
 0x8e4   : > { %9252 = vst [vmem:[#allocation49_spill] sm:$0xff] %v6716_v7 }
 0x8e5   : > { %v6728_v45 = vpop.permute.xlu1 %2725 }
 0x8e6   : > { %9254 = vst [vmem:[#allocation51_spill] sm:$0xff] %v6728_v45 }
 0x8e7   : > { %v6730_v32 = vpop.permute.xlu0 %2671 }
 0x8e8   : > { %9255 = vst [vmem:[#allocation52_spill] sm:$0xff] %v6730_v32 }
 0x961   : > { %v6524_v27 = vpop.f32.mrf.mxu0  ;;  %v6544_v17 = vpop.f32.mrf.mxu1 }
 0x962   : > { %2074 = vrot.lane.b32.xlu0 %v6524_v27, %s9202_s28  ;;  %1837 = vrot.lane.b32.xlu1 %v6524_v27, %s9203_s22 }
 0x963   : > { %v6554_v19 = vpop.f32.mrf.mxu0  ;;  %v6596_v14 = vpop.f32.mrf.mxu1 }
 0x965   : > { %v6612_v56 = vpop.f32.mrf.mxu0  ;;  %v6648_v22 = vpop.f32.mrf.mxu1 }
 0x966   : > { %2128 = vrot.lane.b32.xlu0 %v6524_v27, %s9199_s25  ;;  %1894 = vrot.lane.b32.xlu1 %v6524_v27, %s9205_s18 }
 0x967   : > { %v6670_v8 = vpop.f32.mrf.mxu0  ;;  %v6694_v37 = vpop.f32.mrf.mxu1 }
 0x969   : > { %v6708_v26 = vpop.f32.mrf.mxu0  ;;  %v6722_v28 = vpop.f32.mrf.mxu1 }
 0x96a   : > { %2182 = vrot.lane.b32.xlu0 %v6524_v27, %s9200_s0  ;;  %1942 = vrot.lane.b32.xlu1 %v6524_v27, %s9201_s27  ;;  %9250 = vst [vmem:[#allocation47_spill] sm:$0xff] %v6708_v26  ;;  %9253 = vst [vmem:[#allocation50_spill] sm:$0xff] %v6722_v28 }
 0x96b   : > { %v6732_v16 = vpop.f32.mrf.mxu0  ;;  %v6779_v57 = vpop.f32.mrf.mxu1 }
 0x96c   : > { %9256 = vst [vmem:[#allocation53_spill] sm:$0xff] %v6732_v16  ;;  %9260 = vst [vmem:[#allocation57_spill] sm:$0xff] %v6779_v57 }
 0x96e   : > { %2530 = vrot.lane.b32.xlu0 %v6544_v17, %s9202_s28  ;;  %1996 = vrot.lane.b32.xlu1 %v6524_v27, %s9198_s26 }
 0x972   : > { %2230 = vrot.lane.b32.xlu1 %v6524_v27, %s9213_s15  ;;  %1896 = vrot.lane.b32.xlu0 %v6554_v19, %s9205_s18 }
 0x976   : > { %2293 = vrot.lane.b32.xlu1 %v6544_v17, %s9203_s22  ;;  %1944 = vrot.lane.b32.xlu0 %v6554_v19, %s9201_s27 }
 0x97a   : > { %2350 = vrot.lane.b32.xlu1 %v6544_v17, %s9205_s18  ;;  %1998 = vrot.lane.b32.xlu0 %v6554_v19, %s9198_s26 }
 0x97e   : > { %2398 = vrot.lane.b32.xlu1 %v6544_v17, %s9201_s27  ;;  %2076 = vrot.lane.b32.xlu0 %v6554_v19, %s9202_s28 }
 0x982   : > { %2452 = vrot.lane.b32.xlu1 %v6544_v17, %s9198_s26  ;;  %2130 = vrot.lane.b32.xlu0 %v6554_v19, %s9199_s25 }
 0x986   : > { %2184 = vrot.lane.b32.xlu0 %v6554_v19, %s9200_s0  ;;  %1839 = vrot.lane.b32.xlu1 %v6554_v19, %s9203_s22 }
 0x98a   : > { %2352 = vrot.lane.b32.xlu0 %v6596_v14, %s9205_s18  ;;  %2232 = vrot.lane.b32.xlu1 %v6554_v19, %s9213_s15 }
 0x98e   : > { %2400 = vrot.lane.b32.xlu0 %v6596_v14, %s9201_s27  ;;  %2295 = vrot.lane.b32.xlu1 %v6596_v14, %s9203_s22 }
 0x992   : > { %2454 = vrot.lane.b32.xlu0 %v6596_v14, %s9198_s26  ;;  %1841 = vrot.lane.b32.xlu1 %v6612_v56, %s9203_s22 }
 0x996   : > { %2532 = vrot.lane.b32.xlu0 %v6596_v14, %s9202_s28  ;;  %2000 = vrot.lane.b32.xlu1 %v6612_v56, %s9198_s26 }
 0x99a   : > { %2586 = vrot.lane.b32.xlu0 %v6596_v14, %s9199_s25  ;;  %2078 = vrot.lane.b32.xlu1 %v6612_v56, %s9202_s28 }
 0x99e   : > { %1898 = vrot.lane.b32.xlu0 %v6612_v56, %s9205_s18  ;;  %2132 = vrot.lane.b32.xlu1 %v6612_v56, %s9199_s25 }
 0x9a2   : > { %1946 = vrot.lane.b32.xlu0 %v6612_v56, %s9201_s27  ;;  %2234 = vrot.lane.b32.xlu1 %v6612_v56, %s9213_s15 }
 0x9a6   : > { %2186 = vrot.lane.b32.xlu0 %v6612_v56, %s9200_s0  ;;  %2297 = vrot.lane.b32.xlu1 %v6648_v22, %s9203_s22 }
 0x9aa   : > { %2354 = vrot.lane.b32.xlu0 %v6648_v22, %s9205_s18  ;;  %2456 = vrot.lane.b32.xlu1 %v6648_v22, %s9198_s26 }
 0x9ae   : > { %2402 = vrot.lane.b32.xlu0 %v6648_v22, %s9201_s27  ;;  %2534 = vrot.lane.b32.xlu1 %v6648_v22, %s9202_s28 }
 0x9b2   : > { %2588 = vrot.lane.b32.xlu1 %v6648_v22, %s9199_s25  ;;  %1843 = vrot.lane.b32.xlu0 %v6670_v8, %s9203_s22 }
 0x9b6   : > { %1900 = vrot.lane.b32.xlu1 %v6670_v8, %s9205_s18  ;;  %2002 = vrot.lane.b32.xlu0 %v6670_v8, %s9198_s26 }
 0x9ba   : > { %1948 = vrot.lane.b32.xlu1 %v6670_v8, %s9201_s27  ;;  %2236 = vrot.lane.b32.xlu0 %v6670_v8, %s9213_s15 }
 0x9be   : > { %2080 = vrot.lane.b32.xlu1 %v6670_v8, %s9202_s28  ;;  %2299 = vrot.lane.b32.xlu0 %v6694_v37, %s9203_s22 }
 0x9c2   : > { %2134 = vrot.lane.b32.xlu1 %v6670_v8, %s9199_s25  ;;  %2458 = vrot.lane.b32.xlu0 %v6694_v37, %s9198_s26 }
 0x9c6   : > { %2188 = vrot.lane.b32.xlu1 %v6670_v8, %s9200_s0  ;;  %1902 = vrot.lane.b32.xlu0 %v6708_v26, %s9205_s18 }
 0x9ca   : > { %2356 = vrot.lane.b32.xlu1 %v6694_v37, %s9205_s18  ;;  %2238 = vrot.lane.b32.xlu0 %v6708_v26, %s9213_s15 }
 0x9ce   : > { %2404 = vrot.lane.b32.xlu1 %v6694_v37, %s9201_s27  ;;  %2358 = vrot.lane.b32.xlu0 %v6722_v28, %s9205_s18 }
 0x9d2   : > { %2536 = vrot.lane.b32.xlu1 %v6694_v37, %s9202_s28  ;;  %1952 = vrot.lane.b32.xlu0 %v6732_v16, %s9201_s27 }
 0x9d4   : > { %v6738_v21 = vpop.permute.xlu0 %2074  ;;  %v6740_v38 = vpop.permute.xlu1 %1837 }
 0x9d6   : > { %2590 = vrot.lane.b32.xlu1 %v6694_v37, %s9199_s25  ;;  %2084 = vrot.lane.b32.xlu0 %v6732_v16, %s9202_s28 }
 0x9d8   : > { %v6746_v45 = vpop.permute.xlu0 %2128  ;;  %v6748_v32 = vpop.permute.xlu1 %1894 }
 0x9da   : > { %1845 = vrot.lane.b32.xlu1 %v6708_v26, %s9203_s22  ;;  %2663 = vperm.xlu0 %5530, %v6402_v15  }
 0x9dc   : > { %v6753_v52 = vpop.permute.xlu0 %2182  ;;  %v6755_v3 = vpop.permute.xlu1 %1942 }
 0x9dd   : > { %9257 = vst [vmem:[#allocation54_spill] sm:$0xff] %v6753_v52 }
 0x9de   : > { %1950 = vrot.lane.b32.xlu1 %v6708_v26, %s9201_s27  ;;  %5533 = vset.pattern.permute.xlu0 %v9210_v10 }
 0x9df   : > { %2335 = vperm.xlu0 %5533, %v6409_v18  }
 0x9e0   : > { %v6761_v63 = vpop.permute.xlu0 %2530  ;;  %v6763_v30 = vpop.permute.xlu1 %1996 }
 0x9e1   : > { %9258 = vst [vmem:[#allocation55_spill] sm:$0xff] %v6761_v63 }
 0x9e2   : > { %2004 = vrot.lane.b32.xlu1 %v6708_v26, %s9198_s26 }
 0x9e3   : > { %2584 = vrot.lane.b32.xlu0 %v6544_v17, %s9199_s25 }
 0x9e4   : > { %v6769_v34 = vpop.permute.xlu1 %2230  ;;  %v6771_v41 = vpop.permute.xlu0 %1896 }
 0x9e5   : > { %9259 = vst [vmem:[#allocation56_spill] sm:$0xff] %v6769_v34  ;;  %v1906_v58 = vsel %vm737_vm3, %v6748_v32, %v6771_v41 }
 0x9e6   : > { %2082 = vrot.lane.b32.xlu1 %v6708_v26, %s9202_s28  ;;  %v1931_v41 = vmul.f32 %v6522_v2, %v1906_v58 }
 0x9e7   : > { %2694 = vrot.lane.b32.xlu0 %v6722_v28, %s9213_s15 }
 0x9e8   : > { %v6777_v18 = vpop.permute.xlu1 %2293  ;;  %v6785_v43 = vpop.permute.xlu0 %1944 }
 0x9ea   : > { %2136 = vrot.lane.b32.xlu1 %v6708_v26, %s9199_s25 }
 0x9eb   : > { %2303 = vrot.lane.b32.xlu0 %v6779_v57, %s9203_s22 }
 0x9ec   : > { %v6787_v11 = vpop.permute.xlu1 %2350  ;;  %v6795_v63 = vpop.permute.xlu0 %1998 }
 0x9ed   : > { %9261 = vst [vmem:[#allocation58_spill] sm:$0xff] %v6787_v11 }
 0x9ee   : > { %2190 = vrot.lane.b32.xlu1 %v6708_v26, %s9200_s0 }
 0x9ef   : > { %2408 = vrot.lane.b32.xlu0 %v6779_v57, %s9201_s27 }
 0x9f0   : > { %v6793_v12 = vpop.permute.xlu1 %2398  ;;  %v6807_v54 = vpop.permute.xlu0 %2076 }
 0x9f2   : > { %2301 = vrot.lane.b32.xlu1 %v6722_v28, %s9203_s22 }
 0x9f3   : > { %2692 = vrot.lane.b32.xlu0 %v6694_v37, %s9213_s15 }
 0x9f4   : > { %v6801_v61 = vpop.permute.xlu1 %2452  ;;  %v6817_v35 = vpop.permute.xlu0 %2130 }
 0x9f5   : > { %9262 = vst [vmem:[#allocation59_spill] sm:$0xff] %v6801_v61 }
 0x9f6   : > { %2406 = vrot.lane.b32.xlu1 %v6722_v28, %s9201_s27 }
 0x9f7   : > { %2540 = vrot.lane.b32.xlu0 %v6779_v57, %s9202_s28 }
 0x9f8   : > { %v6809_v26 = vpop.permute.xlu1 %1839  ;;  %v6829_v48 = vpop.permute.xlu0 %2184 }
 0x9f9   : > { %9264 = vst [vmem:[#allocation61_spill] sm:$0xff] %v6829_v48 }
 0x9fa   : > { %2460 = vrot.lane.b32.xlu1 %v6722_v28, %s9198_s26 }
 0x9fb   : > { %2642 = vrot.lane.b32.xlu0 %v6648_v22, %s9200_s0 }
 0x9fc   : > { %v6815_v51 = vpop.permute.xlu1 %2232  ;;  %v6840_v24 = vpop.permute.xlu0 %2352 }
 0x9fd   : > { %9265 = vst [vmem:[#allocation62_spill] sm:$0xff] %v6840_v24 }
 0x9fe   : > { %2538 = vrot.lane.b32.xlu1 %v6722_v28, %s9202_s28 }
 0x9ff   : > { %2640 = vrot.lane.b32.xlu0 %v6596_v14, %s9200_s0 }
 0xa00   : > { %v6823_v55 = vpop.permute.xlu1 %2295  ;;  %v6849_v7 = vpop.permute.xlu0 %2400 }
 0xa01   : > { %9263 = vst [vmem:[#allocation60_spill] sm:$0xff] %v6823_v55  ;;  %9268 = vst [vmem:[#allocation64_spill] sm:$0xff] %v6849_v7 }
 0xa02   : > { %2592 = vrot.lane.b32.xlu1 %v6722_v28, %s9199_s25 }
 0xa03   : > { %2638 = vrot.lane.b32.xlu0 %v6544_v17, %s9200_s0 }
 0xa04   : > { %v6831_v20 = vpop.permute.xlu1 %1841  ;;  %v6856_v5 = vpop.permute.xlu0 %2454 }
 0xa05   : > { %9271 = vst [vmem:[#allocation67_spill] sm:$0xff] %v6856_v5 }
 0xa06   : > { %1847 = vrot.lane.b32.xlu1 %v6732_v16, %s9203_s22 }
 0xa07   : > { %2929 = vperm.xlu0 %5533, %v5367_v33  }
 0xa08   : > { %v6838_v61 = vpop.permute.xlu1 %2000 }
 0xa0a   : > { %1904 = vrot.lane.b32.xlu1 %v6732_v16, %s9205_s18 }
 0xa0b   : > { %5535 = vset.pattern.permute.xlu0 %v9266_v1 }
 0xa0c   : > { %v6845_v55 = vpop.permute.xlu1 %2078 }
 0xa0d   : > { %9267 = vst [vmem:[#allocation63_spill] sm:$0xff] %v6845_v55  ;;  %v6864_v55 = vpop.permute.xlu0 %2532 }
 0xa0e   : > { %2006 = vrot.lane.b32.xlu1 %v6732_v16, %s9198_s26  ;;  %9273 = vst [vmem:[#allocation69_spill] sm:$0xff] %v6864_v55 }
 0xa10   : > { %v6851_v6 = vpop.permute.xlu1 %2132 }
 0xa11   : > { %9269 = vst [vmem:[#allocation65_spill] sm:$0xff] %v6851_v6 }
 0xa12   : > { %2721 = vperm.xlu1 %5532, %v6396_v42  }
 0xa14   : > { %v6854_v33 = vpop.permute.xlu1 %2234 }
 0xa15   : > { %9270 = vst [vmem:[#allocation66_spill] sm:$0xff] %v6854_v33  ;;  %v6872_v33 = vpop.permute.xlu0 %2586 }
 0xa16   : > { %2646 = vrot.lane.b32.xlu1 %v6722_v28, %s9200_s0  ;;  %9276 = vst [vmem:[#allocation72_spill] sm:$0xff] %v6872_v33 }
 0xa18   : > { %v6860_v24 = vpop.permute.xlu1 %2297 }
 0xa19   : > { %9272 = vst [vmem:[#allocation68_spill] sm:$0xff] %v6860_v24  ;;  %v6880_v24 = vpop.permute.xlu0 %1898 }
 0xa1a   : > { %2644 = vrot.lane.b32.xlu1 %v6694_v37, %s9200_s0 }
 0xa1c   : > { %v6866_v11 = vpop.permute.xlu1 %2456 }
 0xa1d   : > { %9274 = vst [vmem:[#allocation70_spill] sm:$0xff] %v6866_v11 }
 0xa1e   : > { %2138 = vrot.lane.b32.xlu1 %v6732_v16, %s9199_s25 }
 0xa20   : > { %v6870_v42 = vpop.permute.xlu1 %2534 }
 0xa21   : > { %9275 = vst [vmem:[#allocation71_spill] sm:$0xff] %v6870_v42  ;;  %v6888_v42 = vpop.permute.xlu0 %1946 }
 0xa22   : > { %2192 = vrot.lane.b32.xlu1 %v6732_v16, %s9200_s0 }
 0xa24   : > { %v6876_v28 = vpop.permute.xlu1 %2588 }
 0xa25   : > { %9277 = vst [vmem:[#allocation73_spill] sm:$0xff] %v6876_v28  ;;  %v6896_v28 = vpop.permute.xlu0 %2186 }
 0xa26   : > { %2240 = vrot.lane.b32.xlu1 %v6732_v16, %s9213_s15  ;;  %9279 = vst [vmem:[#allocation75_spill] sm:$0xff] %v6896_v28 }
 0xa28   : > { %v6882_v55 = vpop.permute.xlu1 %1900 }
 0xa29   : > { %v6904_v6 = vpop.permute.xlu0 %2354 }
 0xa2a   : > { %2360 = vrot.lane.b32.xlu1 %v6779_v57, %s9205_s18  ;;  %9282 = vst [vmem:[#allocation78_spill] sm:$0xff] %v6904_v6 }
 0xa2c   : > { %v6886_v11 = vpop.permute.xlu1 %1948 }
 0xa2e   : > { %2717 = vperm.xlu1 %5532, %v6402_v15  }
 0xa30   : > { %v6891_v33 = vpop.permute.xlu1 %2080 }
 0xa31   : > { %9278 = vst [vmem:[#allocation74_spill] sm:$0xff] %v6891_v33  ;;  %v1915_v33 = vsel %vm737_vm3, 0.0, %v6748_v32  ;;  %v2086_v32 = vsel %vm920_vm9, %v6738_v21, %v6807_v54  ;;  %v2062_v21 = vmul.f32 %v6520_v36, %v6524_v27  ;;  %v1955_v27 = vsel %vm786_vm5, %v6888_v42, %v6886_v11 }
 0xa32   : > { %2462 = vrot.lane.b32.xlu1 %v6779_v57, %s9198_s26  ;;  %v1930_v48 = vmul.f32 %v6522_v2, %v1915_v33  ;;  %v7063_v11 = vmul.f32 %v6620_v40, %v6670_v8  ;;  %v2419_v8 = vsel %vm786_vm5, 0.0, %v6793_v12 }
 0xa33   : > { %5534 = vset.pattern.permute.xlu1 %v9210_v10  ;;  %v6912_v10 = vpop.permute.xlu0 %2402 }
 0xa34   : > { %v6898_v16 = vpop.permute.xlu1 %2134  ;;  %9284 = vst [vmem:[#allocation80_spill] sm:$0xff] %v6912_v10 }
 0xa35   : > { %9280 = vst [vmem:[#allocation76_spill] sm:$0xff] %v6898_v16 }
 0xa36   : > { %2690 = vrot.lane.b32.xlu1 %v6648_v22, %s9213_s15 }
 0xa38   : > { %v6902_v5 = vpop.permute.xlu1 %2188 }
 0xa39   : > { %9281 = vst [vmem:[#allocation77_spill] sm:$0xff] %v6902_v5  ;;  %v6920_v5 = vpop.permute.xlu0 %1843 }
 0xa3a   : > { %2594 = vrot.lane.b32.xlu1 %v6779_v57, %s9199_s25 }
 0xa3c   : > { %v6908_v15 = vpop.permute.xlu1 %2356 }
 0xa3d   : > { %9283 = vst [vmem:[#allocation79_spill] sm:$0xff] %v6908_v15  ;;  %v6928_v15 = vpop.permute.xlu0 %2002 }
 0xa3e   : > { %2648 = vrot.lane.b32.xlu1 %v6779_v57, %s9200_s0 }
 0xa40   : > { %v6914_v28 = vpop.permute.xlu1 %2404 }
 0xa41   : > { %9285 = vst [vmem:[#allocation81_spill] sm:$0xff] %v6914_v28 }
 0xa42   : > { %2696 = vrot.lane.b32.xlu1 %v6779_v57, %s9213_s15  ;;  %v6940_v57 = vld [vmem:[%s9013_s4 + $0x20] sm:$0xff] }
 0xa43   : > { %3133 = vperm.xlu0 %5535, %v6940_v57  }
 0xa44   : > { %v6918_v7 = vpop.permute.xlu1 %2536 }
 0xa45   : > { %9286 = vst [vmem:[#allocation82_spill] sm:$0xff] %v6918_v7  ;;  %v5368_v7 = vld [vmem:[%s9011_s2 + $0x8] sm:$0xff] }
 0xa46   : > { %2688 = vrot.lane.b32.xlu1 %v6596_v14, %s9213_s15 }
 0xa47   : > { %5537 = vset.pattern.permute.xlu0 %v9204_v9  ;;  %v1963_v9 = vsel %vm786_vm5, 0.0, %v6755_v3 }
 0xa48   : > { %v6924_v6 = vpop.permute.xlu1 %2590  ;;  %3187 = vperm.xlu0 %5537, %v6940_v57   ;;  %v1966_v52 = vmul.f32 %v6049_v59, %v1963_v9 }
 0xa49   : > { %9287 = vst [vmem:[#allocation83_spill] sm:$0xff] %v6924_v6  ;;  %v6943_v6 = vpop.permute.xlu0 %2236 }
 0xa4a   : > { %2686 = vrot.lane.b32.xlu1 %v6544_v17, %s9213_s15  ;;  %9290 = vst [vmem:[#allocation86_spill] sm:$0xff] %v6943_v6 }
 0xa4c   : > { %v6930_v10 = vpop.permute.xlu1 %1845 }
 0xa4d   : > { %9288 = vst [vmem:[#allocation84_spill] sm:$0xff] %v6930_v10  ;;  %v6958_v10 = vpop.permute.xlu0 %2299 }
 0xa4e   : > { %2936 = vperm.xlu1 %5534, %v5368_v7   ;;  %v1849_v7 = vsel %vm679_vm2, %v6740_v38, %v6809_v26  ;;  %9292 = vst [vmem:[#allocation88_spill] sm:$0xff] %v6958_v10  ;;  %v2017_v26 = vsel %vm841_vm8, 0.0, %v6763_v30 }
 0xa4f   : > { %v1862_v10 = vmul.f32 %v6055_v4, %v1849_v7  ;;  %v2020_v0 = vmul.f32 %v6041_v53, %v2017_v26  ;;  %v1954_v7 = vsel %vm786_vm5, %v6755_v3, %v6785_v43  ;;  %v1984_v26 = vmul.f32 %v6560_v49, %v1966_v52 }
 0xa50   : > { %v6932_v28 = vpop.permute.xlu1 %1950  ;;  %v1967_v43 = vmul.f32 %v6059_v47, %v1954_v7  ;;  %v2098_v52 = vmul.f32 %v6049_v59, %v2086_v32  ;;  %v1969_v32 = vmul.f32 %v6059_v47, %v1955_v27 }
 0xa51   : > { %9289 = vst [vmem:[#allocation85_spill] sm:$0xff] %v6932_v28  ;;  %v6952_v28 = vld [vmem:[%s9013_s4 + $0x18] sm:$0xff]  ;;  %v6986_v34 = vpop.permute.xlu0 %2458  ;;  %v1883_v9 = vmul.f32 %v6508_v25, %v1862_v10  ;;  %v2008_v10 = vsel %vm841_vm8, %v6763_v30, %v6795_v63  ;;  %v7018_v63 = vmul.f32 %v6684_v29, %v6544_v17 }
 0xa52   : > { %3084 = vperm.xlu1 %5534, %v6940_v57   ;;  %3183 = vperm.xlu0 %5537, %v6952_v28   ;;  %9294 = vst [vmem:[#allocation90_spill] sm:$0xff] %v6986_v34  ;;  %v2038_v34 = vmul.f32 %v6514_v50, %v2020_v0  ;;  %v2021_v30 = vmul.f32 %v6055_v4, %v2008_v10 }
 0xa54   : > { %v6945_v16 = vpop.permute.xlu1 %2004 }
 0xa55   : > { %9291 = vst [vmem:[#allocation87_spill] sm:$0xff] %v6945_v16  ;;  %v1858_v16 = vsel %vm679_vm2, 0.0, %v6740_v38  ;;  %v7011_v2 = vpop.permute.xlu0 %1902 }
 0xa56   : > { %3079 = vperm.xlu1 %5534, %v6952_v28  }
 0xa58   : > { %v6960_v6 = vpop.permute.xlu1 %2082 }
 0xa59   : > { %9293 = vst [vmem:[#allocation89_spill] sm:$0xff] %v6960_v6  ;;  %v1861_v6 = vmul.f32 %v6041_v53, %v1858_v16  ;;  %v9295_v16 = vmov 3  }
 0xa5a   : > { %5536 = vset.pattern.permute.xlu1 %v9266_v1  ;;  %5539 = vset.pattern.permute.xlu0 %v9295_v16 }
 0xa5b   : > { %3129 = vperm.xlu1 %5536, %v6952_v28   ;;  %3237 = vperm.xlu0 %5539, %v6952_v28   ;;  %v1882_v33 = vmul.f32 %v6508_v25, %v1861_v6  ;;  %v1937_v6 = vadd.f32 %v1931_v41, %v1883_v9  ;;  %v2314_v25 = vsel %vm679_vm2, 0.0, %v6777_v18  ;;  %v2140_v9 = vsel %vm975_vm10, %v6746_v45, %v6817_v35 }
 0xa5c   : > { %v6975_v38 = vpop.permute.xlu1 %2136  ;;  %v2317_v17 = vmul.f32 %v6041_v53, %v2314_v25  ;;  %v1850_v41 = vsel %vm679_vm2, %v6831_v20, %v6920_v5  ;;  %v2039_v5 = vmul.f32 %v6514_v50, %v2021_v30  ;;  %v9296_v30 = vld [vmem:[#allocation56_spill] sm:$0xff] }
 0xa5d   : > { %v1936_v3 = vadd.f32 %v1930_v48, %v1882_v33  ;;  %v1985_v48 = vmul.f32 %v6560_v49, %v1967_v43  ;;  %v2063_v33 = vmul.f32 %v6520_v36, %v6554_v19  ;;  %v7043_v36 = vmul.f32 %v6620_v40, %v6612_v56 }
 0xa5e   : > { %v2116_v19 = vmul.f32 %v6638_v39, %v2098_v52  ;;  %v1907_v56 = vsel %vm737_vm3, %v6880_v24, %v6882_v55  ;;  %v1864_v43 = vmul.f32 %v6055_v4, %v1850_v41  ;;  %v7070_v50 = vmul.f32 %v6626_v44, %v2317_v17 }
 0xa5f   : > { %5538 = vset.pattern.permute.xlu1 %v9295_v16  ;;  %5540 = vset.pattern.permute.xlu0 %v9206_v13  ;;  %v1990_v58 = vadd.f32 %v1984_v26, %v1936_v3  ;;  %v7031_v26 = vmul.f32 %v6684_v29, %v6596_v14  ;;  %v1991_v49 = vadd.f32 %v1985_v48, %v1937_v6  ;;  %v7067_v3 = vpop.permute.xlu0 %2238 }
 0xa60   : > { %v6994_v1 = vpop.permute.xlu1 %2190  ;;  %3241 = vperm.xlu1 %5538, %v6940_v57   ;;  %3265 = vperm.xlu0 %5540, %v6940_v57   ;;  %v7047_v29 = vmul.f32 %v6632_v31, %v6648_v22  ;;  %v2152_v14 = vmul.f32 %v6041_v53, %v2140_v9  ;;  %v7076_v55 = vmul.f32 %v6632_v31, %v6694_v37  ;;  %v1859_v37 = vsel %vm679_vm2, 0.0, %v6831_v20  ;;  %v9298_v20 = vld [vmem:[#allocation17_spill] sm:$0xff] }
 0xa61   : > { %v2044_v7 = vadd.f32 %v2038_v34, %v1990_v58  ;;  %v2095_v34 = vsel %vm920_vm9, %v6807_v54, 0.0  ;;  %v2149_v54 = vsel %vm975_vm10, %v6817_v35, 0.0  ;;  %v2045_v10 = vadd.f32 %v2039_v5, %v1991_v49  ;;  %v9299_v49 = vld [vmem:[#allocation61_spill] sm:$0xff] }
 0xa62   : > { %v2099_v40 = vmul.f32 %v6059_v47, %v2095_v34  ;;  %v1933_v58 = vmul.f32 %v6518_v23, %v1907_v56  ;;  %v2170_v35 = vmul.f32 %v6668_v46, %v2152_v14  ;;  %v1964_v31 = vsel %vm786_vm5, 0.0, %v6888_v42  ;;  %v9300_v42 = vld [vmem:[#allocation54_spill] sm:$0xff] }
 0xa63   : > { %v2068_v22 = vadd.f32 %v2062_v21, %v2044_v7  ;;  %v2009_v52 = vsel %vm841_vm8, %v6838_v61, %v6928_v15  ;;  %v2153_v48 = vmul.f32 %v6055_v4, %v2149_v54  ;;  %v2242_v21 = vsel %vm1079_vm12, %v9296_v30, %v6815_v51  ;;  %v9297_v7 = vld [vmem:[#allocation15_spill] sm:$0xff] }
 0xa64   : > { %v7013_v0 = vpop.permute.xlu1 %2301  ;;  %5541 = vset.pattern.permute.xlu1 %v9207_v62  ;;  %3261 = vperm.xlu0 %5540, %v6952_v28   ;;  %v1885_v9 = vmul.f32 %v9297_v7, %v1864_v43  ;;  %v1987_v17 = vmul.f32 %v9298_v20, %v1969_v32  ;;  %v2194_v41 = vsel %vm1030_vm11, %v9300_v42, %v9299_v49  ;;  %v2203_v15 = vsel %vm1030_vm11, %v9299_v49, 0.0  ;;  %v9301_v43 = vld [vmem:[#allocation58_spill] sm:$0xff] }
 0xa65   : > { %3319 = vperm.xlu1 %5541, %v6940_v57   ;;  %v2122_v6 = vadd.f32 %v2116_v19, %v2068_v22  ;;  %v2069_v27 = vadd.f32 %v2063_v33, %v2045_v10  ;;  %v1916_v19 = vsel %vm737_vm3, 0.0, %v6880_v24  ;;  %v1863_v5 = vmul.f32 %v6041_v53, %v1859_v37  ;;  %v7112_v22 = vpop.permute.xlu0 %2358 }
 0xa66   : > { %v1968_v34 = vmul.f32 %v6049_v59, %v1964_v31  ;;  %v1939_v14 = vadd.f32 %v1933_v58, %v1885_v9  ;;  %v2023_v56 = vmul.f32 %v6055_v4, %v2009_v52  ;;  %v2371_v32 = vsel %vm737_vm3, 0.0, %v9301_v43  ;;  %v9304_v31 = vld [vmem:[#allocation49_spill] sm:$0xff] }
 0xa67   : > { %v2117_v54 = vmul.f32 %v6638_v39, %v2099_v40  ;;  %v2176_v30 = vadd.f32 %v2170_v35, %v2122_v6  ;;  %v2254_v33 = vmul.f32 %v6049_v59, %v2242_v21  ;;  %v9302_v24 = vmov 6   ;;  %v9305_v21 = vld [vmem:[#allocation60_spill] sm:$0xff] }
 0xa68   : > { %v7050_v45 = vpop.permute.xlu1 %2406  ;;  %5542 = vset.pattern.permute.xlu0 %v9207_v62  ;;  %v9303_v37 = vmov 8   ;;  %v2218_v58 = vmul.f32 %v9304_v31, %v2194_v41  ;;  %v2018_v52 = vsel %vm841_vm8, 0.0, %v6838_v61  ;;  %v1932_v9 = vmul.f32 %v6518_v23, %v1916_v19  ;;  %v9307_v19 = vld [vmem:[#allocation29_spill] sm:$0xff] }
 0xa69   : > { %5544 = vset.pattern.permute.xlu1 %v9209_v60  ;;  %3315 = vperm.xlu0 %5542, %v6952_v28   ;;  %v1993_v49 = vadd.f32 %v1987_v17, %v1939_v14  ;;  %v2422_v39 = vmul.f32 %v6049_v59, %v2419_v8  ;;  %v2171_v40 = vmul.f32 %v6668_v46, %v2153_v48  ;;  %v9306_v17 = vld [vmem:[#allocation30_spill] sm:$0xff] }
 0xa6a   : > { %3421 = vperm.xlu1 %5544, %v6940_v57   ;;  %v2219_v6 = vmul.f32 %v9304_v31, %v2203_v15  ;;  %v2123_v35 = vadd.f32 %v2117_v54, %v2069_v27  ;;  %v2305_v42 = vsel %vm679_vm2, %v6777_v18, %v9305_v21  ;;  %v1884_v61 = vmul.f32 %v9297_v7, %v1863_v5  ;;  %v9308_v48 = vld [vmem:[#allocation74_spill] sm:$0xff]  ;;  %v9309_v27 = vld [vmem:[#allocation59_spill] sm:$0xff]  ;;  %v7145_v5 = vpop.permute.xlu0 %1952  ;;  %v9314_v21 = vld [vmem:[#allocation64_spill] sm:$0xff] }
 0xa6b   : > { %v1986_v23 = vmul.f32 %v9298_v20, %v1968_v34  ;;  %v2041_v41 = vmul.f32 %v9306_v17, %v2023_v56  ;;  %v2272_v8 = vmul.f32 %v9307_v19, %v2254_v33  ;;  %v2022_v46 = vmul.f32 %v6041_v53, %v2018_v52  ;;  %v9310_v34 = vld [vmem:[#allocation63_spill] sm:$0xff]  ;;  %v9311_v33 = vld [vmem:[#allocation76_spill] sm:$0xff] }
 0xa6c   : > { %v7082_v25 = vpop.permute.xlu1 %2460  ;;  %v2096_v15 = vsel %vm920_vm9, %v9308_v48, 0.0  ;;  %v2473_v14 = vsel %vm841_vm8, 0.0, %v9309_v27  ;;  %v2224_v18 = vadd.f32 %v2218_v58, %v2176_v30  ;;  %v1938_v54 = vadd.f32 %v1932_v9, %v1884_v61  ;;  %v9312_v30 = vld [vmem:[#allocation62_spill] sm:$0xff] }
 0xa6d   : > { %5543 = vset.pattern.permute.xlu0 %v9302_v24  ;;  %v2047_v7 = vadd.f32 %v2041_v41, %v1993_v49  ;;  %v2318_v20 = vmul.f32 %v6055_v4, %v2305_v42  ;;  %v2087_v56 = vsel %vm920_vm9, %v9310_v34, %v9308_v48  ;;  %v2150_v31 = vsel %vm975_vm10, %v9311_v33, 0.0  ;;  %v9315_v41 = vld [vmem:[#allocation65_spill] sm:$0xff]  ;;  %v9350_v24 = vld [vmem:[#allocation28_spill] sm:$0xff] }
 0xa6e   : > { %5546 = vset.pattern.permute.xlu1 %v9303_v37  ;;  %3373 = vperm.xlu0 %5543, %v6940_v57   ;;  %v2362_v58 = vsel %vm737_vm3, %v9301_v43, %v9312_v30  ;;  %v1992_v49 = vadd.f32 %v1986_v23, %v1938_v54  ;;  %v2410_v42 = vsel %vm786_vm5, %v6793_v12, %v9314_v21  ;;  %v9347_v37 = vld [vmem:[#allocation16_spill] sm:$0xff] }
 0xa6f   : > { %3475 = vperm.xlu1 %5546, %v6940_v57   ;;  %v2251_v57 = vsel %vm1079_vm12, %v6815_v51, 0.0  ;;  %v2177_v51 = vadd.f32 %v2171_v40, %v2123_v35  ;;  %v2101_v40 = vmul.f32 %v6059_v47, %v2096_v15  ;;  %v7162_v35 = vadd.f32 %v2272_v8, %v2224_v18  ;;  %v9317_v8 = vld [vmem:[#allocation23_spill] sm:$0xff] }
 0xa70   : > { %v7118_v10 = vpop.permute.xlu1 %2538  ;;  %v2255_v9 = vmul.f32 %v6059_v47, %v2251_v57  ;;  %v2040_v61 = vmul.f32 %v9306_v17, %v2022_v46  ;;  %v2141_v48 = vsel %vm975_vm10, %v9315_v41, %v9311_v33  ;;  %v2071_v34 = vadd.f32 %v7063_v11, %v2047_v7  ;;  %v9318_v46 = vld [vmem:[#allocation67_spill] sm:$0xff]  ;;  %v9319_v7 = vld [vmem:[#allocation20_spill] sm:$0xff]  ;;  %v9323_v41 = vld [vmem:[#allocation77_spill] sm:$0xff] }
 0xa71   : > { %9313 = vst [vmem:[#allocation56_spill] sm:$0xff] %v7162_v35  ;;  %v2100_v43 = vmul.f32 %v6049_v59, %v2087_v56  ;;  %v2155_v23 = vmul.f32 %v6055_v4, %v2150_v31  ;;  %v9316_v57 = vmov 0   ;;  %v2386_v15 = vmul.f32 %v9317_v8, %v2371_v32  ;;  %v7185_v31 = vpop.permute.xlu0 %2084 }
 0xa72   : > { %3369 = vperm.xlu0 %5543, %v6952_v28   ;;  %v2476_v12 = vmul.f32 %v6041_v53, %v2473_v14  ;;  %v2225_v18 = vadd.f32 %v2219_v6, %v2177_v51  ;;  %v2339_v17 = vmul.f32 %v6626_v44, %v2318_v20  ;;  %v2464_v11 = vsel %vm841_vm8, %v9309_v27, %v9318_v46  ;;  %v9320_v51 = vld [vmem:[#allocation26_spill] sm:$0xff]  ;;  %v9326_v46 = vld [vmem:[#allocation75_spill] sm:$0xff] }
 0xa73   : > { %3471 = vperm.xlu1 %5546, %v6952_v28   ;;  %v2046_v54 = vadd.f32 %v2040_v61, %v1992_v49  ;;  %v2119_v56 = vmul.f32 %v9319_v7, %v2101_v40  ;;  %v2154_v33 = vmul.f32 %v6041_v53, %v2141_v48  ;;  %v2387_v32 = vmul.f32 %v9317_v8, %v2362_v58  ;;  %v9321_v49 = vld [vmem:[#allocation22_spill] sm:$0xff] }
 0xa74   : > { %v7155_v52 = vpop.permute.xlu1 %2592  ;;  %v2273_v14 = vmul.f32 %v9307_v19, %v2255_v9  ;;  %v2740_v44 = vmul.f32 %v7162_v35, %v7162_v35  ;;  %v2440_v20 = vmul.f32 %v9320_v51, %v2422_v39  ;;  %v2118_v27 = vmul.f32 %v9319_v7, %v2100_v43  ;;  %v9327_v7 = vld [vmem:[#allocation24_spill] sm:$0xff] }
 0xa75   : > { %v2125_v30 = vadd.f32 %v2119_v56, %v2071_v34  ;;  %v2173_v40 = vmul.f32 %v9321_v49, %v2155_v23  ;;  %v2393_v61 = vadd.f32 %v2387_v32, %v2339_v17  ;;  %v2477_v58 = vmul.f32 %v6055_v4, %v2464_v11  ;;  %v7205_v43 = vpop.permute.xlu0 %2663  ;;  %v9328_v32 = vld [vmem:[#allocation66_spill] sm:$0xff] }
 0xa76   : > { %5545 = vset.pattern.permute.xlu0 %v9209_v60  ;;  %v7195_v21 = vadd.f32 %v2273_v14, %v2225_v18  ;;  %v2204_v19 = vsel %vm1030_vm11, %v9323_v41, 0.0  ;;  %v2392_v9 = vadd.f32 %v2386_v15, %v7070_v50  ;;  %v2070_v39 = vadd.f32 %v7043_v36, %v2046_v54  ;;  %v9325_v18 = vld [vmem:[#allocation86_spill] sm:$0xff] }
 0xa77   : > { %5548 = vset.pattern.permute.xlu1 %v9316_v57  ;;  %3417 = vperm.xlu0 %5545, %v6952_v28   ;;  %v2423_v28 = vmul.f32 %v6059_v47, %v2410_v42  ;;  %v9324_v42 = vld [vmem:[#allocation40_spill] sm:$0xff]  ;;  %v2172_v34 = vmul.f32 %v9321_v49, %v2154_v33  ;;  %v2746_v23 = vmul.f32 %v2740_v44, %v7162_v35  ;;  %v2252_v17 = vsel %vm1079_vm12, %v9325_v18, 0.0 }
 0xa78   : > { %v1848_v6 = vpop.permute.xlu1 %1847  ;;  %9322 = vst [vmem:[#allocation15_spill] sm:$0xff] %v7195_v21  ;;  %v2494_v48 = vmul.f32 %v9324_v42, %v2476_v12  ;;  %v2195_v11 = vsel %vm1030_vm11, %v9326_v46, %v9323_v41  ;;  %v2446_v50 = vadd.f32 %v2440_v20, %v2392_v9  ;;  %v2124_v15 = vadd.f32 %v2118_v27, %v2070_v39  ;;  %v9334_v39 = vld [vmem:[#allocation69_spill] sm:$0xff] }
 0xa79   : > { %v2441_v8 = vmul.f32 %v9320_v51, %v2423_v28  ;;  %v2179_v12 = vadd.f32 %v2173_v40, %v2125_v30  ;;  %v2221_v36 = vmul.f32 %v9327_v7, %v2204_v19  ;;  %v2741_v54 = vmul.f32 %v7195_v21, %v7195_v21  ;;  %v9329_v30 = vld [vmem:[#allocation47_spill] sm:$0xff]  ;;  %v9330_v40 = vld [vmem:[#allocation18_spill] sm:$0xff] }
 0xa7a   : > { %v2495_v33 = vmul.f32 %v9324_v42, %v2477_v58  ;;  %v2243_v14 = vsel %vm1079_vm12, %v9328_v32, %v9325_v18  ;;  %v2500_v28 = vadd.f32 %v2494_v48, %v2446_v50  ;;  %v2257_v51 = vmul.f32 %v6059_v47, %v2252_v17  ;;  %v9331_v19 = vld [vmem:[#allocation50_spill] sm:$0xff]  ;;  %v9333_v58 = vld [vmem:[#allocation53_spill] sm:$0xff]  ;;  %v9335_v48 = vld [vmem:[#allocation55_spill] sm:$0xff]  ;;  %v7241_v17 = vpop.permute.xlu0 %2335 }
 0xa7b   : > { %5547 = vset.pattern.permute.xlu0 %v9316_v57  ;;  %v2447_v56 = vadd.f32 %v2441_v8, %v2393_v61  ;;  %v2178_v49 = vadd.f32 %v2172_v34, %v2124_v15  ;;  %v2220_v20 = vmul.f32 %v9327_v7, %v2195_v11  ;;  %v2752_v27 = vmul.f32 0.044715, %v2746_v23  ;;  %v9332_v61 = vld [vmem:[#allocation38_spill] sm:$0xff]  ;;  %v9336_v11 = vld [vmem:[#allocation84_spill] sm:$0xff]  ;;  %v9337_v15 = vld [vmem:[#allocation57_spill] sm:$0xff] }
 0xa7c   : > { %v1905_v44 = vpop.permute.xlu1 %1904  ;;  %v7225_v41 = vmul.f32 %v9330_v40, %v9329_v30  ;;  %v7229_v9 = vmul.f32 %v9332_v61, %v9331_v19  ;;  %v7233_v42 = vmul.f32 %v9330_v40, %v9333_v58  ;;  %v2542_v8 = vsel %vm920_vm9, %v9335_v48, %v9334_v39  ;;  %v9338_v40 = vld [vmem:[#allocation27_spill] sm:$0xff] }
 0xa7d   : > { %v2551_v34 = vsel %vm920_vm9, %v9334_v39, 0.0  ;;  %v2256_v23 = vmul.f32 %v6049_v59, %v2243_v14  ;;  %v2227_v18 = vadd.f32 %v2221_v36, %v2179_v12  ;;  %v2501_v46 = vadd.f32 %v2495_v33, %v2447_v56  ;;  %v9339_v33 = vld [vmem:[#allocation85_spill] sm:$0xff] }
 0xa7e   : > { %v1860_v50 = vsel %vm679_vm2, 0.0, %v9336_v11  ;;  %v7247_v7 = vmul.f32 %v9332_v61, %v9337_v15  ;;  %v2747_v32 = vmul.f32 %v2741_v54, %v7195_v21  ;;  %v2524_v30 = vadd.f32 %v7018_v63, %v2500_v28  ;;  %v9343_v15 = vld [vmem:[#allocation14_spill] sm:$0xff] }
 0xa7f   : > { %v2275_v19 = vmul.f32 %v9338_v40, %v2257_v51  ;;  %v2226_v58 = vadd.f32 %v2220_v20, %v2178_v49  ;;  %v1851_v12 = vsel %vm679_vm2, %v9336_v11, %v1848_v6  ;;  %v2554_v36 = vmul.f32 %v6049_v59, %v2542_v8  ;;  %v9340_v51 = vld [vmem:[#allocation87_spill] sm:$0xff] }
 0xa80   : > { %v2555_v56 = vmul.f32 %v6059_v47, %v2551_v34  ;;  %v1965_v14 = vsel %vm786_vm5, 0.0, %v9339_v33  ;;  %v2007_v39 = vpop.permute.xlu1 %2006  ;;  %v2758_v61 = vadd.f32 %v2752_v27, %v7162_v35  ;;  %v2274_v54 = vmul.f32 %v9338_v40, %v2256_v23  ;;  %v9356_v35 = vld [vmem:[#allocation36_spill] sm:$0xff] }
 0xa81   : > { %v7260_v48 = vadd.f32 %v2275_v19, %v2227_v18  ;;  %v1865_v63 = vmul.f32 %v6041_v53, %v1860_v50  ;;  %v1908_v28 = vsel %vm737_vm3, %v7011_v2, %v1905_v44  ;;  %v2525_v6 = vadd.f32 %v7031_v26, %v2501_v46  ;;  %v7275_v18 = vpop.permute.xlu0 %2584  ;;  %v9342_v26 = vld [vmem:[#allocation37_spill] sm:$0xff]  ;;  %v9344_v19 = vld [vmem:[#allocation72_spill] sm:$0xff] }
 0xa82   : > { %v2019_v49 = vsel %vm841_vm8, 0.0, %v9340_v51  ;;  %v1866_v20 = vmul.f32 %v6055_v4, %v1851_v12  ;;  %v2753_v8 = vmul.f32 0.044715, %v2747_v32  ;;  %v7269_v34 = vadd.f32 %v2274_v54, %v2226_v58  ;;  %v9345_v12 = vld [vmem:[#allocation13_spill] sm:$0xff]  ;;  %v9346_v54 = vld [vmem:[#allocation68_spill] sm:$0xff] }
 0xa83   : > { %v1956_v27 = vsel %vm786_vm5, %v9339_v33, %v7145_v5  ;;  %v1970_v23 = vmul.f32 %v6049_v59, %v1965_v14  ;;  %v2010_v44 = vsel %vm841_vm8, %v9340_v51, %v2007_v39  ;;  %v2572_v46 = vmul.f32 %v9342_v26, %v2554_v36 }
 0xa84   : > { %9341 = vst [vmem:[#allocation17_spill] sm:$0xff] %v7269_v34  ;;  %v2573_v11 = vmul.f32 %v9342_v26, %v2555_v56  ;;  %v1917_v50 = vsel %vm737_vm3, 0.0, %v7011_v2  ;;  %v1935_v32 = vmul.f32 %v9343_v15, %v1908_v28  ;;  %v2605_v5 = vsel %vm975_vm10, %v9344_v19, 0.0 }
 0xa85   : > { %v2743_v58 = vmul.f32 %v7260_v48, %v7260_v48  ;;  %v1886_v33 = vmul.f32 %v9345_v12, %v1865_v63  ;;  %v2024_v14 = vmul.f32 %v6041_v53, %v2019_v49  ;;  %v1971_v36 = vmul.f32 %v6059_v47, %v1956_v27  ;;  %v9349_v49 = vld [vmem:[#allocation80_spill] sm:$0xff]  ;;  %v7311_v13 = vpop.permute.xlu0 %2694 }
 0xa86   : > { %v1887_v56 = vmul.f32 %v9345_v12, %v1866_v20  ;;  %v2025_v2 = vmul.f32 %v6055_v4, %v2010_v44  ;;  %v2759_v39 = vadd.f32 %v2753_v8, %v7195_v21  ;;  %v2315_v28 = vsel %vm679_vm2, 0.0, %v9346_v54 }
 0xa87   : > { %v2742_v51 = vmul.f32 %v7269_v34, %v7269_v34  ;;  %v1934_v26 = vmul.f32 %v9343_v15, %v1917_v50  ;;  %v1988_v63 = vmul.f32 %v9347_v37, %v1970_v23  ;;  %v7302_v57 = vadd.f32 %v2572_v46, %v2524_v30 }
 0xa88   : > { %v2420_v27 = vsel %vm786_vm5, 0.0, %v9349_v49  ;;  %v1941_v20 = vadd.f32 %v1935_v32, %v1887_v56  ;;  %v2764_v44 = vmul.f32 0.7978846, %v2758_v61  ;;  %v7308_v8 = vadd.f32 %v2573_v11, %v2525_v6  ;;  %v9351_v11 = vld [vmem:[#allocation89_spill] sm:$0xff] }
 0xa89   : > { %9348 = vst [vmem:[#allocation61_spill] sm:$0xff] %v7302_v57  ;;  %v1940_v60 = vadd.f32 %v1934_v26, %v1886_v33  ;;  %v2042_v62 = vmul.f32 %v9350_v24, %v2024_v14  ;;  %v2749_v50 = vmul.f32 %v2743_v58, %v7260_v48  ;;  %v2319_v23 = vmul.f32 %v6041_v53, %v2315_v28  ;;  %v9352_v58 = vld [vmem:[#allocation78_spill] sm:$0xff]  ;;  %v7338_v21 = vpop.permute.xlu0 %2303  ;;  %v9357_v57 = vld [vmem:[#allocation88_spill] sm:$0xff] }
 0xa8a   : > { %v1989_v30 = vmul.f32 %v9347_v37, %v1971_v36  ;;  %v2043_v46 = vmul.f32 %v9350_v24, %v2025_v2  ;;  %v2765_v15 = vmul.f32 0.7978846, %v2759_v39  ;;  %v2424_v32 = vmul.f32 %v6049_v59, %v2420_v27  ;;  %v9353_v28 = vld [vmem:[#allocation70_spill] sm:$0xff]  ;;  %v9355_v27 = vld [vmem:[#allocation21_spill] sm:$0xff] }
 0xa8b   : > { %v2748_v61 = vmul.f32 %v2742_v51, %v7269_v34  ;;  %v1994_v6 = vadd.f32 %v1988_v63, %v1940_v60  ;;  %v2088_v33 = vsel %vm920_vm9, %v9351_v11, %v7185_v31  ;;  %v7323_v14 = vmul.f32 %v6055_v4, %v2605_v5  ;;  %v9354_v51 = vld [vmem:[#allocation33_spill] sm:$0xff] }
 0xa8c   : > { %v2372_v56 = vsel %vm737_vm3, 0.0, %v9352_v58  ;;  %v2474_v37 = vsel %vm841_vm8, 0.0, %v9353_v28  ;;  %v1995_v24 = vadd.f32 %v1989_v30, %v1941_v20  ;;  %v2097_v2 = vsel %vm920_vm9, %v7185_v31, 0.0  ;;  %v9358_v31 = vld [vmem:[#allocation79_spill] sm:$0xff] }
 0xa8d   : > { %v7284_v40 = vpop.permute.xlu1 %2721  ;;  %v2048_v60 = vadd.f32 %v2042_v62, %v1994_v6  ;;  %v2755_v39 = vmul.f32 0.044715, %v2749_v50  ;;  %5614 = vtanh.f32 %v2764_v44  ;;  %v2340_v26 = vmul.f32 %v9354_v51, %v2319_v23  ;;  %v9359_v50 = vld [vmem:[#allocation81_spill] sm:$0xff] }
 0xa8e   : > { %v2102_v5 = vmul.f32 %v6049_v59, %v2088_v33  ;;  %v2049_v63 = vadd.f32 %v2043_v46, %v1995_v24  ;;  %5616 = vtanh.f32 %v2765_v15  ;;  %v2388_v11 = vmul.f32 %v9355_v27, %v2372_v56 }
 0xa8f   : > { %v2478_v16 = vmul.f32 %v6041_v53, %v2474_v37  ;;  %v2442_v20 = vmul.f32 %v9356_v35, %v2424_v32  ;;  %v2754_v30 = vmul.f32 0.044715, %v2748_v61  ;;  %v2306_v62 = vsel %vm679_vm2, %v9346_v54, %v9357_v57  ;;  %v9360_v54 = vld [vmem:[#allocation19_spill] sm:$0xff] }
 0xa90   : > { %v2363_v44 = vsel %vm737_vm3, %v9352_v58, %v9358_v31  ;;  %v2411_v23 = vsel %vm786_vm5, %v9349_v49, %v9359_v50  ;;  %v2103_v46 = vmul.f32 %v6059_v47, %v2097_v2  ;;  %v2072_v32 = vadd.f32 %v7225_v41, %v2048_v60 }
 0xa91   : > { %v7306_v12 = vpop.permute.xlu1 %2646  ;;  %v2761_v57 = vadd.f32 %v2755_v39, %v7260_v48  ;;  %v2120_v33 = vmul.f32 %v9360_v54, %v2102_v5  ;;  %v2073_v58 = vadd.f32 %v7233_v42, %v2049_v63  ;;  %v2394_v37 = vadd.f32 %v2388_v11, %v2340_v26  ;;  %v9362_v39 = vld [vmem:[#allocation39_spill] sm:$0xff] }
 0xa92   : > { %v2320_v24 = vmul.f32 %v6055_v4, %v2306_v62  ;;  %v2425_v41 = vmul.f32 %v6059_v47, %v2411_v23  ;;  %v2760_v2 = vadd.f32 %v2754_v30, %v7269_v34  ;;  %v2121_v31 = vmul.f32 %v9360_v54, %v2103_v46  ;;  %v9363_v62 = vld [vmem:[#allocation90_spill] sm:$0xff] }
 0xa93   : > { %v2448_v63 = vadd.f32 %v2442_v20, %v2394_v37  ;;  %v2126_v30 = vadd.f32 %v2120_v33, %v2072_v32  ;;  %v2767_v46 = vmul.f32 0.7978846, %v2761_v57  ;;  %v9364_v20 = vld [vmem:[#allocation82_spill] sm:$0xff] }
 0xa94   : > { %v2127_v23 = vadd.f32 %v2121_v31, %v2073_v58  ;;  %v2443_v54 = vmul.f32 %v9356_v35, %v2425_v41  ;;  %v9366_v37 = vld [vmem:[#allocation46_spill] sm:$0xff]  ;;  %v2552_v33 = vsel %vm920_vm9, %v9364_v20, 0.0 }
 0xa95   : > { %v7329_v36 = vpop.permute.xlu1 %2644  ;;  %5618 = vtanh.f32 %v2767_v46  ;;  %v2316_v46 = vsel %vm679_vm2, 0.0, %v7013_v0 }
 0xa99   : > { %v2139_v15 = vpop.permute.xlu1 %2138 }
 0xa9a   : > { %v2142_v61 = vsel %vm975_vm10, %v6975_v38, %v2139_v15  ;;  %v2151_v6 = vsel %vm975_vm10, %v2139_v15, 0.0  ;;  %v9361_v38 = vld [vmem:[#allocation34_spill] sm:$0xff]  ;;  %v2389_v15 = vmul.f32 %v9355_v27, %v2363_v44  ;;  %v2766_v44 = vmul.f32 0.7978846, %v2760_v2  ;;  %v5615_v57 = vpop.eup %5614 }
 0xa9b   : > { %v2156_v56 = vmul.f32 %v6041_v53, %v2142_v61  ;;  %v2157_v49 = vmul.f32 %v6055_v4, %v2151_v6  ;;  %v2496_v60 = vmul.f32 %v9361_v38, %v2478_v16  ;;  %v2409_v61 = vpop.permute.xlu0 %2408  ;;  %v2465_v16 = vsel %vm841_vm8, %v9353_v28, %v9363_v62  ;;  %v5617_v41 = vpop.eup %5616 }
 0xa9c   : > { %v2341_v6 = vmul.f32 %v9354_v51, %v2320_v24  ;;  %v2479_v28 = vmul.f32 %v6055_v4, %v2465_v16  ;;  %5620 = vtanh.f32 %v2766_v44  ;;  %v9368_v16 = vld [vmem:[#allocation44_spill] sm:$0xff]  ;;  %v9369_v44 = vld [vmem:[#allocation43_spill] sm:$0xff] }
 0xa9d   : > { %v2174_v50 = vmul.f32 %v9362_v39, %v2156_v56  ;;  %v2175_v5 = vmul.f32 %v9362_v39, %v2157_v49  ;;  %v2193_v42 = vpop.permute.xlu1 %2192  ;;  %v9365_v56 = vld [vmem:[#allocation71_spill] sm:$0xff]  ;;  %v2502_v2 = vadd.f32 %v2496_v60, %v2448_v63  ;;  %v2557_v60 = vmul.f32 %v6059_v47, %v2552_v33 }
 0xa9e   : > { %v2196_v26 = vsel %vm1030_vm11, %v6994_v1, %v2193_v42  ;;  %v2205_v11 = vsel %vm1030_vm11, %v2193_v42, 0.0  ;;  %v2543_v27 = vsel %vm920_vm9, %v9365_v56, %v9364_v20  ;;  %v2395_v32 = vadd.f32 %v2389_v15, %v2341_v6 }
 0xa9f   : > { %v2180_v49 = vadd.f32 %v2174_v50, %v2126_v30  ;;  %v2181_v1 = vadd.f32 %v2175_v5, %v2127_v23  ;;  %v2222_v39 = vmul.f32 %v9366_v37, %v2196_v26  ;;  %v2223_v42 = vmul.f32 %v9366_v37, %v2205_v11  ;;  %v7389_v5 = vpop.permute.xlu0 %2692 }
 0xaa0   : > { %v2449_v31 = vadd.f32 %v2443_v54, %v2395_v32  ;;  %v2556_v50 = vmul.f32 %v6049_v59, %v2543_v27  ;;  %v7395_v30 = vmul.f32 %v9368_v16, %v7323_v14  ;;  %v2497_v23 = vmul.f32 %v9361_v38, %v2479_v28 }
 0xaa1   : > { %v2241_v34 = vpop.permute.xlu1 %2240  ;;  %v2229_v15 = vadd.f32 %v2223_v42, %v2181_v1  ;;  %v7399_v63 = vadd.f32 1.0, %v5615_v57  ;;  %v2307_v6 = vsel %vm679_vm2, %v7013_v0, %v7338_v21  ;;  %v2373_v14 = vsel %vm737_vm3, 0.0, %v7112_v22  ;;  %v9371_v42 = vld [vmem:[#allocation73_spill] sm:$0xff] }
 0xaa2   : > { %v2244_v51 = vsel %vm1079_vm12, %v7067_v3, %v2241_v34  ;;  %v2253_v35 = vsel %vm1079_vm12, %v2241_v34, 0.0  ;;  %v2228_v3 = vadd.f32 %v2222_v39, %v2180_v49  ;;  %v9367_v34 = vld [vmem:[#allocation25_spill] sm:$0xff]  ;;  %v2503_v56 = vadd.f32 %v2497_v23, %v2449_v31  ;;  %v9370_v39 = vld [vmem:[#allocation83_spill] sm:$0xff] }
 0xaa3   : > { %v2258_v58 = vmul.f32 %v6049_v59, %v2244_v51  ;;  %v2259_v24 = vmul.f32 %v6059_v47, %v2253_v35  ;;  %v2526_v38 = vadd.f32 %v7047_v29, %v2502_v2  ;;  %v7413_v27 = vadd.f32 1.0, %v5617_v41  ;;  %v2541_v35 = vpop.permute.xlu0 %2540  ;;  %v9372_v31 = vld [vmem:[#allocation31_spill] sm:$0xff] }
 0xaa4   : > { %v2574_v49 = vmul.f32 %v9369_v44, %v2556_v50  ;;  %v2597_v28 = vsel %vm975_vm10, %v9371_v42, %v9370_v39  ;;  %v2321_v29 = vmul.f32 %v6041_v53, %v2316_v46  ;;  %v2322_v32 = vmul.f32 %v6055_v4, %v2307_v6 }
 0xaa5   : > { %v2276_v26 = vmul.f32 %v9367_v34, %v2258_v58  ;;  %v2277_v11 = vmul.f32 %v9367_v34, %v2259_v24  ;;  %v2361_v62 = vpop.permute.xlu1 %2360  ;;  %v2421_v51 = vsel %vm786_vm5, 0.0, %v7050_v45  ;;  %v2575_v57 = vmul.f32 %v9369_v44, %v2557_v60 }
 0xaa6   : > { %v2364_v21 = vsel %vm737_vm3, %v7112_v22, %v2361_v62  ;;  %v2412_v33 = vsel %vm786_vm5, %v7050_v45, %v2409_v61  ;;  %v2527_v24 = vadd.f32 %v7076_v55, %v2503_v56  ;;  %v2606_v41 = vsel %vm975_vm10, %v9370_v39, 0.0  ;;  %v5619_v56 = vpop.eup %5618 }
 0xaa7   : > { %v7406_v54 = vadd.f32 %v2276_v26, %v2228_v3  ;;  %v7408_v20 = vadd.f32 %v2277_v11, %v2229_v15  ;;  %v2475_v2 = vsel %vm841_vm8, 0.0, %v7082_v25  ;;  %v2391_v50 = vmul.f32 %v9372_v31, %v2364_v21 }
 0xaa8   : > { %v2610_v3 = vmul.f32 %v6041_v53, %v2597_v28  ;;  %v2426_v15 = vmul.f32 %v6049_v59, %v2421_v51  ;;  %v2342_v26 = vmul.f32 %v7241_v17, %v2321_v29  ;;  %v2343_v11 = vmul.f32 %v7241_v17, %v2322_v32  ;;  %v2643_v17 = vpop.permute.xlu0 %2642  ;;  %v9373_v28 = vld [vmem:[#allocation35_spill] sm:$0xff] }
 0xaa9   : > { %v2744_v1 = vmul.f32 %v7406_v54, %v7406_v54  ;;  %v2745_v0 = vmul.f32 %v7408_v20, %v7408_v20  ;;  %v7422_v37 = vpop.permute.xlu1 %2717  ;;  %v2427_v55 = vmul.f32 %v6059_v47, %v2412_v33  ;;  %v2480_v23 = vmul.f32 %v6041_v53, %v2475_v2  ;;  %v5621_v39 = vpop.eup %5620  ;;  %v9374_v33 = vld [vmem:[#allocation45_spill] sm:$0xff] }
 0xaaa   : > { %v2390_v44 = vmul.f32 %v9372_v31, %v2373_v14  ;;  %v2397_v21 = vadd.f32 %v2391_v50, %v2343_v11  ;;  %v2581_v42 = vadd.f32 %v2575_v57, %v2527_v24  ;;  %v2544_v2 = vsel %vm920_vm9, %v7118_v10, %v2541_v35  ;;  %v9375_v14 = vld [vmem:[#allocation32_spill] sm:$0xff] }
 0xaab   : > { %v2750_v22 = vmul.f32 %v2744_v1, %v7406_v54  ;;  %v2751_v58 = vmul.f32 %v2745_v0, %v7408_v20  ;;  %v2580_v1 = vadd.f32 %v2574_v49, %v2526_v38  ;;  %v2611_v0 = vmul.f32 %v6055_v4, %v2606_v41 }
 0xaac   : > { %v2596_v49 = vsel %vm975_vm10, %v7275_v18, %v9344_v19  ;;  %v2396_v41 = vadd.f32 %v2390_v44, %v2342_v26  ;;  %v2498_v57 = vmul.f32 %v9375_v14, %v2480_v23  ;;  %v2779_v50 = vadd.f32 1.0, %v5619_v56  ;;  %v2641_v11 = vpop.permute.xlu0 %2640 }
 0xaad   : > { %v2756_v34 = vmul.f32 0.044715, %v2750_v22  ;;  %v2757_v45 = vmul.f32 0.044715, %v2751_v58  ;;  %v2463_v61 = vpop.permute.xlu1 %2462  ;;  %v2628_v22 = vmul.f32 %v9374_v33, %v2610_v3  ;;  %v2445_v58 = vmul.f32 %v9373_v28, %v2427_v55 }
 0xaae   : > { %v2466_v62 = vsel %vm841_vm8, %v7082_v25, %v2463_v61  ;;  %v2444_v25 = vmul.f32 %v9373_v28, %v2426_v15  ;;  %v2629_v24 = vmul.f32 %v9374_v33, %v2611_v0  ;;  %v2553_v15 = vsel %vm920_vm9, %v2541_v35, 0.0 }
 0xaaf   : > { %v2762_v60 = vadd.f32 %v2756_v34, %v7406_v54  ;;  %v2481_v46 = vmul.f32 %v6055_v4, %v2466_v62  ;;  %v2763_v6 = vadd.f32 %v2757_v45, %v7408_v20  ;;  %v2451_v31 = vadd.f32 %v2445_v58, %v2397_v21 }
 0xab0   : > { %v2450_v3 = vadd.f32 %v2444_v25, %v2396_v41  ;;  %v2558_v10 = vmul.f32 %v6049_v59, %v2544_v2  ;;  %v2778_v45 = vadd.f32 1.0, %v5621_v39  ;;  %v2608_v61 = vmul.f32 %v6041_v53, %v2596_v49 }
 0xab1   : > { %v2768_v29 = vmul.f32 0.7978846, %v2762_v60  ;;  %v2691_v32 = vpop.permute.xlu1 %2690  ;;  %v2769_v51 = vmul.f32 0.7978846, %v2763_v6  ;;  %v2499_v38 = vmul.f32 %v9375_v14, %v2481_v46  ;;  %v2633_v62 = vadd.f32 %v7395_v30, %v7308_v8  ;;  %v9378_v14 = vld [vmem:[#allocation48_spill] sm:$0xff] }
 0xab2   : > { %v2504_v55 = vadd.f32 %v2498_v57, %v2450_v3  ;;  %v7476_v35 = vmul.f32 0.5, %v7399_v63  ;;  %v2559_v60 = vmul.f32 %v6059_v47, %v2553_v15  ;;  %v2634_v46 = vadd.f32 %v2628_v22, %v2580_v1 }
 0xab3   : > { %5622 = vtanh.f32 %v2768_v29  ;;  %v2505_v18 = vadd.f32 %v2499_v38, %v2451_v31  ;;  %v7481_v56 = vmul.f32 0.5, %v7413_v27  ;;  %v2659_v0 = vsel %vm1030_vm11, %v2641_v11, 0.0  ;;  %v9377_v29 = vld [vmem:[#allocation42_spill] sm:$0xff] }
 0xab4   : > { %5624 = vtanh.f32 %v2769_v51  ;;  %v2635_v21 = vadd.f32 %v2629_v24, %v2581_v42  ;;  %v7485_v8 = vmul.f32 0.5, %v2779_v50  ;;  %v2626_v30 = vmul.f32 %v9368_v16, %v2608_v61 }
 0xab5   : > { %v2595_v34 = vpop.permute.xlu1 %2594  ;;  %v2660_v63 = vsel %vm1030_vm11, %v7329_v36, 0.0  ;;  %v2529_v1 = vadd.f32 %v7247_v7, %v2505_v18  ;;  %v7491_v28 = vmul.f32 0.5, %v2778_v45  ;;  %v2708_v27 = vsel %vm1079_vm12, %v7389_v5, 0.0 }
 0xab6   : > { %v2598_v19 = vsel %vm975_vm10, %v7155_v52, %v2595_v34  ;;  %v2607_v26 = vsel %vm975_vm10, %v2595_v34, 0.0  ;;  %v9376_v52 = vld [vmem:[#allocation41_spill] sm:$0xff]  ;;  %v2528_v25 = vadd.f32 %v7229_v9, %v2504_v55  ;;  %v2699_v42 = vsel %vm1079_vm12, %v2691_v32, %v7389_v5  ;;  %v2639_v32 = vpop.permute.xlu0 %2638 }
 0xab7   : > { %v2612_v23 = vmul.f32 %v6041_v53, %v2598_v19  ;;  %v2613_v6 = vmul.f32 %v6055_v4, %v2607_v26  ;;  %v2576_v44 = vmul.f32 %v9376_v52, %v2558_v10  ;;  %v2577_v33 = vmul.f32 %v9376_v52, %v2559_v60  ;;  %v9380_v26 = vld [vmem:[#allocation51_spill] sm:$0xff] }
 0xab8   : > { %v2675_v16 = vmul.f32 %v7205_v43, %v2659_v0  ;;  %v2651_v2 = vsel %vm1030_vm11, %v2643_v17, %v7329_v36  ;;  %v2677_v9 = vmul.f32 %v9378_v14, %v2660_v63  ;;  %v2712_v49 = vmul.f32 %v6049_v59, %v2699_v42 }
 0xab9   : > { %v2649_v39 = vpop.permute.xlu1 %2648  ;;  %v2630_v51 = vmul.f32 %v9377_v29, %v2612_v23  ;;  %v2631_v22 = vmul.f32 %v9377_v29, %v2613_v6  ;;  %v2582_v58 = vadd.f32 %v2576_v44, %v2528_v25  ;;  %v2583_v41 = vadd.f32 %v2577_v33, %v2529_v1 }
 0xaba   : > { %v2652_v7 = vsel %vm1030_vm11, %v7306_v12, %v2649_v39  ;;  %v2661_v38 = vsel %vm1030_vm11, %v2649_v39, 0.0  ;;  %v9379_v12 = vld [vmem:[#allocation52_spill] sm:$0xff]  ;;  %v2713_v15 = vmul.f32 %v6059_v47, %v2708_v27  ;;  %v2681_v10 = vadd.f32 %v2675_v16, %v2633_v62 }
 0xabb   : > { %v2636_v31 = vadd.f32 %v2630_v51, %v2582_v58  ;;  %v2678_v50 = vmul.f32 %v9379_v12, %v2652_v7  ;;  %v2637_v34 = vadd.f32 %v2631_v22, %v2583_v41  ;;  %v2679_v45 = vmul.f32 %v9379_v12, %v2661_v38  ;;  %v9384_v12 = vld [vmem:[#allocation56_spill] sm:$0xff] }
 0xabc   : > { %v2676_v18 = vmul.f32 %v9378_v14, %v2651_v2  ;;  %v2683_v60 = vadd.f32 %v2677_v9, %v2635_v21  ;;  %v2730_v62 = vmul.f32 %v7284_v40, %v2712_v49  ;;  %v2731_v1 = vmul.f32 %v7284_v40, %v2713_v15  ;;  %v9381_v2 = vld [vmem:[#allocation61_spill] sm:$0xff] }
 0xabd   : > { %v2697_v5 = vpop.permute.xlu1 %2696  ;;  %v2684_v0 = vadd.f32 %v2678_v50, %v2636_v31  ;;  %v2685_v27 = vadd.f32 %v2679_v45, %v2637_v34  ;;  %v2632_v14 = vadd.f32 %v2626_v30, %v9381_v2  ;;  %v9382_v49 = vld [vmem:[#allocation17_spill] sm:$0xff]  ;;  %v9385_v50 = vld [vmem:[#allocation11_spill] sm:$0xff] }
 0xabe   : > { %v2700_v57 = vsel %vm1079_vm12, %v7311_v13, %v2697_v5  ;;  %v2709_v24 = vsel %vm1079_vm12, %v2697_v5, 0.0  ;;  %v2650_v13 = vsel %vm1030_vm11, %v2639_v32, %v2641_v11  ;;  %v2682_v42 = vadd.f32 %v2676_v18, %v2634_v46 }
 0xabf   : > { %v2714_v3 = vmul.f32 %v6049_v59, %v2700_v57  ;;  %v2715_v36 = vmul.f32 %v6059_v47, %v2709_v24  ;;  %v2674_v11 = vmul.f32 %v7205_v43, %v2650_v13  ;;  %v2737_v58 = vadd.f32 %v2731_v1, %v2683_v60  ;;  %v9383_v57 = vld [vmem:[#allocation15_spill] sm:$0xff] }
 0xac0   : > { %v5623_v17 = vpop.eup %5622  ;;  %v2736_v43 = vadd.f32 %v2730_v62, %v2682_v42  ;;  %v2790_v41 = vmul.f32 %v7491_v28, %v9382_v49  ;;  %v2789_v30 = vmul.f32 %v7481_v56, %v9383_v57  ;;  %v2800_v28 = vld [vmem:[%s9022_s13] sm:$0xff]  ;;  %v9389_v57 = vmov 0.0  }
 0xac1   : > { %v5625_v61 = vpop.eup %5624  ;;  %v2780_v19 = vadd.f32 1.0, %v5623_v17  ;;  %v2732_v55 = vmul.f32 %v9380_v26, %v2714_v3  ;;  %v2689_v23 = vpop.permute.xlu1 %2688  ;;  %v2733_v6 = vmul.f32 %v9380_v26, %v2715_v36  ;;  %v2680_v5 = vadd.f32 %v2674_v11, %v2632_v14  ;;  %v9387_v17 = vld [vmem:[#allocation12_spill] sm:$0xff] }
 0xac2   : > { %v2707_v52 = vsel %vm1079_vm12, %v2689_v23, 0.0  ;;  %v2781_v44 = vadd.f32 1.0, %v5625_v61  ;;  %v2796_v31 = vmul.f32 %v2790_v41, %v2736_v43 }
 0xac3   : > { %v2786_v39 = vmul.f32 0.5, %v2780_v19  ;;  %v2711_v63 = vmul.f32 %v6059_v47, %v2707_v52  ;;  %v2738_v29 = vadd.f32 %v2732_v55, %v2684_v0  ;;  %v2739_v16 = vadd.f32 %v2733_v6, %v2685_v27 }
 0xac4   : > { %v2787_v25 = vmul.f32 0.5, %v2781_v44 }
 0xac5   : > { %v2792_v21 = vmul.f32 %v2786_v39, %v7406_v54  ;;  %v2729_v51 = vmul.f32 %v7422_v37, %v2711_v63  ;;  %v2687_v33 = vpop.permute.xlu1 %2686  ;;  %v2791_v54 = vmul.f32 %v7485_v8, %v7260_v48  ;;  %v2788_v48 = vmul.f32 %v7476_v35, %v9384_v12 }
 0xac6   : > { %v2698_v22 = vsel %vm1079_vm12, %v2687_v33, %v2689_v23  ;;  %v2793_v7 = vmul.f32 %v2787_v25, %v7408_v20 }
 0xac7   : > { %v2798_v9 = vmul.f32 %v2792_v21, %v2738_v29  ;;  %v2710_v40 = vmul.f32 %v6049_v59, %v2698_v22  ;;  %v2735_v46 = vadd.f32 %v2729_v51, %v2681_v10  ;;  %v2797_v20 = vmul.f32 %v2791_v54, %v2737_v58 }
 0xac8   : > { %v2799_v38 = vmul.f32 %v2793_v7, %v2739_v16 }
 0xac9   : > { %v2728_v32 = vmul.f32 %v7422_v37, %v2710_v40  ;;  %v2795_v8 = vmul.f32 %v2789_v30, %v2735_v46  ;;  %v5370_v30 = vld [vmem:[%s9012_s3 + $0x20] sm:$0xff] }
 0xaca   : > { %5364 = vmatprep.subr.msk.mxu0 %vm9146_vm13, %v2799_v38  ;;  %v2930_v38 = vpop.permute.xlu0 %2929 }
 0xacb   : > { %v2734_v24 = vadd.f32 %v2728_v32, %v2680_v5  ;;  %5365 = vmatpush1.msk.msra.mxu0 %vm9146_vm13, %v2798_v9  ;;  %v2937_v32 = vpop.permute.xlu1 %2936 }
 0xacc   : > { %2840 = vmatprep.subr.mxu0 %v2797_v20  ;;  %v5369_v20 = vld [vmem:[%s9012_s3 + $0x18] sm:$0xff] }
 0xacd   : > { %2841 = vmatpush1.msra.mxu0 %v2796_v31  ;;  %v2794_v37 = vmul.f32 %v2788_v48, %v2734_v24 }
 0xace   : > { %2842 = vmatprep.subr.mxu0 %v2795_v8  ;;  %v5371_v8 = vld [vmem:[%s9012_s3 + $0x28] sm:$0xff] }
 0xacf   : > { %2843 = vmatpush1.msra.mxu0 %v2794_v37  ;;  %v7640_v37 = vpop.permute.xlu1 %3084 }
 0xad0   : > { %5366 = vmatmul.mubr.msk.f32.vlgmr.msra.gmra.mxu0 %vm9145_vm14, %v2800_v28  ;;  %v7644_v28 = vpop.permute.xlu0 %3133 }
 0xb90   : > { %v2878_v56 = vpop.f32.mrf.mxu0 }
 0xb91   : > { %v7548_v3 = vadd.f32 %v2878_v56, %v9385_v50  ;;  %v7646_v56 = vpop.permute.xlu1 %3079  ;;  %v7650_v50 = vpop.permute.xlu0 %3187 }
 0xb92   : > { %v2880_v36 = vpop.f32.mrf.mxu0 }
 0xb93   : > { %9386 = vst [vmem:[#allocation54_spill] sm:$0xff] %v7548_v3  ;;  %v2889_v35 = vrot.slane %v7548_v3, 4  ;;  %v7552_v15 = vadd.f32 %v2880_v36, %v9387_v17 }
 0xb95   : > { %9388 = vst [vmem:[#allocation58_spill] sm:$0xff] %v7552_v15  ;;  %v2890_v10 = vadd.f32 %v2889_v35, %v7548_v3  ;;  %v2895_v34 = vrot.slane %v7552_v15, 4  ;;  %v7654_v36 = vpop.permute.xlu1 %3129  ;;  %v7656_v35 = vpop.permute.xlu0 %3183 }
 0xb97   : > { %v2891_v45 = vrot.slane %v2890_v10, 2  ;;  %v2896_v61 = vadd.f32 %v2895_v34, %v7552_v15 }
 0xb99   : > { %v2892_v13 = vadd.f32 %v2891_v45, %v2890_v10  ;;  %v2897_v18 = vrot.slane %v2896_v61, 2  ;;  %v7658_v17 = vpop.permute.xlu1 %3241  ;;  %v7660_v10 = vpop.permute.xlu0 %3237 }
 0xb9b   : > { %v2893_v19 = vrot.slane %v2892_v13, 1  ;;  %v2898_v26 = vadd.f32 %v2897_v18, %v2896_v61 }
 0xb9d   : > { %v2894_v55 = vadd.f32 %v2893_v19, %v2892_v13  ;;  %v2899_v23 = vrot.slane %v2898_v26, 1  ;;  %v7662_v34 = vpop.permute.xlu1 %3319  ;;  %v7664_v45 = vpop.permute.xlu0 %3265 }
 0xb9f   : > { %v2901_v60 = vmul.f32 0.125, %v2894_v55  ;;  %v2900_v6 = vadd.f32 %v2899_v23, %v2898_v26 }
 0xba1   : > { %v2903_v52 = vsub.f32 %v7548_v3, %v2901_v60  ;;  %v2902_v44 = vmul.f32 0.125, %v2900_v6  ;;  %v7666_v61 = vpop.permute.xlu1 %3421  ;;  %v7668_v13 = vpop.permute.xlu0 %3261 }
 0xba3   : > { %v2905_v62 = vmul.f32 %v2903_v52, %v2903_v52  ;;  %v2904_v0 = vsub.f32 %v7552_v15, %v2902_v44 }
 0xba5   : > { %v2907_v39 = vrot.slane %v2905_v62, 4  ;;  %v2906_v63 = vmul.f32 %v2904_v0, %v2904_v0  ;;  %v7670_v18 = vpop.permute.xlu1 %3475  ;;  %v7672_v19 = vpop.permute.xlu0 %3315 }
 0xba7   : > { %v2908_v11 = vadd.f32 %v2907_v39, %v2905_v62  ;;  %v2913_v1 = vrot.slane %v2906_v63, 4 }
 0xba9   : > { %v2909_v27 = vrot.slane %v2908_v11, 2  ;;  %v2914_v25 = vadd.f32 %v2913_v1, %v2906_v63  ;;  %v7674_v26 = vpop.permute.xlu1 %3471  ;;  %v7676_v55 = vpop.permute.xlu0 %3373 }
 0xbab   : > { %v2910_v42 = vadd.f32 %v2909_v27, %v2908_v11  ;;  %v2915_v21 = vrot.slane %v2914_v25, 2 }
 0xbad   : > { %v2911_v29 = vrot.slane %v2910_v42, 1  ;;  %v2916_v51 = vadd.f32 %v2915_v21, %v2914_v25  ;;  %v7678_v6 = vpop.permute.xlu0 %3369 }
 0xbaf   : > { %v2912_v33 = vadd.f32 %v2911_v29, %v2910_v42  ;;  %v2917_v16 = vrot.slane %v2916_v51, 1 }
 0xbb1   : > { %v2919_v22 = vmul.f32 0.125, %v2912_v33  ;;  %v2918_v7 = vadd.f32 %v2917_v16, %v2916_v51  ;;  %v7682_v44 = vpop.permute.xlu0 %3417 }
 0xbb3   : > { %v2921_v58 = vadd.f32 1e-05, %v2919_v22  ;;  %v2920_v2 = vmul.f32 0.125, %v2918_v7 }
 0xbb5   : > { %5626 = vrsqrt.f32 %v2921_v58  ;;  %v2922_v14 = vadd.f32 1e-05, %v2920_v2 }
 0xbb7   : > { %5628 = vrsqrt.f32 %v2922_v14 }
 0xbc2   : > { %v5627_v43 = vpop.eup %5626 }
 0xbc3   : > { %v2925_v9 = vmul.f32 %v5627_v43, %v2903_v52 }
 0xbc4   : > { %v5629_v40 = vpop.eup %5628 }
 0xbc5   : > { %v2926_v54 = vmul.f32 %v5629_v40, %v2904_v0  ;;  %v2932_v46 = vmul.f32 %v2930_v38, %v2925_v9 }
 0xbc7   : > { %v2933_v5 = vmul.f32 %v2930_v38, %v2926_v54  ;;  %v2939_v41 = vadd.f32 %v2937_v32, %v2932_v46 }
 0xbc9   : > { %v2940_v49 = vadd.f32 %v2937_v32, %v2933_v5 }
 0xbcb   : > { %2984 = vmatprep.subr.mxu1 %v2940_v49 }
 0xbcc   : > { %2985 = vmatpush1.msra.mxu1 %v2939_v41 }
 0xbcd   : > { %5372 = vmatmul.mubr.msk.f32.vlgmr.msra.gmra.mxu1 %vm565_vm0, %v5369_v20 }
 0xbce   : > { %3024 = vmatprep.mubr.f32.mxu1 %v9389_v57 }
 0xbd1   : > { %5373 = vmatmul.mubr.msk.f32.gmra.mxu1 %vm565_vm0, %v5370_v30 }
 0xbd2   : > { %3030 = vmatprep.mubr.f32.mxu1 %v9389_v57 }
 0xbd5   : > { %5374 = vmatmul.mubr.msk.f32.gmra.mxu1 %vm565_vm0, %v5371_v8 }
 0xbd6   : > { %3862 = vmatprep.mubr.f32.mxu1 %v9389_v57 }
 0xc8d   : > { %v7569_v24 = vpop.f32.mrf.mxu1 }
 0xc8e   : > { %3104 = vrot.lane.b32.xlu0 %v7569_v24, %s9205_s18  ;;  %3047 = vrot.lane.b32.xlu1 %v7569_v24, %s9203_s22 }
 0xc8f   : > { %v7579_v31 = vpop.f32.mrf.mxu1 }
 0xc91   : > { %v7585_v12 = vpop.f32.mrf.mxu1 }
 0xc92   : > { %3152 = vrot.lane.b32.xlu0 %v7569_v24, %s9201_s27  ;;  %3206 = vrot.lane.b32.xlu1 %v7569_v24, %s9198_s26 }
 0xc93   : > { %v7595_v48 = vpop.f32.mrf.mxu1 }
 0xc96   : > { %3338 = vrot.lane.b32.xlu0 %v7569_v24, %s9199_s25  ;;  %3284 = vrot.lane.b32.xlu1 %v7569_v24, %s9202_s28 }
 0xc9a   : > { %3049 = vrot.lane.b32.xlu1 %v7579_v31, %s9203_s22  ;;  %3051 = vrot.lane.b32.xlu0 %v7585_v12, %s9203_s22 }
 0xc9e   : > { %3106 = vrot.lane.b32.xlu1 %v7579_v31, %s9205_s18  ;;  %3396 = vrot.lane.b32.xlu0 %v7585_v12, %s9200_s0 }
 0xca2   : > { %3154 = vrot.lane.b32.xlu1 %v7579_v31, %s9201_s27  ;;  %3110 = vrot.lane.b32.xlu0 %v7595_v48, %s9205_s18 }
 0xca6   : > { %3208 = vrot.lane.b32.xlu1 %v7579_v31, %s9198_s26  ;;  %3158 = vrot.lane.b32.xlu0 %v7595_v48, %s9201_s27 }
 0xcaa   : > { %3286 = vrot.lane.b32.xlu1 %v7579_v31, %s9202_s28  ;;  %3444 = vrot.lane.b32.xlu0 %v7585_v12, %s9213_s15 }
 0xcae   : > { %3340 = vrot.lane.b32.xlu1 %v7579_v31, %s9199_s25  ;;  %3344 = vrot.lane.b32.xlu0 %v7595_v48, %s9199_s25 }
 0xcb2   : > { %3108 = vrot.lane.b32.xlu1 %v7585_v12, %s9205_s18  ;;  %3392 = vrot.lane.b32.xlu0 %v7569_v24, %s9200_s0 }
 0xcb6   : > { %3156 = vrot.lane.b32.xlu1 %v7585_v12, %s9201_s27  ;;  %3440 = vrot.lane.b32.xlu0 %v7569_v24, %s9213_s15 }
 0xcba   : > { %3210 = vrot.lane.b32.xlu1 %v7585_v12, %s9198_s26 }
 0xcbe   : > { %3288 = vrot.lane.b32.xlu1 %v7585_v12, %s9202_s28 }
 0xcc2   : > { %3342 = vrot.lane.b32.xlu1 %v7585_v12, %s9199_s25 }
 0xcc6   : > { %3053 = vrot.lane.b32.xlu1 %v7595_v48, %s9203_s22 }
 0xcca   : > { %3212 = vrot.lane.b32.xlu1 %v7595_v48, %s9198_s26 }
 0xcce   : > { %3290 = vrot.lane.b32.xlu1 %v7595_v48, %s9202_s28 }
 0xcd2   : > { %3394 = vrot.lane.b32.xlu1 %v7579_v31, %s9200_s0 }
 0xcd6   : > { %3398 = vrot.lane.b32.xlu1 %v7595_v48, %s9200_s0 }
 0xcda   : > { %3446 = vrot.lane.b32.xlu1 %v7595_v48, %s9213_s15 }
 0xcde   : > { %3442 = vrot.lane.b32.xlu1 %v7579_v31, %s9213_s15 }
 0xd00   : > { %v3048_v23 = vpop.permute.xlu1 %3047  ;;  %v3105_v39 = vpop.permute.xlu0 %3104 }
 0xd01   : > { %v3068_v22 = vsel %vm679_vm2, 0.0, %v3048_v23  ;;  %v3125_v14 = vsel %vm737_vm3, 0.0, %v3105_v39 }
 0xd02   : > { %v3071_v2 = vmul.f32 %v6041_v53, %v3068_v22  ;;  %v3140_v54 = vmul.f32 %v7654_v36, %v3125_v14 }
 0xd04   : > { %v3207_v60 = vpop.permute.xlu1 %3206  ;;  %v3153_v11 = vpop.permute.xlu0 %3152  ;;  %v3092_v46 = vmul.f32 %v7646_v56, %v3071_v2 }
 0xd05   : > { %v3173_v43 = vsel %vm786_vm5, 0.0, %v3153_v11  ;;  %v3227_v32 = vsel %vm841_vm8, 0.0, %v3207_v60 }
 0xd06   : > { %v3176_v5 = vmul.f32 %v6049_v59, %v3173_v43 }
 0xd08   : > { %v7680_v52 = vpop.permute.xlu1 %3284  ;;  %v7686_v25 = vpop.permute.xlu0 %3338 }
 0xd0c   : > { %v3050_v62 = vpop.permute.xlu1 %3049  ;;  %v3052_v21 = vpop.permute.xlu0 %3051 }
 0xd0d   : > { %v3069_v40 = vsel %vm679_vm2, 0.0, %v3052_v21  ;;  %v3059_v20 = vsel %vm679_vm2, %v3048_v23, %v3050_v62 }
 0xd0e   : > { %v3073_v30 = vmul.f32 %v6041_v53, %v3069_v40 }
 0xd10   : > { %v3107_v0 = vpop.permute.xlu1 %3106  ;;  %v7690_v33 = vpop.permute.xlu0 %3396 }
 0xd11   : > { %v3116_v8 = vsel %vm737_vm3, %v3105_v39, %v3107_v0  ;;  %v3146_v0 = vadd.f32 %v3140_v54, %v3092_v46  ;;  %v3194_v39 = vmul.f32 %v7656_v35, %v3176_v5 }
 0xd12   : > { %v3141_v40 = vmul.f32 %v7654_v36, %v3116_v8 }
 0xd14   : > { %v3155_v63 = vpop.permute.xlu1 %3154  ;;  %v3111_v7 = vpop.permute.xlu0 %3110 }
 0xd15   : > { %v3164_v22 = vsel %vm786_vm5, %v3153_v11, %v3155_v63  ;;  %v3072_v63 = vmul.f32 %v6055_v4, %v3059_v20  ;;  %v3200_v20 = vadd.f32 %v3194_v39, %v3146_v0 }
 0xd16   : > { %v3177_v11 = vmul.f32 %v6059_v47, %v3164_v22  ;;  %v3230_v22 = vmul.f32 %v6041_v53, %v3227_v32 }
 0xd18   : > { %v3209_v1 = vpop.permute.xlu1 %3208  ;;  %v3159_v38 = vpop.permute.xlu0 %3158  ;;  %v3248_v0 = vmul.f32 %v7660_v10, %v3230_v22 }
 0xd1c   : > { %v7684_v27 = vpop.permute.xlu1 %3286 }
 0xd20   : > { %v7688_v42 = vpop.permute.xlu1 %3340 }
 0xd24   : > { %v3109_v29 = vpop.permute.xlu1 %3108 }
 0xd25   : > { %v3117_v14 = vsel %vm737_vm3, %v3109_v29, %v3111_v7  ;;  %v3126_v2 = vsel %vm737_vm3, 0.0, %v3109_v29  ;;  %v7720_v29 = vpop.permute.xlu0 %3444 }
 0xd26   : > { %v3142_v7 = vmul.f32 %v7644_v28, %v3126_v2 }
 0xd28   : > { %v3157_v51 = vpop.permute.xlu1 %3156 }
 0xd29   : > { %v3165_v49 = vsel %vm786_vm5, %v3157_v51, %v3159_v38  ;;  %v3174_v41 = vsel %vm786_vm5, 0.0, %v3157_v51  ;;  %v3218_v38 = vsel %vm841_vm8, %v3207_v60, %v3209_v1 }
 0xd2a   : > { %v3178_v51 = vmul.f32 %v6049_v59, %v3174_v41  ;;  %v3179_v23 = vmul.f32 %v6059_v47, %v3165_v49  ;;  %v3231_v54 = vmul.f32 %v6055_v4, %v3218_v38  ;;  %v3345_v38 = vpop.permute.xlu0 %3344 }
 0xd2c   : > { %v3211_v16 = vpop.permute.xlu1 %3210  ;;  %v3196_v5 = vmul.f32 %v7650_v50, %v3178_v51  ;;  %v3197_v49 = vmul.f32 %v7650_v50, %v3179_v23  ;;  %v3249_v50 = vmul.f32 %v7660_v10, %v3231_v54 }
 0xd2d   : > { %v3228_v43 = vsel %vm841_vm8, 0.0, %v3211_v16 }
 0xd2e   : > { %v3232_v60 = vmul.f32 %v6041_v53, %v3228_v43 }
 0xd30   : > { %v3289_v58 = vpop.permute.xlu1 %3288  ;;  %v3250_v36 = vmul.f32 %v7658_v17, %v3232_v60 }
 0xd34   : > { %v7696_v9 = vpop.permute.xlu1 %3342 }
 0xd38   : > { %v3054_v15 = vpop.permute.xlu1 %3053 }
 0xd39   : > { %v3060_v3 = vsel %vm679_vm2, %v3052_v21, %v3054_v15  ;;  %v3143_v15 = vmul.f32 %v7644_v28, %v3117_v14  ;;  %v3093_v14 = vmul.f32 %v7646_v56, %v3072_v63  ;;  %v3275_v63 = vmul.f32 %v7664_v45, %v7595_v48 }
 0xd3a   : > { %v3074_v62 = vmul.f32 %v6055_v4, %v3060_v3  ;;  %v3094_v3 = vmul.f32 %v7640_v37, %v3073_v30  ;;  %v3359_v48 = vsel %vm975_vm10, %v7688_v42, 0.0 }
 0xd3b   : > { %v3147_v43 = vadd.f32 %v3141_v40, %v3093_v14  ;;  %v3393_v14 = vpop.permute.xlu0 %3392 }
 0xd3c   : > { %v3095_v1 = vmul.f32 %v7640_v37, %v3074_v62  ;;  %v3213_v21 = vpop.permute.xlu1 %3212  ;;  %v3195_v37 = vmul.f32 %v7656_v35, %v3177_v11  ;;  %v3148_v30 = vadd.f32 %v3142_v7, %v3094_v3  ;;  %v3360_v11 = vsel %vm975_vm10, %v3345_v38, 0.0 }
 0xd3d   : > { %v3219_v46 = vsel %vm841_vm8, %v3211_v16, %v3213_v21  ;;  %v3350_v21 = vsel %vm975_vm10, %v7686_v25, %v7688_v42  ;;  %v3272_v25 = vmul.f32 %v7668_v13, %v7569_v24 }
 0xd3e   : > { %v3149_v41 = vadd.f32 %v3143_v15, %v3095_v1  ;;  %v3233_v28 = vmul.f32 %v6055_v4, %v3219_v46  ;;  %v3202_v32 = vadd.f32 %v3196_v5, %v3148_v30  ;;  %v3201_v39 = vadd.f32 %v3195_v37, %v3147_v43 }
 0xd3f   : > { %v3351_v15 = vsel %vm975_vm10, %v7696_v9, %v3345_v38  ;;  %v3254_v1 = vadd.f32 %v3248_v0, %v3200_v20  ;;  %v3365_v46 = vmul.f32 %v6055_v4, %v3360_v11 }
 0xd40   : > { %v3203_v8 = vadd.f32 %v3197_v49, %v3149_v41  ;;  %v3251_v16 = vmul.f32 %v7658_v17, %v3233_v28  ;;  %v3291_v2 = vpop.permute.xlu1 %3290  ;;  %v3296_v17 = vsel %vm920_vm9, %v7680_v52, %v7684_v27  ;;  %v3256_v7 = vadd.f32 %v3250_v36, %v3202_v32 }
 0xd41   : > { %v3297_v51 = vsel %vm920_vm9, %v3289_v58, %v3291_v2  ;;  %v3306_v23 = vsel %vm920_vm9, %v3291_v2, 0.0  ;;  %v3305_v58 = vsel %vm920_vm9, %v7684_v27, 0.0  ;;  %v3255_v10 = vadd.f32 %v3249_v50, %v3201_v39  ;;  %v3441_v39 = vpop.permute.xlu0 %3440 }
 0xd42   : > { %v3257_v62 = vadd.f32 %v3251_v16, %v3203_v8  ;;  %v3310_v56 = vmul.f32 %v6049_v59, %v3297_v51  ;;  %v3311_v35 = vmul.f32 %v6059_v47, %v3306_v23  ;;  %v3274_v52 = vmul.f32 %v7664_v45, %v7585_v12 }
 0xd43   : > { %v3308_v9 = vmul.f32 %v6049_v59, %v3296_v17  ;;  %v3309_v54 = vmul.f32 %v6059_v47, %v3305_v58  ;;  %v3364_v5 = vmul.f32 %v6041_v53, %v3351_v15  ;;  %v3273_v12 = vmul.f32 %v7668_v13, %v7579_v31 }
 0xd44   : > { %v3395_v60 = vpop.permute.xlu1 %3394  ;;  %v3281_v27 = vadd.f32 %v3275_v63, %v3257_v62  ;;  %v3328_v3 = vmul.f32 %v7662_v34, %v3310_v56  ;;  %v3329_v40 = vmul.f32 %v7662_v34, %v3311_v35  ;;  %v3280_v45 = vadd.f32 %v3274_v52, %v3256_v7 }
 0xd45   : > { %v3362_v49 = vmul.f32 %v6041_v53, %v3350_v21  ;;  %v3363_v34 = vmul.f32 %v6055_v4, %v3359_v48  ;;  %v3279_v20 = vadd.f32 %v3273_v12, %v3255_v10  ;;  %v3278_v22 = vadd.f32 %v3272_v25, %v3254_v1 }
 0xd46   : > { %v3334_v37 = vadd.f32 %v3328_v3, %v3280_v45  ;;  %v3335_v30 = vadd.f32 %v3329_v40, %v3281_v27  ;;  %v3326_v24 = vmul.f32 %v7672_v19, %v3308_v9  ;;  %v3327_v31 = vmul.f32 %v7672_v19, %v3309_v54  ;;  %v7823_v45 = vld [vmem:[%s9013_s4 + $0x28] sm:$0xff] }
 0xd47   : > { %v3383_v13 = vmul.f32 %v7676_v55, %v3365_v46  ;;  %v3382_v36 = vmul.f32 %v7676_v55, %v3364_v5  ;;  %v3404_v8 = vsel %vm1030_vm11, %v3393_v14, %v3395_v60  ;;  %v3413_v16 = vsel %vm1030_vm11, %v3395_v60, 0.0 }
 0xd48   : > { %v3399_v42 = vpop.permute.xlu1 %3398  ;;  %v3380_v50 = vmul.f32 %v7678_v6, %v3362_v49  ;;  %v3381_v38 = vmul.f32 %v7678_v6, %v3363_v34  ;;  %v3332_v56 = vadd.f32 %v3326_v24, %v3278_v22  ;;  %v3333_v35 = vadd.f32 %v3327_v31, %v3279_v20  ;;  %v7829_v34 = vpop.f32.mrf.mxu1 }
 0xd49   : > { %v3405_v41 = vsel %vm1030_vm11, %v7690_v33, %v3399_v42  ;;  %v3414_v28 = vsel %vm1030_vm11, %v3399_v42, 0.0  ;;  %v3388_v23 = vadd.f32 %v3382_v36, %v3334_v37  ;;  %v3389_v55 = vadd.f32 %v3383_v13, %v3335_v30 }
 0xd4a   : > { %v3430_v33 = vmul.f32 %v7666_v61, %v3405_v41  ;;  %v3431_v2 = vmul.f32 %v7666_v61, %v3414_v28  ;;  %v3428_v61 = vmul.f32 %v7682_v44, %v3404_v8  ;;  %v3429_v0 = vmul.f32 %v7682_v44, %v3413_v16  ;;  %v7835_v41 = vpop.f32.mrf.mxu1 }
 0xd4b   : > { %v3386_v11 = vadd.f32 %v3380_v50, %v3332_v56  ;;  %v3387_v7 = vadd.f32 %v3381_v38, %v3333_v35  ;;  %v9390_v42 = vmov 3   ;;  %v9391_v49 = vmov 1  }
 0xd4c   : > { %v3447_v43 = vpop.permute.xlu1 %3446  ;;  %v3436_v17 = vadd.f32 %v3430_v33, %v3388_v23  ;;  %v3437_v6 = vadd.f32 %v3431_v2, %v3389_v55  ;;  %v9392_v28 = vmov 2   ;;  %v9393_v20 = vmov 4  }
 0xd4d   : > { %v3453_v19 = vsel %vm1079_vm12, %v7720_v29, %v3447_v43  ;;  %v3462_v51 = vsel %vm1079_vm12, %v3447_v43, 0.0  ;;  %v3434_v52 = vadd.f32 %v3428_v61, %v3386_v11  ;;  %v3435_v48 = vadd.f32 %v3429_v0, %v3387_v7 }
 0xd4e   : > { %v3466_v32 = vmul.f32 %v6049_v59, %v3453_v19  ;;  %v3467_v62 = vmul.f32 %v6059_v47, %v3462_v51  ;;  %v9394_v22 = vmov 5   ;;  %v9395_v14 = vmov 6  }
 0xd4f   : > { %v9396_v37 = vmov 7   ;;  %v9397_v30 = vmov 0   ;;  %v9398_v24 = vmov 8  }
 0xd50   : > { %v3484_v63 = vmul.f32 %v7670_v18, %v3466_v32  ;;  %v3485_v29 = vmul.f32 %v7670_v18, %v3467_v62  ;;  %v3443_v58 = vpop.permute.xlu1 %3442 }
 0xd51   : > { %v3452_v15 = vsel %vm1079_vm12, %v3441_v39, %v3443_v58  ;;  %v3461_v60 = vsel %vm1079_vm12, %v3443_v58, 0.0 }
 0xd52   : > { %v3464_v1 = vmul.f32 %v6049_v59, %v3452_v15  ;;  %v3465_v10 = vmul.f32 %v6059_v47, %v3461_v60  ;;  %v7799_v21 = vadd.f32 %v3484_v63, %v3436_v17  ;;  %v7801_v44 = vadd.f32 %v3485_v29, %v3437_v6 }
 0xd54   : > { %v3482_v27 = vmul.f32 %v7674_v26, %v3464_v1  ;;  %v3483_v18 = vmul.f32 %v7674_v26, %v3465_v10  ;;  %v3519_v3 = vmul.f32 %v7799_v21, %v7799_v21  ;;  %v3520_v40 = vmul.f32 %v7801_v44, %v7801_v44  ;;  %v5378_v26 = vld [vmem:[%s9014_s5 + $0x8] sm:$0xff] }
 0xd56   : > { %v3521_v9 = vadd.f32 %v3520_v40, %v3519_v3  ;;  %v7809_v54 = vadd.f32 %v3482_v27, %v3434_v52  ;;  %v7811_v46 = vadd.f32 %v3483_v18, %v3435_v48 }
 0xd58   : > { %3522 = vadd.xlane.f32.xlu0 %v3521_v9  ;;  %v3494_v5 = vmul.f32 %v7809_v54, %v7809_v54  ;;  %v3495_v25 = vmul.f32 %v7811_v46, %v7811_v46 }
 0xd5a   : > { %v3496_v12 = vadd.f32 %v3495_v25, %v3494_v5 }
 0xd5c   : > { %3497 = vadd.xlane.f32.xlu1 %v3496_v12 }
 0xd6d   : > { %3089 = vperm.xlu1 %5548, %v7823_v45  }
 0xd6e   : > { %3514 = vperm.xlu0 %5547, %v5378_v26  }
 0xd71   : > { %5549 = vset.pattern.permute.xlu1 %v9391_v49 }
 0xd72   : > { %5551 = vset.pattern.permute.xlu0 %v9390_v42  ;;  %3137 = vperm.xlu1 %5549, %v7823_v45  }
 0xd73   : > { %3112 = vrot.lane.b32.xlu0 %v7829_v34, %s9205_s18 }
 0xd76   : > { %3055 = vrot.lane.b32.xlu1 %v7829_v34, %s9203_s22 }
 0xd77   : > { %5550 = vset.pattern.permute.xlu1 %v9392_v28  ;;  %3160 = vrot.lane.b32.xlu0 %v7829_v34, %s9201_s27 }
 0xd7a   : > { %3057 = vrot.lane.b32.xlu1 %v7835_v41, %s9203_s22 }
 0xd7b   : > { %3245 = vperm.xlu0 %5551, %v7823_v45  }
 0xd7e   : > { %3191 = vperm.xlu1 %5550, %v7823_v45  }
 0xd7f   : > { %5552 = vset.pattern.permute.xlu0 %v9393_v20 }
 0xd80   : > { %3269 = vperm.xlu0 %5552, %v7823_v45  }
 0xd82   : > { %3114 = vrot.lane.b32.xlu1 %v7835_v41, %s9205_s18 }
 0xd83   : > { %5553 = vset.pattern.permute.xlu1 %v9394_v22 }
 0xd84   : > { %5554 = vset.pattern.permute.xlu0 %v9395_v14 }
 0xd85   : > { %3377 = vperm.xlu0 %5554, %v7823_v45  }
 0xd86   : > { %3162 = vrot.lane.b32.xlu1 %v7835_v41, %s9201_s27 }
 0xd89   : > { %5555 = vset.pattern.permute.xlu0 %v9396_v37 }
 0xd8a   : > { %3214 = vrot.lane.b32.xlu1 %v7829_v34, %s9198_s26  ;;  %3425 = vperm.xlu0 %5555, %v7823_v45  }
 0xd8e   : > { %3216 = vrot.lane.b32.xlu1 %v7835_v41, %s9198_s26  ;;  %3402 = vrot.lane.b32.xlu0 %v7835_v41, %s9200_s0 }
 0xd8f   : > { %5557 = vset.pattern.permute.xlu0 %v9397_v30 }
 0xd92   : > { %3323 = vperm.xlu1 %5553, %v7823_v45   ;;  %3400 = vrot.lane.b32.xlu0 %v7829_v34, %s9200_s0 }
 0xd96   : > { %5556 = vset.pattern.permute.xlu1 %v9398_v24 }
 0xde1   : > { %v3523_v31 = vpop.xlane.xlu0 %3522 }
 0xde2   : > { %5630 = vrsqrt.f32 %v3523_v31  ;;  %vm3526_vm15 = vcmp.eq.f32.partialorder %v3523_v31, inf  ;;  %v3529_v16 = vand.u32 2147483648, %v3523_v31  ;;  %vm3528_vm1 = vcmp.eq.f32.partialorder %v3523_v31, 0.0 }
 0xde5   : > { %v3498_v13 = vpop.xlane.xlu1 %3497 }
 0xde6   : > { %5632 = vrsqrt.f32 %v3498_v13  ;;  %vm3501_vm14 = vcmp.eq.f32.partialorder %v3498_v13, inf  ;;  %v3504_v19 = vand.u32 2147483648, %v3498_v13  ;;  %vm3503_vm13 = vcmp.eq.f32.partialorder %v3498_v13, 0.0 }
 0xde9   : > { %v3515_v61 = vpop.permute.xlu0 %3514  ;;  %v7896_v11 = vpop.permute.xlu1 %3089 }
 0xded   : > { %v7898_v7 = vpop.permute.xlu1 %3137  ;;  %v3113_v52 = vpop.permute.xlu0 %3112 }
 0xdef   : > { %v5631_v36 = vpop.eup %5630 }
 0xdf0   : > { %v3525_v8 = vmul.f32 %v5631_v36, %v3523_v31 }
 0xdf1   : > { %v7900_v15 = vpop.permute.xlu1 %3055  ;;  %v3161_v27 = vpop.permute.xlu0 %3160 }
 0xdf2   : > { %v3527_v33 = vsel %vm3526_vm15, %v3523_v31, %v3525_v8 }
 0xdf3   : > { %v5633_v2 = vpop.eup %5632  ;;  %v3530_v43 = vsel %vm3528_vm1, %v3529_v16, %v3527_v33 }
 0xdf4   : > { %v3531_v50 = vmax.f32 %v3530_v43, 1e-12  ;;  %v3500_v38 = vmul.f32 %v5633_v2, %v3498_v13 }
 0xdf5   : > { %v3058_v60 = vpop.permute.xlu1 %3057 }
 0xdf6   : > { %v3502_v51 = vsel %vm3501_vm14, %v3498_v13, %v3500_v38  ;;  %5634 = vrcp.f32 %v3531_v50  ;;  %v3061_v3 = vsel %vm679_vm2, %v7900_v15, %v3058_v60  ;;  %v7911_v9 = vpop.permute.xlu0 %3245 }
 0xdf7   : > { %v3505_v23 = vsel %vm3503_vm13, %v3504_v19, %v3502_v51  ;;  %v3076_v40 = vmul.f32 %v6055_v4, %v3061_v3 }
 0xdf8   : > { %v3506_v55 = vmax.f32 %v3505_v23, 1e-12 }
 0xdf9   : > { %v7902_v1 = vpop.permute.xlu1 %3191  ;;  %v3097_v26 = vmul.f32 %v7896_v11, %v3076_v40 }
 0xdfa   : > { %5636 = vrcp.f32 %v3506_v55 }
 0xdfb   : > { %v3270_v8 = vpop.permute.xlu0 %3269 }
 0xdfd   : > { %v3115_v10 = vpop.permute.xlu1 %3114 }
 0xe00   : > { %v3378_v50 = vpop.permute.xlu0 %3377 }
 0xe03   : > { %v5635_v32 = vpop.eup %5634 }
 0xe04   : > { %v7867_v62 = vmul.f32 %v5635_v32, %v7801_v44  ;;  %v7870_v56 = vmul.f32 %v5635_v32, %v7799_v21  ;;  %v3163_v21 = vpop.permute.xlu1 %3162 }
 0xe05   : > { %v3166_v5 = vsel %vm786_vm5, %v3161_v27, %v3163_v21 }
 0xe06   : > { %3565 = vmatprep.subr.mxu0 %v7867_v62  ;;  %v3181_v31 = vmul.f32 %v6059_v47, %v3166_v5 }
 0xe07   : > { %v5637_v35 = vpop.eup %5636  ;;  %3566 = vmatpush1.xpose.msra.mxu0 %v7870_v56 }
 0xe08   : > { %v3508_v0 = vmul.f32 %v5637_v35, %v7809_v54  ;;  %v3509_v39 = vmul.f32 %v5637_v35, %v7811_v46  ;;  %v7904_v44 = vpop.permute.xlu1 %3214  ;;  %v3118_v46 = vsel %vm737_vm3, %v3113_v52, %v3115_v10  ;;  %v3199_v33 = vmul.f32 %v7902_v1, %v3181_v31 }
 0xe0a   : > { %v7876_v17 = vmul.f32 %v3515_v61, %v3508_v0  ;;  %v7878_v6 = vmul.f32 %v3515_v61, %v3509_v39  ;;  %v3277_v61 = vmul.f32 %v3270_v8, %v7835_v41  ;;  %v3426_v0 = vpop.permute.xlu0 %3425 }
 0xe0c   : > { %3599 = vmatprep.mubr.f32.mxu0 %v7878_v6  ;;  %v3217_v48 = vpop.permute.xlu1 %3216 }
 0xe0d   : > { %3600 = vmatmul.mubr.f32.vlgmr.msra.gmra.mxu0 %v7876_v17  ;;  %v3220_v36 = vsel %vm841_vm8, %v7904_v44, %v3217_v48 }
 0xe0e   : > { %3689 = vmatprep.mubr.f32.mxu0 %v9389_v57  ;;  %v3235_v2 = vmul.f32 %v6055_v4, %v3220_v36  ;;  %v3403_v3 = vpop.permute.xlu0 %3402 }
 0xe10   : > { %v7906_v18 = vpop.permute.xlu1 %3323  ;;  %v3253_v51 = vmul.f32 %v7911_v9, %v3235_v2  ;;  %v3127_v2 = vsel %vm737_vm3, 0.0, %v3113_v52 }
 0xecd   : > { %v3601_v63 = vpop.f32.mrf.mxu0 }
 0xece   : > { %v3605_v29 = vsel %vm1232_vm4, %v3601_v63, -inf }
 0xecf   : > { %v3603_v58 = vpop.f32.mrf.mxu0  ;;  %3606 = vmax.xlane.f32.xlu1 %v3605_v29 }
 0xee0   : > { %3294 = vrot.lane.b32.xlu1 %v7835_v41, %s9202_s28 }
 0xee4   : > { %3292 = vrot.lane.b32.xlu1 %v7829_v34, %s9202_s28 }
 0xee8   : > { %3348 = vrot.lane.b32.xlu1 %v7835_v41, %s9199_s25 }
 0xeec   : > { %3346 = vrot.lane.b32.xlu1 %v7829_v34, %s9199_s25 }
 0xef0   : > { %3479 = vperm.xlu1 %5556, %v7823_v45   ;;  %v3145_v45 = vmul.f32 %v7898_v7, %v3118_v46 }
 0xef2   : > { %v3151_v16 = vadd.f32 %v3145_v45, %v3097_v26 }
 0xef4   : > { %3450 = vrot.lane.b32.xlu1 %v7835_v41, %s9213_s15  ;;  %v3205_v19 = vadd.f32 %v3199_v33, %v3151_v16  ;;  %v3070_v16 = vsel %vm679_vm2, 0.0, %v7900_v15 }
 0xef5   : > { %5558 = vset.pattern.permute.xlu1 %v9397_v30  ;;  %v3075_v33 = vmul.f32 %v6041_v53, %v3070_v16 }
 0xef6   : > { %v3259_v35 = vadd.f32 %v3253_v51, %v3205_v19  ;;  %v3144_v51 = vmul.f32 %v7898_v7, %v3127_v2 }
 0xef7   : > { %v3096_v19 = vmul.f32 %v7896_v11, %v3075_v33 }
 0xef8   : > { %v3283_v10 = vadd.f32 %v3277_v61, %v3259_v35 }
 0xef9   : > { %v3150_v35 = vadd.f32 %v3144_v51, %v3096_v19  ;;  %v5387_v19 = vld [vmem:[%s9016_s7 + $0x8] sm:$0xff] }
 0xefa   : > { %v5388_v51 = vld [vmem:[%s9017_s8 + $0x8] sm:$0xff] }
 0xf58   : > { %v3607_v54 = vpop.xlane.xlu1 %3606 }
 0xf59   : > { %v3608_v25 = vsub.f32 %v3601_v63, %v3607_v54  ;;  %v3415_v54 = vsel %vm1030_vm11, %v3403_v3, 0.0 }
 0xf5b   : > { %v3609_v12 = vmul.f32 1.442695, %v3608_v25  ;;  %v3433_v25 = vmul.f32 %v3426_v0, %v3415_v54 }
 0xf5c   : > { %v3295_v13 = vpop.permute.xlu1 %3294 }
 0xf5d   : > { %5638 = vpow2.f32 %v3609_v12  ;;  %v3307_v38 = vsel %vm920_vm9, %v3295_v13, 0.0 }
 0xf5e   : > { %v3313_v32 = vmul.f32 %v6059_v47, %v3307_v38  ;;  %v3175_v38 = vsel %vm786_vm5, 0.0, %v3161_v27 }
 0xf60   : > { %v3293_v43 = vpop.permute.xlu1 %3292  ;;  %v3331_v58 = vmul.f32 %v7906_v18, %v3313_v32  ;;  %v3229_v32 = vsel %vm841_vm8, 0.0, %v7904_v44 }
 0xf61   : > { %v3234_v61 = vmul.f32 %v6041_v53, %v3229_v32  ;;  %v7993_v32 = vld [vmem:[%s9020_s11 + $0x18] sm:$0xff] }
 0xf62   : > { %v3337_v40 = vadd.f32 %v3331_v58, %v3283_v10 }
 0xf63   : > { %v3252_v52 = vmul.f32 %v7911_v9, %v3234_v61  ;;  %v8005_v61 = vld [vmem:[%s9020_s11 + $0x28] sm:$0x1f] }
 0xf64   : > { %v3349_v23 = vpop.permute.xlu1 %3348 }
 0xf65   : > { %v3361_v55 = vsel %vm975_vm10, %v3349_v23, 0.0 }
 0xf66   : > { %v3367_v39 = vmul.f32 %v6055_v4, %v3361_v55  ;;  %v3180_v55 = vmul.f32 %v6049_v59, %v3175_v38 }
 0xf68   : > { %v3347_v63 = vpop.permute.xlu1 %3346  ;;  %v3385_v21 = vmul.f32 %v3378_v50, %v3367_v39  ;;  %v3198_v15 = vmul.f32 %v7902_v1, %v3180_v55  ;;  %v3298_v39 = vsel %vm920_vm9, %v3293_v43, %v3295_v13  ;;  %v7988_v55 = vld [vmem:[%s9020_s11 + $0x20] sm:$0xff] }
 0xf69   : > { %v3352_v27 = vsel %vm975_vm10, %v3347_v63, %v3349_v23  ;;  %v3312_v11 = vmul.f32 %v6049_v59, %v3298_v39 }
 0xf6a   : > { %v7928_v29 = vpop.eup %5638  ;;  %v3391_v41 = vadd.f32 %v3385_v21, %v3337_v40  ;;  %v3204_v58 = vadd.f32 %v3198_v15, %v3150_v35  ;;  %v3366_v10 = vmul.f32 %v6041_v53, %v3352_v27  ;;  %v3401_v40 = vpop.permute.xlu0 %3400  ;;  %v8000_v35 = vld [vmem:[%s9021_s12 + $0x28] sm:$0x1f] }
 0xf6b   : > { %v3611_v60 = vsel %vm1232_vm4, %v7928_v29, 0.0  ;;  %v3330_v44 = vmul.f32 %v7906_v18, %v3312_v11  ;;  %v3406_v43 = vsel %vm1030_vm11, %v3401_v40, %v3403_v3  ;;  %v3705_v18 = vrot.slane %v7867_v62, 4  ;;  %v5385_v11 = vld [vmem:[%s9015_s6 + $0x8] sm:$0xff] }
 0xf6c   : > { %3612 = vadd.xlane.f32.xlu1 %v3611_v60  ;;  %v3480_v48 = vpop.permute.xlu1 %3479  ;;  %v3439_v45 = vadd.f32 %v3433_v25, %v3391_v41  ;;  %v3258_v7 = vadd.f32 %v3252_v52, %v3204_v58  ;;  %v3276_v60 = vmul.f32 %v3270_v8, %v7829_v34  ;;  %v3384_v54 = vmul.f32 %v3378_v50, %v3366_v10  ;;  %v9402_v10 = vld [vmem:[#allocation58_spill] sm:$0xff] }
 0xf6d   : > { %v3432_v63 = vmul.f32 %v3426_v0, %v3406_v43  ;;  %v3699_v0 = vrot.slane %v7878_v6, 4 }
 0xf6e   : > { %v3282_v21 = vadd.f32 %v3276_v60, %v3258_v7  ;;  %v8057_v60 = vld [vmem:[%s9021_s12 + $0x18] sm:$0xff] }
 0xf6f   : > { %9399 = vst [vmem:[#allocation49_spill] sm:$0xff] %v8057_v60 }
 0xf70   : > { %v3451_v46 = vpop.permute.xlu1 %3450  ;;  %v3336_v13 = vadd.f32 %v3330_v44, %v3282_v21 }
 0xf71   : > { %v3463_v5 = vsel %vm1079_vm12, %v3451_v46, 0.0 }
 0xf72   : > { %v3469_v12 = vmul.f32 %v6059_v47, %v3463_v5  ;;  %v3390_v9 = vadd.f32 %v3384_v54, %v3336_v13 }
 0xf74   : > { %v3487_v26 = vmul.f32 %v3480_v48, %v3469_v12 }
 0xf76   : > { %v3493_v31 = vadd.f32 %v3487_v26, %v3439_v45  ;;  %v3704_v26 = vrot.slane %v7870_v56, 4 }
 0xf78   : > { %5379 = vmatprep.subr.msk.mxu0 %vm1248_vm6, %v3493_v31  ;;  %v3790_v36 = vrot.slane %v3493_v31, 4 }
 0xf7a   : > { %5382 = vmatprep.subr.msk.mxu1 %vm1248_vm6, %v3790_v36 }
 0xf7d   : > { %3448 = vrot.lane.b32.xlu1 %v7829_v34, %s9213_s15  ;;  %v3438_v34 = vadd.f32 %v3432_v63, %v3390_v9 }
 0xff5   : > { %v3613_v1 = vpop.xlane.xlu1 %3612 }
 0xff6   : > { %5640 = vrcp.f32 %v3613_v1 }
 0xff9   : > { %v3449_v41 = vpop.permute.xlu1 %3448 }
 0xffa   : > { %v3454_v23 = vsel %vm1079_vm12, %v3449_v41, %v3451_v46 }
 0xffb   : > { %v3468_v5 = vmul.f32 %v6049_v59, %v3454_v23 }
 0xffd   : > { %v3486_v8 = vmul.f32 %v3480_v48, %v3468_v5  ;;  %v3698_v48 = vrot.slane %v7876_v17, 4 }
 0xfff   : > { %v3492_v25 = vadd.f32 %v3486_v8, %v3438_v34 }
0x1001   : > { %v3789_v12 = vrot.slane %v3492_v25, 4  ;;  %5380 = vmatpush1.msk.msra.mxu0 %vm1248_vm6, %v3492_v25 }
0x1002   : > { %3738 = vmatprep.subr.mxu0 %v3705_v18 }
0x1003   : > { %v5641_v50 = vpop.eup %5640  ;;  %5383 = vmatpush1.msk.msra.mxu1 %vm1248_vm6, %v3789_v12 }
0x1004   : > { %v3615_v3 = vmul.f32 %v5641_v50, %v7928_v29 }
0x1006   : > { %5381 = vmatmul.mubr.msk.f32.vlgmr.msra.gmra.mxu0 %vm1244_vm7, %v3615_v3 }
0x1007   : > { %3739 = vmatpush1.xpose.msra.mxu0 %v3704_v26  ;;  %3772 = vmatprep.mubr.f32.mxu0 %v3699_v0 }
0x100a   : > { %3773 = vmatmul.mubr.f32.vlgmr.msra.gmra.mxu0 %v3698_v48 }
0x100b   : > { %3946 = vmatprep.mubr.f32.mxu0 %v9389_v57 }
0x10c6   : > { %v7971_v62 = vpop.f32.mrf.mxu0 }
0x10c8   : > { %v7973_v46 = vpop.f32.mrf.mxu0 }
0x10ca   : > { %v3774_v45 = vpop.f32.mrf.mxu0 }
0x10cb   : > { %v3778_v29 = vsel %vm1232_vm4, %v3774_v45, -inf }
0x10cc   : > { %3779 = vmax.xlane.f32.xlu0 %v3778_v29  ;;  %v3776_v56 = vpop.f32.mrf.mxu0 }
0x10e2   : > { %3999 = vperm.xlu0 %5557, %v5387_v19  }
0x10e6   : > { %4250 = vperm.xlu0 %5557, %v7988_v55  }
0x10ea   : > { %4712 = vperm.xlu0 %5557, %v8000_v35  }
0x10ee   : > { %5569 = vset.pattern.permute.xlu0 %v9391_v49 }
0x10ef   : > { %4303 = vperm.xlu0 %5569, %v8005_v61  }
0x10f3   : > { %4295 = vperm.xlu0 %5569, %v7993_v32  }
0x1155   : > { %v3780_v31 = vpop.xlane.xlu0 %3779 }
0x1156   : > { %v3781_v6 = vsub.f32 %v3774_v45, %v3780_v31 }
0x1158   : > { %v3782_v36 = vmul.f32 1.442695, %v3781_v6 }
0x115a   : > { %5642 = vpow2.f32 %v3782_v36 }
0x115d   : > { %v4000_v19 = vpop.permute.xlu0 %3999 }
0x1167   : > { %v5643_v16 = vpop.eup %5642 }
0x1168   : > { %v3784_v33 = vsel %vm1232_vm4, %v5643_v16, 0.0 }
0x1169   : > { %3785 = vadd.xlane.f32.xlu1 %v3784_v33 }
0x117a   : > { %4006 = vperm.xlu1 %5558, %v5388_v51  }
0x117e   : > { %4245 = vperm.xlu1 %5558, %v7993_v32  }
0x1182   : > { %4255 = vperm.xlu1 %5558, %v8005_v61  }
0x1186   : > { %5559 = vset.pattern.permute.xlu1 %v9391_v49 }
0x1187   : > { %4299 = vperm.xlu1 %5559, %v7988_v55  }
0x118b   : > { %5560 = vset.pattern.permute.xlu1 %v9392_v28 }
0x118c   : > { %4357 = vperm.xlu1 %5560, %v8005_v61  }
0x1190   : > { %4353 = vperm.xlu1 %5560, %v7988_v55  }
0x1194   : > { %5561 = vset.pattern.permute.xlu1 %v9393_v20 }
0x1195   : > { %4435 = vperm.xlu1 %5561, %v8005_v61  }
0x1199   : > { %5562 = vset.pattern.permute.xlu1 %v9390_v42 }
0x119a   : > { %4403 = vperm.xlu1 %5562, %v7993_v32  }
0x119e   : > { %5563 = vset.pattern.permute.xlu1 %v9394_v22 }
0x119f   : > { %4489 = vperm.xlu1 %5563, %v8005_v61  }
0x11a3   : > { %5564 = vset.pattern.permute.xlu1 %v9393_v20 }
0x11a4   : > { %4427 = vperm.xlu1 %5564, %v7993_v32  }
0x11a8   : > { %5565 = vset.pattern.permute.xlu1 %v9394_v22 }
0x11a9   : > { %4485 = vperm.xlu1 %5565, %v7988_v55  }
0x11ad   : > { %5566 = vset.pattern.permute.xlu1 %v9395_v14 }
0x11ae   : > { %4539 = vperm.xlu1 %5566, %v7988_v55  }
0x11b2   : > { %5567 = vset.pattern.permute.xlu1 %v9396_v37 }
0x11b3   : > { %4587 = vperm.xlu1 %5567, %v7988_v55  }
0x11b7   : > { %5568 = vset.pattern.permute.xlu1 %v9398_v24 }
0x11b8   : > { %4645 = vperm.xlu1 %5568, %v8005_v61  }
0x11bc   : > { %4641 = vperm.xlu1 %5568, %v7988_v55  }
0x11c0   : > { %4637 = vperm.xlu1 %5568, %v7993_v32  }
0x11c4   : > { %5570 = vset.pattern.permute.xlu1 %v9391_v49  ;;  %v8050_v49 = vld [vmem:[%s9021_s12 + $0x20] sm:$0xff] }
0x11c5   : > { %4760 = vperm.xlu1 %5570, %v8000_v35   ;;  %4756 = vperm.xlu0 %5569, %v8050_v49  }
0x11c9   : > { %5571 = vset.pattern.permute.xlu1 %v9397_v30  ;;  %4752 = vperm.xlu0 %5569, %v8057_v60  }
0x11ca   : > { %4707 = vperm.xlu1 %5571, %v8050_v49  }
0x11cd   : > { %5574 = vset.pattern.permute.xlu0 %v9392_v28 }
0x11ce   : > { %5572 = vset.pattern.permute.xlu1 %v9392_v28  ;;  %4349 = vperm.xlu0 %5574, %v7993_v32  }
0x11cf   : > { %4814 = vperm.xlu1 %5572, %v8000_v35  }
0x11d2   : > { %4806 = vperm.xlu0 %5574, %v8057_v60  }
0x11d3   : > { %5573 = vset.pattern.permute.xlu1 %v9397_v30 }
0x11d4   : > { %4702 = vperm.xlu1 %5573, %v8057_v60  }
0x11d6   : > { %5576 = vset.pattern.permute.xlu0 %v9390_v42 }
0x11d7   : > { %4411 = vperm.xlu0 %5576, %v8005_v61  }
0x11d8   : > { %5575 = vset.pattern.permute.xlu1 %v9392_v28  ;;  %v9400_v28 = vld [vmem:[#allocation54_spill] sm:$0xff] }
0x11d9   : > { %4810 = vperm.xlu1 %5575, %v8050_v49  }
0x11db   : > { %4407 = vperm.xlu0 %5576, %v7988_v55  }
0x11dd   : > { %5578 = vset.pattern.permute.xlu1 %v9393_v20 }
0x11de   : > { %4892 = vperm.xlu1 %5578, %v8000_v35  }
0x11df   : > { %4868 = vperm.xlu0 %5576, %v8000_v35  }
0x11e2   : > { %5579 = vset.pattern.permute.xlu1 %v9390_v42 }
0x11e3   : > { %4860 = vperm.xlu1 %5579, %v8057_v60   ;;  %4864 = vperm.xlu0 %5576, %v8050_v49  }
0x11e7   : > { %5581 = vset.pattern.permute.xlu1 %v9394_v22  ;;  %5577 = vset.pattern.permute.xlu0 %v9393_v20 }
0x11e8   : > { %4946 = vperm.xlu1 %5581, %v8000_v35   ;;  %4431 = vperm.xlu0 %5577, %v7988_v55  }
0x11ec   : > { %5582 = vset.pattern.permute.xlu1 %v9393_v20  ;;  %4888 = vperm.xlu0 %5577, %v8050_v49  }
0x11ed   : > { %4884 = vperm.xlu1 %5582, %v8057_v60  }
0x11f0   : > { %5580 = vset.pattern.permute.xlu0 %v9394_v22 }
0x11f1   : > { %5583 = vset.pattern.permute.xlu1 %v9394_v22  ;;  %4481 = vperm.xlu0 %5580, %v7993_v32  }
0x11f2   : > { %v3786_v17 = vpop.xlane.xlu1 %3785  ;;  %4942 = vperm.xlu1 %5583, %v8050_v49  }
0x11f3   : > { %5644 = vrcp.f32 %v3786_v17 }
0x11f5   : > { %4938 = vperm.xlu0 %5580, %v8057_v60  }
0x11f6   : > { %5585 = vset.pattern.permute.xlu1 %v9395_v14 }
0x11f7   : > { %4996 = vperm.xlu1 %5585, %v8050_v49  }
0x11f9   : > { %5584 = vset.pattern.permute.xlu0 %v9395_v14 }
0x11fa   : > { %4543 = vperm.xlu0 %5584, %v8005_v61  }
0x11fb   : > { %5587 = vset.pattern.permute.xlu1 %v9396_v37 }
0x11fc   : > { %5044 = vperm.xlu1 %5587, %v8050_v49  }
0x11fe   : > { %4535 = vperm.xlu0 %5584, %v7993_v32  }
0x1200   : > { %v5645_v2 = vpop.eup %5644  ;;  %5588 = vset.pattern.permute.xlu1 %v9398_v24 }
0x1201   : > { %v3788_v38 = vmul.f32 %v5645_v2, %v5643_v16  ;;  %5102 = vperm.xlu1 %5588, %v8000_v35  }
0x1202   : > { %5000 = vperm.xlu0 %5584, %v8000_v35  }
0x1203   : > { %5384 = vmatmul.mubr.msk.f32.vlgmr.msra.gmra.mxu1 %vm1244_vm7, %v3788_v38 }
0x1204   : > { %4088 = vmatprep.mubr.f32.mxu1 %v9389_v57 }
0x1206   : > { %4992 = vperm.xlu0 %5584, %v8057_v60  }
0x120a   : > { %5586 = vset.pattern.permute.xlu0 %v9396_v37 }
0x120b   : > { %4591 = vperm.xlu0 %5586, %v8005_v61  }
0x120f   : > { %4583 = vperm.xlu0 %5586, %v7993_v32  }
0x1213   : > { %5048 = vperm.xlu0 %5586, %v8000_v35   ;;  %v4007_v35 = vpop.permute.xlu1 %4006 }
0x12c3   : > { %v3864_v15 = vpop.f32.mrf.mxu1 }
0x12c4   : > { %v3871_v39 = vrot.slane %v3864_v15, 4 }
0x12c5   : > { %v3866_v58 = vpop.f32.mrf.mxu1 }
0x12c6   : > { %v3872_v52 = vrot.slane %v3866_v58, 4  ;;  %v3875_v7 = vsel %vm1248_vm6, %v7971_v62, %v3871_v39  ;;  %v5389_v39 = vld [vmem:[%s9018_s9 + $0x18] sm:$0xff] }
0x12c7   : > { %v5395_v58 = vld [vmem:[%s9019_s10 + $0x18] sm:$0xff] }
0x12c8   : > { %v3876_v27 = vsel %vm1248_vm6, %v7973_v46, %v3872_v52  ;;  %v5390_v52 = vld [vmem:[%s9018_s9 + $0x20] sm:$0xff] }
0x12c9   : > { %3912 = vmatprep.subr.mxu0 %v3876_v27  ;;  %v5396_v27 = vld [vmem:[%s9019_s10 + $0x20] sm:$0xff] }
0x12ca   : > { %3913 = vmatpush1.msra.mxu0 %v3875_v7  ;;  %v5397_v7 = vld [vmem:[%s9019_s10 + $0x28] sm:$0x1f] }
0x12cb   : > { %5386 = vmatmul.mubr.msk.f32.vlgmr.msra.gmra.mxu0 %vm565_vm0, %v5385_v11  ;;  %v5391_v11 = vld [vmem:[%s9018_s9 + $0x28] sm:$0x1f] }
0x12cc   : > { %4184 = vmatprep.mubr.f32.mxu0 %v9389_v57 }
0x138b   : > { %v3948_v42 = vpop.f32.mrf.mxu0 }
0x138c   : > { %v8100_v20 = vadd.f32 %v3948_v42, %v9400_v28  ;;  %v8146_v42 = vpop.permute.xlu1 %4245 }
0x138d   : > { %v3950_v22 = vpop.f32.mrf.mxu0 }
0x138e   : > { %9401 = vst [vmem:[#allocation60_spill] sm:$0xff] %v8100_v20  ;;  %v3959_v30 = vrot.slane %v8100_v20, 4  ;;  %v8104_v44 = vadd.f32 %v3950_v22, %v9402_v10 }
0x1390   : > { %9403 = vst [vmem:[#allocation30_spill] sm:$0xff] %v8104_v44  ;;  %v3960_v14 = vadd.f32 %v3959_v30, %v8100_v20  ;;  %v3965_v21 = vrot.slane %v8104_v44, 4  ;;  %v8148_v28 = vpop.permute.xlu1 %4255 }
0x1391   : > { %9404 = vst [vmem:[#allocation29_spill] sm:$0xff] %v8148_v28 }
0x1392   : > { %v3961_v40 = vrot.slane %v3960_v14, 2  ;;  %v3966_v54 = vadd.f32 %v3965_v21, %v8104_v44  ;;  %v8158_v21 = vpop.permute.xlu0 %4250 }
0x1394   : > { %v3962_v1 = vadd.f32 %v3961_v40, %v3960_v14  ;;  %v3967_v13 = vrot.slane %v3966_v54, 2  ;;  %v8150_v22 = vpop.permute.xlu1 %4299 }
0x1396   : > { %v3968_v43 = vadd.f32 %v3967_v13, %v3966_v54  ;;  %v3963_v9 = vrot.slane %v3962_v1, 1  ;;  %v8162_v54 = vpop.permute.xlu0 %4712 }
0x1397   : > { %9407 = vst [vmem:[#allocation63_spill] sm:$0xff] %v8162_v54 }
0x1398   : > { %v3964_v41 = vadd.f32 %v3963_v9, %v3962_v1  ;;  %v3969_v23 = vrot.slane %v3968_v43, 1  ;;  %v8152_v30 = vpop.permute.xlu1 %4357 }
0x1399   : > { %9405 = vst [vmem:[#allocation74_spill] sm:$0xff] %v8152_v30 }
0x139a   : > { %v3970_v63 = vadd.f32 %v3969_v23, %v3968_v43  ;;  %v3971_v5 = vmul.f32 0.125, %v3964_v41 }
0x139c   : > { %v3972_v34 = vmul.f32 0.125, %v3970_v63  ;;  %v3973_v8 = vsub.f32 %v8100_v20, %v3971_v5  ;;  %v8154_v10 = vpop.permute.xlu1 %4353 }
0x139e   : > { %v3974_v25 = vsub.f32 %v8104_v44, %v3972_v34  ;;  %v3975_v18 = vmul.f32 %v3973_v8, %v3973_v8 }
0x13a0   : > { %v3976_v12 = vmul.f32 %v3974_v25, %v3974_v25  ;;  %v3977_v50 = vrot.slane %v3975_v18, 4  ;;  %v8156_v14 = vpop.permute.xlu1 %4435 }
0x13a1   : > { %9406 = vst [vmem:[#allocation59_spill] sm:$0xff] %v8156_v14 }
0x13a2   : > { %v3978_v3 = vadd.f32 %v3977_v50, %v3975_v18  ;;  %v3983_v37 = vrot.slane %v3976_v12, 4 }
0x13a4   : > { %v3979_v26 = vrot.slane %v3978_v3, 2  ;;  %v3984_v0 = vadd.f32 %v3983_v37, %v3976_v12  ;;  %v8160_v40 = vpop.permute.xlu1 %4403 }
0x13a6   : > { %v3980_v48 = vadd.f32 %v3979_v26, %v3978_v3  ;;  %v3985_v62 = vrot.slane %v3984_v0, 2 }
0x13a8   : > { %v3981_v46 = vrot.slane %v3980_v48, 1  ;;  %v3986_v45 = vadd.f32 %v3985_v62, %v3984_v0  ;;  %v8164_v1 = vpop.permute.xlu1 %4489 }
0x13a9   : > { %9408 = vst [vmem:[#allocation76_spill] sm:$0xff] %v8164_v1 }
0x13aa   : > { %v3982_v29 = vadd.f32 %v3981_v46, %v3980_v48  ;;  %v3987_v56 = vrot.slane %v3986_v45, 1 }
0x13ac   : > { %v3988_v31 = vadd.f32 %v3987_v56, %v3986_v45  ;;  %v3989_v6 = vmul.f32 0.125, %v3982_v29  ;;  %v8168_v13 = vpop.permute.xlu1 %4427 }
0x13ae   : > { %v3990_v36 = vmul.f32 0.125, %v3988_v31  ;;  %v3991_v16 = vadd.f32 1e-05, %v3989_v6 }
0x13b0   : > { %v3992_v33 = vadd.f32 1e-05, %v3990_v36  ;;  %5646 = vrsqrt.f32 %v3991_v16  ;;  %v8178_v41 = vpop.permute.xlu1 %4485 }
0x13b1   : > { %9410 = vst [vmem:[#allocation64_spill] sm:$0xff] %v8178_v41 }
0x13b2   : > { %5648 = vrsqrt.f32 %v3992_v33 }
0x13b4   : > { %v8186_v63 = vpop.permute.xlu1 %4539 }
0x13b5   : > { %9411 = vst [vmem:[#allocation65_spill] sm:$0xff] %v8186_v63 }
0x13b8   : > { %v8198_v34 = vpop.permute.xlu1 %4587 }
0x13b9   : > { %9412 = vst [vmem:[#allocation23_spill] sm:$0xff] %v8198_v34 }
0x13bc   : > { %v8210_v12 = vpop.permute.xlu1 %4645 }
0x13bd   : > { %v5647_v17 = vpop.eup %5646  ;;  %9413 = vst [vmem:[#allocation67_spill] sm:$0xff] %v8210_v12 }
0x13be   : > { %v3995_v2 = vmul.f32 %v5647_v17, %v3973_v8 }
0x13bf   : > { %v5649_v38 = vpop.eup %5648 }
0x13c0   : > { %v3996_v51 = vmul.f32 %v5649_v38, %v3974_v25  ;;  %v4002_v55 = vmul.f32 %v4000_v19, %v3995_v2  ;;  %v8222_v3 = vpop.permute.xlu1 %4641 }
0x13c1   : > { %9414 = vst [vmem:[#allocation20_spill] sm:$0xff] %v8222_v3 }
0x13c2   : > { %v4003_v32 = vmul.f32 %v4000_v19, %v3996_v51  ;;  %v4009_v15 = vadd.f32 %v4007_v35, %v4002_v55 }
0x13c4   : > { %v4010_v61 = vadd.f32 %v4007_v35, %v4003_v32  ;;  %v8230_v26 = vpop.permute.xlu1 %4637 }
0x13c5   : > { %9416 = vst [vmem:[#allocation22_spill] sm:$0xff] %v8230_v26 }
0x13c6   : > { %4054 = vmatprep.subr.mxu1 %v4010_v61  ;;  %4150 = vmatprep.subr.mxu0 %v4010_v61 }
0x13c7   : > { %4055 = vmatpush1.msra.mxu1 %v4009_v15  ;;  %4151 = vmatpush1.msra.mxu0 %v4009_v15 }
0x13c8   : > { %5392 = vmatmul.mubr.msk.f32.vlgmr.msra.gmra.mxu1 %vm565_vm0, %v5389_v39  ;;  %5398 = vmatmul.mubr.msk.f32.vlgmr.msra.gmra.mxu0 %vm565_vm0, %v5395_v58  ;;  %v8242_v48 = vpop.permute.xlu1 %4760 }
0x13c9   : > { %4094 = vmatprep.mubr.f32.mxu1 %v9389_v57  ;;  %4190 = vmatprep.mubr.f32.mxu0 %v9389_v57  ;;  %9417 = vst [vmem:[#allocation77_spill] sm:$0xff] %v8242_v48 }
0x13cc   : > { %5393 = vmatmul.mubr.msk.f32.gmra.mxu1 %vm565_vm0, %v5390_v52  ;;  %5399 = vmatmul.mubr.msk.f32.gmra.mxu0 %vm565_vm0, %v5396_v27  ;;  %v8252_v45 = vpop.permute.xlu1 %4707 }
0x13cd   : > { %4100 = vmatprep.mubr.f32.mxu1 %v9389_v57  ;;  %4196 = vmatprep.mubr.f32.mxu0 %v9389_v57 }
0x13d0   : > { %5394 = vmatmul.mubr.msk.f32.gmra.mxu1 %vm565_vm0, %v5391_v11  ;;  %5400 = vmatmul.mubr.msk.f32.gmra.mxu0 %vm565_vm0, %v5397_v7  ;;  %v8266_v31 = vpop.permute.xlu1 %4814  ;;  %vm9490_vm0 = vcmask 1044480  }
0x13d1   : > { %5252 = vmatprep.mubr.f32.mxu1 %v9389_v57  ;;  %v8166_v57 = vpop.permute.xlu0 %4303  ;;  %9419 = vst [vmem:[#allocation86_spill] sm:$0xff] %v8266_v31 }
0x13d2   : > { %9409 = vst [vmem:[#allocation62_spill] sm:$0xff] %v8166_v57 }
0x13d4   : > { %v8274_v36 = vpop.permute.xlu1 %4702 }
0x13d5   : > { %v8170_v43 = vpop.permute.xlu0 %4295 }
0x13d8   : > { %v8288_v17 = vpop.permute.xlu1 %4810 }
0x13d9   : > { %v8184_v23 = vpop.permute.xlu0 %4756 }
0x13dc   : > { %v8298_v19 = vpop.permute.xlu1 %4892 }
0x13dd   : > { %v8192_v5 = vpop.permute.xlu0 %4752  ;;  %9421 = vst [vmem:[#allocation24_spill] sm:$0xff] %v8298_v19 }
0x13e0   : > { %v8310_v55 = vpop.permute.xlu1 %4860 }
0x13e1   : > { %v8206_v25 = vpop.permute.xlu0 %4349 }
0x13e4   : > { %v8320_v61 = vpop.permute.xlu1 %4946 }
0x13e5   : > { %v8216_v50 = vpop.permute.xlu0 %4806  ;;  %9424 = vst [vmem:[#allocation18_spill] sm:$0xff] %v8320_v61 }
0x13e8   : > { %v8334_v58 = vpop.permute.xlu1 %4884 }
0x13e9   : > { %v8228_v37 = vpop.permute.xlu0 %4411 }
0x13ea   : > { %9415 = vst [vmem:[#allocation26_spill] sm:$0xff] %v8228_v37 }
0x13ec   : > { %v8340_v52 = vpop.permute.xlu1 %4942 }
0x13ed   : > { %v8236_v0 = vpop.permute.xlu0 %4407  ;;  %9426 = vst [vmem:[#allocation38_spill] sm:$0xff] %v8340_v52 }
0x13f0   : > { %v8354_v7 = vpop.permute.xlu1 %4996 }
0x13f1   : > { %v8250_v46 = vpop.permute.xlu0 %4868  ;;  %9428 = vst [vmem:[#allocation69_spill] sm:$0xff] %v8354_v7 }
0x13f2   : > { %9418 = vst [vmem:[#allocation40_spill] sm:$0xff] %v8250_v46 }
0x13f5   : > { %v8258_v29 = vpop.permute.xlu0 %4864 }
0x13f9   : > { %v8268_v6 = vpop.permute.xlu0 %4431 }
0x13fd   : > { %v8280_v16 = vpop.permute.xlu0 %4888 }
0x1401   : > { %v8286_v33 = vpop.permute.xlu0 %4481 }
0x1405   : > { %v8296_v38 = vpop.permute.xlu0 %4938 }
0x1406   : > { %9420 = vst [vmem:[#allocation75_spill] sm:$0xff] %v8296_v38 }
0x1409   : > { %v8308_v51 = vpop.permute.xlu0 %4543 }
0x140a   : > { %9422 = vst [vmem:[#allocation66_spill] sm:$0xff] %v8308_v51 }
0x140d   : > { %v8318_v35 = vpop.permute.xlu0 %4535 }
0x1411   : > { %v8332_v39 = vpop.permute.xlu0 %5000 }
0x1412   : > { %9425 = vst [vmem:[#allocation50_spill] sm:$0xff] %v8332_v39 }
0x1415   : > { %v8342_v27 = vpop.permute.xlu0 %4992 }
0x1416   : > { %9427 = vst [vmem:[#allocation53_spill] sm:$0xff] %v8342_v27  ;;  %v8364_v27 = vpop.permute.xlu1 %5044 }
0x1417   : > { %9431 = vst [vmem:[#allocation57_spill] sm:$0xff] %v8364_v27 }
0x1419   : > { %v8356_v44 = vpop.permute.xlu0 %4591 }
0x141a   : > { %9429 = vst [vmem:[#allocation55_spill] sm:$0xff] %v8356_v44  ;;  %v8378_v19 = vpop.permute.xlu1 %5102 }
0x141b   : > { %9432 = vst [vmem:[#allocation27_spill] sm:$0xff] %v8378_v19 }
0x141d   : > { %v8366_v39 = vpop.permute.xlu0 %4583 }
0x1421   : > { %v8380_v46 = vpop.permute.xlu0 %5048 }
0x1422   : > { %9433 = vst [vmem:[#allocation85_spill] sm:$0xff] %v8380_v46 }
0x1488   : > { %v8172_v9 = vpop.f32.mrf.mxu1  ;;  %v8200_v8 = vpop.f32.mrf.mxu0 }
0x1489   : > { %4270 = vrot.lane.b32.xlu0 %v8172_v9, %s9205_s18  ;;  %4213 = vrot.lane.b32.xlu1 %v8172_v9, %s9203_s22 }
0x148a   : > { %v8208_v18 = vpop.f32.mrf.mxu1  ;;  %v8244_v62 = vpop.f32.mrf.mxu0 }
0x148c   : > { %v8260_v56 = vpop.f32.mrf.mxu1  ;;  %v8294_v2 = vpop.f32.mrf.mxu0 }
0x148d   : > { %4450 = vrot.lane.b32.xlu0 %v8172_v9, %s9202_s28  ;;  %4318 = vrot.lane.b32.xlu1 %v8172_v9, %s9201_s27 }
0x148e   : > { %v8312_v32 = vpop.f32.mrf.mxu1  ;;  %v8326_v15 = vpop.f32.mrf.mxu0 }
0x148f   : > { %9423 = vst [vmem:[#allocation47_spill] sm:$0xff] %v8312_v32 }
0x1490   : > { %v8344_v11 = vpop.f32.mrf.mxu1  ;;  %v8358_v20 = vpop.f32.mrf.mxu0 }
0x1491   : > { %4504 = vrot.lane.b32.xlu0 %v8172_v9, %s9199_s25  ;;  %4372 = vrot.lane.b32.xlu1 %v8172_v9, %s9198_s26  ;;  %9430 = vst [vmem:[#allocation84_spill] sm:$0xff] %v8358_v20 }
0x1492   : > { %v8368_v61 = vpop.f32.mrf.mxu1 }
0x1495   : > { %4558 = vrot.lane.b32.xlu0 %v8172_v9, %s9200_s0  ;;  %4606 = vrot.lane.b32.xlu1 %v8172_v9, %s9213_s15 }
0x1499   : > { %4907 = vrot.lane.b32.xlu0 %v8200_v8, %s9202_s28  ;;  %4670 = vrot.lane.b32.xlu1 %v8200_v8, %s9203_s22 }
0x149d   : > { %4727 = vrot.lane.b32.xlu1 %v8200_v8, %s9205_s18  ;;  %4320 = vrot.lane.b32.xlu0 %v8208_v18, %s9201_s27 }
0x14a1   : > { %4775 = vrot.lane.b32.xlu1 %v8200_v8, %s9201_s27  ;;  %4374 = vrot.lane.b32.xlu0 %v8208_v18, %s9198_s26 }
0x14a5   : > { %4829 = vrot.lane.b32.xlu1 %v8200_v8, %s9198_s26  ;;  %4452 = vrot.lane.b32.xlu0 %v8208_v18, %s9202_s28 }
0x14a9   : > { %4506 = vrot.lane.b32.xlu0 %v8208_v18, %s9199_s25  ;;  %4215 = vrot.lane.b32.xlu1 %v8208_v18, %s9203_s22 }
0x14ad   : > { %4560 = vrot.lane.b32.xlu0 %v8208_v18, %s9200_s0  ;;  %4272 = vrot.lane.b32.xlu1 %v8208_v18, %s9205_s18 }
0x14b1   : > { %4729 = vrot.lane.b32.xlu0 %v8244_v62, %s9205_s18  ;;  %4608 = vrot.lane.b32.xlu1 %v8208_v18, %s9213_s15 }
0x14b5   : > { %4777 = vrot.lane.b32.xlu0 %v8244_v62, %s9201_s27  ;;  %4672 = vrot.lane.b32.xlu1 %v8244_v62, %s9203_s22 }
0x14b9   : > { %4831 = vrot.lane.b32.xlu0 %v8244_v62, %s9198_s26  ;;  %4217 = vrot.lane.b32.xlu1 %v8260_v56, %s9203_s22 }
0x14bd   : > { %4909 = vrot.lane.b32.xlu0 %v8244_v62, %s9202_s28  ;;  %4274 = vrot.lane.b32.xlu1 %v8260_v56, %s9205_s18 }
0x14c1   : > { %4963 = vrot.lane.b32.xlu0 %v8244_v62, %s9199_s25  ;;  %4376 = vrot.lane.b32.xlu1 %v8260_v56, %s9198_s26 }
0x14c5   : > { %4322 = vrot.lane.b32.xlu0 %v8260_v56, %s9201_s27  ;;  %4454 = vrot.lane.b32.xlu1 %v8260_v56, %s9202_s28 }
0x14c9   : > { %4562 = vrot.lane.b32.xlu0 %v8260_v56, %s9200_s0  ;;  %4508 = vrot.lane.b32.xlu1 %v8260_v56, %s9199_s25 }
0x14cd   : > { %4731 = vrot.lane.b32.xlu0 %v8294_v2, %s9205_s18  ;;  %4610 = vrot.lane.b32.xlu1 %v8260_v56, %s9213_s15 }
0x14d1   : > { %4779 = vrot.lane.b32.xlu0 %v8294_v2, %s9201_s27  ;;  %4674 = vrot.lane.b32.xlu1 %v8294_v2, %s9203_s22 }
0x14d5   : > { %4833 = vrot.lane.b32.xlu1 %v8294_v2, %s9198_s26  ;;  %4378 = vrot.lane.b32.xlu0 %v8312_v32, %s9198_s26 }
0x14d9   : > { %4911 = vrot.lane.b32.xlu1 %v8294_v2, %s9202_s28  ;;  %4612 = vrot.lane.b32.xlu0 %v8312_v32, %s9213_s15 }
0x14dd   : > { %4965 = vrot.lane.b32.xlu1 %v8294_v2, %s9199_s25  ;;  %4676 = vrot.lane.b32.xlu0 %v8326_v15, %s9203_s22 }
0x14e1   : > { %4835 = vrot.lane.b32.xlu0 %v8326_v15, %s9198_s26  ;;  %4219 = vrot.lane.b32.xlu1 %v8312_v32, %s9203_s22 }
0x14e5   : > { %4276 = vrot.lane.b32.xlu1 %v8312_v32, %s9205_s18  ;;  %4278 = vrot.lane.b32.xlu0 %v8344_v11, %s9205_s18 }
0x14e9   : > { %4324 = vrot.lane.b32.xlu1 %v8312_v32, %s9201_s27  ;;  %4614 = vrot.lane.b32.xlu0 %v8344_v11, %s9213_s15 }
0x14ed   : > { %4456 = vrot.lane.b32.xlu1 %v8312_v32, %s9202_s28  ;;  %4735 = vrot.lane.b32.xlu0 %v8358_v20, %s9205_s18 }
0x14f1   : > { %4510 = vrot.lane.b32.xlu1 %v8312_v32, %s9199_s25  ;;  %4223 = vrot.lane.b32.xlu0 %v8368_v61, %s9203_s22 }
0x14f5   : > { %4564 = vrot.lane.b32.xlu1 %v8312_v32, %s9200_s0  ;;  %4328 = vrot.lane.b32.xlu0 %v8368_v61, %s9201_s27 }
0x14f9   : > { %4733 = vrot.lane.b32.xlu1 %v8326_v15, %s9205_s18  ;;  %4460 = vrot.lane.b32.xlu0 %v8368_v61, %s9202_s28 }
0x14fb   : > { %v8386_v12 = vpop.permute.xlu0 %4270  ;;  %v4214_v44 = vpop.permute.xlu1 %4213 }
0x14fc   : > { %v4234_v51 = vsel %vm679_vm2, 0.0, %v4214_v44  ;;  %v4291_v27 = vsel %vm737_vm3, 0.0, %v8386_v12 }
0x14fd   : > { %v4237_v1 = vmul.f32 %v6041_v53, %v4234_v51  ;;  %4781 = vrot.lane.b32.xlu1 %v8326_v15, %s9201_s27  ;;  %5040 = vperm.xlu0 %5586, %v8057_v60   ;;  %v4306_v51 = vmul.f32 %v8170_v43, %v4291_v27 }
0x14ff   : > { %v4451_v19 = vpop.permute.xlu0 %4450  ;;  %v4319_v46 = vpop.permute.xlu1 %4318  ;;  %v4258_v26 = vmul.f32 %v8146_v42, %v4237_v1 }
0x1500   : > { %v4339_v14 = vsel %vm786_vm5, 0.0, %v4319_v46 }
0x1501   : > { %v4342_v37 = vmul.f32 %v6049_v59, %v4339_v14  ;;  %4913 = vrot.lane.b32.xlu1 %v8326_v15, %s9202_s28  ;;  %4961 = vrot.lane.b32.xlu0 %v8200_v8, %s9199_s25  ;;  %v4312_v48 = vadd.f32 %v4306_v51, %v4258_v26  ;;  %v4438_v26 = vmul.f32 %v8168_v13, %v8172_v9 }
0x1502   : > { %5589 = vset.pattern.permute.xlu0 %v9398_v24 }
0x1503   : > { %v4360_v30 = vmul.f32 %v8206_v25, %v4342_v37  ;;  %v4505_v57 = vpop.permute.xlu0 %4504  ;;  %v4373_v28 = vpop.permute.xlu1 %4372 }
0x1504   : > { %v4393_v31 = vsel %vm841_vm8, 0.0, %v4373_v28  ;;  %v8414_v37 = vpop.f32.mrf.mxu0 }
0x1505   : > { %v4396_v1 = vmul.f32 %v6041_v53, %v4393_v31  ;;  %4967 = vrot.lane.b32.xlu1 %v8326_v15, %s9199_s25  ;;  %5071 = vrot.lane.b32.xlu0 %v8358_v20, %s9213_s15  ;;  %v4366_v14 = vadd.f32 %v4360_v30, %v4312_v48  ;;  %9435 = vst [vmem:[#allocation37_spill] sm:$0xff] %v8414_v37 }
0x1507   : > { %v4414_v24 = vmul.f32 %v8160_v40, %v4396_v1  ;;  %v4559_v54 = vpop.permute.xlu0 %4558  ;;  %v8412_v27 = vpop.permute.xlu1 %4606 }
0x1508   : > { %9434 = vst [vmem:[#allocation87_spill] sm:$0xff] %v8412_v27 }
0x1509   : > { %v4420_v7 = vadd.f32 %v4414_v24, %v4366_v14  ;;  %4221 = vrot.lane.b32.xlu1 %v8344_v11, %s9203_s22  ;;  %4680 = vrot.lane.b32.xlu0 %v8414_v37, %s9203_s22 }
0x150b   : > { %v8422_v31 = vpop.permute.xlu0 %4907  ;;  %v8424_v30 = vpop.permute.xlu1 %4670  ;;  %v4444_v48 = vadd.f32 %v4438_v26, %v4420_v7 }
0x150d   : > { %4326 = vrot.lane.b32.xlu1 %v8344_v11, %s9201_s27  ;;  %4785 = vrot.lane.b32.xlu0 %v8414_v37, %s9201_s27 }
0x150f   : > { %v8430_v51 = vpop.permute.xlu1 %4727  ;;  %v4321_v1 = vpop.permute.xlu0 %4320 }
0x1510   : > { %v4330_v63 = vsel %vm786_vm5, %v4319_v46, %v4321_v1 }
0x1511   : > { %4380 = vrot.lane.b32.xlu1 %v8344_v11, %s9198_s26  ;;  %5069 = vrot.lane.b32.xlu0 %v8326_v15, %s9213_s15 }
0x1513   : > { %v8436_v9 = vpop.permute.xlu1 %4775  ;;  %v4375_v14 = vpop.permute.xlu0 %4374 }
0x1515   : > { %4458 = vrot.lane.b32.xlu1 %v8344_v11, %s9202_s28  ;;  %4917 = vrot.lane.b32.xlu0 %v8414_v37, %s9202_s28 }
0x1517   : > { %v8442_v7 = vpop.permute.xlu1 %4829  ;;  %v4453_v24 = vpop.permute.xlu0 %4452 }
0x1518   : > { %v4462_v26 = vsel %vm920_vm9, %v4451_v19, %v4453_v24  ;;  %v4384_v19 = vsel %vm841_vm8, %v4373_v28, %v4375_v14  ;;  %v4471_v28 = vsel %vm920_vm9, %v4453_v24, 0.0 }
0x1519   : > { %v4474_v27 = vmul.f32 %v6049_v59, %v4462_v26  ;;  %4512 = vrot.lane.b32.xlu1 %v8344_v11, %s9199_s25  ;;  %5019 = vrot.lane.b32.xlu0 %v8294_v2, %s9200_s0 }
0x151b   : > { %v4492_v52 = vmul.f32 %v8286_v33, %v4474_v27  ;;  %v4507_v3 = vpop.permute.xlu0 %4506  ;;  %v4216_v34 = vpop.permute.xlu1 %4215  ;;  %v4343_v27 = vmul.f32 %v6059_v47, %v4330_v63 }
0x151c   : > { %v4516_v41 = vsel %vm975_vm10, %v4505_v57, %v4507_v3  ;;  %v4225_v32 = vsel %vm679_vm2, %v4214_v44, %v4216_v34  ;;  %v4397_v44 = vmul.f32 %v6055_v4, %v4384_v19 }
0x151d   : > { %v4498_v60 = vadd.f32 %v4492_v52, %v4444_v48  ;;  %v4528_v26 = vmul.f32 %v6041_v53, %v4516_v41  ;;  %4566 = vrot.lane.b32.xlu1 %v8344_v11, %s9200_s0  ;;  %v4238_v37 = vmul.f32 %v6055_v4, %v4225_v32  ;;  %5017 = vrot.lane.b32.xlu0 %v8244_v62, %s9200_s0 }
0x151e   : > { %v4361_v14 = vmul.f32 %v8206_v25, %v4343_v27  ;;  %v4439_v25 = vmul.f32 %v8168_v13, %v8208_v18 }
0x151f   : > { %v4546_v46 = vmul.f32 %v8318_v35, %v4528_v26  ;;  %v4561_v57 = vpop.permute.xlu0 %4560  ;;  %v4273_v1 = vpop.permute.xlu1 %4272  ;;  %v4259_v32 = vmul.f32 %v8146_v42, %v4238_v37  ;;  %v4525_v42 = vsel %vm975_vm10, %v4507_v3, 0.0 }
0x1520   : > { %v4570_v41 = vsel %vm1030_vm11, %v4559_v54, %v4561_v57  ;;  %v4282_v34 = vsel %vm737_vm3, %v8386_v12, %v4273_v1  ;;  %v4529_v26 = vmul.f32 %v6055_v4, %v4525_v42 }
0x1521   : > { %v4552_v52 = vadd.f32 %v4546_v46, %v4498_v60  ;;  %v4594_v48 = vmul.f32 %v8366_v39, %v4570_v41  ;;  %v4307_v63 = vmul.f32 %v8170_v43, %v4282_v34  ;;  %4678 = vrot.lane.b32.xlu1 %v8358_v20, %s9203_s22  ;;  %5015 = vrot.lane.b32.xlu0 %v8200_v8, %s9200_s0 }
0x1522   : > { %v4475_v60 = vmul.f32 %v6059_v47, %v4471_v28  ;;  %v4415_v43 = vmul.f32 %v8160_v40, %v4397_v44  ;;  %v4579_v44 = vsel %vm1030_vm11, %v4561_v57, 0.0  ;;  %v4547_v18 = vmul.f32 %v8318_v35, %v4529_v26 }
0x1523   : > { %v8476_v24 = vadd.f32 %v4594_v48, %v4552_v52  ;;  %v4313_v54 = vadd.f32 %v4307_v63, %v4259_v32  ;;  %v4730_v19 = vpop.permute.xlu0 %4729  ;;  %v8478_v12 = vpop.permute.xlu1 %4608  ;;  %v4595_v57 = vmul.f32 %v8366_v39, %v4579_v44 }
0x1524   : > { %v4493_v41 = vmul.f32 %v8286_v33, %v4475_v60  ;;  %v4739_v28 = vsel %vm737_vm3, %v8430_v51, %v4730_v19 }
0x1525   : > { %v4367_v37 = vadd.f32 %v4361_v14, %v4313_v54  ;;  %4783 = vrot.lane.b32.xlu1 %v8358_v20, %s9201_s27  ;;  %v4764_v52 = vmul.f32 %v8192_v5, %v4739_v28  ;;  %s5417_s27 = sshll.u32 %s5841_s17, 8  ;;  %s5744_s17 = smov [#allocation2]  }
0x1526   : > { %s5276_s19 = scalar_lea.hbm %s9495_s16, %s5417_s27  ;;  %s5668_s1 = sshll.u32 %s5744_s17, 4  ;;  %s5669_s1 = int_to_ptr.vmem [resolvable:$false] %s5668_s1 }
0x1527   : > { %v4421_v46 = vadd.f32 %v4415_v43, %v4367_v37  ;;  %v4778_v27 = vpop.permute.xlu0 %4777  ;;  %v4673_v1 = vpop.permute.xlu1 %4672  ;;  %s5670_s29 = scalar_lea.vmem %s5669_s1, 512 }
0x1528   : > { %v4787_v40 = vsel %vm786_vm5, %v8436_v9, %v4778_v27  ;;  %v4682_v3 = vsel %vm679_vm2, %v8424_v30, %v4673_v1 }
0x1529   : > { %v4445_v34 = vadd.f32 %v4439_v25, %v4421_v46  ;;  %v4800_v32 = vmul.f32 %v6059_v47, %v4787_v40  ;;  %v4695_v13 = vmul.f32 %v6055_v4, %v4682_v3  ;;  %4837 = vrot.lane.b32.xlu1 %v8358_v20, %s9198_s26  ;;  %v4896_v3 = vmul.f32 %v8334_v58, %v8244_v62 }
0x152b   : > { %v4499_v33 = vadd.f32 %v4493_v41, %v4445_v34  ;;  %v4716_v48 = vmul.f32 %v8274_v36, %v4695_v13  ;;  %v4832_v63 = vpop.permute.xlu0 %4831  ;;  %v8503_v14 = vpop.permute.xlu1 %4217  ;;  %v4818_v42 = vmul.f32 %v8216_v50, %v4800_v32 }
0x152c   : > { %v4841_v54 = vsel %vm841_vm8, %v8442_v7, %v4832_v63  ;;  %v4235_v19 = vsel %vm679_vm2, 0.0, %v8503_v14 }
0x152d   : > { %v4553_v60 = vadd.f32 %v4547_v18, %v4499_v33  ;;  %v4770_v35 = vadd.f32 %v4764_v52, %v4716_v48  ;;  %v4854_v43 = vmul.f32 %v6055_v4, %v4841_v54  ;;  %4915 = vrot.lane.b32.xlu1 %v8358_v20, %s9202_s28  ;;  %v4239_v37 = vmul.f32 %v6041_v53, %v4235_v19 }
0x152f   : > { %v8515_v26 = vadd.f32 %v4595_v57, %v4553_v60  ;;  %v4824_v39 = vadd.f32 %v4818_v42, %v4770_v35  ;;  %v4872_v46 = vmul.f32 %v8310_v55, %v4854_v43  ;;  %v4910_v25 = vpop.permute.xlu0 %4909  ;;  %v8518_v27 = vpop.permute.xlu1 %4274  ;;  %v4260_v34 = vmul.f32 %v8158_v21, %v4239_v37 }
0x1530   : > { %v8522_v1 = vsel %vm920_vm9, %v8422_v31, %v4910_v25  ;;  %v4928_v41 = vsel %vm920_vm9, %v4910_v25, 0.0  ;;  %v4292_v28 = vsel %vm737_vm3, 0.0, %v8518_v27  ;;  %v4440_v25 = vmul.f32 %v8268_v6, %v8260_v56 }
0x1531   : > { %9436 = vst [vmem:[#allocation14_spill] sm:$0xff] %v8522_v1  ;;  %v4878_v40 = vadd.f32 %v4872_v46, %v4824_v39  ;;  %v4932_v44 = vmul.f32 %v6059_v47, %v4928_v41  ;;  %4969 = vrot.lane.b32.xlu1 %v8358_v20, %s9199_s25  ;;  %v4308_v32 = vmul.f32 %v8150_v22, %v4292_v28 }
0x1533   : > { %v4902_v31 = vadd.f32 %v4896_v3, %v4878_v40  ;;  %v4950_v13 = vmul.f32 %v8296_v38, %v4932_v44  ;;  %v8535_v18 = vpop.permute.xlu0 %4963  ;;  %v4377_v33 = vpop.permute.xlu1 %4376  ;;  %v4314_v52 = vadd.f32 %v4308_v32, %v4260_v34 }
0x1534   : > { %9437 = vst [vmem:[#allocation72_spill] sm:$0xff] %v8535_v18  ;;  %v4394_v63 = vsel %vm841_vm8, 0.0, %v4377_v33 }
0x1535   : > { %v8537_v48 = vadd.f32 %v4950_v13, %v4902_v31  ;;  %4280 = vrot.lane.b32.xlu1 %v8368_v61, %s9205_s18  ;;  %v4398_v60 = vmul.f32 %v6041_v53, %v4394_v63 }
0x1537   : > { %9438 = vst [vmem:[#allocation13_spill] sm:$0xff] %v8537_v48  ;;  %v4323_v57 = vpop.permute.xlu0 %4322  ;;  %v8542_v54 = vpop.permute.xlu1 %4454  ;;  %v4416_v39 = vmul.f32 %v8236_v0, %v4398_v60 }
0x1538   : > { %v4340_v19 = vsel %vm786_vm5, 0.0, %v4323_v57 }
0x1539   : > { %v4344_v42 = vmul.f32 %v6049_v59, %v4340_v19  ;;  %4382 = vrot.lane.b32.xlu1 %v8368_v61, %s9198_s26 }
0x153b   : > { %v4362_v35 = vmul.f32 %v8154_v10, %v4344_v42  ;;  %v8550_v43 = vpop.permute.xlu0 %4562  ;;  %v8552_v37 = vpop.permute.xlu1 %4508 }
0x153d   : > { %v4368_v46 = vadd.f32 %v4362_v35, %v4314_v52  ;;  %5098 = vperm.xlu1 %5588, %v8050_v49  }
0x153f   : > { %v4422_v41 = vadd.f32 %v4416_v39, %v4368_v46  ;;  %v8558_v28 = vpop.permute.xlu0 %4731  ;;  %v4611_v40 = vpop.permute.xlu1 %4610 }
0x1540   : > { %v4749_v32 = vsel %vm737_vm3, 0.0, %v8558_v28 }
0x1541   : > { %5023 = vrot.lane.b32.xlu1 %v8358_v20, %s9200_s0  ;;  %v8562_v3 = vadd.f32 %v4440_v25, %v4422_v41  ;;  %v4765_v52 = vmul.f32 %v8184_v23, %v4749_v32  ;;  %v4897_v32 = vmul.f32 %v8280_v16, %v8294_v2 }
0x1543   : > { %v8564_v44 = vpop.permute.xlu0 %4779  ;;  %v4675_v34 = vpop.permute.xlu1 %4674 }
0x1544   : > { %v4797_v49 = vsel %vm786_vm5, 0.0, %v8564_v44  ;;  %v4692_v56 = vsel %vm679_vm2, 0.0, %v4675_v34 }
0x1545   : > { %v4801_v31 = vmul.f32 %v6049_v59, %v4797_v49  ;;  %v4696_v13 = vmul.f32 %v6041_v53, %v4692_v56  ;;  %5021 = vrot.lane.b32.xlu1 %v8326_v15, %s9200_s0 }
0x1547   : > { %v4717_v63 = vmul.f32 %v8252_v45, %v4696_v13  ;;  %v8577_v19 = vpop.permute.xlu1 %4833  ;;  %v4819_v42 = vmul.f32 %v8288_v17, %v4801_v31 }
0x1548   : > { %v4851_v60 = vsel %vm841_vm8, 0.0, %v8577_v19 }
0x1549   : > { %v4771_v35 = vadd.f32 %v4765_v52, %v4717_v63  ;;  %v4855_v39 = vmul.f32 %v6041_v53, %v4851_v60  ;;  %4514 = vrot.lane.b32.xlu1 %v8368_v61, %s9199_s25  ;;  %v4379_v63 = vpop.permute.xlu0 %4378 }
0x154b   : > { %v4825_v46 = vadd.f32 %v4819_v42, %v4771_v35  ;;  %v4873_v25 = vmul.f32 %v8258_v29, %v4855_v39  ;;  %v8586_v41 = vpop.permute.xlu1 %4911  ;;  %v9439_v42 = vld [vmem:[#allocation37_spill] sm:$0xff] }
0x154d   : > { %v4879_v49 = vadd.f32 %v4873_v25, %v4825_v46  ;;  %4568 = vrot.lane.b32.xlu1 %v8368_v61, %s9200_s0  ;;  %v8609_v48 = vpop.permute.xlu0 %4612 }
0x154f   : > { %v8592_v56 = vpop.permute.xlu1 %4965  ;;  %v8594_v31 = vadd.f32 %v4897_v32, %v4879_v49  ;;  %v9440_v32 = vld [vmem:[#allocation49_spill] sm:$0xff]  ;;  %v4385_v49 = vsel %vm841_vm8, %v4377_v33, %v4379_v63 }
0x1550   : > { %v4399_v38 = vmul.f32 %v6055_v4, %v4385_v49 }
0x1551   : > { %4616 = vrot.lane.b32.xlu1 %v8368_v61, %s9213_s15 }
0x1552   : > { %v4417_v63 = vmul.f32 %v8236_v0, %v4399_v38 }
0x1553   : > { %v4220_v13 = vpop.permute.xlu1 %4219 }
0x1554   : > { %v4226_v52 = vsel %vm679_vm2, %v8503_v14, %v4220_v13 }
0x1555   : > { %v4240_v60 = vmul.f32 %v6055_v4, %v4226_v52  ;;  %4737 = vrot.lane.b32.xlu1 %v9439_v42, %s9205_s18 }
0x1557   : > { %v4277_v35 = vpop.permute.xlu1 %4276  ;;  %v4261_v46 = vmul.f32 %v8158_v21, %v4240_v60  ;;  %v4677_v60 = vpop.permute.xlu0 %4676 }
0x1558   : > { %v4283_v39 = vsel %vm737_vm3, %v8518_v27, %v4277_v35  ;;  %v4683_v0 = vsel %vm679_vm2, %v4675_v34, %v4677_v60 }
0x1559   : > { %v4309_v25 = vmul.f32 %v8150_v22, %v4283_v39  ;;  %5094 = vperm.xlu1 %5588, %v9440_v32  }
0x155b   : > { %v4315_v14 = vadd.f32 %v4309_v25, %v4261_v46  ;;  %v4325_v13 = vpop.permute.xlu1 %4324  ;;  %v9441_v46 = vld [vmem:[#allocation47_spill] sm:$0xff]  ;;  %v9442_v25 = vld [vmem:[#allocation64_spill] sm:$0xff] }
0x155c   : > { %v4331_v52 = vsel %vm786_vm5, %v4323_v57, %v4325_v13 }
0x155d   : > { %v4345_v20 = vmul.f32 %v6059_v47, %v4331_v52  ;;  %4839 = vrot.lane.b32.xlu1 %v9439_v42, %s9198_s26 }
0x155f   : > { %v4363_v21 = vmul.f32 %v8154_v10, %v4345_v20  ;;  %v4457_v22 = vpop.permute.xlu1 %4456  ;;  %v4441_v20 = vmul.f32 %v8268_v6, %v9441_v46  ;;  %v4619_v10 = vsel %vm1079_vm12, %v4611_v40, %v8609_v48 }
0x1560   : > { %v4463_v27 = vsel %vm920_vm9, %v8542_v54, %v4457_v22  ;;  %v4472_v33 = vsel %vm920_vm9, %v4457_v22, 0.0  ;;  %v9443_v22 = vld [vmem:[#allocation65_spill] sm:$0xff] }
0x1561   : > { %v4369_v35 = vadd.f32 %v4363_v21, %v4315_v14  ;;  %v4476_v57 = vmul.f32 %v6049_v59, %v4463_v27  ;;  %v4477_v39 = vmul.f32 %v6059_v47, %v4472_v33  ;;  %5067 = vrot.lane.b32.xlu1 %v8294_v2, %s9213_s15  ;;  %v4632_v21 = vmul.f32 %v6049_v59, %v4619_v10  ;;  %v9445_v10 = vld [vmem:[#allocation20_spill] sm:$0xff] }
0x1563   : > { %v4423_v54 = vadd.f32 %v4417_v63, %v4369_v35  ;;  %v4494_v32 = vmul.f32 %v9442_v25, %v4476_v57  ;;  %v4511_v49 = vpop.permute.xlu1 %4510  ;;  %v4495_v38 = vmul.f32 %v9442_v25, %v4477_v39  ;;  %v4697_v63 = vmul.f32 %v6055_v4, %v4683_v0  ;;  %v9444_v39 = vld [vmem:[#allocation23_spill] sm:$0xff]  ;;  %v4836_v25 = vpop.permute.xlu0 %4835 }
0x1564   : > { %v4517_v14 = vsel %vm975_vm10, %v8552_v37, %v4511_v49  ;;  %v4526_v13 = vsel %vm975_vm10, %v4511_v49, 0.0 }
0x1565   : > { %v4447_v2 = vadd.f32 %v4441_v20, %v4423_v54  ;;  %v4500_v52 = vadd.f32 %v4494_v32, %v8562_v3  ;;  %v4530_v6 = vmul.f32 %v6041_v53, %v4517_v14  ;;  %v4531_v40 = vmul.f32 %v6055_v4, %v4526_v13  ;;  %4971 = vrot.lane.b32.xlu1 %v9439_v42, %s9199_s25  ;;  %s458_s25 = sand.u32 1, %s5716_s30  }
0x1566   : > { %v4650_v54 = vmul.f32 %v9445_v10, %v4632_v21  ;;  %s5341_s26 = sshll.u32 %s458_s25, 4  ;;  %s5264_s21 = scalar_lea.sflag [#allocation3], %s458_s25 }
0x1567   : > { %v4501_v34 = vadd.f32 %v4495_v38, %v4447_v2  ;;  %v4548_v27 = vmul.f32 %v9443_v22, %v4530_v6  ;;  %v4549_v33 = vmul.f32 %v9443_v22, %v4531_v40  ;;  %v4565_v37 = vpop.permute.xlu1 %4564  ;;  %v4718_v38 = vmul.f32 %v8252_v45, %v4697_v63  ;;  %s460_s22 = scalar_lea.vmem [#allocation2], %s5341_s26 }
0x1568   : > { %v4571_v3 = vsel %vm1030_vm11, %v8550_v43, %v4565_v37  ;;  %v4580_v60 = vsel %vm1030_vm11, %v4565_v37, 0.0  ;;  %v4842_v2 = vsel %vm841_vm8, %v8577_v19, %v4836_v25  ;;  %s5278_s18 = sshll.u32 %s460_s22, 4  ;;  %s5279_s18 = int_to_ptr.vmem [resolvable:$true] %s5278_s18 }
0x1569   : > { %v4554_v35 = vadd.f32 %v4548_v27, %v4500_v52  ;;  %v4555_v57 = vadd.f32 %v4549_v33, %v4501_v34  ;;  %v4596_v46 = vmul.f32 %v9444_v39, %v4571_v3  ;;  %v4597_v20 = vmul.f32 %v9444_v39, %v4580_v60  ;;  %5025 = vrot.lane.b32.xlu1 %v9439_v42, %s9200_s0  ;;  %s5664_s20 = scalar_lea.vmem %s5279_s18, 256  ;;  %p5671_p0 = scmp.lt.s32.totalorder %s5279_s18, %s5669_s1 }
0x156a   : > { %v4856_v21 = vmul.f32 %v6055_v4, %v4842_v2  ;;  %p5665_p11 = scmp.ne.s32.totalorder %s5279_s18, %s5664_s20  ;;  %p5672_p1 = scmp.lt.s32.totalorder %s5670_s29, %s5664_s20 }
0x156b   : > { %v4602_v32 = vadd.f32 %v4596_v46, %v4554_v35  ;;  %v4603_v49 = vadd.f32 %v4597_v20, %v4555_v57  ;;  %v4734_v0 = vpop.permute.xlu1 %4733 }
0x156c   : > { %v4740_v43 = vsel %vm737_vm3, %v8558_v28, %v4734_v0  ;;  %v4874_v22 = vmul.f32 %v8258_v29, %v4856_v21  ;;  %p5666_p12 = pnand %p5665_p11, %p5858_p5  ;;  %p5673_p2 = por %p5672_p1, %p5671_p0 }
0x156d   : > { %v8655_v14 = vadd.f32 %v4650_v54, %v4602_v32  ;;  %v4766_v13 = vmul.f32 %v8184_v23, %v4740_v43  ;;  %5073 = vrot.lane.b32.xlu1 %v9439_v42, %s9213_s15  ;;  %v9447_v54 = vld [vmem:[#allocation69_spill] sm:$0xff]  ;;  %v4279_v32 = vpop.permute.xlu0 %4278 }
0x156e   : > { %p5667_p13 = pneg %p5666_p12 }
0x156f   : > { %v4772_v52 = vadd.f32 %v4766_v13, %v4718_v38  ;;  %v4782_v6 = vpop.permute.xlu1 %4781 }
0x1570   : > { %v4788_v40 = vsel %vm786_vm5, %v8564_v44, %v4782_v6  ;;  %v4628_v6 = vsel %vm1079_vm12, %v8609_v48, 0.0  ;;  %p5674_p3 = pnand %p5673_p2, %p5667_p13 }
0x1571   : > { %v4802_v28 = vmul.f32 %v6059_v47, %v4788_v40  ;;  %5065 = vrot.lane.b32.xlu1 %v8244_v62, %s9213_s15  ;;  %v4898_v62 = vmul.f32 %v8280_v16, %v8326_v15  ;;  %v8693_v38 = vpop.permute.xlu0 %4614  ;;  %v4633_v21 = vmul.f32 %v6059_v47, %v4628_v6 }
0x1573   : > { %v4820_v23 = vmul.f32 %v8288_v17, %v4802_v28  ;;  %v4914_v45 = vpop.permute.xlu1 %4913  ;;  %v9446_v17 = vld [vmem:[#allocation38_spill] sm:$0xff] }
0x1574   : > { %v4920_v34 = vsel %vm920_vm9, %v8586_v41, %v4914_v45  ;;  %v4929_v19 = vsel %vm920_vm9, %v4914_v45, 0.0 }
0x1575   : > { %v4826_v27 = vadd.f32 %v4820_v23, %v4772_v52  ;;  %v4933_v44 = vmul.f32 %v6049_v59, %v4920_v34  ;;  %v4934_v33 = vmul.f32 %v6059_v47, %v4929_v19  ;;  %5063 = vrot.lane.b32.xlu1 %v8200_v8, %s9213_s15  ;;  %v8697_v2 = vpop.permute.xlu0 %4735  ;;  %v4651_v23 = vmul.f32 %v9445_v10, %v4633_v21 }
0x1576   : > { %v4750_v48 = vsel %vm737_vm3, 0.0, %v8697_v2 }
0x1577   : > { %v4880_v37 = vadd.f32 %v4874_v22, %v4826_v27  ;;  %v4951_v63 = vmul.f32 %v9446_v17, %v4933_v44  ;;  %v4968_v3 = vpop.permute.xlu1 %4967  ;;  %v4952_v41 = vmul.f32 %v9446_v17, %v4934_v33  ;;  %v8711_v22 = vadd.f32 %v4651_v23, %v4603_v49  ;;  %v9449_v44 = vld [vmem:[#allocation63_spill] sm:$0xff] }
0x1578   : > { %v4974_v29 = vsel %vm975_vm10, %v8592_v56, %v4968_v3  ;;  %v4983_v60 = vsel %vm975_vm10, %v4968_v3, 0.0 }
0x1579   : > { %v4904_v35 = vadd.f32 %v4898_v62, %v4880_v37  ;;  %v4957_v57 = vadd.f32 %v4951_v63, %v8594_v31  ;;  %v4987_v39 = vmul.f32 %v6041_v53, %v4974_v29  ;;  %v4988_v46 = vmul.f32 %v6055_v4, %v4983_v60  ;;  %v4224_v40 = vpop.permute.xlu0 %4223  ;;  %v9450_v62 = vld [vmem:[#allocation77_spill] sm:$0xff]  ;;  %v9451_v29 = vld [vmem:[#allocation86_spill] sm:$0xff] }
0x157a   : > { %v4767_v17 = vmul.f32 %v9450_v62, %v4750_v48  ;;  %v5120_v63 = vmul.f32 %v8711_v22, %v8711_v22 }
0x157b   : > { %v4958_v20 = vadd.f32 %v4952_v41, %v4904_v35  ;;  %v5005_v16 = vmul.f32 %v9447_v54, %v4987_v39  ;;  %v5006_v15 = vmul.f32 %v9447_v54, %v4988_v46  ;;  %v4222_v25 = vpop.permute.xlu1 %4221 }
0x157c   : > { %v4236_v48 = vsel %vm679_vm2, 0.0, %v4222_v25 }
0x157d   : > { %v8689_v0 = vadd.f32 %v5005_v16, %v4957_v57  ;;  %v8691_v43 = vadd.f32 %v5006_v15, %v4958_v20  ;;  %v4329_v34 = vpop.permute.xlu0 %4328  ;;  %v5126_v57 = vmul.f32 %v5120_v63, %v8711_v22  ;;  %v4241_v63 = vmul.f32 %v6041_v53, %v4236_v48 }
0x157f   : > { %9448 = vst [vmem:[#allocation68_spill] sm:$0xff] %v8689_v0  ;;  %v4327_v56 = vpop.permute.xlu1 %4326  ;;  %v5132_v20 = vmul.f32 0.044715, %v5126_v57  ;;  %v4627_v57 = vsel %vm1079_vm12, %v8478_v12, 0.0 }
0x1581   : > { %v4461_v3 = vpop.permute.xlu0 %4460  ;;  %v5138_v15 = vadd.f32 %v5132_v20, %v8711_v22  ;;  %v4293_v20 = vsel %vm737_vm3, 0.0, %v4279_v32 }
0x1583   : > { %v4381_v13 = vpop.permute.xlu1 %4380  ;;  %v5144_v21 = vmul.f32 0.7978846, %v5138_v15 }
0x1585   : > { %v8731_v46 = vpop.permute.xlu0 %5040  ;;  %5650 = vtanh.f32 %v5144_v21  ;;  %v9458_v21 = vld [vmem:[#allocation87_spill] sm:$0xff] }
0x1586   : > { %9453 = vst [vmem:[#allocation80_spill] sm:$0xff] %v8731_v46  ;;  %v4618_v48 = vsel %vm1079_vm12, %v9458_v21, %v8478_v12  ;;  %v4332_v46 = vsel %vm786_vm5, %v4327_v56, %v4329_v34 }
0x1587   : > { %v8695_v31 = vpop.permute.xlu1 %4458 }
0x1589   : > { %v8735_v16 = vpop.permute.xlu0 %4961 }
0x158a   : > { %9455 = vst [vmem:[#allocation89_spill] sm:$0xff] %v8735_v16  ;;  %v9459_v16 = vld [vmem:[#allocation29_spill] sm:$0xff] }
0x158b   : > { %v8699_v52 = vpop.permute.xlu1 %4512  ;;  %v4262_v42 = vmul.f32 %v9459_v16, %v4241_v63  ;;  %v4630_v63 = vmul.f32 %v6049_v59, %v4618_v48 }
0x158d   : > { %v8740_v23 = vpop.permute.xlu0 %5071 }
0x158e   : > { %9457 = vst [vmem:[#allocation70_spill] sm:$0xff] %v8740_v23 }
0x158f   : > { %v8704_v28 = vpop.permute.xlu1 %4566 }
0x1592   : > { %v5651_v18 = vpop.eup %5650 }
0x1593   : > { %v8707_v45 = vpop.permute.xlu1 %4678 }
0x1594   : > { %v4693_v19 = vsel %vm679_vm2, 0.0, %v8707_v45 }
0x1595   : > { %v4698_v27 = vmul.f32 %v6041_v53, %v4693_v19 }
0x1597   : > { %v4719_v33 = vmul.f32 %v9449_v44, %v4698_v27  ;;  %v8717_v37 = vpop.permute.xlu1 %4783  ;;  %v8742_v27 = vpop.permute.xlu0 %4680 }
0x1598   : > { %v4798_v10 = vsel %vm786_vm5, 0.0, %v8717_v37 }
0x1599   : > { %v4803_v49 = vmul.f32 %v6049_v59, %v4798_v10  ;;  %v4773_v41 = vadd.f32 %v4767_v17, %v4719_v33  ;;  %v4227_v33 = vsel %vm679_vm2, %v4222_v25, %v4224_v40  ;;  %v4341_v10 = vsel %vm786_vm5, 0.0, %v4327_v56 }
0x159a   : > { %v5119_v17 = vmul.f32 %v8655_v14, %v8655_v14  ;;  %v4242_v15 = vmul.f32 %v6055_v4, %v4227_v33  ;;  %v4346_v25 = vmul.f32 %v6049_v59, %v4341_v10  ;;  %v4631_v10 = vmul.f32 %v6059_v47, %v4627_v57 }
0x159b   : > { %v4821_v60 = vmul.f32 %v9451_v29, %v4803_v49  ;;  %v8726_v35 = vpop.permute.xlu1 %4837  ;;  %v8757_v40 = vpop.permute.xlu0 %4785  ;;  %v4347_v56 = vmul.f32 %v6059_v47, %v4332_v46 }
0x159c   : > { %v4263_v12 = vmul.f32 %v9459_v16, %v4242_v15  ;;  %v5156_v16 = vadd.f32 1.0, %v5651_v18  ;;  %v4473_v18 = vsel %vm920_vm9, %v4461_v3, 0.0 }
0x159d   : > { %v8729_v39 = vadd.f32 %v4821_v60, %v4773_v41  ;;  %v4395_v41 = vsel %vm841_vm8, 0.0, %v4381_v13 }
0x159f   : > { %9452 = vst [vmem:[#allocation16_spill] sm:$0xff] %v8729_v39  ;;  %v8733_v54 = vpop.permute.xlu1 %4915  ;;  %v8778_v1 = vpop.permute.xlu0 %5069 }
0x15a0   : > { %9454 = vst [vmem:[#allocation28_spill] sm:$0xff] %v8733_v54  ;;  %v5085_v48 = vsel %vm1079_vm12, %v8778_v1, 0.0 }
0x15a3   : > { %v8738_v6 = vpop.permute.xlu1 %4969 }
0x15a4   : > { %9456 = vst [vmem:[#allocation78_spill] sm:$0xff] %v8738_v6  ;;  %v9460_v6 = vld [vmem:[#allocation62_spill] sm:$0xff] }
0x15a5   : > { %v4310_v39 = vmul.f32 %v9460_v6, %v4293_v20 }
0x15a7   : > { %v4281_v19 = vpop.permute.xlu1 %4280 }
0x15a8   : > { %v4284_v60 = vsel %vm737_vm3, %v4279_v32, %v4281_v19  ;;  %v5125_v19 = vmul.f32 %v5119_v17, %v8655_v14  ;;  %v4400_v32 = vmul.f32 %v6041_v53, %v4395_v41  ;;  %v4316_v41 = vadd.f32 %v4310_v39, %v4262_v42 }
0x15a9   : > { %v4311_v33 = vmul.f32 %v9460_v6, %v4284_v60  ;;  %v9462_v60 = vld [vmem:[#allocation26_spill] sm:$0xff] }
0x15aa   : > { %v4418_v21 = vmul.f32 %v9462_v60, %v4400_v32  ;;  %v9463_v6 = vld [vmem:[#allocation22_spill] sm:$0xff] }
0x15ab   : > { %v4383_v49 = vpop.permute.xlu1 %4382  ;;  %v4317_v57 = vadd.f32 %v4311_v33, %v4263_v12  ;;  %v4649_v20 = vmul.f32 %v9463_v6, %v4631_v10  ;;  %v4648_v42 = vmul.f32 %v9463_v6, %v4630_v63  ;;  %v9465_v63 = vld [vmem:[#allocation57_spill] sm:$0xff] }
0x15ac   : > { %v4386_v23 = vsel %vm841_vm8, %v4381_v13, %v4383_v49  ;;  %v9461_v13 = vld [vmem:[#allocation74_spill] sm:$0xff]  ;;  %v5131_v49 = vmul.f32 0.044715, %v5125_v19 }
0x15ad   : > { %v4364_v34 = vmul.f32 %v9461_v13, %v4346_v25  ;;  %v4401_v17 = vmul.f32 %v6055_v4, %v4386_v23  ;;  %v4365_v46 = vmul.f32 %v9461_v13, %v4347_v56  ;;  %v4464_v23 = vsel %vm920_vm9, %v8695_v31, %v4461_v3 }
0x15ae   : > { %v8789_v39 = vadd.f32 %v4649_v20, %v8515_v26  ;;  %v5137_v19 = vadd.f32 %v5131_v49, %v8655_v14  ;;  %v4478_v31 = vmul.f32 %v6049_v59, %v4464_v23  ;;  %v5162_v56 = vmul.f32 0.5, %v5156_v16  ;;  %v9464_v26 = vld [vmem:[#allocation59_spill] sm:$0xff] }
0x15af   : > { %v4370_v15 = vadd.f32 %v4364_v34, %v4316_v41  ;;  %v4419_v25 = vmul.f32 %v9462_v60, %v4401_v17  ;;  %v4371_v33 = vadd.f32 %v4365_v46, %v4317_v57  ;;  %v4442_v13 = vmul.f32 %v9464_v26, %v8344_v11  ;;  %v9466_v46 = vld [vmem:[#allocation76_spill] sm:$0xff] }
0x15b0   : > { %v5090_v34 = vmul.f32 %v6059_v47, %v5085_v48  ;;  %v8805_v3 = vadd.f32 %v4648_v42, %v8476_v24  ;;  %v5118_v41 = vmul.f32 %v8789_v39, %v8789_v39  ;;  %v4479_v60 = vmul.f32 %v6059_v47, %v4473_v18 }
0x15b1   : > { %v4424_v32 = vadd.f32 %v4418_v21, %v4370_v15  ;;  %v4425_v17 = vadd.f32 %v4419_v25, %v4371_v33  ;;  %v4443_v21 = vmul.f32 %v9464_v26, %v8368_v61  ;;  %v5143_v57 = vmul.f32 0.7978846, %v5137_v19  ;;  %v9467_v33 = vld [vmem:[#allocation66_spill] sm:$0xff] }
0x15b2   : > { %v4496_v15 = vmul.f32 %v9466_v46, %v4478_v31  ;;  %v5168_v25 = vmul.f32 %v5162_v56, %v8711_v22  ;;  %v5117_v18 = vmul.f32 %v8805_v3, %v8805_v3 }
0x15b3   : > { %v4448_v6 = vadd.f32 %v4442_v13, %v4424_v32  ;;  %v4449_v42 = vadd.f32 %v4443_v21, %v4425_v17  ;;  %v4497_v32 = vmul.f32 %v9466_v46, %v4479_v60  ;;  %5652 = vtanh.f32 %v5143_v57 }
0x15b4   : > { %v4691_v17 = vsel %vm679_vm2, 0.0, %v8424_v30 }
0x15b5   : > { %v4502_v13 = vadd.f32 %v4496_v15, %v4448_v6  ;;  %v4694_v30 = vmul.f32 %v6041_v53, %v4691_v17 }
0x15b8   : > { %v8768_v0 = vpop.permute.xlu1 %5098 }
0x15b9   : > { %v5108_v11 = vmul.f32 %v8768_v0, %v5090_v34  ;;  %v4503_v34 = vadd.f32 %v4497_v32, %v4449_v42 }
0x15bc   : > { %v8780_v54 = vpop.permute.xlu1 %5023 }
0x15c0   : > { %v8795_v10 = vpop.permute.xlu1 %5021 }
0x15c1   : > { %v5037_v12 = vsel %vm1030_vm11, %v8795_v10, 0.0 }
0x15c2   : > { %v5054_v49 = vmul.f32 %v9465_v63, %v5037_v12 }
0x15c4   : > { %v5060_v20 = vadd.f32 %v5054_v49, %v8691_v43  ;;  %v4515_v16 = vpop.permute.xlu1 %4514  ;;  %v5124_v43 = vmul.f32 %v5118_v41, %v8789_v39  ;;  %v4796_v49 = vsel %vm786_vm5, 0.0, %v8436_v9  ;;  %v5123_v41 = vmul.f32 %v5117_v18, %v8805_v3 }
0x15c5   : > { %v4518_v24 = vsel %vm975_vm10, %v8699_v52, %v4515_v16  ;;  %v4527_v23 = vsel %vm975_vm10, %v4515_v16, 0.0  ;;  %v4748_v9 = vsel %vm737_vm3, 0.0, %v8430_v51 }
0x15c6   : > { %v4532_v48 = vmul.f32 %v6041_v53, %v4518_v24  ;;  %v4533_v61 = vmul.f32 %v6055_v4, %v4527_v23  ;;  %v5114_v19 = vadd.f32 %v5108_v11, %v5060_v20  ;;  %v5130_v60 = vmul.f32 0.044715, %v5124_v43  ;;  %v9468_v20 = vld [vmem:[#allocation55_spill] sm:$0xff] }
0x15c7   : > { %v4799_v23 = vmul.f32 %v6049_v59, %v4796_v49  ;;  %v5129_v42 = vmul.f32 0.044715, %v5123_v41  ;;  %v4763_v51 = vmul.f32 %v8192_v5, %v4748_v9  ;;  %v4789_v41 = vsel %vm786_vm5, %v8717_v37, %v8757_v40 }
0x15c8   : > { %v4550_v31 = vmul.f32 %v9467_v33, %v4532_v48  ;;  %v4551_v52 = vmul.f32 %v9467_v33, %v4533_v61  ;;  %v4569_v12 = vpop.permute.xlu1 %4568  ;;  %v8827_v26 = vmul.f32 %v5168_v25, %v5114_v19  ;;  %v4850_v25 = vsel %vm841_vm8, 0.0, %v8442_v7  ;;  %v9469_v19 = vld [vmem:[#allocation67_spill] sm:$0xff]  ;;  %v4918_v33 = vpop.permute.xlu0 %4917 }
0x15c9   : > { %v4572_v22 = vsel %vm1030_vm11, %v8704_v28, %v4569_v12  ;;  %v4581_v56 = vsel %vm1030_vm11, %v4569_v12, 0.0  ;;  %v5136_v48 = vadd.f32 %v5130_v60, %v8789_v39  ;;  %v4715_v12 = vmul.f32 %v8274_v36, %v4694_v30 }
0x15ca   : > { %v4556_v21 = vadd.f32 %v4550_v31, %v4502_v13  ;;  %v4557_v11 = vadd.f32 %v4551_v52, %v4503_v34  ;;  %v4598_v16 = vmul.f32 %v9468_v20, %v4572_v22  ;;  %v4599_v28 = vmul.f32 %v9468_v20, %v4581_v56 }
0x15cb   : > { %v4684_v31 = vsel %vm679_vm2, %v8707_v45, %v8742_v27  ;;  %v4817_v22 = vmul.f32 %v8216_v50, %v4799_v23  ;;  %v4853_v56 = vmul.f32 %v6041_v53, %v4850_v25  ;;  %v5135_v13 = vadd.f32 %v5129_v42, %v8805_v3  ;;  %vm9491_vm2 = vmmov %vm9490_vm0 }
0x15cc   : > { %v4617_v46 = vpop.permute.xlu1 %4616  ;;  %v4605_v61 = vadd.f32 %v4599_v28, %v4557_v11  ;;  %v5142_v17 = vmul.f32 0.7978846, %v5136_v48  ;;  %v4769_v49 = vadd.f32 %v4763_v51, %v4715_v12  ;;  %v4699_v36 = vmul.f32 %v6055_v4, %v4684_v31  ;;  %v5653_v11 = vpop.eup %5652 }
0x15cd   : > { %v4620_v6 = vsel %vm1079_vm12, %v8693_v38, %v4617_v46  ;;  %v4629_v57 = vsel %vm1079_vm12, %v4617_v46, 0.0  ;;  %v4604_v38 = vadd.f32 %v4598_v16, %v4556_v21  ;;  %v4852_v50 = vsel %vm841_vm8, 0.0, %v8726_v35  ;;  %v5020_v46 = vpop.permute.xlu0 %5019 }
0x15ce   : > { %v4634_v15 = vmul.f32 %v6049_v59, %v4620_v6  ;;  %v4635_v24 = vmul.f32 %v6059_v47, %v4629_v57  ;;  %v4823_v20 = vadd.f32 %v4817_v22, %v4769_v49  ;;  %v5141_v28 = vmul.f32 0.7978846, %v5135_v13  ;;  %v9475_v49 = vld [vmem:[#allocation68_spill] sm:$0xff] }
0x15cf   : > { %v4857_v6 = vmul.f32 %v6041_v53, %v4852_v50  ;;  %5654 = vtanh.f32 %v5142_v17  ;;  %v4720_v37 = vmul.f32 %v9449_v44, %v4699_v36  ;;  %v4804_v40 = vmul.f32 %v6059_v47, %v4789_v41  ;;  %v9476_v41 = vld [vmem:[#allocation84_spill] sm:$0xff] }
0x15d0   : > { %v4652_v18 = vmul.f32 %v9469_v19, %v4634_v15  ;;  %v4653_v43 = vmul.f32 %v9469_v19, %v4635_v24  ;;  %v4738_v32 = vpop.permute.xlu1 %4737  ;;  %v5028_v15 = vsel %vm1030_vm11, %v5020_v46, %v8795_v10  ;;  %v5155_v25 = vadd.f32 1.0, %v5653_v11 }
0x15d1   : > { %v4741_v45 = vsel %vm737_vm3, %v8697_v2, %v4738_v32  ;;  %v4871_v2 = vmul.f32 %v8310_v55, %v4853_v56  ;;  %v4895_v42 = vmul.f32 %v8334_v58, %v8200_v8  ;;  %5656 = vtanh.f32 %v5141_v28  ;;  %v9471_v32 = vld [vmem:[#allocation28_spill] sm:$0xff]  ;;  %v9472_v58 = vld [vmem:[#allocation14_spill] sm:$0xff] }
0x15d2   : > { %v8857_v52 = vadd.f32 %v4652_v18, %v4604_v38  ;;  %v8859_v7 = vadd.f32 %v4653_v43, %v4605_v61  ;;  %v4768_v16 = vmul.f32 %v9450_v62, %v4741_v45  ;;  %v9470_v38 = vld [vmem:[#allocation40_spill] sm:$0xff]  ;;  %v5053_v10 = vmul.f32 %v9465_v63, %v5028_v15 }
0x15d3   : > { %v4877_v48 = vadd.f32 %v4871_v2, %v4823_v20  ;;  %v4875_v61 = vmul.f32 %v9470_v38, %v4857_v6  ;;  %v4822_v43 = vmul.f32 %v9451_v29, %v4804_v40  ;;  %v4921_v51 = vsel %vm920_vm9, %v9471_v32, %v4918_v33  ;;  %v9473_v56 = vld [vmem:[#allocation72_spill] sm:$0xff]  ;;  %v9478_v20 = vld [vmem:[#allocation78_spill] sm:$0xff] }
0x15d4   : > { %v5121_v5 = vmul.f32 %v8857_v52, %v8857_v52  ;;  %v5122_v34 = vmul.f32 %v8859_v7, %v8859_v7  ;;  %v8871_v27 = vpop.permute.xlu1 %5094  ;;  %v4774_v44 = vadd.f32 %v4768_v16, %v4720_v37  ;;  %v4931_v12 = vmul.f32 %v6049_v59, %v9472_v58  ;;  %v9479_v16 = vld [vmem:[#allocation75_spill] sm:$0xff] }
0x15d5   : > { %v5161_v63 = vmul.f32 0.5, %v5155_v25  ;;  %v4982_v13 = vsel %vm975_vm10, %v9473_v56, 0.0  ;;  %v4930_v29 = vsel %vm920_vm9, %v4918_v33, 0.0  ;;  %v4935_v17 = vmul.f32 %v6049_v59, %v4921_v51 }
0x15d6   : > { %v5127_v60 = vmul.f32 %v5121_v5, %v8857_v52  ;;  %v5128_v21 = vmul.f32 %v5122_v34, %v8859_v7  ;;  %v4828_v5 = vadd.f32 %v4822_v43, %v4774_v44  ;;  %v9474_v34 = vld [vmem:[#allocation16_spill] sm:$0xff]  ;;  %v4949_v28 = vmul.f32 %v9479_v16, %v4931_v12  ;;  %v9484_v43 = vld [vmem:[#allocation53_spill] sm:$0xff] }
0x15d7   : > { %v4881_v45 = vadd.f32 %v4875_v61, %v9474_v34  ;;  %v4901_v15 = vadd.f32 %v4895_v42, %v4877_v48  ;;  %vm9492_vm3 = vcmask 171008  }
0x15d8   : > { %v5133_v57 = vmul.f32 0.044715, %v5127_v60  ;;  %v5134_v30 = vmul.f32 0.044715, %v5128_v21  ;;  %v4840_v9 = vpop.permute.xlu1 %4839  ;;  %v9477_v60 = vld [vmem:[#allocation24_spill] sm:$0xff] }
0x15d9   : > { %v4843_v55 = vsel %vm841_vm8, %v8726_v35, %v4840_v9  ;;  %v4899_v21 = vmul.f32 %v9477_v60, %v9476_v41  ;;  %v9480_v9 = vld [vmem:[#allocation37_spill] sm:$0xff] }
0x15da   : > { %v5139_v62 = vadd.f32 %v5133_v57, %v8857_v52  ;;  %v5140_v24 = vadd.f32 %v5134_v30, %v8859_v7  ;;  %v4858_v23 = vmul.f32 %v6055_v4, %v4843_v55  ;;  %v5167_v57 = vmul.f32 %v5161_v63, %v8655_v14  ;;  %v5018_v55 = vpop.permute.xlu0 %5017 }
0x15db   : > { %v4986_v30 = vmul.f32 %v6055_v4, %v4982_v13  ;;  %v4900_v37 = vmul.f32 %v9477_v60, %v9480_v9  ;;  %v4955_v14 = vadd.f32 %v4949_v28, %v4901_v15  ;;  %v9485_v13 = vld [vmem:[#allocation70_spill] sm:$0xff] }
0x15dc   : > { %v5145_v19 = vmul.f32 0.7978846, %v5139_v62  ;;  %v5146_v18 = vmul.f32 0.7978846, %v5140_v24  ;;  %v5068_v35 = vpop.permute.xlu1 %5067  ;;  %v4876_v31 = vmul.f32 %v9470_v38, %v4858_v23  ;;  %v4905_v62 = vadd.f32 %v4899_v21, %v4881_v45  ;;  %v9481_v24 = vld [vmem:[#allocation18_spill] sm:$0xff]  ;;  %v5655_v38 = vpop.eup %5654 }
0x15dd   : > { %v5076_v8 = vsel %vm1079_vm12, %v5068_v35, %v8778_v1  ;;  %v5059_v1 = vadd.f32 %v5053_v10, %v9475_v49  ;;  %v4953_v23 = vmul.f32 %v9481_v24, %v4935_v17  ;;  %v9482_v10 = vld [vmem:[#allocation89_spill] sm:$0xff]  ;;  %v5004_v32 = vmul.f32 %v9484_v43, %v4986_v30 }
0x15de   : > { %5658 = vtanh.f32 %v5145_v19  ;;  %v5089_v22 = vmul.f32 %v6049_v59, %v5076_v8  ;;  %v4882_v11 = vadd.f32 %v4876_v31, %v4828_v5  ;;  %v4973_v19 = vsel %vm975_vm10, %v9482_v10, %v9473_v56  ;;  %v5657_v51 = vpop.eup %5656  ;;  %v5016_v34 = vpop.permute.xlu0 %5015  ;;  %v9486_v17 = vld [vmem:[#allocation85_spill] sm:$0xff] }
0x15df   : > { %5660 = vtanh.f32 %v5146_v18  ;;  %v9483_v18 = vld [vmem:[#allocation50_spill] sm:$0xff]  ;;  %v5036_v31 = vsel %vm1030_vm11, %v5018_v55, 0.0  ;;  %v4959_v8 = vadd.f32 %v4953_v23, %v4905_v62  ;;  %v4985_v63 = vmul.f32 %v6041_v53, %v4973_v19 }
0x15e0   : > { %v5107_v36 = vmul.f32 %v8768_v0, %v5089_v22  ;;  %v4972_v50 = vpop.permute.xlu1 %4971  ;;  %v4936_v0 = vmul.f32 %v6059_v47, %v4930_v29  ;;  %v4906_v61 = vadd.f32 %v4900_v37, %v4882_v11  ;;  %v5154_v22 = vadd.f32 1.0, %v5655_v38 }
0x15e1   : > { %v4975_v2 = vsel %vm975_vm10, %v9478_v20, %v4972_v50  ;;  %v4984_v33 = vsel %vm975_vm10, %v4972_v50, 0.0  ;;  %v9487_v50 = vld [vmem:[#allocation80_spill] sm:$0xff]  ;;  %v5153_v21 = vadd.f32 1.0, %v5657_v51  ;;  %v9488_v20 = vld [vmem:[#allocation13_spill] sm:$0xff]  ;;  %v5003_v37 = vmul.f32 %v9484_v43, %v4985_v63 }
0x15e2   : > { %v5113_v46 = vadd.f32 %v5107_v36, %v5059_v1  ;;  %v4989_v6 = vmul.f32 %v6041_v53, %v4975_v2  ;;  %v4990_v40 = vmul.f32 %v6055_v4, %v4984_v33  ;;  %v4954_v4 = vmul.f32 %v9481_v24, %v4936_v0  ;;  %v9489_v33 = vld [vmem:[#allocation27_spill] sm:$0xff] }
0x15e3   : > { %v5052_v41 = vmul.f32 %v9487_v50, %v5036_v31  ;;  %v5010_v2 = vadd.f32 %v5004_v32, %v9488_v20  ;;  %v5159_v38 = vmul.f32 0.5, %v5153_v21 }
0x15e4   : > { %v5026_v25 = vpop.permute.xlu1 %5025  ;;  %v8927_v44 = vmul.f32 %v5167_v57, %v5113_v46  ;;  %v5007_v35 = vmul.f32 %v9483_v18, %v4989_v6  ;;  %v5008_v42 = vmul.f32 %v9483_v18, %v4990_v40  ;;  %v4960_v56 = vadd.f32 %v4954_v4, %v4906_v61 }
0x15e5   : > { %v5029_v48 = vsel %vm1030_vm11, %v8780_v54, %v5026_v25  ;;  %v5038_v58 = vsel %vm1030_vm11, %v5026_v25, 0.0  ;;  %v5160_v6 = vmul.f32 0.5, %v5154_v22  ;;  %v5027_v57 = vsel %vm1030_vm11, %v5016_v34, %v5018_v55 }
0x15e6   : > { %v5013_v45 = vadd.f32 %v5007_v35, %v4959_v8  ;;  %v5055_v54 = vmul.f32 %v9486_v17, %v5029_v48  ;;  %v5014_v60 = vadd.f32 %v5008_v42, %v4960_v56  ;;  %v5056_v53 = vmul.f32 %v9486_v17, %v5038_v58 }
0x15e7   : > { %v5058_v24 = vadd.f32 %v5052_v41, %v5010_v2  ;;  %v5051_v61 = vmul.f32 %v9487_v50, %v5027_v57  ;;  %v5166_v4 = vmul.f32 %v5160_v6, %v8789_v39  ;;  %v5407_v39 = vld [vmem:[%s9022_s13 + $0x8] sm:$0xff] }
0x15e8   : > { %v5074_v12 = vpop.permute.xlu1 %5073  ;;  %v5061_v40 = vadd.f32 %v5055_v54, %v5013_v45  ;;  %v5062_v23 = vadd.f32 %v5056_v53, %v5014_v60 }
0x15e9   : > { %v5077_v29 = vsel %vm1079_vm12, %v9485_v13, %v5074_v12  ;;  %v5086_v5 = vsel %vm1079_vm12, %v5074_v12, 0.0 }
0x15ea   : > { %v5091_v49 = vmul.f32 %v6049_v59, %v5077_v29  ;;  %v5092_v1 = vmul.f32 %v6059_v47, %v5086_v5 }
0x15eb   : > { %v5659_v36 = vpop.eup %5658 }
0x15ec   : > { %v5661_v11 = vpop.eup %5660  ;;  %v5109_v16 = vmul.f32 %v9489_v33, %v5091_v49  ;;  %v5157_v28 = vadd.f32 1.0, %v5659_v36  ;;  %v5066_v46 = vpop.permute.xlu1 %5065  ;;  %v5110_v30 = vmul.f32 %v9489_v33, %v5092_v1 }
0x15ed   : > { %v5084_v0 = vsel %vm1079_vm12, %v5066_v46, 0.0  ;;  %v5158_v9 = vadd.f32 1.0, %v5661_v11 }
0x15ee   : > { %v5163_v15 = vmul.f32 0.5, %v5157_v28  ;;  %v5088_v62 = vmul.f32 %v6059_v47, %v5084_v0  ;;  %v5115_v10 = vadd.f32 %v5109_v16, %v5061_v40  ;;  %v5116_v35 = vadd.f32 %v5110_v30, %v5062_v23 }
0x15ef   : > { %v5164_v25 = vmul.f32 0.5, %v5158_v9  ;;  %v5009_v47 = vadd.f32 %v5003_v37, %v4955_v14 }
0x15f0   : > { %v5169_v55 = vmul.f32 %v5163_v15, %v8857_v52  ;;  %v5106_v19 = vmul.f32 %v8871_v27, %v5088_v62  ;;  %v5064_v18 = vpop.permute.xlu1 %5063 }
0x15f1   : > { %v5075_v32 = vsel %vm1079_vm12, %v5064_v18, %v5066_v46  ;;  %v5170_v43 = vmul.f32 %v5164_v25, %v8859_v7  ;;  %v5057_v8 = vadd.f32 %v5051_v61, %v5009_v47  ;;  %v5165_v7 = vmul.f32 %v5159_v38, %v8805_v3  ;;  %v9493_v3 = vld [vmem:[#allocation60_spill] sm:$0xff] }
0x15f2   : > { %v5175_v42 = vmul.f32 %v5169_v55, %v5115_v10  ;;  %v5087_v48 = vmul.f32 %v6049_v59, %v5075_v32  ;;  %v5112_v51 = vadd.f32 %v5106_v19, %v5058_v24 }
0x15f3   : > { %v5176_v31 = vmul.f32 %v5170_v43, %v5116_v35 }
0x15f4   : > { %v5105_v52 = vmul.f32 %v8871_v27, %v5087_v48  ;;  %v5172_v58 = vmul.f32 %v5166_v4, %v5112_v51 }
0x15f5   : > { %5408 = vmatprep.subr.msk.mxu1 %vm9490_vm0, %v5176_v31 }
0x15f6   : > { %v5111_v12 = vadd.f32 %v5105_v52, %v5057_v8  ;;  %5409 = vmatpush1.msk.msra.mxu1 %vm9491_vm2, %v5175_v42 }
0x15f7   : > { %5216 = vmatprep.subr.mxu1 %v8827_v26 }
0x15f8   : > { %5217 = vmatpush1.msra.mxu1 %v8927_v44  ;;  %v5171_v59 = vmul.f32 %v5165_v7, %v5111_v12  ;;  %v9494_v44 = vld [vmem:[#allocation30_spill] sm:$0xff] }
0x15f9   : > { %5218 = vmatprep.subr.mxu1 %v5172_v58 }
0x15fa   : > { %5219 = vmatpush1.msra.mxu1 %v5171_v59 }
0x15fb   : > { %5410 = vmatmul.mubr.msk.f32.vlgmr.msra.gmra.mxu1 %vm9492_vm3, %v5407_v39 }
0x16bb   : > { %v5254_v27 = vpop.f32.mrf.mxu1 }
0x16bc   : > { %v5259_v26 = vadd.f32 %v5254_v27, %v9493_v3 }
0x16bd   : > { %v5256_v14 = vpop.f32.mrf.mxu1 }
0x16be   : > { %5261 = vst [vmem:[%s460_s22] sm:$0xff] %v5259_v26  ;;  %v5260_v22 = vadd.f32 %v5256_v14, %v9494_v44 }
0x16c0   : > { %5262 = vst [vmem:[%s460_s22 + $0x8] sm:$0xff] %v5260_v22 }
0x16c1   : > { %5677 = shalt.err (!%p5674_p3)
}
0x16c2   : > { %s5678_s0 = scalar_lea.hbm %s5276_s19, 256  ;;  %s5682_s26 = scalar_lea.hbm %s9496_s24, 512 }
0x16c3   : > { %p5679_p4 = scmp.ne.s32.totalorder %s5276_s19, %s5678_s0  ;;  %p5683_p9 = scmp.lt.s32.totalorder %s5276_s19, %s9496_s24 }
0x16c4   : > { %p5684_p10 = scmp.lt.s32.totalorder %s5682_s26, %s5678_s0 }
0x16c5   : > { %p5680_p7 = pnand %p5679_p4, %p5858_p5 }
0x16c6   : > { %p5685_p11 = por %p5684_p10, %p5683_p9 }
0x16c7   : > { %p5681_p8 = pneg %p5680_p7 }
0x16c9   : > { %p5686_p12 = pnand %p5685_p11, %p5681_p8 }
0x16cb   : > { %5689 = shalt.err (!%p5686_p12)
}
0x16cc   : > { %5418 = dma.vmem_to_hbm [thread:$0]  (%p5858_p5), %s5279_s18, 256, %s5276_s19, %s5264_s21  }
0x16cd PF: > { %s9497_s15 = sld [smem:[#allocation7_spill]] }
0x16ce   : > { %s9498_s14 = sld [smem:[#allocation5_spill]] }
0x16d3   : > { %p5424_p13 = scmp.ge.s32.totalorder %s9497_s15, 2 }
0x16d4   : > { %s5290_s20 = sand.u32 1, %s9498_s14  }
0x16d5   : > { %p5421_p0 = pnand %p5424_p13, %p5862_p6  ;;  %s5291_s17 = scalar_lea.sflag [#allocation3], %s5290_s20 }
0x16d7   : > { %p5422_p1 = pneg %p5421_p0 }
0x16d9   : > { %5707 = dma.done.wait (%p5422_p1), %s5291_s17, 256  }
0x16da   : > { %5709 = vsyncadd (%p5422_p1), %s5291_s17, 4294967040  ;;  %s9500_s16 = sld [smem:[#allocation8_spill]]  ;;  %s9503_s29 = smov %s5716_s30 }
0x16db   : > { %s9501_s1 = sld [smem:[#allocation6_spill]] }
0x16dc   : > { %s9502_s15 = sld [smem:[#allocation9_spill]] }
0x16e0   : > { %p24_p2 = scmp.ge.s32.totalorder %s9500_s16, 4  }
0x16e1   : > { %s9504_s30 = smov %s9501_s1 }
0x16e2   :  { %26 = sbr.rel (!%p24_p2) target bundleno = 7 (0x7), region = 124 }
0x16e7   :  { %5296 = vsyncpa [#allocation3], 1 }
0x16e8   :  { %5298 = vsyncpa [#allocation3 + $0x1], 1 }

</bundles_post_ra>
